<compile_context>
chip_gen: v6e
topology: v6e:2x2x1
jax: 0.10.0
libtpu: 0.0.40
codegen_flags: <defaults>
</compile_context>

<pallas_src>
import numpy as np
import jax
import jax.numpy as jnp
from jax.experimental import pallas as pl
from jax.experimental.pallas import tpu as pltpu

LEVEL = 6
NUM_FEATURE = 256
DIM = NUM_FEATURE // LEVEL          # 42 (reducer bottleneck)
DIM_PAD = 128                       # padded to lane-dense width
IN_C = 2048
NB_MAX = 256                        # all part bottlenecks zero-padded to 256
EPS = 1e-5                          # PyTorch BatchNorm1d default eps
PART_BLOCK = 3                      # parts per grid step in the classifier kernel (21 % 3 == 0)


# ----------------------------------------------------------------------------- kernels

def _pool_kernel(mask_ref, inv_ref, x_ref, o_ref):
    """Mean-pool all 21 pyramid parts on the MXU: o[b, p, c] = (1/count_p) * sum_hw mask[p,hw] x[b,hw,c]."""
    m = mask_ref[...]                     # [P, HW]  bf16 (exact 0/1)
    inv = inv_ref[...]                    # [P, 1]   f32
    B = x_ref.shape[0]
    for b in range(B):                    # static, small; one M=P matmul per batch
        s = jnp.dot(m, x_ref[b], preferred_element_type=jnp.float32)   # [P, TC] f32
        o_ref[b] = inv * s


def pooled_parts(x_flat, mask, inv, *, tc):
    """x_flat: [B, HW, C] bf16; mask: [P, HW] bf16; inv: [P, 1] f32 -> pooled [B, P, C] f32."""
    B, HW, C = x_flat.shape
    P = mask.shape[0]
    assert C % tc == 0
    return pl.pallas_call(
        _pool_kernel,
        out_shape=jax.ShapeDtypeStruct((B, P, C), jnp.float32),
        grid=(C // tc,),
        in_specs=[
            pl.BlockSpec((P, HW), lambda c: (0, 0)),          # mask, VMEM-resident
            pl.BlockSpec((P, 1), lambda c: (0, 0)),           # 1/count, VMEM-resident
            pl.BlockSpec((B, HW, tc), lambda c: (0, 0, c)),   # feature-map C-tile
        ],
        out_specs=pl.BlockSpec((B, P, tc), lambda c: (0, 0, c)),
        compiler_params=pltpu.CompilerParams(dimension_semantics=("parallel",)),
    )(mask, inv, x_flat)


def _part_kernel(pooled_ref, w1_ref, b1_ref, w2_ref, b2_ref, o_ref):
    """Per part: Linear(2048->nb, BN folded) -> LeakyReLU(0.1) -> Linear(nb->256), G parts per step."""
    pid = pl.program_id(0)
    G = w1_ref.shape[0]
    for g in range(G):                                       # static, unrolled
        idx = pid * G + g                                    # global part index (for resident biases)
        pooled = pooled_ref[g]                               # [B, C] f32
        h = jnp.dot(pooled.astype(jnp.bfloat16), w1_ref[g],
                    preferred_element_type=jnp.float32) + b1_ref[idx]
        h = jnp.where(h > 0, h, 0.1 * h)                     # LeakyReLU(0.1)
        o_ref[g] = jnp.dot(h.astype(jnp.bfloat16), w2_ref[g],
                           preferred_element_type=jnp.float32) + b2_ref[idx]


def part_blocks(pooled, W1, b1, W2, b2, *, g=PART_BLOCK):
    """pooled: [P, B, C] f32; weights stacked on the part axis -> [P, B, 256] f32."""
    P, B, C = pooled.shape
    NB = W1.shape[2]
    FO = W2.shape[2]
    assert P % g == 0
    return pl.pallas_call(
        _part_kernel,
        out_shape=jax.ShapeDtypeStruct((P, B, FO), jnp.float32),
        grid=(P // g,),
        in_specs=[
            pl.BlockSpec((g, B, C), lambda p: (p, 0, 0)),     # pooled features of this part block
            pl.BlockSpec((g, C, NB), lambda p: (p, 0, 0)),    # W1 (bf16, BN folded), streamed
            pl.BlockSpec((P, 1, NB), lambda p: (0, 0, 0)),    # b1 (f32, BN folded), VMEM-resident
            pl.BlockSpec((g, NB, FO), lambda p: (p, 0, 0)),   # W2 (bf16), streamed
            pl.BlockSpec((P, 1, FO), lambda p: (0, 0, 0)),    # b2 (f32), VMEM-resident
        ],
        out_specs=pl.BlockSpec((g, B, FO), lambda p: (p, 0, 0)),
        compiler_params=pltpu.CompilerParams(
            dimension_semantics=("parallel",),
            vmem_limit_bytes=32 * 1024 * 1024),
    )(pooled, W1, b1, W2, b2)


def _reducer_kernel(feat_ref, w1_ref, b1_ref, w2_ref, b2_ref, o_ref):
    """All 5 Dim_Reducers in one step; the per-level concat is folded into per-part W1 slices:
       concat_j(part_j) @ W1 == sum_j part_j @ W1[j*256:(j+1)*256]."""
    B = feat_ref.shape[1]
    DP = w1_ref.shape[2]
    off = 0
    for i in range(LEVEL - 1):                               # levels 0..4 (level 5 has no reducer)
        n = LEVEL - i
        acc = jnp.zeros((B, DP), jnp.float32)
        for j in range(n):
            acc = acc + jnp.dot(feat_ref[off + j].astype(jnp.bfloat16), w1_ref[off + j],
                                preferred_element_type=jnp.float32)
        h = acc + b1_ref[i]                                  # Linear1 + folded BN (no ReLU)
        o_ref[i] = jnp.dot(h.astype(jnp.bfloat16), w2_ref[i],
                           preferred_element_type=jnp.float32) + b2_ref[i]
        off += n


def reducer_blocks(part_feats, RW1, Rb1, RW2, Rb2):
    """part_feats: [21, B, 256]; RW1: [20, 256, DIM_PAD] (per-part slices); returns [5, B, 256]."""
    P, B, F = part_feats.shape
    PR = RW1.shape[0]
    DP = RW1.shape[2]
    R = Rb1.shape[0]
    FO = RW2.shape[2]
    return pl.pallas_call(
        _reducer_kernel,
        out_shape=jax.ShapeDtypeStruct((R, B, FO), jnp.float32),
        grid=(1,),
        in_specs=[
            pl.BlockSpec((P, B, F), lambda r: (0, 0, 0)),
            pl.BlockSpec((PR, F, DP), lambda r: (0, 0, 0)),
            pl.BlockSpec((R, 1, DP), lambda r: (0, 0, 0)),
            pl.BlockSpec((R, DP, FO), lambda r: (0, 0, 0)),
            pl.BlockSpec((R, 1, FO), lambda r: (0, 0, 0)),
        ],
        out_specs=pl.BlockSpec((R, B, FO), lambda r: (0, 0, 0)),
        compiler_params=pltpu.CompilerParams(dimension_semantics=("arbitrary",)),
    )(part_feats, RW1, Rb1, RW2, Rb2)


# ------------------------------------------------------------------------- parameters

def _fold_bn(w1, b1, gamma, beta, mu, var):
    """Fold eval-mode BatchNorm1d into the preceding Linear: y = (x@W1+b1-mu)*s*g+be.
    NOTE: fold before the bf16 cast to avoid double rounding (keep this ordering)."""
    scale = gamma * jax.lax.rsqrt(var + EPS)
    return w1 * scale[None, :], (b1 - mu) * scale + beta


def init_params(key):
    keys = iter(jax.random.split(key, 64))

    # --- pyramid part ClassBlocks (21 of them), bottleneck zero-padded to NB_MAX ---
    w1s, b1s, w2s, b2s = [], [], [], []
    for i in range(LEVEL):                          # cur_level = i + 1
        c = i + 1
        nb = 128 if c == LEVEL else NUM_FEATURE
        for _ in range(LEVEL + 1 - c):              # block0 .. block_{level-cur}
            w1 = 0.001 * jax.random.normal(next(keys), (IN_C, nb), jnp.float32)
            b1 = jnp.zeros((nb,), jnp.float32)
            g = jnp.ones((nb,), jnp.float32)
            be = jnp.zeros((nb,), jnp.float32)
            mu = jnp.zeros((nb,), jnp.float32)
            var = jnp.ones((nb,), jnp.float32)
            w1f, b1f = _fold_bn(w1, b1, g, be, mu, var)
            w2 = 0.001 * jax.random.normal(next(keys), (nb, NUM_FEATURE), jnp.float32)
            w1s.append(jnp.pad(w1f, ((0, 0), (0, NB_MAX - nb))))
            b1s.append(jnp.pad(b1f, (0, NB_MAX - nb)))
            w2s.append(jnp.pad(w2, ((0, NB_MAX - nb), (0, 0))))
            b2s.append(jnp.zeros((NUM_FEATURE,), jnp.float32))
    params = {
        "W1": jnp.stack(w1s).astype(jnp.bfloat16),          # [21, 2048, 256] bf16
        "b1": jnp.stack(b1s)[:, None, :],                   # [21, 1, 256]    f32
        "W2": jnp.stack(w2s).astype(jnp.bfloat16),          # [21, 256, 256]  bf16
        "b2": jnp.stack(b2s)[:, None, :],                   # [21, 1, 256]    f32
    }

    # --- Dim_Reducer blocks for levels 0..4, W1 stored as per-part 256-row slices ---
    rw1_parts, rb1s, rw2s, rb2s = [], [], [], []
    for i in range(LEVEL - 1):
        n = LEVEL - i
        in_dim = NUM_FEATURE * n
        w1 = 0.001 * jax.random.normal(next(keys), (in_dim, DIM), jnp.float32)
        b1 = jnp.zeros((DIM,), jnp.float32)
        g = jnp.ones((DIM,), jnp.float32)
        be = jnp.zeros((DIM,), jnp.float32)
        mu = jnp.zeros((DIM,), jnp.float32)
        var = jnp.ones((DIM,), jnp.float32)
        w1f, b1f = _fold_bn(w1, b1, g, be, mu, var)
        w2 = 0.001 * jax.random.normal(next(keys), (DIM, NUM_FEATURE), jnp.float32)
        for j in range(n):                                  # slice matching part ordering
            sl = w1f[j * NUM_FEATURE:(j + 1) * NUM_FEATURE, :]
            rw1_parts.append(jnp.pad(sl, ((0, 0), (0, DIM_PAD - DIM))))
        rb1s.append(jnp.pad(b1f, (0, DIM_PAD - DIM)))
        rw2s.append(jnp.pad(w2, ((0, DIM_PAD - DIM), (0, 0))))
        rb2s.append(jnp.zeros((NUM_FEATURE,), jnp.float32))
    params.update({
        "RW1": jnp.stack(rw1_parts).astype(jnp.bfloat16),   # [20, 256, 128] bf16 (parts 0..19)
        "Rb1": jnp.stack(rb1s)[:, None, :],                 # [5, 1, 128]    f32
        "RW2": jnp.stack(rw2s).astype(jnp.bfloat16),        # [5, 128, 256]  bf16
        "Rb2": jnp.stack(rb2s)[:, None, :],                 # [5, 1, 256]    f32
    })
    return params


# ---------------------------------------------------------------------------- forward

def _pooling_layout(H, W):
    """Exact reproduction of the torch slicing arithmetic (float division + int() truncation;
    end = ... - 1 drops the last row of each slice). Returns 0/1 mask (bf16) and 1/count (f32)."""
    rows = []
    for i in range(LEVEL):                          # cur_level = i + 1
        c = i + 1
        for j in range(LEVEL + 1 - c):
            start = int(j * H / LEVEL)
            end = int(j * H / LEVEL + c * H / LEVEL - 1)
            n_rows = end - start
            assert n_rows >= 1
            rows.append((start, n_rows))
    P = len(rows)                                   # 21 pyramid parts
    mask = np.zeros((P, H * W), np.float32)
    inv = np.zeros((P, 1), np.float32)
    for p, (start, n) in enumerate(rows):
        mask[p, start * W:(start + n) * W] = 1.0
        inv[p, 0] = 1.0 / float(n * W)
    return jnp.asarray(mask, jnp.bfloat16), jnp.asarray(inv, jnp.float32)


def pyramid_v2_forward(x_nchw, params):
    """x_nchw: [B, 2048, H, W] layer4 feature map. Returns list of 6 arrays [B, 256]."""
    B, C, H, W = x_nchw.shape
    # TODO(synk): for realistic sizes, fuse this relayout into the pooling kernel.
    x_flat = jnp.transpose(x_nchw, (0, 2, 3, 1)).reshape(B, H * W, C).astype(jnp.bfloat16)
    mask, inv = _pooling_layout(H, W)

    # Stage 1: pooled parts (tiny intermediate: P*B*C f32).
    tc = 512 if C % 512 == 0 else C
    pooled_bpc = pooled_parts(x_flat, mask, inv, tc=tc)      # [B, P, C] f32
    pooled = jnp.transpose(pooled_bpc, (1, 0, 2))            # [P, B, C]; ~P*B*C*4 bytes, negligible

    # Stage 2: blocked, weight-streaming part classifiers: [21, B, 256].
    part_out = part_blocks(pooled, params["W1"], params["b1"], params["W2"], params["b2"])

    # Stage 3: all 5 Dim_Reducers in one step; per-level concat folded into the kernel.
    reduced = reducer_blocks(part_out, params["RW1"], params["Rb1"],
                             params["RW2"], params["Rb2"])   # [5, B, 256]

    # predict[i] = reducer_i(cat(level_i parts)) for i<5; predict[5] = level-6 part directly.
    return [reduced[i] for i in range(LEVEL - 1)] + [part_out[-1]]


# ------------------------------------------------------------------ pure-JAX reference

def _reference_forward(x_nchw, params):
    """f32 reference sharing the same (bf16-stored, BN-folded) params; isolates activation rounding."""
    B, C, H, W = x_nchw.shape
    xb = (jnp.transpose(x_nchw, (0, 2, 3, 1)).reshape(B, H * W, C)
          .astype(jnp.bfloat16).astype(jnp.float32))
    mask, inv = _pooling_layout(H, W)
    mask = mask.astype(jnp.float32)
    pooled = jnp.einsum("ph,bhc->pbc", mask, xb) * inv[:, :, None]           # [P, B, C]
    W1 = params["W1"].astype(jnp.float32)
    W2 = params["W2"].astype(jnp.float32)
    h = jnp.einsum("pbc,pcn->pbn", pooled, W1) + params["b1"]
    h = jnp.where(h > 0, h, 0.1 * h)
    part = jnp.einsum("pbn,pnf->pbf", h, W2) + params["b2"]                  # [P, B, 256]
    RW1 = params["RW1"].astype(jnp.float32)
    RW2 = params["RW2"].astype(jnp.float32)
    outs, off = [], 0
    for i in range(LEVEL - 1):
        n = LEVEL - i
        acc = jnp.zeros((B, DIM_PAD), jnp.float32)
        for j in range(n):
            acc = acc + part[off + j] @ RW1[off + j]
        hr = acc + params["Rb1"][i]
        outs.append(hr @ RW2[i] + params["Rb2"][i])
        off += n
    outs.append(part[-1])
    return outs


# ------------------------------------------------------------------------------- main

if __name__ == "__main__":
    key = jax.random.PRNGKey(0)
    kx, kp = jax.random.split(key)

    B, H, W = 2, 12, 4                              # small layer4-style feature map
    x = jax.random.normal(kx, (B, IN_C, H, W), jnp.float32)
    params = init_params(kp)

    fwd = jax.jit(pyramid_v2_forward)
    predict = fwd(x, params)
    predict = jax.block_until_ready(predict)

    assert len(predict) == LEVEL
    assert all(p.shape == (B, NUM_FEATURE) for p in predict)
    assert all(bool(jnp.all(jnp.isfinite(p))) for p in predict)

    # Tolerance check against the pure-JAX f32 reference (bf16 activation rounding only).
    ref = _reference_forward(x, params)
    for k_out, r_out in zip(predict, ref):
        scale = float(jnp.max(jnp.abs(r_out))) + 1e-12
        rel = float(jnp.max(jnp.abs(k_out - r_out))) / scale
        assert rel < 5e-2, f"kernel deviates from f32 reference: rel={rel}"

    print("KERNEL_OK")
</pallas_src>

<mosaic_0001>
module attributes {stable_mosaic.version = 11 : i64} {
  func.func @_pool_kernel(%arg0: i32, %arg1: memref<21x48xbf16, #tpu.memory_space<vmem>>, %arg2: memref<21x1xf32, #tpu.memory_space<vmem>>, %arg3: memref<2x48x512xbf16, #tpu.memory_space<vmem>>, %arg4: memref<2x21x512xf32, #tpu.memory_space<vmem>>) attributes {dimension_semantics = [#tpu.dimension_semantics<parallel>], iteration_bounds = array<i64: 4>, scalar_prefetch = 0 : i64, scratch_operands = 0 : i64, tpu.core_type = #tpu.core_type<tc>, window_params = [{pipeline_mode = #tpu.pipeline_mode<synchronous>, transform_indices = @transform_0, window_bounds = array<i64: 21, 48>}, {pipeline_mode = #tpu.pipeline_mode<synchronous>, transform_indices = @transform_1, window_bounds = array<i64: 21, 1>}, {transform_indices = @transform_2, window_bounds = array<i64: 2, 48, 512>}, {transform_indices = @transform_3, window_bounds = array<i64: 2, 21, 512>}]} {
    %c0 = arith.constant 0 : index
    %c0_0 = arith.constant 0 : index
    %0 = vector.load %arg1[%c0, %c0_0] : memref<21x48xbf16, #tpu.memory_space<vmem>>, vector<21x48xbf16>
    %c0_1 = arith.constant 0 : index
    %c0_2 = arith.constant 0 : index
    %1 = vector.load %arg2[%c0_1, %c0_2] : memref<21x1xf32, #tpu.memory_space<vmem>>, vector<21x1xf32>
    %c0_3 = arith.constant 0 : index
    %c0_4 = arith.constant 0 : index
    %c0_5 = arith.constant 0 : index
    %2 = vector.load %arg3[%c0_3, %c0_4, %c0_5] : memref<2x48x512xbf16, #tpu.memory_space<vmem>>, vector<1x48x512xbf16>
    %3 = vector.shape_cast %2 : vector<1x48x512xbf16> to vector<48x512xbf16>
    %cst = arith.constant dense<0.000000e+00> : vector<21x512xf32>
    %4 = tpu.matmul %0, %3, %cst {dimension_numbers = #tpu.dot_dimension_numbers<[1], [0], [0], [1], [0, 0, 1, 1], [], []>} : vector<21x48xbf16>, vector<48x512xbf16>, vector<21x512xf32> -> vector<21x512xf32>
    %5 = vector.broadcast %1 : vector<21x1xf32> to vector<21x512xf32>
    %6 = arith.mulf %5, %4 : vector<21x512xf32>
    %c0_6 = arith.constant 0 : index
    %c0_7 = arith.constant 0 : index
    %c0_8 = arith.constant 0 : index
    %7 = vector.load %arg4[%c0_6, %c0_7, %c0_8] : memref<2x21x512xf32, #tpu.memory_space<vmem>>, vector<1x21x512xf32>
    %8 = vector.shape_cast %7 : vector<1x21x512xf32> to vector<21x512xf32>
    %9 = vector.shape_cast %6 : vector<21x512xf32> to vector<1x21x512xf32>
    tpu.vector_store %arg4[%c0_6, %c0_7, %c0_8], %9 {strides = array<i32>} : memref<2x21x512xf32, #tpu.memory_space<vmem>>, vector<1x21x512xf32>,
    %c1 = arith.constant 1 : index
    %c0_9 = arith.constant 0 : index
    %c0_10 = arith.constant 0 : index
    %10 = vector.load %arg3[%c1, %c0_9, %c0_10] : memref<2x48x512xbf16, #tpu.memory_space<vmem>>, vector<1x48x512xbf16>
    %11 = vector.shape_cast %10 : vector<1x48x512xbf16> to vector<48x512xbf16>
    %cst_11 = arith.constant dense<0.000000e+00> : vector<21x512xf32>
    %12 = tpu.matmul %0, %11, %cst_11 {dimension_numbers = #tpu.dot_dimension_numbers<[1], [0], [0], [1], [0, 0, 1, 1], [], []>} : vector<21x48xbf16>, vector<48x512xbf16>, vector<21x512xf32> -> vector<21x512xf32>
    %13 = vector.broadcast %1 : vector<21x1xf32> to vector<21x512xf32>
    %14 = arith.mulf %13, %12 : vector<21x512xf32>
    %c1_12 = arith.constant 1 : index
    %c0_13 = arith.constant 0 : index
    %c0_14 = arith.constant 0 : index
    %15 = vector.load %arg4[%c1_12, %c0_13, %c0_14] : memref<2x21x512xf32, #tpu.memory_space<vmem>>, vector<1x21x512xf32>
    %16 = vector.shape_cast %15 : vector<1x21x512xf32> to vector<21x512xf32>
    %17 = vector.shape_cast %14 : vector<21x512xf32> to vector<1x21x512xf32>
    tpu.vector_store %arg4[%c1_12, %c0_13, %c0_14], %17 {strides = array<i32>} : memref<2x21x512xf32, #tpu.memory_space<vmem>>, vector<1x21x512xf32>,
    return
  }
  func.func @transform_0(%arg0: i32) -> (i32, i32) {
    %c0_i32 = arith.constant 0 : i32
    %c0_i32_0 = arith.constant 0 : i32
    %c0_i32_1 = arith.constant 0 : i32
    return %c0_i32, %c0_i32_0 : i32, i32
  }
  func.func @transform_1(%arg0: i32) -> (i32, i32) {
    %c0_i32 = arith.constant 0 : i32
    %c0_i32_0 = arith.constant 0 : i32
    %c0_i32_1 = arith.constant 0 : i32
    return %c0_i32, %c0_i32_0 : i32, i32
  }
  func.func @transform_2(%arg0: i32) -> (i32, i32, i32) {
    %c0_i32 = arith.constant 0 : i32
    %c0_i32_0 = arith.constant 0 : i32
    %c0_i32_1 = arith.constant 0 : i32
    return %c0_i32, %c0_i32_0, %arg0 : i32, i32, i32
  }
  func.func @transform_3(%arg0: i32) -> (i32, i32, i32) {
    %c0_i32 = arith.constant 0 : i32
    %c0_i32_0 = arith.constant 0 : i32
    %c0_i32_1 = arith.constant 0 : i32
    return %c0_i32, %c0_i32_0, %arg0 : i32, i32, i32
  }
}

module attributes {stable_mosaic.version = 11 : i64} {
  func.func @_part_kernel(%arg0: i32, %arg1: memref<3x2x2048xf32, #tpu.memory_space<vmem>>, %arg2: memref<3x2048x256xbf16, #tpu.memory_space<vmem>>, %arg3: memref<21x1x256xf32, #tpu.memory_space<vmem>>, %arg4: memref<3x256x256xbf16, #tpu.memory_space<vmem>>, %arg5: memref<21x1x256xf32, #tpu.memory_space<vmem>>, %arg6: memref<3x2x256xf32, #tpu.memory_space<vmem>>) attributes {dimension_semantics = [#tpu.dimension_semantics<parallel>], iteration_bounds = array<i64: 7>, scalar_prefetch = 0 : i64, scratch_operands = 0 : i64, tpu.core_type = #tpu.core_type<tc>, window_params = [{transform_indices = @transform_0, window_bounds = array<i64: 3, 2, 2048>}, {transform_indices = @transform_1, window_bounds = array<i64: 3, 2048, 256>}, {pipeline_mode = #tpu.pipeline_mode<synchronous>, transform_indices = @transform_2, window_bounds = array<i64: 21, 1, 256>}, {transform_indices = @transform_3, window_bounds = array<i64: 3, 256, 256>}, {pipeline_mode = #tpu.pipeline_mode<synchronous>, transform_indices = @transform_4, window_bounds = array<i64: 21, 1, 256>}, {transform_indices = @transform_5, window_bounds = array<i64: 3, 2, 256>}]} {
    %c3_i32 = arith.constant 3 : i32
    %0 = arith.muli %arg0, %c3_i32 : i32
    %c0_i32 = arith.constant 0 : i32
    %1 = arith.addi %0, %c0_i32 : i32
    %c0 = arith.constant 0 : index
    %c0_0 = arith.constant 0 : index
    %c0_1 = arith.constant 0 : index
    %2 = vector.load %arg1[%c0, %c0_0, %c0_1] : memref<3x2x2048xf32, #tpu.memory_space<vmem>>, vector<1x2x2048xf32>
    %3 = vector.shape_cast %2 : vector<1x2x2048xf32> to vector<2x2048xf32>
    %4 = arith.truncf %3 : vector<2x2048xf32> to vector<2x2048xbf16>
    %c0_2 = arith.constant 0 : index
    %c0_3 = arith.constant 0 : index
    %c0_4 = arith.constant 0 : index
    %5 = vector.load %arg2[%c0_2, %c0_3, %c0_4] : memref<3x2048x256xbf16, #tpu.memory_space<vmem>>, vector<1x2048x256xbf16>
    %6 = vector.shape_cast %5 : vector<1x2048x256xbf16> to vector<2048x256xbf16>
    %cst = arith.constant dense<0.000000e+00> : vector<2x256xf32>
    %7 = tpu.matmul %4, %6, %cst {dimension_numbers = #tpu.dot_dimension_numbers<[1], [0], [0], [1], [0, 0, 1, 1], [], []>} : vector<2x2048xbf16>, vector<2048x256xbf16>, vector<2x256xf32> -> vector<2x256xf32>
    %8 = arith.index_cast %1 : i32 to index
    %c0_5 = arith.constant 0 : index
    %c0_6 = arith.constant 0 : index
    %9 = vector.load %arg3[%8, %c0_5, %c0_6] : memref<21x1x256xf32, #tpu.memory_space<vmem>>, vector<1x1x256xf32>
    %10 = vector.shape_cast %9 : vector<1x1x256xf32> to vector<1x256xf32>
    %11 = vector.broadcast %10 : vector<1x256xf32> to vector<2x256xf32>
    %12 = arith.addf %7, %11 : vector<2x256xf32>
    %cst_7 = arith.constant 0.000000e+00 : f32
    %13 = vector.broadcast %cst_7 : f32 to vector<2x256xf32>
    %14 = arith.cmpf ogt, %12, %13 : vector<2x256xf32>
    %cst_8 = arith.constant 1.000000e-01 : f32
    %15 = vector.broadcast %cst_8 : f32 to vector<2x256xf32>
    %16 = arith.mulf %15, %12 : vector<2x256xf32>
    %17 = arith.select %14, %12, %16 : vector<2x256xi1>, vector<2x256xf32>
    %18 = arith.truncf %17 : vector<2x256xf32> to vector<2x256xbf16>
    %c0_9 = arith.constant 0 : index
    %c0_10 = arith.constant 0 : index
    %c0_11 = arith.constant 0 : index
    %19 = vector.load %arg4[%c0_9, %c0_10, %c0_11] : memref<3x256x256xbf16, #tpu.memory_space<vmem>>, vector<1x256x256xbf16>
    %20 = vector.shape_cast %19 : vector<1x256x256xbf16> to vector<256x256xbf16>
    %cst_12 = arith.constant dense<0.000000e+00> : vector<2x256xf32>
    %21 = tpu.matmul %18, %20, %cst_12 {dimension_numbers = #tpu.dot_dimension_numbers<[1], [0], [0], [1], [0, 0, 1, 1], [], []>} : vector<2x256xbf16>, vector<256x256xbf16>, vector<2x256xf32> -> vector<2x256xf32>
    %22 = arith.index_cast %1 : i32 to index
    %c0_13 = arith.constant 0 : index
    %c0_14 = arith.constant 0 : index
    %23 = vector.load %arg5[%22, %c0_13, %c0_14] : memref<21x1x256xf32, #tpu.memory_space<vmem>>, vector<1x1x256xf32>
    %24 = vector.shape_cast %23 : vector<1x1x256xf32> to vector<1x256xf32>
    %25 = vector.broadcast %24 : vector<1x256xf32> to vector<2x256xf32>
    %26 = arith.addf %21, %25 : vector<2x256xf32>
    %c0_15 = arith.constant 0 : index
    %c0_16 = arith.constant 0 : index
    %c0_17 = arith.constant 0 : index
    %27 = vector.load %arg6[%c0_15, %c0_16, %c0_17] : memref<3x2x256xf32, #tpu.memory_space<vmem>>, vector<1x2x256xf32>
    %28 = vector.shape_cast %27 : vector<1x2x256xf32> to vector<2x256xf32>
    %29 = vector.shape_cast %26 : vector<2x256xf32> to vector<1x2x256xf32>
    tpu.vector_store %arg6[%c0_15, %c0_16, %c0_17], %29 {strides = array<i32>} : memref<3x2x256xf32, #tpu.memory_space<vmem>>, vector<1x2x256xf32>,
    %c3_i32_18 = arith.constant 3 : i32
    %30 = arith.muli %arg0, %c3_i32_18 : i32
    %c1_i32 = arith.constant 1 : i32
    %31 = arith.addi %30, %c1_i32 : i32
    %c1 = arith.constant 1 : index
    %c0_19 = arith.constant 0 : index
    %c0_20 = arith.constant 0 : index
    %32 = vector.load %arg1[%c1, %c0_19, %c0_20] : memref<3x2x2048xf32, #tpu.memory_space<vmem>>, vector<1x2x2048xf32>
    %33 = vector.shape_cast %32 : vector<1x2x2048xf32> to vector<2x2048xf32>
    %34 = arith.truncf %33 : vector<2x2048xf32> to vector<2x2048xbf16>
    %c1_21 = arith.constant 1 : index
    %c0_22 = arith.constant 0 : index
    %c0_23 = arith.constant 0 : index
    %35 = vector.load %arg2[%c1_21, %c0_22, %c0_23] : memref<3x2048x256xbf16, #tpu.memory_space<vmem>>, vector<1x2048x256xbf16>
    %36 = vector.shape_cast %35 : vector<1x2048x256xbf16> to vector<2048x256xbf16>
    %cst_24 = arith.constant dense<0.000000e+00> : vector<2x256xf32>
    %37 = tpu.matmul %34, %36, %cst_24 {dimension_numbers = #tpu.dot_dimension_numbers<[1], [0], [0], [1], [0, 0, 1, 1], [], []>} : vector<2x2048xbf16>, vector<2048x256xbf16>, vector<2x256xf32> -> vector<2x256xf32>
    %38 = arith.index_cast %31 : i32 to index
    %c0_25 = arith.constant 0 : index
    %c0_26 = arith.constant 0 : index
    %39 = vector.load %arg3[%38, %c0_25, %c0_26] : memref<21x1x256xf32, #tpu.memory_space<vmem>>, vector<1x1x256xf32>
    %40 = vector.shape_cast %39 : vector<1x1x256xf32> to vector<1x256xf32>
    %41 = vector.broadcast %40 : vector<1x256xf32> to vector<2x256xf32>
    %42 = arith.addf %37, %41 : vector<2x256xf32>
    %cst_27 = arith.constant 0.000000e+00 : f32
    %43 = vector.broadcast %cst_27 : f32 to vector<2x256xf32>
    %44 = arith.cmpf ogt, %42, %43 : vector<2x256xf32>
    %cst_28 = arith.constant 1.000000e-01 : f32
    %45 = vector.broadcast %cst_28 : f32 to vector<2x256xf32>
    %46 = arith.mulf %45, %42 : vector<2x256xf32>
    %47 = arith.select %44, %42, %46 : vector<2x256xi1>, vector<2x256xf32>
    %48 = arith.truncf %47 : vector<2x256xf32> to vector<2x256xbf16>
    %c1_29 = arith.constant 1 : index
    %c0_30 = arith.constant 0 : index
    %c0_31 = arith.constant 0 : index
    %49 = vector.load %arg4[%c1_29, %c0_30, %c0_31] : memref<3x256x256xbf16, #tpu.memory_space<vmem>>, vector<1x256x256xbf16>
    %50 = vector.shape_cast %49 : vector<1x256x256xbf16> to vector<256x256xbf16>
    %cst_32 = arith.constant dense<0.000000e+00> : vector<2x256xf32>
    %51 = tpu.matmul %48, %50, %cst_32 {dimension_numbers = #tpu.dot_dimension_numbers<[1], [0], [0], [1], [0, 0, 1, 1], [], []>} : vector<2x256xbf16>, vector<256x256xbf16>, vector<2x256xf32> -> vector<2x256xf32>
    %52 = arith.index_cast %31 : i32 to index
    %c0_33 = arith.constant 0 : index
    %c0_34 = arith.constant 0 : index
    %53 = vector.load %arg5[%52, %c0_33, %c0_34] : memref<21x1x256xf32, #tpu.memory_space<vmem>>, vector<1x1x256xf32>
    %54 = vector.shape_cast %53 : vector<1x1x256xf32> to vector<1x256xf32>
    %55 = vector.broadcast %54 : vector<1x256xf32> to vector<2x256xf32>
    %56 = arith.addf %51, %55 : vector<2x256xf32>
    %c1_35 = arith.constant 1 : index
    %c0_36 = arith.constant 0 : index
    %c0_37 = arith.constant 0 : index
    %57 = vector.load %arg6[%c1_35, %c0_36, %c0_37] : memref<3x2x256xf32, #tpu.memory_space<vmem>>, vector<1x2x256xf32>
    %58 = vector.shape_cast %57 : vector<1x2x256xf32> to vector<2x256xf32>
    %59 = vector.shape_cast %56 : vector<2x256xf32> to vector<1x2x256xf32>
    tpu.vector_store %arg6[%c1_35, %c0_36, %c0_37], %59 {strides = array<i32>} : memref<3x2x256xf32, #tpu.memory_space<vmem>>, vector<1x2x256xf32>,
    %c3_i32_38 = arith.constant 3 : i32
    %60 = arith.muli %arg0, %c3_i32_38 : i32
    %c2_i32 = arith.constant 2 : i32
    %61 = arith.addi %60, %c2_i32 : i32
    %c2 = arith.constant 2 : index
    %c0_39 = arith.constant 0 : index
    %c0_40 = arith.constant 0 : index
    %62 = vector.load %arg1[%c2, %c0_39, %c0_40] : memref<3x2x2048xf32, #tpu.memory_space<vmem>>, vector<1x2x2048xf32>
    %63 = vector.shape_cast %62 : vector<1x2x2048xf32> to vector<2x2048xf32>
    %64 = arith.truncf %63 : vector<2x2048xf32> to vector<2x2048xbf16>
    %c2_41 = arith.constant 2 : index
    %c0_42 = arith.constant 0 : index
    %c0_43 = arith.constant 0 : index
    %65 = vector.load %arg2[%c2_41, %c0_42, %c0_43] : memref<3x2048x256xbf16, #tpu.memory_space<vmem>>, vector<1x2048x256xbf16>
    %66 = vector.shape_cast %65 : vector<1x2048x256xbf16> to vector<2048x256xbf16>
    %cst_44 = arith.constant dense<0.000000e+00> : vector<2x256xf32>
    %67 = tpu.matmul %64, %66, %cst_44 {dimension_numbers = #tpu.dot_dimension_numbers<[1], [0], [0], [1], [0, 0, 1, 1], [], []>} : vector<2x2048xbf16>, vector<2048x256xbf16>, vector<2x256xf32> -> vector<2x256xf32>
    %68 = arith.index_cast %61 : i32 to index
    %c0_45 = arith.constant 0 : index
    %c0_46 = arith.constant 0 : index
    %69 = vector.load %arg3[%68, %c0_45, %c0_46] : memref<21x1x256xf32, #tpu.memory_space<vmem>>, vector<1x1x256xf32>
    %70 = vector.shape_cast %69 : vector<1x1x256xf32> to vector<1x256xf32>
    %71 = vector.broadcast %70 : vector<1x256xf32> to vector<2x256xf32>
    %72 = arith.addf %67, %71 : vector<2x256xf32>
    %cst_47 = arith.constant 0.000000e+00 : f32
    %73 = vector.broadcast %cst_47 : f32 to vector<2x256xf32>
    %74 = arith.cmpf ogt, %72, %73 : vector<2x256xf32>
    %cst_48 = arith.constant 1.000000e-01 : f32
    %75 = vector.broadcast %cst_48 : f32 to vector<2x256xf32>
    %76 = arith.mulf %75, %72 : vector<2x256xf32>
    %77 = arith.select %74, %72, %76 : vector<2x256xi1>, vector<2x256xf32>
    %78 = arith.truncf %77 : vector<2x256xf32> to vector<2x256xbf16>
    %c2_49 = arith.constant 2 : index
    %c0_50 = arith.constant 0 : index
    %c0_51 = arith.constant 0 : index
    %79 = vector.load %arg4[%c2_49, %c0_50, %c0_51] : memref<3x256x256xbf16, #tpu.memory_space<vmem>>, vector<1x256x256xbf16>
    %80 = vector.shape_cast %79 : vector<1x256x256xbf16> to vector<256x256xbf16>
    %cst_52 = arith.constant dense<0.000000e+00> : vector<2x256xf32>
    %81 = tpu.matmul %78, %80, %cst_52 {dimension_numbers = #tpu.dot_dimension_numbers<[1], [0], [0], [1], [0, 0, 1, 1], [], []>} : vector<2x256xbf16>, vector<256x256xbf16>, vector<2x256xf32> -> vector<2x256xf32>
    %82 = arith.index_cast %61 : i32 to index
    %c0_53 = arith.constant 0 : index
    %c0_54 = arith.constant 0 : index
    %83 = vector.load %arg5[%82, %c0_53, %c0_54] : memref<21x1x256xf32, #tpu.memory_space<vmem>>, vector<1x1x256xf32>
    %84 = vector.shape_cast %83 : vector<1x1x256xf32> to vector<1x256xf32>
    %85 = vector.broadcast %84 : vector<1x256xf32> to vector<2x256xf32>
    %86 = arith.addf %81, %85 : vector<2x256xf32>
    %c2_55 = arith.constant 2 : index
    %c0_56 = arith.constant 0 : index
    %c0_57 = arith.constant 0 : index
    %87 = vector.load %arg6[%c2_55, %c0_56, %c0_57] : memref<3x2x256xf32, #tpu.memory_space<vmem>>, vector<1x2x256xf32>
    %88 = vector.shape_cast %87 : vector<1x2x256xf32> to vector<2x256xf32>
    %89 = vector.shape_cast %86 : vector<2x256xf32> to vector<1x2x256xf32>
    tpu.vector_store %arg6[%c2_55, %c0_56, %c0_57], %89 {strides = array<i32>} : memref<3x2x256xf32, #tpu.memory_space<vmem>>, vector<1x2x256xf32>,
    return
  }
  func.func @transform_0(%arg0: i32) -> (i32, i32, i32) {
    %c0_i32 = arith.constant 0 : i32
    %c0_i32_0 = arith.constant 0 : i32
    %c0_i32_1 = arith.constant 0 : i32
    return %arg0, %c0_i32, %c0_i32_0 : i32, i32, i32
  }
  func.func @transform_1(%arg0: i32) -> (i32, i32, i32) {
    %c0_i32 = arith.constant 0 : i32
    %c0_i32_0 = arith.constant 0 : i32
    %c0_i32_1 = arith.constant 0 : i32
    return %arg0, %c0_i32, %c0_i32_0 : i32, i32, i32
  }
  func.func @transform_2(%arg0: i32) -> (i32, i32, i32) {
    %c0_i32 = arith.constant 0 : i32
    %c0_i32_0 = arith.constant 0 : i32
    %c0_i32_1 = arith.constant 0 : i32
    %c0_i32_2 = arith.constant 0 : i32
    return %c0_i32, %c0_i32_0, %c0_i32_1 : i32, i32, i32
  }
  func.func @transform_3(%arg0: i32) -> (i32, i32, i32) {
    %c0_i32 = arith.constant 0 : i32
    %c0_i32_0 = arith.constant 0 : i32
    %c0_i32_1 = arith.constant 0 : i32
    return %arg0, %c0_i32, %c0_i32_0 : i32, i32, i32
  }
  func.func @transform_4(%arg0: i32) -> (i32, i32, i32) {
    %c0_i32 = arith.constant 0 : i32
    %c0_i32_0 = arith.constant 0 : i32
    %c0_i32_1 = arith.constant 0 : i32
    %c0_i32_2 = arith.constant 0 : i32
    return %c0_i32, %c0_i32_0, %c0_i32_1 : i32, i32, i32
  }
  func.func @transform_5(%arg0: i32) -> (i32, i32, i32) {
    %c0_i32 = arith.constant 0 : i32
    %c0_i32_0 = arith.constant 0 : i32
    %c0_i32_1 = arith.constant 0 : i32
    return %arg0, %c0_i32, %c0_i32_0 : i32, i32, i32
  }
}

module attributes {stable_mosaic.version = 11 : i64} {
  func.func @_reducer_kernel(%arg0: i32, %arg1: memref<21x2x256xf32, #tpu.memory_space<vmem>>, %arg2: memref<20x256x128xbf16, #tpu.memory_space<vmem>>, %arg3: memref<5x1x128xf32, #tpu.memory_space<vmem>>, %arg4: memref<5x128x256xbf16, #tpu.memory_space<vmem>>, %arg5: memref<5x1x256xf32, #tpu.memory_space<vmem>>, %arg6: memref<5x2x256xf32, #tpu.memory_space<vmem>>) attributes {dimension_semantics = [#tpu.dimension_semantics<arbitrary>], iteration_bounds = array<i64: 1>, scalar_prefetch = 0 : i64, scratch_operands = 0 : i64, tpu.core_type = #tpu.core_type<tc>, window_params = [{pipeline_mode = #tpu.pipeline_mode<synchronous>, transform_indices = @transform_0, window_bounds = array<i64: 21, 2, 256>}, {pipeline_mode = #tpu.pipeline_mode<synchronous>, transform_indices = @transform_1, window_bounds = array<i64: 20, 256, 128>}, {pipeline_mode = #tpu.pipeline_mode<synchronous>, transform_indices = @transform_2, window_bounds = array<i64: 5, 1, 128>}, {pipeline_mode = #tpu.pipeline_mode<synchronous>, transform_indices = @transform_3, window_bounds = array<i64: 5, 128, 256>}, {pipeline_mode = #tpu.pipeline_mode<synchronous>, transform_indices = @transform_4, window_bounds = array<i64: 5, 1, 256>}, {pipeline_mode = #tpu.pipeline_mode<synchronous>, transform_indices = @transform_5, window_bounds = array<i64: 5, 2, 256>}]} {
    %cst = arith.constant 0.000000e+00 : f32
    %0 = vector.broadcast %cst : f32 to vector<2x128xf32>
    %c0 = arith.constant 0 : index
    %c0_0 = arith.constant 0 : index
    %c0_1 = arith.constant 0 : index
    %1 = vector.load %arg1[%c0, %c0_0, %c0_1] : memref<21x2x256xf32, #tpu.memory_space<vmem>>, vector<1x2x256xf32>
    %2 = vector.shape_cast %1 : vector<1x2x256xf32> to vector<2x256xf32>
    %3 = arith.truncf %2 : vector<2x256xf32> to vector<2x256xbf16>
    %c0_2 = arith.constant 0 : index
    %c0_3 = arith.constant 0 : index
    %c0_4 = arith.constant 0 : index
    %4 = vector.load %arg2[%c0_2, %c0_3, %c0_4] : memref<20x256x128xbf16, #tpu.memory_space<vmem>>, vector<1x256x128xbf16>
    %5 = vector.shape_cast %4 : vector<1x256x128xbf16> to vector<256x128xbf16>
    %cst_5 = arith.constant dense<0.000000e+00> : vector<2x128xf32>
    %6 = tpu.matmul %3, %5, %cst_5 {dimension_numbers = #tpu.dot_dimension_numbers<[1], [0], [0], [1], [0, 0, 1, 1], [], []>} : vector<2x256xbf16>, vector<256x128xbf16>, vector<2x128xf32> -> vector<2x128xf32>
    %7 = arith.addf %0, %6 : vector<2x128xf32>
    %c1 = arith.constant 1 : index
    %c0_6 = arith.constant 0 : index
    %c0_7 = arith.constant 0 : index
    %8 = vector.load %arg1[%c1, %c0_6, %c0_7] : memref<21x2x256xf32, #tpu.memory_space<vmem>>, vector<1x2x256xf32>
    %9 = vector.shape_cast %8 : vector<1x2x256xf32> to vector<2x256xf32>
    %10 = arith.truncf %9 : vector<2x256xf32> to vector<2x256xbf16>
    %c1_8 = arith.constant 1 : index
    %c0_9 = arith.constant 0 : index
    %c0_10 = arith.constant 0 : index
    %11 = vector.load %arg2[%c1_8, %c0_9, %c0_10] : memref<20x256x128xbf16, #tpu.memory_space<vmem>>, vector<1x256x128xbf16>
    %12 = vector.shape_cast %11 : vector<1x256x128xbf16> to vector<256x128xbf16>
    %cst_11 = arith.constant dense<0.000000e+00> : vector<2x128xf32>
    %13 = tpu.matmul %10, %12, %cst_11 {dimension_numbers = #tpu.dot_dimension_numbers<[1], [0], [0], [1], [0, 0, 1, 1], [], []>} : vector<2x256xbf16>, vector<256x128xbf16>, vector<2x128xf32> -> vector<2x128xf32>
    %14 = arith.addf %7, %13 : vector<2x128xf32>
    %c2 = arith.constant 2 : index
    %c0_12 = arith.constant 0 : index
    %c0_13 = arith.constant 0 : index
    %15 = vector.load %arg1[%c2, %c0_12, %c0_13] : memref<21x2x256xf32, #tpu.memory_space<vmem>>, vector<1x2x256xf32>
    %16 = vector.shape_cast %15 : vector<1x2x256xf32> to vector<2x256xf32>
    %17 = arith.truncf %16 : vector<2x256xf32> to vector<2x256xbf16>
    %c2_14 = arith.constant 2 : index
    %c0_15 = arith.constant 0 : index
    %c0_16 = arith.constant 0 : index
    %18 = vector.load %arg2[%c2_14, %c0_15, %c0_16] : memref<20x256x128xbf16, #tpu.memory_space<vmem>>, vector<1x256x128xbf16>
    %19 = vector.shape_cast %18 : vector<1x256x128xbf16> to vector<256x128xbf16>
    %cst_17 = arith.constant dense<0.000000e+00> : vector<2x128xf32>
    %20 = tpu.matmul %17, %19, %cst_17 {dimension_numbers = #tpu.dot_dimension_numbers<[1], [0], [0], [1], [0, 0, 1, 1], [], []>} : vector<2x256xbf16>, vector<256x128xbf16>, vector<2x128xf32> -> vector<2x128xf32>
    %21 = arith.addf %14, %20 : vector<2x128xf32>
    %c3 = arith.constant 3 : index
    %c0_18 = arith.constant 0 : index
    %c0_19 = arith.constant 0 : index
    %22 = vector.load %arg1[%c3, %c0_18, %c0_19] : memref<21x2x256xf32, #tpu.memory_space<vmem>>, vector<1x2x256xf32>
    %23 = vector.shape_cast %22 : vector<1x2x256xf32> to vector<2x256xf32>
    %24 = arith.truncf %23 : vector<2x256xf32> to vector<2x256xbf16>
    %c3_20 = arith.constant 3 : index
    %c0_21 = arith.constant 0 : index
    %c0_22 = arith.constant 0 : index
    %25 = vector.load %arg2[%c3_20, %c0_21, %c0_22] : memref<20x256x128xbf16, #tpu.memory_space<vmem>>, vector<1x256x128xbf16>
    %26 = vector.shape_cast %25 : vector<1x256x128xbf16> to vector<256x128xbf16>
    %cst_23 = arith.constant dense<0.000000e+00> : vector<2x128xf32>
    %27 = tpu.matmul %24, %26, %cst_23 {dimension_numbers = #tpu.dot_dimension_numbers<[1], [0], [0], [1], [0, 0, 1, 1], [], []>} : vector<2x256xbf16>, vector<256x128xbf16>, vector<2x128xf32> -> vector<2x128xf32>
    %28 = arith.addf %21, %27 : vector<2x128xf32>
    %c4 = arith.constant 4 : index
    %c0_24 = arith.constant 0 : index
    %c0_25 = arith.constant 0 : index
    %29 = vector.load %arg1[%c4, %c0_24, %c0_25] : memref<21x2x256xf32, #tpu.memory_space<vmem>>, vector<1x2x256xf32>
    %30 = vector.shape_cast %29 : vector<1x2x256xf32> to vector<2x256xf32>
    %31 = arith.truncf %30 : vector<2x256xf32> to vector<2x256xbf16>
    %c4_26 = arith.constant 4 : index
    %c0_27 = arith.constant 0 : index
    %c0_28 = arith.constant 0 : index
    %32 = vector.load %arg2[%c4_26, %c0_27, %c0_28] : memref<20x256x128xbf16, #tpu.memory_space<vmem>>, vector<1x256x128xbf16>
    %33 = vector.shape_cast %32 : vector<1x256x128xbf16> to vector<256x128xbf16>
    %cst_29 = arith.constant dense<0.000000e+00> : vector<2x128xf32>
    %34 = tpu.matmul %31, %33, %cst_29 {dimension_numbers = #tpu.dot_dimension_numbers<[1], [0], [0], [1], [0, 0, 1, 1], [], []>} : vector<2x256xbf16>, vector<256x128xbf16>, vector<2x128xf32> -> vector<2x128xf32>
    %35 = arith.addf %28, %34 : vector<2x128xf32>
    %c5 = arith.constant 5 : index
    %c0_30 = arith.constant 0 : index
    %c0_31 = arith.constant 0 : index
    %36 = vector.load %arg1[%c5, %c0_30, %c0_31] : memref<21x2x256xf32, #tpu.memory_space<vmem>>, vector<1x2x256xf32>
    %37 = vector.shape_cast %36 : vector<1x2x256xf32> to vector<2x256xf32>
    %38 = arith.truncf %37 : vector<2x256xf32> to vector<2x256xbf16>
    %c5_32 = arith.constant 5 : index
    %c0_33 = arith.constant 0 : index
    %c0_34 = arith.constant 0 : index
    %39 = vector.load %arg2[%c5_32, %c0_33, %c0_34] : memref<20x256x128xbf16, #tpu.memory_space<vmem>>, vector<1x256x128xbf16>
    %40 = vector.shape_cast %39 : vector<1x256x128xbf16> to vector<256x128xbf16>
    %cst_35 = arith.constant dense<0.000000e+00> : vector<2x128xf32>
    %41 = tpu.matmul %38, %40, %cst_35 {dimension_numbers = #tpu.dot_dimension_numbers<[1], [0], [0], [1], [0, 0, 1, 1], [], []>} : vector<2x256xbf16>, vector<256x128xbf16>, vector<2x128xf32> -> vector<2x128xf32>
    %42 = arith.addf %35, %41 : vector<2x128xf32>
    %c0_36 = arith.constant 0 : index
    %c0_37 = arith.constant 0 : index
    %c0_38 = arith.constant 0 : index
    %43 = vector.load %arg3[%c0_36, %c0_37, %c0_38] : memref<5x1x128xf32, #tpu.memory_space<vmem>>, vector<1x1x128xf32>
    %44 = vector.shape_cast %43 : vector<1x1x128xf32> to vector<1x128xf32>
    %45 = vector.broadcast %44 : vector<1x128xf32> to vector<2x128xf32>
    %46 = arith.addf %42, %45 : vector<2x128xf32>
    %47 = arith.truncf %46 : vector<2x128xf32> to vector<2x128xbf16>
    %c0_39 = arith.constant 0 : index
    %c0_40 = arith.constant 0 : index
    %c0_41 = arith.constant 0 : index
    %48 = vector.load %arg4[%c0_39, %c0_40, %c0_41] : memref<5x128x256xbf16, #tpu.memory_space<vmem>>, vector<1x128x256xbf16>
    %49 = vector.shape_cast %48 : vector<1x128x256xbf16> to vector<128x256xbf16>
    %cst_42 = arith.constant dense<0.000000e+00> : vector<2x256xf32>
    %50 = tpu.matmul %47, %49, %cst_42 {dimension_numbers = #tpu.dot_dimension_numbers<[1], [0], [0], [1], [0, 0, 1, 1], [], []>} : vector<2x128xbf16>, vector<128x256xbf16>, vector<2x256xf32> -> vector<2x256xf32>
    %c0_43 = arith.constant 0 : index
    %c0_44 = arith.constant 0 : index
    %c0_45 = arith.constant 0 : index
    %51 = vector.load %arg5[%c0_43, %c0_44, %c0_45] : memref<5x1x256xf32, #tpu.memory_space<vmem>>, vector<1x1x256xf32>
    %52 = vector.shape_cast %51 : vector<1x1x256xf32> to vector<1x256xf32>
    %53 = vector.broadcast %52 : vector<1x256xf32> to vector<2x256xf32>
    %54 = arith.addf %50, %53 : vector<2x256xf32>
    %c0_46 = arith.constant 0 : index
    %c0_47 = arith.constant 0 : index
    %c0_48 = arith.constant 0 : index
    %55 = vector.load %arg6[%c0_46, %c0_47, %c0_48] : memref<5x2x256xf32, #tpu.memory_space<vmem>>, vector<1x2x256xf32>
    %56 = vector.shape_cast %55 : vector<1x2x256xf32> to vector<2x256xf32>
    %57 = vector.shape_cast %54 : vector<2x256xf32> to vector<1x2x256xf32>
    tpu.vector_store %arg6[%c0_46, %c0_47, %c0_48], %57 {strides = array<i32>} : memref<5x2x256xf32, #tpu.memory_space<vmem>>, vector<1x2x256xf32>,
    %cst_49 = arith.constant 0.000000e+00 : f32
    %58 = vector.broadcast %cst_49 : f32 to vector<2x128xf32>
    %c6 = arith.constant 6 : index
    %c0_50 = arith.constant 0 : index
    %c0_51 = arith.constant 0 : index
    %59 = vector.load %arg1[%c6, %c0_50, %c0_51] : memref<21x2x256xf32, #tpu.memory_space<vmem>>, vector<1x2x256xf32>
    %60 = vector.shape_cast %59 : vector<1x2x256xf32> to vector<2x256xf32>
    %61 = arith.truncf %60 : vector<2x256xf32> to vector<2x256xbf16>
    %c6_52 = arith.constant 6 : index
    %c0_53 = arith.constant 0 : index
    %c0_54 = arith.constant 0 : index
    %62 = vector.load %arg2[%c6_52, %c0_53, %c0_54] : memref<20x256x128xbf16, #tpu.memory_space<vmem>>, vector<1x256x128xbf16>
    %63 = vector.shape_cast %62 : vector<1x256x128xbf16> to vector<256x128xbf16>
    %cst_55 = arith.constant dense<0.000000e+00> : vector<2x128xf32>
    %64 = tpu.matmul %61, %63, %cst_55 {dimension_numbers = #tpu.dot_dimension_numbers<[1], [0], [0], [1], [0, 0, 1, 1], [], []>} : vector<2x256xbf16>, vector<256x128xbf16>, vector<2x128xf32> -> vector<2x128xf32>
    %65 = arith.addf %58, %64 : vector<2x128xf32>
    %c7 = arith.constant 7 : index
    %c0_56 = arith.constant 0 : index
    %c0_57 = arith.constant 0 : index
    %66 = vector.load %arg1[%c7, %c0_56, %c0_57] : memref<21x2x256xf32, #tpu.memory_space<vmem>>, vector<1x2x256xf32>
    %67 = vector.shape_cast %66 : vector<1x2x256xf32> to vector<2x256xf32>
    %68 = arith.truncf %67 : vector<2x256xf32> to vector<2x256xbf16>
    %c7_58 = arith.constant 7 : index
    %c0_59 = arith.constant 0 : index
    %c0_60 = arith.constant 0 : index
    %69 = vector.load %arg2[%c7_58, %c0_59, %c0_60] : memref<20x256x128xbf16, #tpu.memory_space<vmem>>, vector<1x256x128xbf16>
    %70 = vector.shape_cast %69 : vector<1x256x128xbf16> to vector<256x128xbf16>
    %cst_61 = arith.constant dense<0.000000e+00> : vector<2x128xf32>
    %71 = tpu.matmul %68, %70, %cst_61 {dimension_numbers = #tpu.dot_dimension_numbers<[1], [0], [0], [1], [0, 0, 1, 1], [], []>} : vector<2x256xbf16>, vector<256x128xbf16>, vector<2x128xf32> -> vector<2x128xf32>
    %72 = arith.addf %65, %71 : vector<2x128xf32>
    %c8 = arith.constant 8 : index
    %c0_62 = arith.constant 0 : index
    %c0_63 = arith.constant 0 : index
    %73 = vector.load %arg1[%c8, %c0_62, %c0_63] : memref<21x2x256xf32, #tpu.memory_space<vmem>>, vector<1x2x256xf32>
    %74 = vector.shape_cast %73 : vector<1x2x256xf32> to vector<2x256xf32>
    %75 = arith.truncf %74 : vector<2x256xf32> to vector<2x256xbf16>
    %c8_64 = arith.constant 8 : index
    %c0_65 = arith.constant 0 : index
    %c0_66 = arith.constant 0 : index
    %76 = vector.load %arg2[%c8_64, %c0_65, %c0_66] : memref<20x256x128xbf16, #tpu.memory_space<vmem>>, vector<1x256x128xbf16>
    %77 = vector.shape_cast %76 : vector<1x256x128xbf16> to vector<256x128xbf16>
    %cst_67 = arith.constant dense<0.000000e+00> : vector<2x128xf32>
    %78 = tpu.matmul %75, %77, %cst_67 {dimension_numbers = #tpu.dot_dimension_numbers<[1], [0], [0], [1], [0, 0, 1, 1], [], []>} : vector<2x256xbf16>, vector<256x128xbf16>, vector<2x128xf32> -> vector<2x128xf32>
    %79 = arith.addf %72, %78 : vector<2x128xf32>
    %c9 = arith.constant 9 : index
    %c0_68 = arith.constant 0 : index
    %c0_69 = arith.constant 0 : index
    %80 = vector.load %arg1[%c9, %c0_68, %c0_69] : memref<21x2x256xf32, #tpu.memory_space<vmem>>, vector<1x2x256xf32>
    %81 = vector.shape_cast %80 : vector<1x2x256xf32> to vector<2x256xf32>
    %82 = arith.truncf %81 : vector<2x256xf32> to vector<2x256xbf16>
    %c9_70 = arith.constant 9 : index
    %c0_71 = arith.constant 0 : index
    %c0_72 = arith.constant 0 : index
    %83 = vector.load %arg2[%c9_70, %c0_71, %c0_72] : memref<20x256x128xbf16, #tpu.memory_space<vmem>>, vector<1x256x128xbf16>
    %84 = vector.shape_cast %83 : vector<1x256x128xbf16> to vector<256x128xbf16>
    %cst_73 = arith.constant dense<0.000000e+00> : vector<2x128xf32>
    %85 = tpu.matmul %82, %84, %cst_73 {dimension_numbers = #tpu.dot_dimension_numbers<[1], [0], [0], [1], [0, 0, 1, 1], [], []>} : vector<2x256xbf16>, vector<256x128xbf16>, vector<2x128xf32> -> vector<2x128xf32>
    %86 = arith.addf %79, %85 : vector<2x128xf32>
    %c10 = arith.constant 10 : index
    %c0_74 = arith.constant 0 : index
    %c0_75 = arith.constant 0 : index
    %87 = vector.load %arg1[%c10, %c0_74, %c0_75] : memref<21x2x256xf32, #tpu.memory_space<vmem>>, vector<1x2x256xf32>
    %88 = vector.shape_cast %87 : vector<1x2x256xf32> to vector<2x256xf32>
    %89 = arith.truncf %88 : vector<2x256xf32> to vector<2x256xbf16>
    %c10_76 = arith.constant 10 : index
    %c0_77 = arith.constant 0 : index
    %c0_78 = arith.constant 0 : index
    %90 = vector.load %arg2[%c10_76, %c0_77, %c0_78] : memref<20x256x128xbf16, #tpu.memory_space<vmem>>, vector<1x256x128xbf16>
    %91 = vector.shape_cast %90 : vector<1x256x128xbf16> to vector<256x128xbf16>
    %cst_79 = arith.constant dense<0.000000e+00> : vector<2x128xf32>
    %92 = tpu.matmul %89, %91, %cst_79 {dimension_numbers = #tpu.dot_dimension_numbers<[1], [0], [0], [1], [0, 0, 1, 1], [], []>} : vector<2x256xbf16>, vector<256x128xbf16>, vector<2x128xf32> -> vector<2x128xf32>
    %93 = arith.addf %86, %92 : vector<2x128xf32>
    %c1_80 = arith.constant 1 : index
    %c0_81 = arith.constant 0 : index
    %c0_82 = arith.constant 0 : index
    %94 = vector.load %arg3[%c1_80, %c0_81, %c0_82] : memref<5x1x128xf32, #tpu.memory_space<vmem>>, vector<1x1x128xf32>
    %95 = vector.shape_cast %94 : vector<1x1x128xf32> to vector<1x128xf32>
    %96 = vector.broadcast %95 : vector<1x128xf32> to vector<2x128xf32>
    %97 = arith.addf %93, %96 : vector<2x128xf32>
    %98 = arith.truncf %97 : vector<2x128xf32> to vector<2x128xbf16>
    %c1_83 = arith.constant 1 : index
    %c0_84 = arith.constant 0 : index
    %c0_85 = arith.constant 0 : index
    %99 = vector.load %arg4[%c1_83, %c0_84, %c0_85] : memref<5x128x256xbf16, #tpu.memory_space<vmem>>, vector<1x128x256xbf16>
    %100 = vector.shape_cast %99 : vector<1x128x256xbf16> to vector<128x256xbf16>
    %cst_86 = arith.constant dense<0.000000e+00> : vector<2x256xf32>
    %101 = tpu.matmul %98, %100, %cst_86 {dimension_numbers = #tpu.dot_dimension_numbers<[1], [0], [0], [1], [0, 0, 1, 1], [], []>} : vector<2x128xbf16>, vector<128x256xbf16>, vector<2x256xf32> -> vector<2x256xf32>
    %c1_87 = arith.constant 1 : index
    %c0_88 = arith.constant 0 : index
    %c0_89 = arith.constant 0 : index
    %102 = vector.load %arg5[%c1_87, %c0_88, %c0_89] : memref<5x1x256xf32, #tpu.memory_space<vmem>>, vector<1x1x256xf32>
    %103 = vector.shape_cast %102 : vector<1x1x256xf32> to vector<1x256xf32>
    %104 = vector.broadcast %103 : vector<1x256xf32> to vector<2x256xf32>
    %105 = arith.addf %101, %104 : vector<2x256xf32>
    %c1_90 = arith.constant 1 : index
    %c0_91 = arith.constant 0 : index
    %c0_92 = arith.constant 0 : index
    %106 = vector.load %arg6[%c1_90, %c0_91, %c0_92] : memref<5x2x256xf32, #tpu.memory_space<vmem>>, vector<1x2x256xf32>
    %107 = vector.shape_cast %106 : vector<1x2x256xf32> to vector<2x256xf32>
    %108 = vector.shape_cast %105 : vector<2x256xf32> to vector<1x2x256xf32>
    tpu.vector_store %arg6[%c1_90, %c0_91, %c0_92], %108 {strides = array<i32>} : memref<5x2x256xf32, #tpu.memory_space<vmem>>, vector<1x2x256xf32>,
    %cst_93 = arith.constant 0.000000e+00 : f32
    %109 = vector.broadcast %cst_93 : f32 to vector<2x128xf32>
    %c11 = arith.constant 11 : index
    %c0_94 = arith.constant 0 : index
    %c0_95 = arith.constant 0 : index
    %110 = vector.load %arg1[%c11, %c0_94, %c0_95] : memref<21x2x256xf32, #tpu.memory_space<vmem>>, vector<1x2x256xf32>
    %111 = vector.shape_cast %110 : vector<1x2x256xf32> to vector<2x256xf32>
    %112 = arith.truncf %111 : vector<2x256xf32> to vector<2x256xbf16>
    %c11_96 = arith.constant 11 : index
    %c0_97 = arith.constant 0 : index
    %c0_98 = arith.constant 0 : index
    %113 = vector.load %arg2[%c11_96, %c0_97, %c0_98] : memref<20x256x128xbf16, #tpu.memory_space<vmem>>, vector<1x256x128xbf16>
    %114 = vector.shape_cast %113 : vector<1x256x128xbf16> to vector<256x128xbf16>
    %cst_99 = arith.constant dense<0.000000e+00> : vector<2x128xf32>
    %115 = tpu.matmul %112, %114, %cst_99 {dimension_numbers = #tpu.dot_dimension_numbers<[1], [0], [0], [1], [0, 0, 1, 1], [], []>} : vector<2x256xbf16>, vector<256x128xbf16>, vector<2x128xf32> -> vector<2x128xf32>
    %116 = arith.addf %109, %115 : vector<2x128xf32>
    %c12 = arith.constant 12 : index
    %c0_100 = arith.constant 0 : index
    %c0_101 = arith.constant 0 : index
    %117 = vector.load %arg1[%c12, %c0_100, %c0_101] : memref<21x2x256xf32, #tpu.memory_space<vmem>>, vector<1x2x256xf32>
    %118 = vector.shape_cast %117 : vector<1x2x256xf32> to vector<2x256xf32>
    %119 = arith.truncf %118 : vector<2x256xf32> to vector<2x256xbf16>
    %c12_102 = arith.constant 12 : index
    %c0_103 = arith.constant 0 : index
    %c0_104 = arith.constant 0 : index
    %120 = vector.load %arg2[%c12_102, %c0_103, %c0_104] : memref<20x256x128xbf16, #tpu.memory_space<vmem>>, vector<1x256x128xbf16>
    %121 = vector.shape_cast %120 : vector<1x256x128xbf16> to vector<256x128xbf16>
    %cst_105 = arith.constant dense<0.000000e+00> : vector<2x128xf32>
    %122 = tpu.matmul %119, %121, %cst_105 {dimension_numbers = #tpu.dot_dimension_numbers<[1], [0], [0], [1], [0, 0, 1, 1], [], []>} : vector<2x256xbf16>, vector<256x128xbf16>, vector<2x128xf32> -> vector<2x128xf32>
    %123 = arith.addf %116, %122 : vector<2x128xf32>
    %c13 = arith.constant 13 : index
    %c0_106 = arith.constant 0 : index
    %c0_107 = arith.constant 0 : index
    %124 = vector.load %arg1[%c13, %c0_106, %c0_107] : memref<21x2x256xf32, #tpu.memory_space<vmem>>, vector<1x2x256xf32>
    %125 = vector.shape_cast %124 : vector<1x2x256xf32> to vector<2x256xf32>
    %126 = arith.truncf %125 : vector<2x256xf32> to vector<2x256xbf16>
    %c13_108 = arith.constant 13 : index
    %c0_109 = arith.constant 0 : index
    %c0_110 = arith.constant 0 : index
    %127 = vector.load %arg2[%c13_108, %c0_109, %c0_110] : memref<20x256x128xbf16, #tpu.memory_space<vmem>>, vector<1x256x128xbf16>
    %128 = vector.shape_cast %127 : vector<1x256x128xbf16> to vector<256x128xbf16>
    %cst_111 = arith.constant dense<0.000000e+00> : vector<2x128xf32>
    %129 = tpu.matmul %126, %128, %cst_111 {dimension_numbers = #tpu.dot_dimension_numbers<[1], [0], [0], [1], [0, 0, 1, 1], [], []>} : vector<2x256xbf16>, vector<256x128xbf16>, vector<2x128xf32> -> vector<2x128xf32>
    %130 = arith.addf %123, %129 : vector<2x128xf32>
    %c14 = arith.constant 14 : index
    %c0_112 = arith.constant 0 : index
    %c0_113 = arith.constant 0 : index
    %131 = vector.load %arg1[%c14, %c0_112, %c0_113] : memref<21x2x256xf32, #tpu.memory_space<vmem>>, vector<1x2x256xf32>
    %132 = vector.shape_cast %131 : vector<1x2x256xf32> to vector<2x256xf32>
    %133 = arith.truncf %132 : vector<2x256xf32> to vector<2x256xbf16>
    %c14_114 = arith.constant 14 : index
    %c0_115 = arith.constant 0 : index
    %c0_116 = arith.constant 0 : index
    %134 = vector.load %arg2[%c14_114, %c0_115, %c0_116] : memref<20x256x128xbf16, #tpu.memory_space<vmem>>, vector<1x256x128xbf16>
    %135 = vector.shape_cast %134 : vector<1x256x128xbf16> to vector<256x128xbf16>
    %cst_117 = arith.constant dense<0.000000e+00> : vector<2x128xf32>
    %136 = tpu.matmul %133, %135, %cst_117 {dimension_numbers = #tpu.dot_dimension_numbers<[1], [0], [0], [1], [0, 0, 1, 1], [], []>} : vector<2x256xbf16>, vector<256x128xbf16>, vector<2x128xf32> -> vector<2x128xf32>
    %137 = arith.addf %130, %136 : vector<2x128xf32>
    %c2_118 = arith.constant 2 : index
    %c0_119 = arith.constant 0 : index
    %c0_120 = arith.constant 0 : index
    %138 = vector.load %arg3[%c2_118, %c0_119, %c0_120] : memref<5x1x128xf32, #tpu.memory_space<vmem>>, vector<1x1x128xf32>
    %139 = vector.shape_cast %138 : vector<1x1x128xf32> to vector<1x128xf32>
    %140 = vector.broadcast %139 : vector<1x128xf32> to vector<2x128xf32>
    %141 = arith.addf %137, %140 : vector<2x128xf32>
    %142 = arith.truncf %141 : vector<2x128xf32> to vector<2x128xbf16>
    %c2_121 = arith.constant 2 : index
    %c0_122 = arith.constant 0 : index
    %c0_123 = arith.constant 0 : index
    %143 = vector.load %arg4[%c2_121, %c0_122, %c0_123] : memref<5x128x256xbf16, #tpu.memory_space<vmem>>, vector<1x128x256xbf16>
    %144 = vector.shape_cast %143 : vector<1x128x256xbf16> to vector<128x256xbf16>
    %cst_124 = arith.constant dense<0.000000e+00> : vector<2x256xf32>
    %145 = tpu.matmul %142, %144, %cst_124 {dimension_numbers = #tpu.dot_dimension_numbers<[1], [0], [0], [1], [0, 0, 1, 1], [], []>} : vector<2x128xbf16>, vector<128x256xbf16>, vector<2x256xf32> -> vector<2x256xf32>
    %c2_125 = arith.constant 2 : index
    %c0_126 = arith.constant 0 : index
    %c0_127 = arith.constant 0 : index
    %146 = vector.load %arg5[%c2_125, %c0_126, %c0_127] : memref<5x1x256xf32, #tpu.memory_space<vmem>>, vector<1x1x256xf32>
    %147 = vector.shape_cast %146 : vector<1x1x256xf32> to vector<1x256xf32>
    %148 = vector.broadcast %147 : vector<1x256xf32> to vector<2x256xf32>
    %149 = arith.addf %145, %148 : vector<2x256xf32>
    %c2_128 = arith.constant 2 : index
    %c0_129 = arith.constant 0 : index
    %c0_130 = arith.constant 0 : index
    %150 = vector.load %arg6[%c2_128, %c0_129, %c0_130] : memref<5x2x256xf32, #tpu.memory_space<vmem>>, vector<1x2x256xf32>
    %151 = vector.shape_cast %150 : vector<1x2x256xf32> to vector<2x256xf32>
    %152 = vector.shape_cast %149 : vector<2x256xf32> to vector<1x2x256xf32>
    tpu.vector_store %arg6[%c2_128, %c0_129, %c0_130], %152 {strides = array<i32>} : memref<5x2x256xf32, #tpu.memory_space<vmem>>, vector<1x2x256xf32>,
    %cst_131 = arith.constant 0.000000e+00 : f32
    %153 = vector.broadcast %cst_131 : f32 to vector<2x128xf32>
    %c15 = arith.constant 15 : index
    %c0_132 = arith.constant 0 : index
    %c0_133 = arith.constant 0 : index
    %154 = vector.load %arg1[%c15, %c0_132, %c0_133] : memref<21x2x256xf32, #tpu.memory_space<vmem>>, vector<1x2x256xf32>
    %155 = vector.shape_cast %154 : vector<1x2x256xf32> to vector<2x256xf32>
    %156 = arith.truncf %155 : vector<2x256xf32> to vector<2x256xbf16>
    %c15_134 = arith.constant 15 : index
    %c0_135 = arith.constant 0 : index
    %c0_136 = arith.constant 0 : index
    %157 = vector.load %arg2[%c15_134, %c0_135, %c0_136] : memref<20x256x128xbf16, #tpu.memory_space<vmem>>, vector<1x256x128xbf16>
    %158 = vector.shape_cast %157 : vector<1x256x128xbf16> to vector<256x128xbf16>
    %cst_137 = arith.constant dense<0.000000e+00> : vector<2x128xf32>
    %159 = tpu.matmul %156, %158, %cst_137 {dimension_numbers = #tpu.dot_dimension_numbers<[1], [0], [0], [1], [0, 0, 1, 1], [], []>} : vector<2x256xbf16>, vector<256x128xbf16>, vector<2x128xf32> -> vector<2x128xf32>
    %160 = arith.addf %153, %159 : vector<2x128xf32>
    %c16 = arith.constant 16 : index
    %c0_138 = arith.constant 0 : index
    %c0_139 = arith.constant 0 : index
    %161 = vector.load %arg1[%c16, %c0_138, %c0_139] : memref<21x2x256xf32, #tpu.memory_space<vmem>>, vector<1x2x256xf32>
    %162 = vector.shape_cast %161 : vector<1x2x256xf32> to vector<2x256xf32>
    %163 = arith.truncf %162 : vector<2x256xf32> to vector<2x256xbf16>
    %c16_140 = arith.constant 16 : index
    %c0_141 = arith.constant 0 : index
    %c0_142 = arith.constant 0 : index
    %164 = vector.load %arg2[%c16_140, %c0_141, %c0_142] : memref<20x256x128xbf16, #tpu.memory_space<vmem>>, vector<1x256x128xbf16>
    %165 = vector.shape_cast %164 : vector<1x256x128xbf16> to vector<256x128xbf16>
    %cst_143 = arith.constant dense<0.000000e+00> : vector<2x128xf32>
    %166 = tpu.matmul %163, %165, %cst_143 {dimension_numbers = #tpu.dot_dimension_numbers<[1], [0], [0], [1], [0, 0, 1, 1], [], []>} : vector<2x256xbf16>, vector<256x128xbf16>, vector<2x128xf32> -> vector<2x128xf32>
    %167 = arith.addf %160, %166 : vector<2x128xf32>
    %c17 = arith.constant 17 : index
    %c0_144 = arith.constant 0 : index
    %c0_145 = arith.constant 0 : index
    %168 = vector.load %arg1[%c17, %c0_144, %c0_145] : memref<21x2x256xf32, #tpu.memory_space<vmem>>, vector<1x2x256xf32>
    %169 = vector.shape_cast %168 : vector<1x2x256xf32> to vector<2x256xf32>
    %170 = arith.truncf %169 : vector<2x256xf32> to vector<2x256xbf16>
    %c17_146 = arith.constant 17 : index
    %c0_147 = arith.constant 0 : index
    %c0_148 = arith.constant 0 : index
    %171 = vector.load %arg2[%c17_146, %c0_147, %c0_148] : memref<20x256x128xbf16, #tpu.memory_space<vmem>>, vector<1x256x128xbf16>
    %172 = vector.shape_cast %171 : vector<1x256x128xbf16> to vector<256x128xbf16>
    %cst_149 = arith.constant dense<0.000000e+00> : vector<2x128xf32>
    %173 = tpu.matmul %170, %172, %cst_149 {dimension_numbers = #tpu.dot_dimension_numbers<[1], [0], [0], [1], [0, 0, 1, 1], [], []>} : vector<2x256xbf16>, vector<256x128xbf16>, vector<2x128xf32> -> vector<2x128xf32>
    %174 = arith.addf %167, %173 : vector<2x128xf32>
    %c3_150 = arith.constant 3 : index
    %c0_151 = arith.constant 0 : index
    %c0_152 = arith.constant 0 : index
    %175 = vector.load %arg3[%c3_150, %c0_151, %c0_152] : memref<5x1x128xf32, #tpu.memory_space<vmem>>, vector<1x1x128xf32>
    %176 = vector.shape_cast %175 : vector<1x1x128xf32> to vector<1x128xf32>
    %177 = vector.broadcast %176 : vector<1x128xf32> to vector<2x128xf32>
    %178 = arith.addf %174, %177 : vector<2x128xf32>
    %179 = arith.truncf %178 : vector<2x128xf32> to vector<2x128xbf16>
    %c3_153 = arith.constant 3 : index
    %c0_154 = arith.constant 0 : index
    %c0_155 = arith.constant 0 : index
    %180 = vector.load %arg4[%c3_153, %c0_154, %c0_155] : memref<5x128x256xbf16, #tpu.memory_space<vmem>>, vector<1x128x256xbf16>
    %181 = vector.shape_cast %180 : vector<1x128x256xbf16> to vector<128x256xbf16>
    %cst_156 = arith.constant dense<0.000000e+00> : vector<2x256xf32>
    %182 = tpu.matmul %179, %181, %cst_156 {dimension_numbers = #tpu.dot_dimension_numbers<[1], [0], [0], [1], [0, 0, 1, 1], [], []>} : vector<2x128xbf16>, vector<128x256xbf16>, vector<2x256xf32> -> vector<2x256xf32>
    %c3_157 = arith.constant 3 : index
    %c0_158 = arith.constant 0 : index
    %c0_159 = arith.constant 0 : index
    %183 = vector.load %arg5[%c3_157, %c0_158, %c0_159] : memref<5x1x256xf32, #tpu.memory_space<vmem>>, vector<1x1x256xf32>
    %184 = vector.shape_cast %183 : vector<1x1x256xf32> to vector<1x256xf32>
    %185 = vector.broadcast %184 : vector<1x256xf32> to vector<2x256xf32>
    %186 = arith.addf %182, %185 : vector<2x256xf32>
    %c3_160 = arith.constant 3 : index
    %c0_161 = arith.constant 0 : index
    %c0_162 = arith.constant 0 : index
    %187 = vector.load %arg6[%c3_160, %c0_161, %c0_162] : memref<5x2x256xf32, #tpu.memory_space<vmem>>, vector<1x2x256xf32>
    %188 = vector.shape_cast %187 : vector<1x2x256xf32> to vector<2x256xf32>
    %189 = vector.shape_cast %186 : vector<2x256xf32> to vector<1x2x256xf32>
    tpu.vector_store %arg6[%c3_160, %c0_161, %c0_162], %189 {strides = array<i32>} : memref<5x2x256xf32, #tpu.memory_space<vmem>>, vector<1x2x256xf32>,
    %cst_163 = arith.constant 0.000000e+00 : f32
    %190 = vector.broadcast %cst_163 : f32 to vector<2x128xf32>
    %c18 = arith.constant 18 : index
    %c0_164 = arith.constant 0 : index
    %c0_165 = arith.constant 0 : index
    %191 = vector.load %arg1[%c18, %c0_164, %c0_165] : memref<21x2x256xf32, #tpu.memory_space<vmem>>, vector<1x2x256xf32>
    %192 = vector.shape_cast %191 : vector<1x2x256xf32> to vector<2x256xf32>
    %193 = arith.truncf %192 : vector<2x256xf32> to vector<2x256xbf16>
    %c18_166 = arith.constant 18 : index
    %c0_167 = arith.constant 0 : index
    %c0_168 = arith.constant 0 : index
    %194 = vector.load %arg2[%c18_166, %c0_167, %c0_168] : memref<20x256x128xbf16, #tpu.memory_space<vmem>>, vector<1x256x128xbf16>
    %195 = vector.shape_cast %194 : vector<1x256x128xbf16> to vector<256x128xbf16>
    %cst_169 = arith.constant dense<0.000000e+00> : vector<2x128xf32>
    %196 = tpu.matmul %193, %195, %cst_169 {dimension_numbers = #tpu.dot_dimension_numbers<[1], [0], [0], [1], [0, 0, 1, 1], [], []>} : vector<2x256xbf16>, vector<256x128xbf16>, vector<2x128xf32> -> vector<2x128xf32>
    %197 = arith.addf %190, %196 : vector<2x128xf32>
    %c19 = arith.constant 19 : index
    %c0_170 = arith.constant 0 : index
    %c0_171 = arith.constant 0 : index
    %198 = vector.load %arg1[%c19, %c0_170, %c0_171] : memref<21x2x256xf32, #tpu.memory_space<vmem>>, vector<1x2x256xf32>
    %199 = vector.shape_cast %198 : vector<1x2x256xf32> to vector<2x256xf32>
    %200 = arith.truncf %199 : vector<2x256xf32> to vector<2x256xbf16>
    %c19_172 = arith.constant 19 : index
    %c0_173 = arith.constant 0 : index
    %c0_174 = arith.constant 0 : index
    %201 = vector.load %arg2[%c19_172, %c0_173, %c0_174] : memref<20x256x128xbf16, #tpu.memory_space<vmem>>, vector<1x256x128xbf16>
    %202 = vector.shape_cast %201 : vector<1x256x128xbf16> to vector<256x128xbf16>
    %cst_175 = arith.constant dense<0.000000e+00> : vector<2x128xf32>
    %203 = tpu.matmul %200, %202, %cst_175 {dimension_numbers = #tpu.dot_dimension_numbers<[1], [0], [0], [1], [0, 0, 1, 1], [], []>} : vector<2x256xbf16>, vector<256x128xbf16>, vector<2x128xf32> -> vector<2x128xf32>
    %204 = arith.addf %197, %203 : vector<2x128xf32>
    %c4_176 = arith.constant 4 : index
    %c0_177 = arith.constant 0 : index
    %c0_178 = arith.constant 0 : index
    %205 = vector.load %arg3[%c4_176, %c0_177, %c0_178] : memref<5x1x128xf32, #tpu.memory_space<vmem>>, vector<1x1x128xf32>
    %206 = vector.shape_cast %205 : vector<1x1x128xf32> to vector<1x128xf32>
    %207 = vector.broadcast %206 : vector<1x128xf32> to vector<2x128xf32>
    %208 = arith.addf %204, %207 : vector<2x128xf32>
    %209 = arith.truncf %208 : vector<2x128xf32> to vector<2x128xbf16>
    %c4_179 = arith.constant 4 : index
    %c0_180 = arith.constant 0 : index
    %c0_181 = arith.constant 0 : index
    %210 = vector.load %arg4[%c4_179, %c0_180, %c0_181] : memref<5x128x256xbf16, #tpu.memory_space<vmem>>, vector<1x128x256xbf16>
    %211 = vector.shape_cast %210 : vector<1x128x256xbf16> to vector<128x256xbf16>
    %cst_182 = arith.constant dense<0.000000e+00> : vector<2x256xf32>
    %212 = tpu.matmul %209, %211, %cst_182 {dimension_numbers = #tpu.dot_dimension_numbers<[1], [0], [0], [1], [0, 0, 1, 1], [], []>} : vector<2x128xbf16>, vector<128x256xbf16>, vector<2x256xf32> -> vector<2x256xf32>
    %c4_183 = arith.constant 4 : index
    %c0_184 = arith.constant 0 : index
    %c0_185 = arith.constant 0 : index
    %213 = vector.load %arg5[%c4_183, %c0_184, %c0_185] : memref<5x1x256xf32, #tpu.memory_space<vmem>>, vector<1x1x256xf32>
    %214 = vector.shape_cast %213 : vector<1x1x256xf32> to vector<1x256xf32>
    %215 = vector.broadcast %214 : vector<1x256xf32> to vector<2x256xf32>
    %216 = arith.addf %212, %215 : vector<2x256xf32>
    %c4_186 = arith.constant 4 : index
    %c0_187 = arith.constant 0 : index
    %c0_188 = arith.constant 0 : index
    %217 = vector.load %arg6[%c4_186, %c0_187, %c0_188] : memref<5x2x256xf32, #tpu.memory_space<vmem>>, vector<1x2x256xf32>
    %218 = vector.shape_cast %217 : vector<1x2x256xf32> to vector<2x256xf32>
    %219 = vector.shape_cast %216 : vector<2x256xf32> to vector<1x2x256xf32>
    tpu.vector_store %arg6[%c4_186, %c0_187, %c0_188], %219 {strides = array<i32>} : memref<5x2x256xf32, #tpu.memory_space<vmem>>, vector<1x2x256xf32>,
    return
  }
  func.func @transform_0(%arg0: i32) -> (i32, i32, i32) {
    %c0_i32 = arith.constant 0 : i32
    %c0_i32_0 = arith.constant 0 : i32
    %c0_i32_1 = arith.constant 0 : i32
    %c0_i32_2 = arith.constant 0 : i32
    return %c0_i32, %c0_i32_0, %c0_i32_1 : i32, i32, i32
  }
  func.func @transform_1(%arg0: i32) -> (i32, i32, i32) {
    %c0_i32 = arith.constant 0 : i32
    %c0_i32_0 = arith.constant 0 : i32
    %c0_i32_1 = arith.constant 0 : i32
    %c0_i32_2 = arith.constant 0 : i32
    return %c0_i32, %c0_i32_0, %c0_i32_1 : i32, i32, i32
  }
  func.func @transform_2(%arg0: i32) -> (i32, i32, i32) {
    %c0_i32 = arith.constant 0 : i32
    %c0_i32_0 = arith.constant 0 : i32
    %c0_i32_1 = arith.constant 0 : i32
    %c0_i32_2 = arith.constant 0 : i32
    return %c0_i32, %c0_i32_0, %c0_i32_1 : i32, i32, i32
  }
  func.func @transform_3(%arg0: i32) -> (i32, i32, i32) {
    %c0_i32 = arith.constant 0 : i32
    %c0_i32_0 = arith.constant 0 : i32
    %c0_i32_1 = arith.constant 0 : i32
    %c0_i32_2 = arith.constant 0 : i32
    return %c0_i32, %c0_i32_0, %c0_i32_1 : i32, i32, i32
  }
  func.func @transform_4(%arg0: i32) -> (i32, i32, i32) {
    %c0_i32 = arith.constant 0 : i32
    %c0_i32_0 = arith.constant 0 : i32
    %c0_i32_1 = arith.constant 0 : i32
    %c0_i32_2 = arith.constant 0 : i32
    return %c0_i32, %c0_i32_0, %c0_i32_1 : i32, i32, i32
  }
  func.func @transform_5(%arg0: i32) -> (i32, i32, i32) {
    %c0_i32 = arith.constant 0 : i32
    %c0_i32_0 = arith.constant 0 : i32
    %c0_i32_1 = arith.constant 0 : i32
    %c0_i32_2 = arith.constant 0 : i32
    return %c0_i32, %c0_i32_0, %c0_i32_1 : i32, i32, i32
  }
}

</mosaic_0001>

<bundles_post_ra>
// kernel: pyramid_v2_forward.3
= control target key start
LH: loop header
LB: loop body
LE: loop exit
PB: predicated region body
PF: predicated region fallthrough
CT: control target
= control target key end

     0   :  { %8 = vsyncpa [#allocation3], 0  ;;  %s1410_s0 = inlined_call_operand.hbm [shape: bf16[21,48], index: 0, kind: input, shape index: {}]   ;;  %s1411_s1 = inlined_call_operand.hbm [shape: f32[21,1], index: 1, kind: input, shape index: {}]   ;;  %s1412_s2 = inlined_call_operand.vmem [shape: bf16[2,48,2048], index: 2, kind: input, shape index: {}]   ;;  %s1413_s3 = inlined_call_operand.vmem [shape: f32[2,21,2048], index: 3, kind: output, shape index: {}]  }
   0x1   :  { %9 = vsyncpa [#allocation5], 0  ;;  %s1127_s12 = smov 0   ;;  %s1129_s13 = smov 0  }
   0x2   :  { %s1131_s14 = smov 0  }
   0x3 LB: > { %s1143_s15 = sadd.s32 4294967295, %s1098_s14   ;;  %s1146_s16 = sadd.s32 1, %s1098_s14   ;;  %s1098_s14 = sphi %s1131_s14, %s1426_s14   ;;  %s1094_s13 = sphi %s1129_s13, %s1425_s13   ;;  %s1090_s12 = sphi %s1127_s12, %s1424_s12  }
   0x4   : > { %s61_s17 = ssub.s32 %s1098_s14, %s1146_s16  ;;  %s64_s18 = sadd.s32 1, %s1094_s13 }
   0x5   : > { %p62_p0 = scmp.eq.s32.totalorder %s61_s17, 0  ;;  %p71_p1 = scmp.ne.s32.totalorder %s1094_s13, %s1090_s12 }
   0x6   : > { %p72_p2 = scmp.eq.s32.totalorder %s1098_s14, 0  ;;  %p101_p3 = scmp.eq.s32.totalorder %s1143_s15, 3 }
   0x7   : > { %s1156_s19 = scalar_select %p62_p0, %s1094_s13, %s64_s18  }
   0x8   : > { %p1158_p4 = por %p72_p2, %p71_p1  ;;  %p1162_p5 = por %p101_p3, %p71_p1 }
   0x9   : > { %p851_p6 = scmp.ge.s32.totalorder %s1098_s14, 1  ;;  %p114_p7 = scmp.lt.s32.totalorder %s1098_s14, 5 }
   0xa   : > { %s1416_s21 = scalar_select %p1162_p5, 1, 0 }
   0xb   : > { %p1414_p8 = scmp.eq.s32.totalorder %s1143_s15, 0  ;;  %p1169_p9 = pnand %p851_p6, %p114_p7 }
   0xc   : > { %s1100_s23 = smov [#allocation2]   ;;  %s1101_s26 = smov [#allocation4]  }
   0xd   : > { %s126_s24 = sshll.u32 %s1100_s23, 4  ;;  %p934_p10 = pneg %p1169_p9  ;;  %s127_s24 = int_to_ptr.vmem [resolvable:$true] %s126_s24 }
   0xe   : > { %s139_s27 = sshll.u32 %s1101_s26, 4  ;;  %s1027_s28 = scalar_lea.vmem %s127_s24, 192  ;;  %s140_s27 = int_to_ptr.vmem [resolvable:$true] %s139_s27 }
   0xf   : > { %p1177_p11 = pnand %p1414_p8, %p934_p10  ;;  %p1028_p13 = scmp.ne.s32.totalorder %s127_s24, %s1027_s28 }
  0x10   : > { %p1035_p2 = scmp.lt.s32.totalorder %s127_s24, %s127_s24  ;;  %p1036_p3 = scmp.lt.s32.totalorder %s1027_s28, %s1027_s28 }
  0x11   : > { %p1018_p12 = pneg %p1177_p11 }
  0x12   : > { %p1037_p6 = por %p1036_p3, %p1035_p2 }
  0x13   : > { %p1030_p0 = pnand %p1028_p13, %p1018_p12 }
  0x15   : > { %p1031_p1 = pneg %p1030_p0 }
  0x17   : > { %p1038_p7 = pnand %p1037_p6, %p1031_p1 }
  0x19   : > { %1041 = shalt.err (!%p1038_p7)
}
  0x1a   : > { %s1102_s29 = smov 64   ;;  %s1103_s30 = smov 4  }
  0x1b   : > { %937 = dma.hbm_to_vmem [thread:$0]  (!%p1177_p11), %s1410_s0, 192, %s127_s24, [#allocation3], %s1102_s29, %s1102_s29, %s1103_s30  }
  0x1c   : > { %s1053_s6 = scalar_lea.vmem %s140_s27, 384  ;;  %p1061_p8 = scmp.lt.s32.totalorder %s140_s27, %s140_s27 }
  0x1d   : > { %p1054_p10 = scmp.ne.s32.totalorder %s140_s27, %s1053_s6  ;;  %p1062_p5 = scmp.lt.s32.totalorder %s1053_s6, %s1053_s6 }
  0x1f   : > { %p1056_p13 = pnand %p1054_p10, %p1018_p12  ;;  %p1063_p2 = por %p1062_p5, %p1061_p8 }
  0x21   : > { %p1057_p0 = pneg %p1056_p13 }
  0x23   : > { %p1064_p1 = pnand %p1063_p2, %p1057_p0 }
  0x25   : > { %1067 = shalt.err (!%p1064_p1)
}
  0x26   : > { %s1104_s7 = smov 128   ;;  %s1105_s8 = smov 8  }
  0x27   : > { %940 = dma.hbm_to_vmem [thread:$0]  (!%p1177_p11), %s1411_s1, 384, %s140_s27, [#allocation5], %s1104_s7, %s1104_s7, %s1105_s8  }
  0x28   : > { %p854_p3 = scmp.ge.s32.totalorder %s1098_s14, 4 }
  0x2a   : > { %149 = sbr.rel (%p854_p3) target bundleno = 63 (0x3f), region = 24 }
  0x2f   : > { %152 = sbr.rel (!%p1158_p4) target bundleno = 63 (0x3f), region = 28  ;;  %s154_s11 = sand.u32 (%p1158_p4), 1, %s1094_s13  }
  0x30   : > { %s922_s17 = sshll.u32 (%p1158_p4), %s1098_s14, 4  ;;  %s924_s18 = smul.u32 (%p1158_p4), 192, %s154_s11 }
  0x31   : > { %s1207_s26 = scalar_lea.vmem (%p1158_p4), %s1412_s2, %s922_s17 }
  0x32   : > { %v172_v0 = vld [vmem:[%s1207_s26] sm:$0xff] (%p1158_p4)  ;;  %v174_v1 = vld [vmem:[%s1207_s26 + $0x8] sm:$0xff] (%p1158_p4)  ;;  %s1215_s14 = scalar_lea.vmem (%p1158_p4), [#allocation6], %s924_s18 }
  0x33   : > { %v176_v2 = vld [vmem:[%s1207_s26 + $0x40] sm:$0xff] (%p1158_p4)  ;;  %v178_v3 = vld [vmem:[%s1207_s26 + $0x48] sm:$0xff] (%p1158_p4)  ;;  %173 = vst [vmem:[%s1215_s14] sm:$0xff] (%p1158_p4), %v172_v0  ;;  %175 = vst [vmem:[%s1215_s14 + $0x8] sm:$0xff] (%p1158_p4), %v174_v1 }
  0x34   : > { %v180_v4 = vld [vmem:[%s1207_s26 + $0x80] sm:$0xff]  ;;  %v182_v5 = vld [vmem:[%s1207_s26 + $0x88] sm:$0xff]  ;;  %177 = vst [vmem:[%s1215_s14 + $0x10] sm:$0xff] %v176_v2  ;;  %179 = vst [vmem:[%s1215_s14 + $0x18] sm:$0xff] %v178_v3 }
  0x35   : > { %181 = vst [vmem:[%s1215_s14 + $0x20] sm:$0xff] %v180_v4  ;;  %183 = vst [vmem:[%s1215_s14 + $0x28] sm:$0xff] %v182_v5  ;;  %v184_v6 = vld [vmem:[%s1207_s26 + $0xc0] sm:$0xff]  ;;  %v186_v7 = vld [vmem:[%s1207_s26 + $0xc8] sm:$0xff] }
  0x36   : > { %v188_v8 = vld [vmem:[%s1207_s26 + $0x100] sm:$0xff]  ;;  %185 = vst [vmem:[%s1215_s14 + $0x30] sm:$0xff] %v184_v6  ;;  %187 = vst [vmem:[%s1215_s14 + $0x38] sm:$0xff] %v186_v7  ;;  %v190_v9 = vld [vmem:[%s1207_s26 + $0x108] sm:$0xff] }
  0x37   : > { %189 = vst [vmem:[%s1215_s14 + $0x40] sm:$0xff] %v188_v8  ;;  %v192_v10 = vld [vmem:[%s1207_s26 + $0x140] sm:$0xff]  ;;  %v194_v11 = vld [vmem:[%s1207_s26 + $0x148] sm:$0xff]  ;;  %191 = vst [vmem:[%s1215_s14 + $0x48] sm:$0xff] %v190_v9 }
  0x38   : > { %193 = vst [vmem:[%s1215_s14 + $0x50] sm:$0xff] %v192_v10  ;;  %195 = vst [vmem:[%s1215_s14 + $0x58] sm:$0xff] %v194_v11  ;;  %v196_v12 = vld [vmem:[%s1207_s26 + $0x180] sm:$0xff]  ;;  %v198_v13 = vld [vmem:[%s1207_s26 + $0x188] sm:$0xff] }
  0x39   : > { %v200_v14 = vld [vmem:[%s1207_s26 + $0x1c0] sm:$0xff]  ;;  %197 = vst [vmem:[%s1215_s14 + $0x60] sm:$0xff] %v196_v12  ;;  %199 = vst [vmem:[%s1215_s14 + $0x68] sm:$0xff] %v198_v13  ;;  %v202_v15 = vld [vmem:[%s1207_s26 + $0x1c8] sm:$0xff] }
  0x3a   : > { %201 = vst [vmem:[%s1215_s14 + $0x70] sm:$0xff] %v200_v14  ;;  %v204_v16 = vld [vmem:[%s1207_s26 + $0x200] sm:$0xff]  ;;  %v206_v17 = vld [vmem:[%s1207_s26 + $0x208] sm:$0xff]  ;;  %203 = vst [vmem:[%s1215_s14 + $0x78] sm:$0xff] %v202_v15 }
  0x3b   : > { %205 = vst [vmem:[%s1215_s14 + $0x80] sm:$0xff] %v204_v16  ;;  %207 = vst [vmem:[%s1215_s14 + $0x88] sm:$0xff] %v206_v17  ;;  %v208_v18 = vld [vmem:[%s1207_s26 + $0x240] sm:$0xff]  ;;  %v210_v19 = vld [vmem:[%s1207_s26 + $0x248] sm:$0xff] }
  0x3c   : > { %v212_v20 = vld [vmem:[%s1207_s26 + $0x280] sm:$0xff]  ;;  %209 = vst [vmem:[%s1215_s14 + $0x90] sm:$0xff] %v208_v18  ;;  %211 = vst [vmem:[%s1215_s14 + $0x98] sm:$0xff] %v210_v19  ;;  %v214_v21 = vld [vmem:[%s1207_s26 + $0x288] sm:$0xff] }
  0x3d   : > { %213 = vst [vmem:[%s1215_s14 + $0xa0] sm:$0xff] %v212_v20  ;;  %v216_v22 = vld [vmem:[%s1207_s26 + $0x2c0] sm:$0xff]  ;;  %v218_v23 = vld [vmem:[%s1207_s26 + $0x2c8] sm:$0xff]  ;;  %215 = vst [vmem:[%s1215_s14 + $0xa8] sm:$0xff] %v214_v21 }
  0x3e   : > { %217 = vst [vmem:[%s1215_s14 + $0xb0] sm:$0xff] %v216_v22  ;;  %219 = vst [vmem:[%s1215_s14 + $0xb8] sm:$0xff] %v218_v23 }
  0x3f PF: > { %228 = sbr.rel (%p1169_p9) target bundleno = 319 (0x13f), region = 51  ;;  %p1419_p4 = scmp.eq.s32.totalorder (!%p1169_p9), %s1143_s15, 0 }
  0x44   : > { %1081 = dma.done.wait (%p1419_p4), [#allocation3], 192   ;;  %p1420_p5 = pmov %p1419_p4 }
  0x45   : > { %p1421_p8 = pmov %p1419_p4 }
  0x46   : > { %1083 = vsyncadd (%p1420_p5), [#allocation3], 4294967104 }
  0x47   : > { %1085 = dma.done.wait (%p1421_p8), [#allocation5], 384   ;;  %p1422_p11 = pmov %p1419_p4 }
  0x48   : > { %s239_s20 = sand.u32 1, %s1090_s12   ;;  %v1106_v24 = vmov 0   ;;  %v996_v38 = vld [vmem:[#allocation2] sm:$0xff]   ;;  %vm350_vm0 = vcmask 392192   ;;  %v267_v48 = vld [vmem:[#allocation4] sm:$0xff]  ;;  %v268_v53 = vld [vmem:[#allocation4 + $0x8] sm:$0xff] }
  0x49   : > { %1087 = vsyncadd (%p1422_p11), [#allocation5], 4294966912  ;;  %s1270_s25 = smul.u32 192, %s239_s20  ;;  %389 = vmatprep.mubr.bf16.mxu0 %v1106_v24  ;;  %440 = vmatprep.mubr.bf16.mxu1 %v1106_v24  ;;  %v269_v49 = vld [vmem:[#allocation4 + $0x10] sm:$0x1f]  ;;  %p1423_p9 = scmp.ne.s32.totalorder %s1416_s21, 0 }
  0x4a   : > { %976 = vset.pattern.permute.xlu0 %v1106_v24  ;;  %977 = vset.pattern.permute.xlu1 %v1106_v24  ;;  %v1009_v50 = vld [vmem:[#allocation2 + $0x8] ss:$0 sps:$4 sm:$0x77]   ;;  %s923_s27 = sshll.u32 (%p1423_p9), %s1143_s15, 5 }
  0x4b   : > { %s1277_s22 = scalar_lea.vmem [#allocation6], %s1270_s25  ;;  %461 = vperm.xlu0 %976, %v267_v48   ;;  %471 = vperm.xlu1 %977, %v269_v49   ;;  %s1318_s12 = scalar_lea.vmem [#allocation7], %s1270_s25 }
  0x4c   : > { %v978_v25 = vld [vmem:[%s1277_s22 + $0x44] ss:$16 sps:$4 sm:$0xff]   ;;  %v980_v26 = vld [vmem:[%s1277_s22 + $0x4c] ss:$16 sps:$4 sm:$0xff]   ;;  %v982_v27 = vld [vmem:[%s1277_s22 + $0x40] ss:$16 sps:$4 sm:$0xff]   ;;  %s1353_s30 = scalar_lea.vmem (%p1423_p9), %s1413_s3, %s923_s27 }
  0x4d   : > { %367 = vmatprep.subr.bf16.mxu0 %v978_v25  ;;  %v983_v28 = vld [vmem:[%s1277_s22 + $0x48] ss:$16 sps:$4 sm:$0xff]   ;;  %418 = vmatprep.subr.bf16.mxu1 %v980_v26  ;;  %v984_v29 = vld [vmem:[%s1277_s22 + $0x24] ss:$16 sps:$4 sm:$0xff]   ;;  %v986_v30 = vld [vmem:[%s1277_s22 + $0x2c] ss:$16 sps:$4 sm:$0xff]  }
  0x4e   : > { %368 = vmatpush1.bf16.msra.mxu0 %v982_v27  ;;  %419 = vmatpush1.bf16.msra.mxu1 %v983_v28  ;;  %v988_v31 = vld [vmem:[%s1277_s22 + $0x20] ss:$16 sps:$4 sm:$0xff]   ;;  %v989_v32 = vld [vmem:[%s1277_s22 + $0x28] ss:$16 sps:$4 sm:$0xff]   ;;  %v990_v33 = vld [vmem:[%s1277_s22 + $0x4] ss:$16 sps:$4 sm:$0xff]  }
  0x4f   : > { %369 = vmatprep.subr.bf16.mxu0 %v984_v29  ;;  %420 = vmatprep.subr.bf16.mxu1 %v986_v30  ;;  %v992_v34 = vld [vmem:[%s1277_s22 + $0xc] ss:$16 sps:$4 sm:$0xff]   ;;  %v994_v35 = vld [vmem:[%s1277_s22] ss:$16 sps:$4 sm:$0xff]   ;;  %v995_v36 = vld [vmem:[%s1277_s22 + $0x8] ss:$16 sps:$4 sm:$0xff]  }
  0x50   : > { %v999_v37 = vld [vmem:[%s1277_s22 + $0xa4] ss:$16 sps:$4 sm:$0xff]   ;;  %v1002_v39 = vld [vmem:[%s1277_s22 + $0xac] ss:$16 sps:$4 sm:$0xff]   ;;  %v997_v40 = vld [vmem:[%s1277_s22 + $0xa0] ss:$16 sps:$4 sm:$0xff]   ;;  %466 = vperm.xlu0 %976, %v268_v53  }
  0x51   : > { %v1000_v41 = vld [vmem:[%s1277_s22 + $0xa8] ss:$16 sps:$4 sm:$0xff]   ;;  %v1005_v42 = vld [vmem:[%s1277_s22 + $0x84] ss:$16 sps:$4 sm:$0xff]   ;;  %v1008_v43 = vld [vmem:[%s1277_s22 + $0x8c] ss:$16 sps:$4 sm:$0xff]  }
  0x52   : > { %370 = vmatpush1.bf16.msra.mxu0 %v988_v31  ;;  %421 = vmatpush1.bf16.msra.mxu1 %v989_v32  ;;  %v1003_v44 = vld [vmem:[%s1277_s22 + $0x80] ss:$16 sps:$4 sm:$0xff]   ;;  %v1006_v45 = vld [vmem:[%s1277_s22 + $0x88] ss:$16 sps:$4 sm:$0xff]   ;;  %v1012_v46 = vld [vmem:[%s1277_s22 + $0x64] ss:$16 sps:$4 sm:$0xff]  }
  0x53   : > { %371 = vmatprep.subr.bf16.mxu0 %v990_v33  ;;  %422 = vmatprep.subr.bf16.mxu1 %v992_v34  ;;  %v1015_v47 = vld [vmem:[%s1277_s22 + $0x6c] ss:$16 sps:$4 sm:$0xff]   ;;  %v1010_v51 = vld [vmem:[%s1277_s22 + $0x60] ss:$16 sps:$4 sm:$0xff]   ;;  %v1013_v52 = vld [vmem:[%s1277_s22 + $0x68] ss:$16 sps:$4 sm:$0xff]  }
  0x56   : > { %372 = vmatpush1.bf16.msra.mxu0 %v994_v35  ;;  %423 = vmatpush1.bf16.msra.mxu1 %v995_v36 }
  0x57   : > { %581 = vmatprep.subr.bf16.mxu0 %v999_v37  ;;  %632 = vmatprep.subr.bf16.mxu1 %v1002_v39 }
  0x59   : > { %874 = vmatmul.mubr.msk.bf16.vlgmr.msra.gmra.mxu0 %vm350_vm0, %v996_v38  ;;  %876 = vmatmul.mubr.msk.bf16.vlgmr.msra.gmra.mxu1 %vm350_vm0, %v996_v38 }
  0x5a   : > { %582 = vmatpush1.bf16.msra.mxu0 %v997_v40  ;;  %633 = vmatpush1.bf16.msra.mxu1 %v1000_v41 }
  0x5b   : > { %583 = vmatprep.subr.bf16.mxu0 %v1005_v42  ;;  %634 = vmatprep.subr.bf16.mxu1 %v1008_v43 }
  0x5c   : > { %399 = vmatprep.mubr.bf16.mxu0 %v1106_v24  ;;  %450 = vmatprep.mubr.bf16.mxu1 %v1106_v24 }
  0x5e   : > { %584 = vmatpush1.bf16.msra.mxu0 %v1003_v44  ;;  %635 = vmatpush1.bf16.msra.mxu1 %v1006_v45 }
  0x5f   : > { %585 = vmatprep.subr.bf16.mxu0 %v1012_v46  ;;  %636 = vmatprep.subr.bf16.mxu1 %v1015_v47 }
  0x61   : > { %875 = vmatmul.mubr.msk.bf16.gmra.mxu0 %vm350_vm0, %v1009_v50  ;;  %877 = vmatmul.mubr.msk.bf16.gmra.mxu1 %vm350_vm0, %v1009_v50 }
  0x62   : > { %586 = vmatpush1.bf16.msra.mxu0 %v1010_v51  ;;  %637 = vmatpush1.bf16.msra.mxu1 %v1013_v52 }
  0x63   : > { %603 = vmatprep.mubr.bf16.mxu0 %v1106_v24  ;;  %654 = vmatprep.mubr.bf16.mxu1 %v1106_v24 }
  0x69   : > { %902 = vmatmul.mubr.msk.bf16.vlgmr.msra.gmra.mxu0 %vm350_vm0, %v996_v38  ;;  %904 = vmatmul.mubr.msk.bf16.vlgmr.msra.gmra.mxu1 %vm350_vm0, %v996_v38 }
  0x6a   : > { %613 = vmatprep.mubr.bf16.mxu0 %v1106_v24  ;;  %664 = vmatprep.mubr.bf16.mxu1 %v1106_v24 }
  0x71   : > { %903 = vmatmul.mubr.msk.bf16.gmra.mxu0 %vm350_vm0, %v1009_v50  ;;  %905 = vmatmul.mubr.msk.bf16.gmra.mxu1 %vm350_vm0, %v1009_v50 }
  0xc6   : > { %v462_v54 = vpop.permute.xlu0 %461  ;;  %v472_v4 = vpop.permute.xlu1 %471 }
  0xcb   : > { %v467_v59 = vpop.permute.xlu0 %466 }
 0x119   : > { %v391_v55 = vpop.f32.mrf.mxu0  ;;  %v442_v56 = vpop.f32.mrf.mxu1 }
 0x11a   : > { %v474_v57 = vmul.f32 %v462_v54, %v391_v55  ;;  %v476_v58 = vmul.f32 %v462_v54, %v442_v56 }
 0x11b   : > { %v393_v60 = vpop.f32.mrf.mxu0  ;;  %v444_v61 = vpop.f32.mrf.mxu1 }
 0x11c   : > { %486 = vst [vmem:[%s1318_s12] sm:$0xff] %v474_v57  ;;  %488 = vst [vmem:[%s1318_s12 + $0x10] sm:$0xff] %v476_v58  ;;  %v475_v62 = vmul.f32 %v462_v54, %v393_v60  ;;  %v477_v63 = vmul.f32 %v462_v54, %v444_v61 }
 0x11d   : > { %v395_v0 = vpop.f32.mrf.mxu0  ;;  %v446_v1 = vpop.f32.mrf.mxu1 }
 0x11e   : > { %487 = vst [vmem:[%s1318_s12 + $0x8] sm:$0xff] %v475_v62  ;;  %489 = vst [vmem:[%s1318_s12 + $0x18] sm:$0xff] %v477_v63  ;;  %v478_v2 = vmul.f32 %v467_v59, %v395_v0  ;;  %v480_v3 = vmul.f32 %v467_v59, %v446_v1 }
 0x11f   : > { %v397_v5 = vpop.f32.mrf.mxu0  ;;  %v448_v6 = vpop.f32.mrf.mxu1 }
 0x120   : > { %490 = vst [vmem:[%s1318_s12 + $0x20] sm:$0xff] %v478_v2  ;;  %492 = vst [vmem:[%s1318_s12 + $0x30] sm:$0xff] %v480_v3  ;;  %v479_v7 = vmul.f32 %v467_v59, %v397_v5  ;;  %v481_v8 = vmul.f32 %v467_v59, %v448_v6 }
 0x121   : > { %v401_v9 = vpop.f32.mrf.mxu0  ;;  %v452_v10 = vpop.f32.mrf.mxu1 }
 0x122   : > { %491 = vst [vmem:[%s1318_s12 + $0x28] sm:$0xff] %v479_v7  ;;  %493 = vst [vmem:[%s1318_s12 + $0x38] sm:$0xff] %v481_v8  ;;  %v482_v11 = vmul.f32 %v472_v4, %v401_v9  ;;  %v484_v12 = vmul.f32 %v472_v4, %v452_v10 }
 0x123   : > { %v403_v13 = vpop.f32.mrf.mxu0  ;;  %v454_v14 = vpop.f32.mrf.mxu1  ;;  %v720_v49 = vld [vmem:[%s1318_s12] sm:$0xff] (%p1423_p9)  ;;  %v724_v51 = vld [vmem:[%s1318_s12 + $0x10] sm:$0xff] (%p1423_p9) }
 0x124   : > { %494 = vst [vmem:[%s1318_s12 + $0x40] sm:$0x1f] %v482_v11  ;;  %496 = vst [vmem:[%s1318_s12 + $0x50] sm:$0x1f] %v484_v12  ;;  %v483_v15 = vmul.f32 %v472_v4, %v403_v13  ;;  %v485_v16 = vmul.f32 %v472_v4, %v454_v14 }
 0x125   : > { %v405_v17 = vpop.f32.mrf.mxu0  ;;  %v456_v18 = vpop.f32.mrf.mxu1  ;;  %v722_v50 = vld [vmem:[%s1318_s12 + $0x8] sm:$0xff] (%p1423_p9)  ;;  %v726_v52 = vld [vmem:[%s1318_s12 + $0x18] sm:$0xff] (%p1423_p9)  ;;  %721 = vst [vmem:[%s1353_s30] sm:$0xff] (%p1423_p9), %v720_v49  ;;  %725 = vst [vmem:[%s1353_s30 + $0x10] sm:$0xff] (%p1423_p9), %v724_v51 }
 0x126   : > { %495 = vst [vmem:[%s1318_s12 + $0x48] sm:$0x1f] %v483_v15  ;;  %497 = vst [vmem:[%s1318_s12 + $0x58] sm:$0x1f] %v485_v16 }
 0x127   : > { %v406_v19 = vpop.f32.mrf.mxu0  ;;  %v457_v20 = vpop.f32.mrf.mxu1  ;;  %v728_v53 = vld [vmem:[%s1318_s12 + $0x20] sm:$0xff] (%p1423_p9)  ;;  %723 = vst [vmem:[%s1353_s30 + $0x8] sm:$0xff] (%p1423_p9), %v722_v50  ;;  %727 = vst [vmem:[%s1353_s30 + $0x18] sm:$0xff] (%p1423_p9), %v726_v52  ;;  %v732_v55 = vld [vmem:[%s1318_s12 + $0x30] sm:$0xff] (%p1423_p9) }
 0x128   : > { %729 = vst [vmem:[%s1353_s30 + $0x80] sm:$0xff] (%p1423_p9), %v728_v53  ;;  %733 = vst [vmem:[%s1353_s30 + $0x90] sm:$0xff] (%p1423_p9), %v732_v55 }
 0x129   : > { %v605_v21 = vpop.f32.mrf.mxu0  ;;  %v656_v22 = vpop.f32.mrf.mxu1  ;;  %v734_v56 = vld [vmem:[%s1318_s12 + $0x38] sm:$0xff] (%p1423_p9) }
 0x12a   : > { %v673_v23 = vmul.f32 %v605_v21, %v462_v54  ;;  %v675_v24 = vmul.f32 %v656_v22, %v462_v54  ;;  %735 = vst [vmem:[%s1353_s30 + $0x98] sm:$0xff] (%p1423_p9), %v734_v56 }
 0x12b   : > { %v607_v25 = vpop.f32.mrf.mxu0  ;;  %v658_v26 = vpop.f32.mrf.mxu1  ;;  %v736_v57 = vld [vmem:[%s1318_s12 + $0x40] sm:$0xff] (%p1423_p9) }
 0x12c   : > { %906 = vst [vmem:[%s1318_s12 + $0x60] sm:$0xff] %v673_v23  ;;  %908 = vst [vmem:[%s1318_s12 + $0x70] sm:$0xff] %v675_v24  ;;  %v674_v27 = vmul.f32 %v607_v25, %v462_v54  ;;  %v676_v28 = vmul.f32 %v658_v26, %v462_v54  ;;  %v730_v54 = vld [vmem:[%s1318_s12 + $0x28] sm:$0xff] (%p1423_p9) }
 0x12d   : > { %v609_v29 = vpop.f32.mrf.mxu0  ;;  %v660_v30 = vpop.f32.mrf.mxu1  ;;  %731 = vst [vmem:[%s1353_s30 + $0x88] sm:$0xff] (%p1423_p9), %v730_v54  ;;  %737 = vst [vmem:[%s1353_s30 + $0x100] sm:$0xff] (%p1423_p9), %v736_v57  ;;  %v738_v58 = vld [vmem:[%s1318_s12 + $0x48] sm:$0xff] (%p1423_p9)  ;;  %v742_v60 = vld [vmem:[%s1318_s12 + $0x58] sm:$0xff] (%p1423_p9) }
 0x12e   : > { %907 = vst [vmem:[%s1318_s12 + $0x68] sm:$0xff] %v674_v27  ;;  %909 = vst [vmem:[%s1318_s12 + $0x78] sm:$0xff] %v676_v28  ;;  %v677_v31 = vmul.f32 %v609_v29, %v467_v59  ;;  %v679_v32 = vmul.f32 %v660_v30, %v467_v59 }
 0x12f   : > { %v611_v33 = vpop.f32.mrf.mxu0  ;;  %v662_v34 = vpop.f32.mrf.mxu1  ;;  %739 = vst [vmem:[%s1353_s30 + $0x108] sm:$0xff] (%p1423_p9), %v738_v58  ;;  %743 = vst [vmem:[%s1353_s30 + $0x118] sm:$0xff] (%p1423_p9), %v742_v60 }
 0x130   : > { %910 = vst [vmem:[%s1318_s12 + $0x80] sm:$0xff] %v677_v31  ;;  %912 = vst [vmem:[%s1318_s12 + $0x90] sm:$0xff] %v679_v32  ;;  %v678_v35 = vmul.f32 %v611_v33, %v467_v59  ;;  %v680_v36 = vmul.f32 %v662_v34, %v467_v59  ;;  %v740_v59 = vld [vmem:[%s1318_s12 + $0x50] sm:$0xff] (%p1423_p9) }
 0x131   : > { %v615_v37 = vpop.f32.mrf.mxu0  ;;  %v666_v38 = vpop.f32.mrf.mxu1  ;;  %741 = vst [vmem:[%s1353_s30 + $0x110] sm:$0xff] (%p1423_p9), %v740_v59 }
 0x132   : > { %911 = vst [vmem:[%s1318_s12 + $0x88] sm:$0xff] %v678_v35  ;;  %913 = vst [vmem:[%s1318_s12 + $0x98] sm:$0xff] %v680_v36  ;;  %v681_v39 = vmul.f32 %v615_v37, %v472_v4  ;;  %v683_v40 = vmul.f32 %v666_v38, %v472_v4 }
 0x133   : > { %v617_v41 = vpop.f32.mrf.mxu0  ;;  %v668_v42 = vpop.f32.mrf.mxu1  ;;  %704 = sbr.rel (!%p1423_p9) target bundleno = 319 (0x13f), region = 67  ;;  %v744_v61 = vld [vmem:[%s1318_s12 + $0x60] sm:$0xff] (%p1423_p9)  ;;  %v748_v63 = vld [vmem:[%s1318_s12 + $0x70] sm:$0xff] (%p1423_p9) }
 0x134   : > { %914 = vst [vmem:[%s1318_s12 + $0xa0] sm:$0x1f] %v681_v39  ;;  %916 = vst [vmem:[%s1318_s12 + $0xb0] sm:$0x1f] %v683_v40  ;;  %v682_v43 = vmul.f32 %v617_v41, %v472_v4  ;;  %v684_v44 = vmul.f32 %v668_v42, %v472_v4 }
 0x135   : > { %v619_v45 = vpop.f32.mrf.mxu0  ;;  %v670_v46 = vpop.f32.mrf.mxu1  ;;  %v746_v62 = vld [vmem:[%s1318_s12 + $0x68] sm:$0xff] (%p1423_p9)  ;;  %745 = vst [vmem:[%s1353_s30 + $0x180] sm:$0xff] (%p1423_p9), %v744_v61  ;;  %749 = vst [vmem:[%s1353_s30 + $0x190] sm:$0xff] (%p1423_p9), %v748_v63  ;;  %v750_v0 = vld [vmem:[%s1318_s12 + $0x78] sm:$0xff] (%p1423_p9) }
 0x136   : > { %915 = vst [vmem:[%s1318_s12 + $0xa8] sm:$0x1f] %v682_v43  ;;  %917 = vst [vmem:[%s1318_s12 + $0xb8] sm:$0x1f] %v684_v44 }
 0x137   : > { %v620_v47 = vpop.f32.mrf.mxu0  ;;  %v671_v48 = vpop.f32.mrf.mxu1  ;;  %747 = vst [vmem:[%s1353_s30 + $0x188] sm:$0xff] (%p1423_p9), %v746_v62  ;;  %v752_v1 = vld [vmem:[%s1318_s12 + $0x80] sm:$0xff] (%p1423_p9)  ;;  %751 = vst [vmem:[%s1353_s30 + $0x198] sm:$0xff] (%p1423_p9), %v750_v0  ;;  %v756_v3 = vld [vmem:[%s1318_s12 + $0x90] sm:$0xff] (%p1423_p9) }
 0x138   : > { %753 = vst [vmem:[%s1353_s30 + $0x200] sm:$0xff] %v752_v1  ;;  %757 = vst [vmem:[%s1353_s30 + $0x210] sm:$0xff] %v756_v3 }
 0x139   : > { %v754_v2 = vld [vmem:[%s1318_s12 + $0x88] sm:$0xff]  ;;  %v758_v4 = vld [vmem:[%s1318_s12 + $0x98] sm:$0xff] }
 0x13a   : > { %755 = vst [vmem:[%s1353_s30 + $0x208] sm:$0xff] %v754_v2  ;;  %759 = vst [vmem:[%s1353_s30 + $0x218] sm:$0xff] %v758_v4 }
 0x13b   : > { %v760_v5 = vld [vmem:[%s1318_s12 + $0xa0] sm:$0xff]  ;;  %v764_v7 = vld [vmem:[%s1318_s12 + $0xb0] sm:$0xff] }
 0x13c   : > { %761 = vst [vmem:[%s1353_s30 + $0x280] sm:$0xff] %v760_v5  ;;  %765 = vst [vmem:[%s1353_s30 + $0x290] sm:$0xff] %v764_v7 }
 0x13d   : > { %v762_v6 = vld [vmem:[%s1318_s12 + $0xa8] sm:$0xff]  ;;  %v766_v8 = vld [vmem:[%s1318_s12 + $0xb8] sm:$0xff] }
 0x13e   : > { %763 = vst [vmem:[%s1353_s30 + $0x288] sm:$0xff] %v762_v6  ;;  %767 = vst [vmem:[%s1353_s30 + $0x298] sm:$0xff] %v766_v8 }
 0x13f PF: > { %p12_p12 = scmp.ge.s32.totalorder %s1146_s16, 6   ;;  %s1424_s12 = smov %s1094_s13 }
 0x140   : > { %s1425_s13 = smov %s1156_s19  ;;  %s1426_s14 = smov %s1146_s16 }
 0x141   :  { %14 = sbr.rel (!%p12_p12) target bundleno = 3 (0x3), region = 124 }
 0x146   :  { %783 = vsyncpa [#allocation3], 1 }
 0x147   :  { %785 = vsyncpa [#allocation3 + $0x1], 1 }
 0x148   :  { %786 = vsyncpa [#allocation5], 1 }

// kernel: pyramid_v2_forward.5
= control target key start
LH: loop header
LB: loop body
LE: loop exit
PB: predicated region body
PF: predicated region fallthrough
CT: control target
= control target key end

     0   :  { %s7969_s1 = inlined_call_operand.vmem [shape: bf16[20,256,128], index: 1, kind: input, shape index: {}]   ;;  %s7970_s0 = inlined_call_operand.vmem [shape: f32[21,2,256], index: 0, kind: input, shape index: {}]   ;;  %s7971_s3 = inlined_call_operand.vmem [shape: bf16[5,128,256], index: 3, kind: input, shape index: {}]   ;;  %s7972_s2 = inlined_call_operand.vmem [shape: f32[5,1,128], index: 2, kind: input, shape index: {}]   ;;  %s7973_s4 = inlined_call_operand.vmem [shape: f32[5,1,256], index: 4, kind: input, shape index: {}]   ;;  %s7974_s5 = inlined_call_operand.vmem [shape: f32[5,2,256], index: 5, kind: output, shape index: {}]  }
   0x1   :  { %v6153_v0 = vld [vmem:[%s7969_s1 + $0xf8] sm:$0xff]   ;;  %v6157_v4 = vld [vmem:[%s7969_s1 + $0xf0] sm:$0xff]   ;;  %v6161_v8 = vld [vmem:[%s7969_s1 + $0xe8] sm:$0xff]  }
   0x2   :  { %v6154_v1 = vld [vmem:[%s7969_s1 + $0x78] sm:$0xff]   ;;  %5712 = vmatprep.subr.bf16.mxu0 %v6153_v0  ;;  %v6158_v5 = vld [vmem:[%s7969_s1 + $0x70] sm:$0xff]   ;;  %v6162_v9 = vld [vmem:[%s7969_s1 + $0x68] sm:$0xff]  }
   0x3   :  { %v6155_v2 = vld [vmem:[%s7969_s1 + $0xb8] sm:$0xff]   ;;  %5734 = vmatprep.subr.bf16.mxu1 %v6154_v1  ;;  %v6159_v6 = vld [vmem:[%s7969_s1 + $0xb0] sm:$0xff]   ;;  %v6163_v10 = vld [vmem:[%s7969_s1 + $0xa8] sm:$0xff]  }
   0x4   :  { %v6156_v3 = vld [vmem:[%s7969_s1 + $0x38] sm:$0xff]   ;;  %5713 = vmatpush3.bf16.msra.mxu0 %v6155_v2  ;;  %v6160_v7 = vld [vmem:[%s7969_s1 + $0x30] sm:$0xff]   ;;  %v6164_v11 = vld [vmem:[%s7969_s1 + $0x28] sm:$0xff]  }
   0x5   :  { %5735 = vmatpush3.bf16.msra.mxu1 %v6156_v3  ;;  %5714 = vmatprep.subr.bf16.mxu0 %v6157_v4  ;;  %v6165_v12 = vld [vmem:[%s7969_s1 + $0xe0] sm:$0xff]   ;;  %v6169_v16 = vld [vmem:[%s7969_s1 + $0xd8] sm:$0xff]   ;;  %v6173_v20 = vld [vmem:[%s7969_s1 + $0xd0] sm:$0xff]  }
   0x6   :  { %5736 = vmatprep.subr.bf16.mxu1 %v6158_v5  ;;  %v6166_v13 = vld [vmem:[%s7969_s1 + $0x60] sm:$0xff]   ;;  %v6170_v17 = vld [vmem:[%s7969_s1 + $0x58] sm:$0xff]   ;;  %v6174_v21 = vld [vmem:[%s7969_s1 + $0x50] sm:$0xff]  }
   0x7   :  { %v6167_v14 = vld [vmem:[%s7969_s1 + $0xa0] sm:$0xff]   ;;  %v6171_v18 = vld [vmem:[%s7969_s1 + $0x98] sm:$0xff]   ;;  %v6175_v22 = vld [vmem:[%s7969_s1 + $0x90] sm:$0xff]  }
   0x8   :  { %5715 = vmatpush3.bf16.msra.mxu0 %v6159_v6  ;;  %v6168_v15 = vld [vmem:[%s7969_s1 + $0x20] sm:$0xff]   ;;  %v6172_v19 = vld [vmem:[%s7969_s1 + $0x18] sm:$0xff]   ;;  %v6176_v23 = vld [vmem:[%s7969_s1 + $0x10] sm:$0xff]  }
   0x9   :  { %5737 = vmatpush3.bf16.msra.mxu1 %v6160_v7  ;;  %5716 = vmatprep.subr.bf16.mxu0 %v6161_v8  ;;  %v6177_v24 = vld [vmem:[%s7969_s1 + $0xc8] sm:$0xff]   ;;  %v6181_v28 = vld [vmem:[%s7969_s1 + $0xc0] sm:$0xff]   ;;  %v6185_v37 = vld [vmem:[%s7969_s1 + $0x178] sm:$0xff]  }
   0xa   :  { %5738 = vmatprep.subr.bf16.mxu1 %v6162_v9  ;;  %v6178_v25 = vld [vmem:[%s7969_s1 + $0x48] sm:$0xff]   ;;  %v6182_v29 = vld [vmem:[%s7969_s1 + $0x40] sm:$0xff]   ;;  %v6186_v40 = vld [vmem:[%s7969_s1 + $0x1f8] sm:$0xff]  }
   0xb   :  { %v6179_v26 = vld [vmem:[%s7969_s1 + $0x88] sm:$0xff]   ;;  %v6183_v30 = vld [vmem:[%s7969_s1 + $0x80] sm:$0xff]   ;;  %v6187_v42 = vld [vmem:[%s7969_s1 + $0x138] sm:$0xff]  }
   0xc   :  { %5717 = vmatpush3.bf16.msra.mxu0 %v6163_v10  ;;  %v6180_v27 = vld [vmem:[%s7969_s1 + $0x8] sm:$0xff]   ;;  %v6184_v31 = vld [vmem:[%s7969_s1] sm:$0xff]   ;;  %v6188_v43 = vld [vmem:[%s7969_s1 + $0x1b8] sm:$0xff]  }
   0xd   :  { %5739 = vmatpush3.bf16.msra.mxu1 %v6164_v11  ;;  %5718 = vmatprep.subr.bf16.mxu0 %v6165_v12  ;;  %v4581_v32 = vld.sshfl [vmem:[%s7970_s0 + $0x4] sm:$0x33 pattern:$0x76325410]  ;;  %v6189_v44 = vld [vmem:[%s7969_s1 + $0x170] sm:$0xff]   ;;  %v6193_v48 = vld [vmem:[%s7969_s1 + $0x168] sm:$0xff]  }
   0xe   :  { %5740 = vmatprep.subr.bf16.mxu1 %v6166_v13  ;;  %v77_v33 = vcombine.high %v4581_v32, %v4581_v32  ;;  %v4579_v34 = vld.sshfl [vmem:[%s7970_s0] sm:$0x33 pattern:$0x76325410]  ;;  %v80_v35 = vpack.c.bf16 %v4581_v32, %v4581_v32  ;;  %v6190_v45 = vld [vmem:[%s7969_s1 + $0x1f0] sm:$0xff]   ;;  %v6194_v49 = vld [vmem:[%s7969_s1 + $0x1e8] sm:$0xff]  }
   0xf   :  { %v30_v36 = vcombine.high %v4579_v34, %v4579_v34  ;;  %v33_v39 = vpack.c.bf16 %v4579_v34, %v4579_v34  ;;  %v6191_v46 = vld [vmem:[%s7969_s1 + $0x130] sm:$0xff]   ;;  %v6195_v50 = vld [vmem:[%s7969_s1 + $0x128] sm:$0xff]   ;;  %v6197_v52 = vld [vmem:[%s7969_s1 + $0x160] sm:$0xff]  }
  0x10   :  { %5719 = vmatpush3.bf16.msra.mxu0 %v6167_v14  ;;  %v81_v38 = vpack.c.bf16 %v77_v33, %v77_v33  ;;  %v6192_v47 = vld [vmem:[%s7969_s1 + $0x1b0] sm:$0xff]   ;;  %v6196_v51 = vld [vmem:[%s7969_s1 + $0x1a8] sm:$0xff]   ;;  %v6198_v53 = vld [vmem:[%s7969_s1 + $0x1e0] sm:$0xff]  }
  0x11   :  { %5741 = vmatpush3.bf16.msra.mxu1 %v6168_v15  ;;  %5720 = vmatprep.subr.bf16.mxu0 %v6169_v16  ;;  %v34_v41 = vpack.c.bf16 %v30_v36, %v30_v36  ;;  %v6199_v54 = vld [vmem:[%s7969_s1 + $0x120] sm:$0xff]   ;;  %v6201_v56 = vld [vmem:[%s7969_s1 + $0x158] sm:$0xff]   ;;  %v6205_v60 = vld [vmem:[%s7969_s1 + $0x150] sm:$0xff]  }
  0x12   :  { %5742 = vmatprep.subr.bf16.mxu1 %v6170_v17  ;;  %243 = vmatprep.mubr.bf16.mxu0 %v81_v38  ;;  %v6200_v55 = vld [vmem:[%s7969_s1 + $0x1a0] sm:$0xff]   ;;  %v6202_v57 = vld [vmem:[%s7969_s1 + $0x1d8] sm:$0xff]   ;;  %v6206_v61 = vld [vmem:[%s7969_s1 + $0x1d0] sm:$0xff]  }
  0x13   :  { %379 = vmatprep.mubr.bf16.mxu1 %v34_v41  ;;  %v6203_v58 = vld [vmem:[%s7969_s1 + $0x118] sm:$0xff]   ;;  %v6207_v62 = vld [vmem:[%s7969_s1 + $0x110] sm:$0xff]   ;;  %v6209_v0 = vld [vmem:[%s7969_s1 + $0x148] sm:$0xff]  }
  0x14   :  { %5721 = vmatpush3.bf16.msra.mxu0 %v6171_v18  ;;  %v6204_v59 = vld [vmem:[%s7969_s1 + $0x198] sm:$0xff]   ;;  %v6208_v63 = vld [vmem:[%s7969_s1 + $0x190] sm:$0xff]   ;;  %v6210_v1 = vld [vmem:[%s7969_s1 + $0x1c8] sm:$0xff]  }
  0x15   :  { %5743 = vmatpush3.bf16.msra.mxu1 %v6172_v19  ;;  %5722 = vmatprep.subr.bf16.mxu0 %v6173_v20  ;;  %v6211_v2 = vld [vmem:[%s7969_s1 + $0x108] sm:$0xff]   ;;  %v6213_v4 = vld [vmem:[%s7969_s1 + $0x140] sm:$0xff]   ;;  %v6217_v9 = vld [vmem:[%s7969_s1 + $0x278] sm:$0xff]  }
  0x16   :  { %5744 = vmatprep.subr.bf16.mxu1 %v6174_v21  ;;  %v6212_v3 = vld [vmem:[%s7969_s1 + $0x188] sm:$0xff]   ;;  %v6214_v5 = vld [vmem:[%s7969_s1 + $0x1c0] sm:$0xff]   ;;  %v6218_v16 = vld [vmem:[%s7969_s1 + $0x2f8] sm:$0xff]  }
  0x17   :  { %v6215_v6 = vld [vmem:[%s7969_s1 + $0x100] sm:$0xff]   ;;  %v4647_v8 = vld.sshfl [vmem:[%s7970_s0 + $0x8] sm:$0x33 pattern:$0x76325410]  ;;  %v6219_v18 = vld [vmem:[%s7969_s1 + $0x238] sm:$0xff]  }
  0x18   :  { %5723 = vmatpush3.bf16.msra.mxu0 %v6175_v22  ;;  %v6216_v7 = vld [vmem:[%s7969_s1 + $0x180] sm:$0xff]   ;;  %v397_v10 = vcombine.high %v4647_v8, %v4647_v8  ;;  %v4697_v11 = vld.sshfl [vmem:[%s7970_s0 + $0xc] sm:$0x33 pattern:$0x76325410]  ;;  %v400_v12 = vpack.c.bf16 %v4647_v8, %v4647_v8  ;;  %v6220_v19 = vld [vmem:[%s7969_s1 + $0x2b8] sm:$0xff]  }
  0x19   :  { %5745 = vmatpush3.bf16.msra.mxu1 %v6176_v23  ;;  %5724 = vmatprep.subr.bf16.mxu0 %v6177_v24  ;;  %v582_v13 = vcombine.high %v4697_v11, %v4697_v11  ;;  %v585_v15 = vpack.c.bf16 %v4697_v11, %v4697_v11  ;;  %v6221_v20 = vld [vmem:[%s7969_s1 + $0x270] sm:$0xff]   ;;  %v6225_v24 = vld [vmem:[%s7969_s1 + $0x268] sm:$0xff]   ;;  %v6233_v32 = vld [vmem:[%s7969_s1 + $0x258] sm:$0xff]  }
  0x1a   :  { %5746 = vmatprep.subr.bf16.mxu1 %v6178_v25  ;;  %v401_v14 = vpack.c.bf16 %v397_v10, %v397_v10  ;;  %v6222_v21 = vld [vmem:[%s7969_s1 + $0x2f0] sm:$0xff]   ;;  %v6226_v25 = vld [vmem:[%s7969_s1 + $0x2e8] sm:$0xff]   ;;  %v6234_v33 = vld [vmem:[%s7969_s1 + $0x2d8] sm:$0xff]  }
  0x1b   :  { %v586_v17 = vpack.c.bf16 %v582_v13, %v582_v13  ;;  %v6223_v22 = vld [vmem:[%s7969_s1 + $0x230] sm:$0xff]   ;;  %v6235_v34 = vld [vmem:[%s7969_s1 + $0x218] sm:$0xff]   ;;  %v6242_v41 = vld [vmem:[%s7969_s1 + $0x2c8] sm:$0xff]  }
  0x1c   :  { %5725 = vmatpush3.bf16.msra.mxu0 %v6179_v26  ;;  %v6224_v23 = vld [vmem:[%s7969_s1 + $0x2b0] sm:$0xff]   ;;  %v6227_v26 = vld [vmem:[%s7969_s1 + $0x228] sm:$0xff]   ;;  %v6270_v10 = vld [vmem:[%s7969_s1 + $0x398] sm:$0xff]  }
  0x1d   :  { %5747 = vmatpush3.bf16.msra.mxu1 %v6180_v27  ;;  %5726 = vmatprep.subr.bf16.mxu0 %v6181_v28  ;;  %v6228_v27 = vld [vmem:[%s7969_s1 + $0x2a8] sm:$0xff]   ;;  %v6229_v28 = vld [vmem:[%s7969_s1 + $0x260] sm:$0xff]   ;;  %v6237_v36 = vld [vmem:[%s7969_s1 + $0x250] sm:$0xff]  }
  0x1e   :  { %5748 = vmatprep.subr.bf16.mxu1 %v6182_v29  ;;  %v6230_v29 = vld [vmem:[%s7969_s1 + $0x2e0] sm:$0xff]   ;;  %v6239_v38 = vld [vmem:[%s7969_s1 + $0x210] sm:$0xff]  }
  0x1f   :  { %v6266_v8 = vld [vmem:[%s7971_s3 + $0x40] ss:$8 sps:$4 sm:$0xff]   ;;  %v6274_v11 = vld [vmem:[%s7969_s1 + $0x3d0] sm:$0xff]  }
  0x20   :  { %5727 = vmatpush3.bf16.msra.mxu0 %v6183_v30  ;;  %v6231_v30 = vld [vmem:[%s7969_s1 + $0x220] sm:$0xff]   ;;  %v6275_v13 = vld [vmem:[%s7969_s1 + $0x390] sm:$0xff]  }
  0x21   :  { %5749 = vmatpush3.bf16.msra.mxu1 %v6184_v31  ;;  %5756 = vmatprep.subr.bf16.mxu0 %v6185_v37  ;;  %v6232_v31 = vld [vmem:[%s7969_s1 + $0x2a0] sm:$0xff]   ;;  %v6238_v37 = vld [vmem:[%s7969_s1 + $0x2d0] sm:$0xff]  }
  0x22   :  { %5778 = vmatprep.subr.bf16.mxu1 %v6186_v40  ;;  %v6241_v40 = vld [vmem:[%s7969_s1 + $0x248] sm:$0xff]  }
  0x23   :  { %244 = vmatmul.mubr.bf16.vlgmr.msra.gmra.mxu0 %v80_v35  ;;  %v6236_v35 = vld [vmem:[%s7969_s1 + $0x298] sm:$0xff]  }
  0x24   :  { %380 = vmatmul.mubr.bf16.vlgmr.msra.gmra.mxu1 %v33_v39  ;;  %5757 = vmatpush3.bf16.msra.mxu0 %v6187_v42  ;;  %v6240_v39 = vld [vmem:[%s7969_s1 + $0x290] sm:$0xff]   ;;  %v6243_v42 = vld [vmem:[%s7969_s1 + $0x208] sm:$0xff]  }
  0x25   :  { %5779 = vmatpush3.bf16.msra.mxu1 %v6188_v43  ;;  %5758 = vmatprep.subr.bf16.mxu0 %v6189_v44  ;;  %v6244_v43 = vld [vmem:[%s7969_s1 + $0x288] sm:$0xff]   ;;  %v6245_v44 = vld [vmem:[%s7969_s1 + $0x240] sm:$0xff]  }
  0x26   :  { %5780 = vmatprep.subr.bf16.mxu1 %v6190_v45  ;;  %563 = vmatprep.mubr.bf16.mxu0 %v401_v14  ;;  %v6246_v45 = vld [vmem:[%s7969_s1 + $0x2c0] sm:$0xff]  }
  0x27   :  { %748 = vmatprep.mubr.bf16.mxu1 %v586_v17  ;;  %v6278_v14 = vld [vmem:[%s7971_s3 + $0x24] ss:$8 sps:$4 sm:$0xff]  }
  0x28   :  { %5759 = vmatpush3.bf16.msra.mxu0 %v6191_v46  ;;  %v6247_v46 = vld [vmem:[%s7969_s1 + $0x200] sm:$0xff]   ;;  %v6280_v17 = vld [vmem:[%s7969_s1 + $0x388] sm:$0xff]  }
  0x29   :  { %5781 = vmatpush3.bf16.msra.mxu1 %v6192_v47  ;;  %5760 = vmatprep.subr.bf16.mxu0 %v6193_v48  ;;  %v6248_v47 = vld [vmem:[%s7969_s1 + $0x280] sm:$0xff]   ;;  %v4747_v48 = vld.sshfl [vmem:[%s7970_s0 + $0x10] sm:$0x33 pattern:$0x76325410] }
  0x2a   :  { %5782 = vmatprep.subr.bf16.mxu1 %v6194_v49  ;;  %v767_v49 = vcombine.high %v4747_v48, %v4747_v48 }
  0x2c   :  { %5761 = vmatpush3.bf16.msra.mxu0 %v6195_v50  ;;  %v4797_v50 = vld.sshfl [vmem:[%s7970_s0 + $0x14] sm:$0x33 pattern:$0x76325410] }
  0x2d   :  { %5783 = vmatpush3.bf16.msra.mxu1 %v6196_v51  ;;  %5762 = vmatprep.subr.bf16.mxu0 %v6197_v52  ;;  %v770_v51 = vpack.c.bf16 %v4747_v48, %v4747_v48  ;;  %v952_v52 = vcombine.high %v4797_v50, %v4797_v50 }
  0x2e   :  { %5784 = vmatprep.subr.bf16.mxu1 %v6198_v53  ;;  %v771_v53 = vpack.c.bf16 %v767_v49, %v767_v49 }
  0x30   :  { %5763 = vmatpush3.bf16.msra.mxu0 %v6199_v54  ;;  %v955_v54 = vpack.c.bf16 %v4797_v50, %v4797_v50  ;;  %v6320_v50 = vld [vmem:[%s7969_s1 + $0x578] sm:$0xff]  }
  0x31   :  { %5785 = vmatpush3.bf16.msra.mxu1 %v6200_v55  ;;  %5764 = vmatprep.subr.bf16.mxu0 %v6201_v56  ;;  %v956_v55 = vpack.c.bf16 %v952_v52, %v952_v52  ;;  %v6249_v56 = vld [vmem:[%s7969_s1 + $0x3f8] sm:$0xff]   ;;  %v6324_v52 = vld [vmem:[%s7969_s1 + $0x570] sm:$0xff]  }
  0x32   :  { %5786 = vmatprep.subr.bf16.mxu1 %v6202_v57  ;;  %v6250_v57 = vld [vmem:[%s7969_s1 + $0x3b8] sm:$0xff]  }
  0x34   :  { %5765 = vmatpush3.bf16.msra.mxu0 %v6203_v58  ;;  %v6254_v58 = vld [vmem:[%s7969_s1 + $0x3f0] sm:$0xff]  }
  0x35   :  { %5787 = vmatpush3.bf16.msra.mxu1 %v6204_v59  ;;  %5766 = vmatprep.subr.bf16.mxu0 %v6205_v60  ;;  %v6251_v59 = vld [vmem:[%s7971_s3 + $0x70] ss:$8 sps:$4 sm:$0xff]   ;;  %v6253_v60 = vld [vmem:[%s7971_s3 + $0x74] ss:$8 sps:$4 sm:$0xff]  }
  0x36   :  { %5788 = vmatprep.subr.bf16.mxu1 %v6206_v61  ;;  %v6255_v61 = vld [vmem:[%s7969_s1 + $0x3b0] sm:$0xff]  }
  0x38   :  { %5767 = vmatpush3.bf16.msra.mxu0 %v6207_v62  ;;  %v6258_v62 = vld [vmem:[%s7971_s3 + $0x64] ss:$8 sps:$4 sm:$0xff]  }
  0x39   :  { %5789 = vmatpush3.bf16.msra.mxu1 %v6208_v63  ;;  %5768 = vmatprep.subr.bf16.mxu0 %v6209_v0  ;;  %v6259_v63 = vld [vmem:[%s7969_s1 + $0x3e8] sm:$0xff]  }
  0x3a   :  { %5790 = vmatprep.subr.bf16.mxu1 %v6210_v1  ;;  %v6256_v0 = vld [vmem:[%s7971_s3 + $0x60] ss:$8 sps:$4 sm:$0xff]   ;;  %v6263_v1 = vld [vmem:[%s7971_s3 + $0x54] ss:$8 sps:$4 sm:$0xff]  }
  0x3c   :  { %5769 = vmatpush3.bf16.msra.mxu0 %v6211_v2  ;;  %v6260_v2 = vld [vmem:[%s7969_s1 + $0x3a8] sm:$0xff]  }
  0x3d   :  { %5791 = vmatpush3.bf16.msra.mxu1 %v6212_v3  ;;  %5770 = vmatprep.subr.bf16.mxu0 %v6213_v4  ;;  %v6264_v3 = vld [vmem:[%s7969_s1 + $0x3e0] sm:$0xff]   ;;  %v6261_v4 = vld [vmem:[%s7971_s3 + $0x50] ss:$8 sps:$4 sm:$0xff]  }
  0x3e   :  { %5792 = vmatprep.subr.bf16.mxu1 %v6214_v5  ;;  %v6265_v5 = vld [vmem:[%s7969_s1 + $0x3a0] sm:$0xff]  }
  0x40   :  { %5771 = vmatpush3.bf16.msra.mxu0 %v6215_v6  ;;  %v6268_v6 = vld [vmem:[%s7971_s3 + $0x44] ss:$8 sps:$4 sm:$0xff]  }
  0x41   :  { %5793 = vmatpush3.bf16.msra.mxu1 %v6216_v7  ;;  %5800 = vmatprep.subr.bf16.mxu0 %v6217_v9  ;;  %v6269_v7 = vld [vmem:[%s7969_s1 + $0x3d8] sm:$0xff]  }
  0x42   :  { %5822 = vmatprep.subr.bf16.mxu1 %v6218_v16  ;;  %v6273_v9 = vld [vmem:[%s7971_s3 + $0x34] ss:$8 sps:$4 sm:$0xff]   ;;  %v6276_v16 = vld [vmem:[%s7971_s3 + $0x20] ss:$8 sps:$4 sm:$0xff]  }
  0x43   :  { %564 = vmatmul.mubr.bf16.vlgmr.msra.gmra.mxu0 %v400_v12  ;;  %v6271_v12 = vld [vmem:[%s7971_s3 + $0x30] ss:$8 sps:$4 sm:$0xff]  }
  0x44   :  { %749 = vmatmul.mubr.bf16.vlgmr.msra.gmra.mxu1 %v585_v15  ;;  %5801 = vmatpush3.bf16.msra.mxu0 %v6219_v18  ;;  %v6279_v15 = vld [vmem:[%s7969_s1 + $0x3c8] sm:$0xff]   ;;  %v6283_v18 = vld [vmem:[%s7971_s3 + $0x14] ss:$8 sps:$4 sm:$0xff]  }
  0x45   :  { %5823 = vmatpush3.bf16.msra.mxu1 %v6220_v19  ;;  %5802 = vmatprep.subr.bf16.mxu0 %v6221_v20  ;;  %v6284_v19 = vld [vmem:[%s7969_s1 + $0x3c0] sm:$0xff]   ;;  %v6281_v20 = vld [vmem:[%s7971_s3 + $0x10] ss:$8 sps:$4 sm:$0xff]  }
  0x46   :  { %5824 = vmatprep.subr.bf16.mxu1 %v6222_v21  ;;  %933 = vmatprep.mubr.bf16.mxu0 %v771_v53  ;;  %v6285_v21 = vld [vmem:[%s7969_s1 + $0x380] sm:$0xff]   ;;  %v6326_v53 = vld [vmem:[%s7969_s1 + $0x530] sm:$0xff]  }
  0x47   :  { %1118 = vmatprep.mubr.bf16.mxu1 %v956_v55  ;;  %v6330_v55 = vld [vmem:[%s7969_s1 + $0x528] sm:$0xff]  }
  0x48   :  { %5803 = vmatpush3.bf16.msra.mxu0 %v6223_v22  ;;  %v4899_v22 = vld.sshfl [vmem:[%s7970_s0 + $0x1c] sm:$0x33 pattern:$0x76325410] }
  0x49   :  { %5825 = vmatpush3.bf16.msra.mxu1 %v6224_v23  ;;  %5804 = vmatprep.subr.bf16.mxu0 %v6225_v24  ;;  %v1355_v23 = vcombine.high %v4899_v22, %v4899_v22  ;;  %v6288_v24 = vld [vmem:[%s7971_s3 + $0x4] ss:$8 sps:$4 sm:$0xff]  }
  0x4a   :  { %5826 = vmatprep.subr.bf16.mxu1 %v6226_v25  ;;  %v6289_v25 = vld [vmem:[%s7969_s1 + $0x478] sm:$0xff]  }
  0x4c   :  { %5805 = vmatpush3.bf16.msra.mxu0 %v6227_v26  ;;  %v6286_v26 = vld [vmem:[%s7971_s3] ss:$8 sps:$4 sm:$0xff]  }
  0x4d   :  { %5827 = vmatpush3.bf16.msra.mxu1 %v6228_v27  ;;  %5806 = vmatprep.subr.bf16.mxu0 %v6229_v28  ;;  %v1358_v27 = vpack.c.bf16 %v4899_v22, %v4899_v22  ;;  %v1359_v28 = vpack.c.bf16 %v1355_v23, %v1355_v23 }
  0x4e   :  { %5828 = vmatprep.subr.bf16.mxu1 %v6230_v29  ;;  %v6290_v29 = vld [vmem:[%s7969_s1 + $0x438] sm:$0xff]  }
  0x50   :  { %5807 = vmatpush3.bf16.msra.mxu0 %v6231_v30  ;;  %v6291_v30 = vld [vmem:[%s7969_s1 + $0x378] sm:$0xff]  }
  0x51   :  { %5829 = vmatpush3.bf16.msra.mxu1 %v6232_v31  ;;  %5808 = vmatprep.subr.bf16.mxu0 %v6233_v32  ;;  %v6292_v31 = vld [vmem:[%s7969_s1 + $0x470] sm:$0xff]   ;;  %v6593_v32 = vmov 0  }
  0x52   :  { %5830 = vmatprep.subr.bf16.mxu1 %v6234_v33  ;;  %v6294_v33 = vld [vmem:[%s7969_s1 + $0x430] sm:$0xff]  }
  0x54   :  { %5809 = vmatpush3.bf16.msra.mxu0 %v6235_v34  ;;  %v6296_v34 = vld [vmem:[%s7969_s1 + $0x468] sm:$0xff]  }
  0x55   :  { %5831 = vmatpush3.bf16.msra.mxu1 %v6236_v35  ;;  %5810 = vmatprep.subr.bf16.mxu0 %v6237_v36  ;;  %v6298_v35 = vld [vmem:[%s7969_s1 + $0x428] sm:$0xff]   ;;  %v6300_v36 = vld [vmem:[%s7969_s1 + $0x460] sm:$0xff]  }
  0x56   :  { %5832 = vmatprep.subr.bf16.mxu1 %v6238_v37  ;;  %v6302_v37 = vld [vmem:[%s7969_s1 + $0x420] sm:$0xff]  }
  0x58   :  { %5811 = vmatpush3.bf16.msra.mxu0 %v6239_v38  ;;  %v6304_v38 = vld [vmem:[%s7969_s1 + $0x458] sm:$0xff]  }
  0x59   :  { %5833 = vmatpush3.bf16.msra.mxu1 %v6240_v39  ;;  %5812 = vmatprep.subr.bf16.mxu0 %v6241_v40  ;;  %v6306_v39 = vld [vmem:[%s7969_s1 + $0x418] sm:$0xff]   ;;  %v6308_v40 = vld [vmem:[%s7969_s1 + $0x450] sm:$0xff]  }
  0x5a   :  { %5834 = vmatprep.subr.bf16.mxu1 %v6242_v41  ;;  %v6310_v41 = vld [vmem:[%s7969_s1 + $0x410] sm:$0xff]  }
  0x5c   :  { %5813 = vmatpush3.bf16.msra.mxu0 %v6243_v42  ;;  %v6312_v42 = vld [vmem:[%s7969_s1 + $0x448] sm:$0xff]  }
  0x5d   :  { %5835 = vmatpush3.bf16.msra.mxu1 %v6244_v43  ;;  %5814 = vmatprep.subr.bf16.mxu0 %v6245_v44  ;;  %v6314_v43 = vld [vmem:[%s7969_s1 + $0x408] sm:$0xff]   ;;  %v6316_v44 = vld [vmem:[%s7969_s1 + $0x440] sm:$0xff]  }
  0x5e   :  { %5836 = vmatprep.subr.bf16.mxu1 %v6246_v45  ;;  %v6318_v45 = vld [vmem:[%s7969_s1 + $0x400] sm:$0xff]  }
  0x60   :  { %5815 = vmatpush3.bf16.msra.mxu0 %v6247_v46  ;;  %v4965_v46 = vld.sshfl [vmem:[%s7970_s0 + $0x20] sm:$0x33 pattern:$0x76325410] }
  0x61   :  { %5837 = vmatpush3.bf16.msra.mxu1 %v6248_v47  ;;  %1244 = vmatprep.subr.bf16.mxu0 %v6253_v60  ;;  %v1675_v47 = vcombine.high %v4965_v46, %v4965_v46  ;;  %v1678_v48 = vpack.c.bf16 %v4965_v46, %v4965_v46  ;;  %v6340_v60 = vld [vmem:[%s7969_s1 + $0x550] sm:$0xff]  }
  0x62   :  { %5844 = vmatprep.subr.bf16.mxu1 %v6249_v56  ;;  %v6332_v56 = vld [vmem:[%s7969_s1 + $0x560] sm:$0xff]  }
  0x63   :  { %934 = vmatmul.mubr.bf16.vlgmr.msra.gmra.mxu0 %v770_v51  ;;  %v1679_v49 = vpack.c.bf16 %v1675_v47, %v1675_v47  ;;  %v6322_v51 = vld [vmem:[%s7969_s1 + $0x538] sm:$0xff]   ;;  %v6295_v47 = vld [vmem:[%s7969_s1 + $0x370] sm:$0xff]  }
  0x64   :  { %1119 = vmatmul.mubr.bf16.vlgmr.msra.gmra.mxu1 %v955_v54  ;;  %1245 = vmatpush1.bf16.msra.mxu0 %v6251_v59  ;;  %v6328_v54 = vld [vmem:[%s7969_s1 + $0x568] sm:$0xff]   ;;  %v6338_v59 = vld [vmem:[%s7969_s1 + $0x518] sm:$0xff]  }
  0x65   :  { %5845 = vmatpush3.bf16.msra.mxu1 %v6250_v57  ;;  %1246 = vmatprep.subr.bf16.mxu0 %v6258_v62  ;;  %v6334_v57 = vld [vmem:[%s7969_s1 + $0x520] sm:$0xff]  }
  0x66   :  { %5846 = vmatprep.subr.bf16.mxu1 %v6254_v58  ;;  %1521 = vmatprep.mubr.bf16.mxu1 %v1359_v28  ;;  %v6336_v58 = vld [vmem:[%s7969_s1 + $0x558] sm:$0xff]  }
  0x67   :  { %1276 = vmatprep.mubr.bf16.mxu0 %v6593_v32 }
  0x68   :  { %1247 = vmatpush1.bf16.msra.mxu0 %v6256_v0  ;;  %v6344_v0 = vld [vmem:[%s7969_s1 + $0x548] sm:$0xff]  }
  0x69   :  { %5847 = vmatpush3.bf16.msra.mxu1 %v6255_v61  ;;  %1248 = vmatprep.subr.bf16.mxu0 %v6263_v1  ;;  %v6342_v61 = vld [vmem:[%s7969_s1 + $0x510] sm:$0xff]  }
  0x6a   :  { %5848 = vmatprep.subr.bf16.mxu1 %v6259_v63 }
  0x6c   :  { %1249 = vmatpush1.bf16.msra.mxu0 %v6261_v4 }
  0x6d   :  { %5849 = vmatpush3.bf16.msra.mxu1 %v6260_v2  ;;  %1250 = vmatprep.subr.bf16.mxu0 %v6268_v6  ;;  %v6346_v2 = vld [vmem:[%s7969_s1 + $0x508] sm:$0xff]   ;;  %v6348_v6 = vld [vmem:[%s7969_s1 + $0x540] sm:$0xff]  }
  0x6e   :  { %5850 = vmatprep.subr.bf16.mxu1 %v6264_v3 }
  0x70   :  { %1251 = vmatpush1.bf16.msra.mxu0 %v6266_v8 }
  0x71   :  { %5851 = vmatpush3.bf16.msra.mxu1 %v6265_v5  ;;  %1252 = vmatprep.subr.bf16.mxu0 %v6273_v9  ;;  %v6350_v9 = vld [vmem:[%s7969_s1 + $0x500] sm:$0xff]  }
  0x72   :  { %5852 = vmatprep.subr.bf16.mxu1 %v6269_v7  ;;  %v5065_v7 = vld.sshfl [vmem:[%s7970_s0 + $0x28] sm:$0x33 pattern:$0x76325410] }
  0x74   :  { %1253 = vmatpush1.bf16.msra.mxu0 %v6271_v12 }
  0x75   :  { %5853 = vmatpush3.bf16.msra.mxu1 %v6270_v10  ;;  %1254 = vmatprep.subr.bf16.mxu0 %v6278_v14  ;;  %v2045_v10 = vcombine.high %v5065_v7, %v5065_v7 }
  0x76   :  { %5854 = vmatprep.subr.bf16.mxu1 %v6274_v11 }
  0x77   :  { %v2049_v12 = vpack.c.bf16 %v2045_v10, %v2045_v10  ;;  %v6337_v10 = vld [vmem:[%s7969_s1 + $0x4a0] sm:$0xff]  }
  0x78   :  { %1255 = vmatpush1.bf16.msra.mxu0 %v6276_v16 }
  0x79   :  { %5855 = vmatpush3.bf16.msra.mxu1 %v6275_v13  ;;  %1256 = vmatprep.subr.bf16.mxu0 %v6283_v18  ;;  %v2048_v13 = vpack.c.bf16 %v5065_v7, %v5065_v7  ;;  %v6331_v7 = vld [vmem:[%s7969_s1 + $0x4e8] sm:$0xff]  }
  0x7a   :  { %5856 = vmatprep.subr.bf16.mxu1 %v6279_v15 }
  0x7c   :  { %1257 = vmatpush1.bf16.msra.mxu0 %v6281_v20 }
  0x7d   :  { %5857 = vmatpush3.bf16.msra.mxu1 %v6280_v17  ;;  %1258 = vmatprep.subr.bf16.mxu0 %v6288_v24 }
  0x7e   :  { %5858 = vmatprep.subr.bf16.mxu1 %v6284_v19 }
  0x80   :  { %1259 = vmatpush1.bf16.msra.mxu0 %v6286_v26 }
  0x81   :  { %5859 = vmatpush3.bf16.msra.mxu1 %v6285_v21  ;;  %5866 = vmatprep.subr.bf16.mxu0 %v6291_v30  ;;  %v4865_v30 = vld.sshfl [vmem:[%s7970_s0 + $0x18] sm:$0x33 pattern:$0x76325410] }
  0x82   :  { %5888 = vmatprep.subr.bf16.mxu1 %v6289_v25 }
  0x84   :  { %1522 = vmatmul.mubr.bf16.vlgmr.msra.gmra.mxu1 %v1358_v27 }
  0x85   :  { %5889 = vmatpush3.bf16.msra.mxu1 %v6290_v29  ;;  %1841 = vmatprep.mubr.bf16.mxu1 %v1679_v49 }
  0x86   :  { %5890 = vmatprep.subr.bf16.mxu1 %v6292_v31 }
  0x89   :  { %5891 = vmatpush3.bf16.msra.mxu1 %v6294_v33 }
  0x8a   :  { %5892 = vmatprep.subr.bf16.mxu1 %v6296_v34 }
  0x8d   :  { %5893 = vmatpush3.bf16.msra.mxu1 %v6298_v35 }
  0x8e   :  { %5894 = vmatprep.subr.bf16.mxu1 %v6300_v36  ;;  %v4846_v36 = vld [vmem:[%s7972_s2] ss:$0 sm:$0xff] }
  0x91   :  { %5895 = vmatpush3.bf16.msra.mxu1 %v6302_v37 }
  0x92   :  { %5896 = vmatprep.subr.bf16.mxu1 %v6304_v38 }
  0x95   :  { %5897 = vmatpush3.bf16.msra.mxu1 %v6306_v39 }
  0x96   :  { %5898 = vmatprep.subr.bf16.mxu1 %v6308_v40 }
  0x99   :  { %5899 = vmatpush3.bf16.msra.mxu1 %v6310_v41 }
  0x9a   :  { %5900 = vmatprep.subr.bf16.mxu1 %v6312_v42  ;;  %v1307_v42 = vcombine.high %v4865_v30, %v4865_v30 }
  0x9d   :  { %5901 = vmatpush3.bf16.msra.mxu1 %v6314_v43 }
  0x9e   :  { %5902 = vmatprep.subr.bf16.mxu1 %v6316_v44 }
  0xa1   :  { %5903 = vmatpush3.bf16.msra.mxu1 %v6318_v45  ;;  %v6293_v45 = vld [vmem:[%s7969_s1 + $0x338] sm:$0xff]  }
  0xa2   :  { %5932 = vmatprep.subr.bf16.mxu1 %v6320_v50  ;;  %v6297_v50 = vld [vmem:[%s7969_s1 + $0x330] sm:$0xff]  }
  0xa4   :  { %1842 = vmatmul.mubr.bf16.vlgmr.msra.gmra.mxu1 %v1678_v48  ;;  %v1311_v48 = vpack.c.bf16 %v1307_v42, %v1307_v42  ;;  %v6367_v42 = vld [vmem:[%s7969_s1 + $0x628] sm:$0xff]  }
  0xa5   :  { %5933 = vmatpush3.bf16.msra.mxu1 %v6322_v51  ;;  %2211 = vmatprep.mubr.bf16.mxu1 %v2049_v12  ;;  %v6299_v51 = vld [vmem:[%s7969_s1 + $0x368] sm:$0xff]   ;;  %v6341_v12 = vld [vmem:[%s7969_s1 + $0x498] sm:$0xff]  }
  0xa6   :  { %5934 = vmatprep.subr.bf16.mxu1 %v6324_v52  ;;  %v6301_v52 = vld [vmem:[%s7969_s1 + $0x328] sm:$0xff]  }
  0xa9   :  { %5935 = vmatpush3.bf16.msra.mxu1 %v6326_v53  ;;  %v6303_v53 = vld [vmem:[%s7969_s1 + $0x360] sm:$0xff]  }
  0xaa   :  { %5936 = vmatprep.subr.bf16.mxu1 %v6328_v54  ;;  %v6305_v54 = vld [vmem:[%s7969_s1 + $0x320] sm:$0xff]  }
  0xad   :  { %5937 = vmatpush3.bf16.msra.mxu1 %v6330_v55  ;;  %v6307_v55 = vld [vmem:[%s7969_s1 + $0x358] sm:$0xff]  }
  0xae   :  { %5938 = vmatprep.subr.bf16.mxu1 %v6332_v56  ;;  %v6309_v56 = vld [vmem:[%s7969_s1 + $0x318] sm:$0xff]  }
  0xb1   :  { %5939 = vmatpush3.bf16.msra.mxu1 %v6334_v57  ;;  %v6311_v57 = vld [vmem:[%s7969_s1 + $0x350] sm:$0xff]  }
  0xb2   :  { %5940 = vmatprep.subr.bf16.mxu1 %v6336_v58  ;;  %v6313_v58 = vld [vmem:[%s7969_s1 + $0x310] sm:$0xff]  }
  0xb5   :  { %5941 = vmatpush3.bf16.msra.mxu1 %v6338_v59  ;;  %v6315_v59 = vld [vmem:[%s7969_s1 + $0x348] sm:$0xff]  }
  0xb6   :  { %5942 = vmatprep.subr.bf16.mxu1 %v6340_v60  ;;  %v6317_v60 = vld [vmem:[%s7969_s1 + $0x308] sm:$0xff]  }
  0xb9   :  { %5943 = vmatpush3.bf16.msra.mxu1 %v6342_v61  ;;  %v6319_v61 = vld [vmem:[%s7969_s1 + $0x340] sm:$0xff]  }
  0xba   :  { %5944 = vmatprep.subr.bf16.mxu1 %v6344_v0 }
  0xbd   :  { %5945 = vmatpush3.bf16.msra.mxu1 %v6346_v2  ;;  %v1310_v2 = vpack.c.bf16 %v4865_v30, %v4865_v30  ;;  %v6353_v30 = vld [vmem:[%s7971_s3 + $0xf0] ss:$8 sps:$4 sm:$0xff]  }
  0xbe   :  { %5946 = vmatprep.subr.bf16.mxu1 %v6348_v6  ;;  %v6329_v6 = vld [vmem:[%s7969_s1 + $0x4b0] sm:$0xff]  }
  0xc1   :  { %5947 = vmatpush3.bf16.msra.mxu1 %v6350_v9  ;;  %v6335_v9 = vld [vmem:[%s7969_s1 + $0x4e0] sm:$0xff]  }
  0xc4   :  { %2212 = vmatmul.mubr.bf16.vlgmr.msra.gmra.mxu1 %v2048_v13  ;;  %v6343_v13 = vld [vmem:[%s7969_s1 + $0x4d0] sm:$0xff]  }
  0xe3   :  { %v5728_v62 = vpop.f32.mrf.mxu0 }
  0xe4   :  { %v5750_v63 = vpop.f32.mrf.mxu1 }
  0xe5   :  { %v5729_v1 = vpop.f32.mrf.mxu0 }
  0xe6   :  { %v5751_v3 = vpop.f32.mrf.mxu1  ;;  %v5730_v22 = vadd.f32 %v5729_v1, %v5728_v62  ;;  %v5015_v62 = vld.sshfl [vmem:[%s7970_s0 + $0x24] sm:$0x33 pattern:$0x76325410]  ;;  %v6323_v1 = vld [vmem:[%s7969_s1 + $0x4f8] sm:$0xff]  }
  0xe7   :  { %v5731_v4 = vpop.f32.mrf.mxu0  ;;  %v5752_v23 = vadd.f32 %v5751_v3, %v5750_v63  ;;  %v6321_v63 = vld [vmem:[%s7969_s1 + $0x300] sm:$0xff]   ;;  %v1860_v0 = vcombine.high %v5015_v62, %v5015_v62  ;;  %v6325_v3 = vld [vmem:[%s7969_s1 + $0x4b8] sm:$0xff]  }
  0xe8   :  { %v5753_v5 = vpop.f32.mrf.mxu1 }
  0xe9   :  { %v5732_v8 = vpop.f32.mrf.mxu0  ;;  %v382_v25 = vadd.f32 %v5752_v23, %v5730_v22  ;;  %v1864_v4 = vpack.c.bf16 %v1860_v0, %v1860_v0  ;;  %v6327_v5 = vld [vmem:[%s7969_s1 + $0x4f0] sm:$0xff]   ;;  %v6390_v0 = vld [vmem:[%s7971_s3 + $0x84] ss:$8 sps:$4 sm:$0xff]  }
  0xea   :  { %v5754_v11 = vpop.f32.mrf.mxu1  ;;  %v6333_v8 = vld [vmem:[%s7969_s1 + $0x4a8] sm:$0xff]  }
  0xeb   :  { %v6339_v11 = vld [vmem:[%s7969_s1 + $0x4d8] sm:$0xff]  }
 0x103   :  { %v5772_v14 = vpop.f32.mrf.mxu0 }
 0x104   :  { %v5794_v15 = vpop.f32.mrf.mxu1 }
 0x105   :  { %v5773_v16 = vpop.f32.mrf.mxu0 }
 0x106   :  { %v5795_v17 = vpop.f32.mrf.mxu1  ;;  %v5774_v24 = vadd.f32 %v5773_v16, %v5772_v14  ;;  %v6345_v14 = vld [vmem:[%s7969_s1 + $0x490] sm:$0xff]   ;;  %v6349_v16 = vld [vmem:[%s7969_s1 + $0x488] sm:$0xff]  }
 0x107   :  { %v5775_v18 = vpop.f32.mrf.mxu0  ;;  %v5796_v27 = vadd.f32 %v5795_v17, %v5794_v15  ;;  %v6347_v15 = vld [vmem:[%s7969_s1 + $0x4c8] sm:$0xff]   ;;  %v6351_v17 = vld [vmem:[%s7969_s1 + $0x4c0] sm:$0xff]  }
 0x108   :  { %v5797_v19 = vpop.f32.mrf.mxu1  ;;  %v571_v26 = vadd.f32 %v5774_v24, %v382_v25  ;;  %v6352_v18 = vld [vmem:[%s7969_s1 + $0x480] sm:$0xff]  }
 0x109   :  { %v5776_v20 = vpop.f32.mrf.mxu0  ;;  %v1863_v19 = vpack.c.bf16 %v5015_v62, %v5015_v62  ;;  %v6386_v62 = vld [vmem:[%s7969_s1 + $0x648] sm:$0xff]  }
 0x10a   :  { %v5798_v21 = vpop.f32.mrf.mxu1  ;;  %v756_v33 = vadd.f32 %v5796_v27, %v571_v26 }
 0x123   :  { %v5816_v28 = vpop.f32.mrf.mxu0 }
 0x124   :  { %v5838_v29 = vpop.f32.mrf.mxu1 }
 0x125   :  { %v5817_v31 = vpop.f32.mrf.mxu0 }
 0x126   :  { %v5818_v34 = vadd.f32 %v5817_v31, %v5816_v28  ;;  %v5839_v35 = vpop.f32.mrf.mxu1  ;;  %v6355_v31 = vld [vmem:[%s7971_s3 + $0xf4] ss:$8 sps:$4 sm:$0xff]  }
 0x127   :  { %v5819_v37 = vpop.f32.mrf.mxu0  ;;  %v5840_v39 = vadd.f32 %v5839_v35, %v5838_v29  ;;  %v6360_v35 = vld [vmem:[%s7971_s3 + $0xe4] ss:$8 sps:$4 sm:$0xff]  }
 0x128   :  { %v941_v38 = vadd.f32 %v5818_v34, %v756_v33  ;;  %v5841_v40 = vpop.f32.mrf.mxu1  ;;  %v6356_v33 = vld [vmem:[%s7969_s1 + $0x678] sm:$0xff]   ;;  %v6358_v37 = vld [vmem:[%s7971_s3 + $0xe0] ss:$8 sps:$4 sm:$0xff]  }
 0x129   :  { %v5820_v41 = vpop.f32.mrf.mxu0  ;;  %v6357_v34 = vld [vmem:[%s7969_s1 + $0x638] sm:$0xff]   ;;  %5954 = vmatprep.subr.bf16.mxu1 %v6356_v33  ;;  %v6366_v40 = vld [vmem:[%s7969_s1 + $0x668] sm:$0xff]  }
 0x12a   :  { %v1126_v43 = vadd.f32 %v5840_v39, %v941_v38  ;;  %v5842_v44 = vpop.f32.mrf.mxu1  ;;  %5955 = vmatpush3.bf16.msra.mxu1 %v6357_v34  ;;  %v6362_v38 = vld [vmem:[%s7969_s1 + $0x630] sm:$0xff]  }
 0x12b   :  { %v6365_v39 = vld [vmem:[%s7971_s3 + $0xd4] ss:$8 sps:$4 sm:$0xff]   ;;  %v6363_v41 = vld [vmem:[%s7971_s3 + $0xd0] ss:$8 sps:$4 sm:$0xff]   ;;  %v6371_v44 = vld [vmem:[%s7969_s1 + $0x660] sm:$0xff]  }
 0x12c   :  { %v1134_v46 = vadd.f32 %v4846_v36, %v1126_v43  ;;  %v6361_v36 = vld [vmem:[%s7969_s1 + $0x670] sm:$0xff]   ;;  %v6370_v43 = vld [vmem:[%s7971_s3 + $0xc4] ss:$8 sps:$4 sm:$0xff]  }
 0x12d   :  { %5956 = vmatprep.subr.bf16.mxu1 %v6361_v36  ;;  %v1152_v36 = vld [vmem:[%s7973_s4] sm:$0x3] }
 0x12e   :  { %v1135_v49 = vpack.c.bf16 %v1134_v46, %v1134_v46  ;;  %5957 = vmatpush3.bf16.msra.mxu1 %v6362_v38  ;;  %v6372_v46 = vld [vmem:[%s7969_s1 + $0x620] sm:$0xff]  }
 0x12f   :  { %5958 = vmatprep.subr.bf16.mxu1 %v6366_v40 }
 0x130   :  { %1277 = vmatmul.mubr.bf16.vlgmr.msra.gmra.mxu0 %v1135_v49  ;;  %v6373_v49 = vld [vmem:[%s7971_s3 + $0xb0] ss:$8 sps:$4 sm:$0xff]  }
 0x131   :  { %5867 = vmatpush3.bf16.msra.mxu0 %v6293_v45  ;;  %1657 = vmatprep.mubr.bf16.mxu0 %v1311_v48  ;;  %v6368_v45 = vld [vmem:[%s7971_s3 + $0xc0] ss:$8 sps:$4 sm:$0xff]   ;;  %v6376_v48 = vld [vmem:[%s7969_s1 + $0x658] sm:$0xff]  }
 0x132   :  { %5868 = vmatprep.subr.bf16.mxu0 %v6295_v47  ;;  %5959 = vmatpush3.bf16.msra.mxu1 %v6367_v42  ;;  %v6375_v47 = vld [vmem:[%s7971_s3 + $0xb4] ss:$8 sps:$4 sm:$0xff]  }
 0x133   :  { %5960 = vmatprep.subr.bf16.mxu1 %v6371_v44 }
 0x135   :  { %5869 = vmatpush3.bf16.msra.mxu0 %v6297_v50  ;;  %v6377_v50 = vld [vmem:[%s7969_s1 + $0x618] sm:$0xff]  }
 0x136   :  { %5870 = vmatprep.subr.bf16.mxu0 %v6299_v51  ;;  %5961 = vmatpush3.bf16.msra.mxu1 %v6372_v46 }
 0x137   :  { %5962 = vmatprep.subr.bf16.mxu1 %v6376_v48 }
 0x139   :  { %5871 = vmatpush3.bf16.msra.mxu0 %v6301_v52  ;;  %v6380_v52 = vld [vmem:[%s7971_s3 + $0xa4] ss:$8 sps:$4 sm:$0xff]  }
 0x13a   :  { %5872 = vmatprep.subr.bf16.mxu0 %v6303_v53  ;;  %5963 = vmatpush3.bf16.msra.mxu1 %v6377_v50  ;;  %v6378_v53 = vld [vmem:[%s7971_s3 + $0xa0] ss:$8 sps:$4 sm:$0xff]  }
 0x13d   :  { %5873 = vmatpush3.bf16.msra.mxu0 %v6305_v54 }
 0x13e   :  { %5874 = vmatprep.subr.bf16.mxu0 %v6307_v55  ;;  %v6381_v55 = vld [vmem:[%s7969_s1 + $0x650] sm:$0xff]  }
 0x13f   :  { %5964 = vmatprep.subr.bf16.mxu1 %v6381_v55 }
 0x141   :  { %5875 = vmatpush3.bf16.msra.mxu0 %v6309_v56 }
 0x142   :  { %5876 = vmatprep.subr.bf16.mxu0 %v6311_v57  ;;  %v6382_v57 = vld [vmem:[%s7969_s1 + $0x610] sm:$0xff]  }
 0x143   :  { %5965 = vmatpush3.bf16.msra.mxu1 %v6382_v57  ;;  %v5151_v57 = vld.sshfl [vmem:[%s7970_s0 + $0x2c] sm:$0x33 pattern:$0x76325410] }
 0x144   :  { %v5860_v20 = vpop.f32.mrf.mxu1  ;;  %5966 = vmatprep.subr.bf16.mxu1 %v6386_v62  ;;  %v2404_v62 = vcombine.high %v5151_v57, %v5151_v57 }
 0x145   :  { %5877 = vmatpush3.bf16.msra.mxu0 %v6313_v58 }
 0x146   :  { %5878 = vmatprep.subr.bf16.mxu0 %v6315_v59  ;;  %v5861_v21 = vpop.f32.mrf.mxu1  ;;  %v6385_v59 = vld [vmem:[%s7971_s3 + $0x94] ss:$8 sps:$4 sm:$0xff]  }
 0x147   :  { %v7237_v22 = vadd.f32 %v5861_v21, %v5860_v20  ;;  %v6416_v20 = vld [vmem:[%s7969_s1 + $0x690] sm:$0xff]   ;;  %v6419_v21 = vld [vmem:[%s7969_s1 + $0x6c8] sm:$0xff]  }
 0x148   :  { %v5863_v23 = vpop.f32.mrf.mxu1 }
 0x149   :  { %5879 = vmatpush3.bf16.msra.mxu0 %v6317_v60  ;;  %v6383_v60 = vld [vmem:[%s7971_s3 + $0x90] ss:$8 sps:$4 sm:$0xff]   ;;  %v6420_v23 = vld [vmem:[%s7969_s1 + $0x688] sm:$0xff]  }
 0x14a   :  { %5880 = vmatprep.subr.bf16.mxu0 %v6319_v61  ;;  %v5864_v24 = vpop.f32.mrf.mxu1 }
 0x14b   :  { %v6423_v24 = vld [vmem:[%s7969_s1 + $0x6c0] sm:$0xff]  }
 0x14d   :  { %5881 = vmatpush3.bf16.msra.mxu0 %v6321_v63  ;;  %v6387_v63 = vld [vmem:[%s7969_s1 + $0x608] sm:$0xff]  }
 0x14e   :  { %5910 = vmatprep.subr.bf16.mxu0 %v6323_v1  ;;  %5967 = vmatpush3.bf16.msra.mxu1 %v6387_v63  ;;  %v6388_v1 = vld [vmem:[%s7971_s3 + $0x80] ss:$8 sps:$4 sm:$0xff]  }
 0x150   :  { %1658 = vmatmul.mubr.bf16.vlgmr.msra.gmra.mxu0 %v1310_v2  ;;  %v6391_v2 = vld [vmem:[%s7969_s1 + $0x640] sm:$0xff]  }
 0x151   :  { %5911 = vmatpush3.bf16.msra.mxu0 %v6325_v3  ;;  %2026 = vmatprep.mubr.bf16.mxu0 %v1864_v4  ;;  %v6392_v3 = vld [vmem:[%s7969_s1 + $0x600] sm:$0xff]   ;;  %v6393_v4 = vld [vmem:[%s7969_s1 + $0x5f8] sm:$0xff]  }
 0x152   :  { %5912 = vmatprep.subr.bf16.mxu0 %v6327_v5  ;;  %5968 = vmatprep.subr.bf16.mxu1 %v6391_v2  ;;  %v5185_v5 = vld.sshfl [vmem:[%s7970_s0 + $0x30] sm:$0x33 pattern:$0x76325410] }
 0x153   :  { %5969 = vmatpush3.bf16.msra.mxu1 %v6392_v3  ;;  %v6397_v2 = vld [vmem:[%s7969_s1 + $0x5f0] sm:$0xff]  }
 0x154   :  { %v6398_v3 = vld [vmem:[%s7969_s1 + $0x5b0] sm:$0xff]  }
 0x155   :  { %5913 = vmatpush3.bf16.msra.mxu0 %v6329_v6  ;;  %v2452_v6 = vcombine.high %v5185_v5, %v5185_v5 }
 0x156   :  { %5914 = vmatprep.subr.bf16.mxu0 %v6331_v7 }
 0x157   :  { %v2456_v7 = vpack.c.bf16 %v2452_v6, %v2452_v6  ;;  %v6406_v6 = vld [vmem:[%s7969_s1 + $0x5a0] sm:$0xff]  }
 0x159   :  { %5915 = vmatpush3.bf16.msra.mxu0 %v6333_v8  ;;  %v6395_v8 = vld [vmem:[%s7969_s1 + $0x6f8] sm:$0xff]   ;;  %2618 = vmatprep.mubr.bf16.mxu1 %v2456_v7 }
 0x15a   :  { %5916 = vmatprep.subr.bf16.mxu0 %v6335_v9  ;;  %v2455_v9 = vpack.c.bf16 %v5185_v5, %v5185_v5  ;;  %5998 = vmatprep.subr.bf16.mxu1 %v6395_v8  ;;  %v6405_v5 = vld [vmem:[%s7969_s1 + $0x5e0] sm:$0xff]   ;;  %v6409_v7 = vld [vmem:[%s7969_s1 + $0x5d8] sm:$0xff]  }
 0x15b   :  { %v6410_v8 = vld [vmem:[%s7969_s1 + $0x598] sm:$0xff]  }
 0x15c   :  { %2619 = vmatmul.mubr.bf16.vlgmr.msra.gmra.mxu1 %v2455_v9  ;;  %v6413_v9 = vld [vmem:[%s7969_s1 + $0x5d0] sm:$0xff]  }
 0x15d   :  { %5917 = vmatpush3.bf16.msra.mxu0 %v6337_v10  ;;  %v6396_v10 = vld [vmem:[%s7969_s1 + $0x6b8] sm:$0xff]  }
 0x15e   :  { %5918 = vmatprep.subr.bf16.mxu0 %v6339_v11  ;;  %5999 = vmatpush3.bf16.msra.mxu1 %v6396_v10  ;;  %v6399_v11 = vld [vmem:[%s7969_s1 + $0x6f0] sm:$0xff]  }
 0x15f   :  { %6000 = vmatprep.subr.bf16.mxu1 %v6399_v11  ;;  %v6414_v10 = vld [vmem:[%s7969_s1 + $0x590] sm:$0xff]   ;;  %v6417_v11 = vld [vmem:[%s7969_s1 + $0x5c8] sm:$0xff]  }
 0x161   :  { %5919 = vmatpush3.bf16.msra.mxu0 %v6341_v12  ;;  %v6400_v12 = vld [vmem:[%s7969_s1 + $0x6b0] sm:$0xff]  }
 0x162   :  { %5920 = vmatprep.subr.bf16.mxu0 %v6343_v13  ;;  %6001 = vmatpush3.bf16.msra.mxu1 %v6400_v12  ;;  %v6403_v13 = vld [vmem:[%s7969_s1 + $0x6e8] sm:$0xff]  }
 0x163   :  { %6002 = vmatprep.subr.bf16.mxu1 %v6403_v13  ;;  %v6418_v12 = vld [vmem:[%s7969_s1 + $0x588] sm:$0xff]   ;;  %v6421_v13 = vld [vmem:[%s7969_s1 + $0x5c0] sm:$0xff]  }
 0x164   :  { %v5904_v25 = vpop.f32.mrf.mxu1 }
 0x165   :  { %5921 = vmatpush3.bf16.msra.mxu0 %v6345_v14  ;;  %v6404_v14 = vld [vmem:[%s7969_s1 + $0x6a8] sm:$0xff]  }
 0x166   :  { %5922 = vmatprep.subr.bf16.mxu0 %v6347_v15  ;;  %v5905_v26 = vpop.f32.mrf.mxu1  ;;  %6003 = vmatpush3.bf16.msra.mxu1 %v6404_v14  ;;  %v6407_v15 = vld [vmem:[%s7969_s1 + $0x6e0] sm:$0xff]   ;;  %v5301_v14 = vld.sshfl [vmem:[%s7970_s0 + $0x38] sm:$0x33 pattern:$0x76325410] }
 0x167   :  { %v7240_v27 = vadd.f32 %v5905_v26, %v5904_v25  ;;  %6004 = vmatprep.subr.bf16.mxu1 %v6407_v15  ;;  %v5251_v25 = vld.sshfl [vmem:[%s7970_s0 + $0x34] sm:$0x33 pattern:$0x76325410]  ;;  %v6424_v26 = vld [vmem:[%s7969_s1 + $0x680] sm:$0xff]  }
 0x168   :  { %v5907_v28 = vpop.f32.mrf.mxu1  ;;  %v6422_v15 = vld [vmem:[%s7969_s1 + $0x580] sm:$0xff]  }
 0x169   :  { %5923 = vmatpush3.bf16.msra.mxu0 %v6349_v16  ;;  %v6408_v16 = vld [vmem:[%s7969_s1 + $0x6a0] sm:$0xff]   ;;  %v2772_v28 = vcombine.high %v5251_v25, %v5251_v25 }
 0x16a   :  { %5924 = vmatprep.subr.bf16.mxu0 %v6351_v17  ;;  %v5908_v29 = vpop.f32.mrf.mxu1  ;;  %6005 = vmatpush3.bf16.msra.mxu1 %v6408_v16  ;;  %v6411_v17 = vld [vmem:[%s7969_s1 + $0x6d8] sm:$0xff]   ;;  %v2957_v16 = vcombine.high %v5301_v14, %v5301_v14 }
 0x16b   :  { %6006 = vmatprep.subr.bf16.mxu1 %v6411_v17  ;;  %v2776_v29 = vpack.c.bf16 %v2772_v28, %v2772_v28  ;;  %v6425_v17 = vld [vmem:[%s7969_s1 + $0x778] sm:$0xff]   ;;  %v6432_v28 = vld [vmem:[%s7969_s1 + $0x720] sm:$0xff]  }
 0x16d   :  { %5925 = vmatpush3.bf16.msra.mxu0 %v6352_v18  ;;  %v6412_v18 = vld [vmem:[%s7969_s1 + $0x698] sm:$0xff]   ;;  %2938 = vmatprep.mubr.bf16.mxu1 %v2776_v29 }
 0x16e   :  { %2340 = vmatprep.subr.bf16.mxu0 %v6355_v31  ;;  %6007 = vmatpush3.bf16.msra.mxu1 %v6412_v18  ;;  %v1154_v31 = vlaneseq  ;;  %v2407_v18 = vpack.c.bf16 %v5151_v57, %v5151_v57  ;;  %v6433_v29 = vld [vmem:[%s7969_s1 + $0x758] sm:$0xff]   ;;  %v6450_v57 = vld [vmem:[%s7971_s3 + $0x164] ss:$8 sps:$4 sm:$0xff]  }
 0x170   :  { %2027 = vmatmul.mubr.bf16.vlgmr.msra.gmra.mxu0 %v1863_v19  ;;  %v6415_v19 = vld [vmem:[%s7969_s1 + $0x6d0] sm:$0xff]   ;;  %v1155_v33 = vshrl.u32 %v1154_v31, 7 }
 0x171   :  { %2372 = vmatprep.mubr.bf16.mxu0 %v6593_v32  ;;  %2341 = vmatpush1.bf16.msra.mxu0 %v6353_v30  ;;  %v2775_v30 = vpack.c.bf16 %v5251_v25, %v5251_v25  ;;  %v6430_v25 = vld [vmem:[%s7969_s1 + $0x728] sm:$0xff]   ;;  %v6435_v31 = vld [vmem:[%s7969_s1 + $0x750] sm:$0xff]  }
 0x172   :  { %2342 = vmatprep.subr.bf16.mxu0 %v6360_v35  ;;  %6008 = vmatprep.subr.bf16.mxu1 %v6415_v19  ;;  %v7398_v34 = vsub.s32 0, %v1155_v33  ;;  %v7400_v35 = vsub.s32 1, %v1155_v33  ;;  %v6426_v19 = vld [vmem:[%s7969_s1 + $0x738] sm:$0xff]   ;;  %v6436_v33 = vld [vmem:[%s7969_s1 + $0x710] sm:$0xff]  }
 0x173   :  { %6009 = vmatpush3.bf16.msra.mxu1 %v6416_v20  ;;  %v2961_v20 = vpack.c.bf16 %v2957_v16, %v2957_v16 }
 0x174   :  { %6010 = vmatprep.subr.bf16.mxu1 %v6419_v21  ;;  %v1161_v38 = vrot.slane %v1152_v36, %v7400_v35  ;;  %v6427_v21 = vld [vmem:[%s7969_s1 + $0x770] sm:$0xff]  }
 0x175   :  { %2343 = vmatpush1.bf16.msra.mxu0 %v6358_v37  ;;  %v1157_v37 = vrot.slane %v1152_v36, %v7398_v34  ;;  %v6437_v36 = vld [vmem:[%s7969_s1 + $0x748] sm:$0xff]  }
 0x176   :  { %2344 = vmatprep.subr.bf16.mxu0 %v6365_v39 }
 0x177   :  { %6011 = vmatpush3.bf16.msra.mxu1 %v6420_v23  ;;  %v6428_v23 = vld [vmem:[%s7969_s1 + $0x730] sm:$0xff]  }
 0x178   :  { %6012 = vmatprep.subr.bf16.mxu1 %v6423_v24  ;;  %v6429_v24 = vld [vmem:[%s7969_s1 + $0x768] sm:$0xff]  }
 0x179   :  { %2345 = vmatpush1.bf16.msra.mxu0 %v6363_v41 }
 0x17a   :  { %2346 = vmatprep.subr.bf16.mxu0 %v6370_v43 }
 0x17b   :  { %6013 = vmatpush3.bf16.msra.mxu1 %v6424_v26  ;;  %v6431_v26 = vld [vmem:[%s7969_s1 + $0x760] sm:$0xff]  }
 0x17d   :  { %2347 = vmatpush1.bf16.msra.mxu0 %v6368_v45 }
 0x17e   :  { %2348 = vmatprep.subr.bf16.mxu0 %v6375_v47  ;;  %2939 = vmatmul.mubr.bf16.vlgmr.msra.gmra.mxu1 %v2775_v30  ;;  %v6434_v30 = vld [vmem:[%s7969_s1 + $0x718] sm:$0xff]  }
 0x17f   :  { %3284 = vmatprep.mubr.bf16.mxu1 %v6593_v32 }
 0x181   :  { %2349 = vmatpush1.bf16.msra.mxu0 %v6373_v49 }
 0x182   :  { %2350 = vmatprep.subr.bf16.mxu0 %v6380_v52 }
 0x184   :  { %v5948_v51 = vpop.f32.mrf.mxu1 }
 0x185   :  { %2351 = vmatpush1.bf16.msra.mxu0 %v6378_v53 }
 0x186   :  { %v5949_v54 = vpop.f32.mrf.mxu1  ;;  %2352 = vmatprep.subr.bf16.mxu0 %v6385_v59 }
 0x187   :  { %v7311_v56 = vadd.f32 %v5949_v54, %v5948_v51 }
 0x188   :  { %v5951_v58 = vpop.f32.mrf.mxu1 }
 0x189   :  { %2353 = vmatpush1.bf16.msra.mxu0 %v6383_v60  ;;  %v5115_v60 = vld [vmem:[%s7972_s2 + $0x1] ss:$0 sm:$0xff] }
 0x18a   :  { %v5952_v61 = vpop.f32.mrf.mxu1  ;;  %2354 = vmatprep.subr.bf16.mxu0 %v6390_v0  ;;  %v2408_v0 = vpack.c.bf16 %v2404_v62, %v2404_v62  ;;  %v6455_v62 = vld [vmem:[%s7971_s3 + $0x154] ss:$8 sps:$4 sm:$0xff]  }
 0x18d   :  { %2355 = vmatpush1.bf16.msra.mxu0 %v6388_v1 }
 0x18e   :  { %5976 = vmatprep.subr.bf16.mxu0 %v6393_v4  ;;  %v6402_v4 = vld [vmem:[%s7969_s1 + $0x5a8] sm:$0xff]  }
 0x1f0   :  { %v1278_v39 = vpop.f32.mrf.mxu0 }
 0x1f1   :  { %v1279_v41 = vadd.f32 %v1278_v39, %v1157_v37  ;;  %v6438_v37 = vld [vmem:[%s7969_s1 + $0x708] sm:$0xff]   ;;  %v6440_v39 = vld [vmem:[%s7969_s1 + $0x700] sm:$0xff]  }
 0x1f2   :  { %v1280_v40 = vpop.f32.mrf.mxu0 }
 0x1f3   :  { %v1281_v42 = vadd.f32 %v1280_v40, %v1161_v38  ;;  %v6439_v38 = vld [vmem:[%s7969_s1 + $0x740] sm:$0xff]   ;;  %v2960_v40 = vpack.c.bf16 %v5301_v14, %v5301_v14 }
 0x1f4   :  { %v1282_v43 = vpop.f32.mrf.mxu0  ;;  %v6477_v14 = vld [vmem:[%s7969_s1 + $0x800] sm:$0xff]  }
 0x1f5   :  { %v1287_v44 = vcombine.low %v1279_v41, %v1281_v42 }
 0x1f6   :  { %v1283_v45 = vpop.f32.mrf.mxu0 }
 0x1f7   :  { %4863 = vst.sshfl [vmem:[%s7974_s5] sm:$0x33 pattern:$0x76325410] %v1287_v44 }
 0x210   :  { %v5882_v46 = vpop.f32.mrf.mxu0 }
 0x212   :  { %v5883_v47 = vpop.f32.mrf.mxu0 }
 0x213   :  { %v5884_v48 = vadd.f32 %v5883_v47, %v5882_v46  ;;  %v6441_v47 = vld [vmem:[%s7969_s1 + $0x878] sm:$0xff]  }
 0x214   :  { %v5885_v49 = vpop.f32.mrf.mxu0 }
 0x215   :  { %v1660_v50 = vadd.f32 %v5884_v48, %v7237_v22  ;;  %v6442_v49 = vld [vmem:[%s7969_s1 + $0x838] sm:$0xff]  }
 0x216   :  { %v5886_v51 = vpop.f32.mrf.mxu0 }
 0x217   :  { %v1849_v52 = vadd.f32 %v7240_v27, %v1660_v50  ;;  %v6394_v27 = vld [vmem:[%s7969_s1 + $0x5b8] sm:$0xff]  }
 0x218   :  { %v6443_v51 = vld [vmem:[%s7971_s3 + $0x170] ss:$8 sps:$4 sm:$0xff]  }
 0x21c   :  { %v5970_v41 = vpop.f32.mrf.mxu1 }
 0x21e   :  { %v5971_v42 = vpop.f32.mrf.mxu1 }
 0x21f   :  { %v7515_v43 = vadd.f32 %v5971_v42, %v5970_v41  ;;  %v6508_v41 = vld [vmem:[%s7969_s1 + $0x8c0] sm:$0xff]  }
 0x220   :  { %v5973_v44 = vpop.f32.mrf.mxu1  ;;  %v5487_v42 = vld.sshfl [vmem:[%s7970_s0 + $0x44] sm:$0x33 pattern:$0x76325410] }
 0x221   :  { %v6510_v44 = vld [vmem:[%s7969_s1 + $0x880] sm:$0xff]  }
 0x222   :  { %v5974_v45 = vpop.f32.mrf.mxu1 }
 0x223   :  { %v3684_v45 = vcombine.high %v5487_v42, %v5487_v42 }
 0x230   :  { %v5926_v53 = vpop.f32.mrf.mxu0 }
 0x232   :  { %v5927_v54 = vpop.f32.mrf.mxu0 }
 0x233   :  { %v5928_v55 = vadd.f32 %v5927_v54, %v5926_v53  ;;  %v6446_v53 = vld [vmem:[%s7969_s1 + $0x870] sm:$0xff]  }
 0x234   :  { %v5929_v58 = vpop.f32.mrf.mxu0 }
 0x235   :  { %v2034_v59 = vadd.f32 %v5928_v55, %v1849_v52  ;;  %v6445_v52 = vld [vmem:[%s7971_s3 + $0x174] ss:$8 sps:$4 sm:$0xff]   ;;  %v6451_v58 = vld [vmem:[%s7969_s1 + $0x868] sm:$0xff]  }
 0x236   :  { %v5930_v61 = vpop.f32.mrf.mxu0  ;;  %v6447_v55 = vld [vmem:[%s7969_s1 + $0x830] sm:$0xff]   ;;  %3252 = vmatprep.subr.bf16.mxu1 %v6445_v52 }
 0x237   :  { %v2219_v22 = vadd.f32 %v7311_v56, %v2034_v59  ;;  %v6401_v56 = vld [vmem:[%s7969_s1 + $0x5e8] sm:$0xff]   ;;  %3253 = vmatpush1.bf16.msra.mxu1 %v6443_v51 }
 0x238   :  { %3254 = vmatprep.subr.bf16.mxu1 %v6450_v57  ;;  %v6452_v61 = vld [vmem:[%s7969_s1 + $0x828] sm:$0xff]  }
 0x239   :  { %v2228_v63 = vadd.f32 %v5115_v60, %v2219_v22  ;;  %v6448_v60 = vld [vmem:[%s7971_s3 + $0x160] ss:$8 sps:$4 sm:$0xff]  }
 0x23a   :  { %v6456_v22 = vld [vmem:[%s7969_s1 + $0x860] sm:$0xff]  }
 0x23b   :  { %v2229_v1 = vpack.c.bf16 %v2228_v63, %v2228_v63  ;;  %3255 = vmatpush1.bf16.msra.mxu1 %v6448_v60  ;;  %v6453_v63 = vld [vmem:[%s7971_s3 + $0x150] ss:$8 sps:$4 sm:$0xff]  }
 0x23c   :  { %3256 = vmatprep.subr.bf16.mxu1 %v6455_v62 }
 0x23d   :  { %2373 = vmatmul.mubr.bf16.vlgmr.msra.gmra.mxu0 %v2229_v1  ;;  %v6461_v1 = vld [vmem:[%s7969_s1 + $0x858] sm:$0xff]  }
 0x23e   :  { %5977 = vmatpush3.bf16.msra.mxu0 %v6394_v27  ;;  %2754 = vmatprep.mubr.bf16.mxu0 %v2408_v0  ;;  %v6014_v46 = vpop.f32.mrf.mxu1  ;;  %v6457_v27 = vld [vmem:[%s7969_s1 + $0x820] sm:$0xff]  }
 0x23f   :  { %5978 = vmatprep.subr.bf16.mxu0 %v6397_v2  ;;  %v6460_v0 = vld [vmem:[%s7971_s3 + $0x144] ss:$8 sps:$4 sm:$0xff]   ;;  %3257 = vmatpush1.bf16.msra.mxu1 %v6453_v63  ;;  %v6458_v2 = vld [vmem:[%s7971_s3 + $0x140] ss:$8 sps:$4 sm:$0xff]  }
 0x240   :  { %v6015_v48 = vpop.f32.mrf.mxu1  ;;  %3258 = vmatprep.subr.bf16.mxu1 %v6460_v0 }
 0x241   :  { %v7523_v50 = vadd.f32 %v6015_v48, %v6014_v46  ;;  %v3687_v46 = vpack.c.bf16 %v5487_v42, %v5487_v42  ;;  %v5132_v48 = vld [vmem:[%s7973_s4 + $0x2] sm:$0x3]  ;;  %v6524_v42 = vld [vmem:[%s7971_s3 + $0x1c4] ss:$8 sps:$4 sm:$0xff]  }
 0x242   :  { %5979 = vmatpush3.bf16.msra.mxu0 %v6398_v3  ;;  %v6017_v54 = vpop.f32.mrf.mxu1  ;;  %v6462_v3 = vld [vmem:[%s7969_s1 + $0x818] sm:$0xff]   ;;  %v2257_v51 = vrot.slane %v5132_v48, %v7400_v35 }
 0x243   :  { %5980 = vmatprep.subr.bf16.mxu0 %v6401_v56  ;;  %v6465_v56 = vld [vmem:[%s7971_s3 + $0x134] ss:$8 sps:$4 sm:$0xff]   ;;  %3259 = vmatpush1.bf16.msra.mxu1 %v6458_v2 }
 0x244   :  { %v6018_v59 = vpop.f32.mrf.mxu1  ;;  %3260 = vmatprep.subr.bf16.mxu1 %v6465_v56  ;;  %v5387_v2 = vld.sshfl [vmem:[%s7970_s0 + $0x3c] sm:$0x33 pattern:$0x76325410] }
 0x246   :  { %5981 = vmatpush3.bf16.msra.mxu0 %v6402_v4  ;;  %v6466_v4 = vld [vmem:[%s7969_s1 + $0x850] sm:$0xff]  }
 0x247   :  { %5982 = vmatprep.subr.bf16.mxu0 %v6405_v5  ;;  %v6463_v5 = vld [vmem:[%s7971_s3 + $0x130] ss:$8 sps:$4 sm:$0xff]  }
 0x248   :  { %3261 = vmatpush1.bf16.msra.mxu1 %v6463_v5 }
 0x24a   :  { %5983 = vmatpush3.bf16.msra.mxu0 %v6406_v6  ;;  %v6467_v6 = vld [vmem:[%s7969_s1 + $0x810] sm:$0xff]  }
 0x24b   :  { %5984 = vmatprep.subr.bf16.mxu0 %v6409_v7  ;;  %v6470_v7 = vld [vmem:[%s7971_s3 + $0x124] ss:$8 sps:$4 sm:$0xff]  }
 0x24c   :  { %3262 = vmatprep.subr.bf16.mxu1 %v6470_v7 }
 0x24e   :  { %5985 = vmatpush3.bf16.msra.mxu0 %v6410_v8  ;;  %v6471_v8 = vld [vmem:[%s7969_s1 + $0x848] sm:$0xff]  }
 0x24f   :  { %5986 = vmatprep.subr.bf16.mxu0 %v6413_v9  ;;  %v6468_v9 = vld [vmem:[%s7971_s3 + $0x120] ss:$8 sps:$4 sm:$0xff]  }
 0x250   :  { %3263 = vmatpush1.bf16.msra.mxu1 %v6468_v9 }
 0x252   :  { %5987 = vmatpush3.bf16.msra.mxu0 %v6414_v10  ;;  %v6472_v10 = vld [vmem:[%s7969_s1 + $0x808] sm:$0xff]  }
 0x253   :  { %5988 = vmatprep.subr.bf16.mxu0 %v6417_v11  ;;  %v6475_v11 = vld [vmem:[%s7971_s3 + $0x114] ss:$8 sps:$4 sm:$0xff]  }
 0x254   :  { %3264 = vmatprep.subr.bf16.mxu1 %v6475_v11  ;;  %v6487_v11 = vld [vmem:[%s7969_s1 + $0x7f0] sm:$0xff]  }
 0x256   :  { %5989 = vmatpush3.bf16.msra.mxu0 %v6418_v12  ;;  %v6476_v12 = vld [vmem:[%s7969_s1 + $0x840] sm:$0xff]  }
 0x257   :  { %5990 = vmatprep.subr.bf16.mxu0 %v6421_v13  ;;  %v6473_v13 = vld [vmem:[%s7971_s3 + $0x110] ss:$8 sps:$4 sm:$0xff]  }
 0x258   :  { %3265 = vmatpush1.bf16.msra.mxu1 %v6473_v13  ;;  %v6491_v13 = vld [vmem:[%s7969_s1 + $0x7e8] sm:$0xff]  }
 0x25a   :  { %5991 = vmatpush3.bf16.msra.mxu0 %v6422_v15  ;;  %v5421_v15 = vld.sshfl [vmem:[%s7970_s0 + $0x40] sm:$0x33 pattern:$0x76325410] }
 0x25b   :  { %6020 = vmatprep.subr.bf16.mxu0 %v6425_v17  ;;  %v3364_v16 = vcombine.high %v5421_v15, %v5421_v15  ;;  %v6480_v17 = vld [vmem:[%s7971_s3 + $0x104] ss:$8 sps:$4 sm:$0xff]  }
 0x25c   :  { %3266 = vmatprep.subr.bf16.mxu1 %v6480_v17  ;;  %v6499_v17 = vld [vmem:[%s7969_s1 + $0x7d8] sm:$0xff]  }
 0x25d   :  { %2755 = vmatmul.mubr.bf16.vlgmr.msra.gmra.mxu0 %v2407_v18  ;;  %v6481_v18 = vld [vmem:[%s7969_s1 + $0x8f8] sm:$0xff]  }
 0x25e   :  { %6021 = vmatpush3.bf16.msra.mxu0 %v6426_v19  ;;  %3123 = vmatprep.mubr.bf16.mxu0 %v2961_v20  ;;  %v6478_v19 = vld [vmem:[%s7971_s3 + $0x100] ss:$8 sps:$4 sm:$0xff]   ;;  %v3367_v20 = vpack.c.bf16 %v5421_v15, %v5421_v15 }
 0x25f   :  { %6022 = vmatprep.subr.bf16.mxu0 %v6427_v21  ;;  %v3368_v21 = vpack.c.bf16 %v3364_v16, %v3364_v16  ;;  %3267 = vmatpush1.bf16.msra.mxu1 %v6478_v19  ;;  %v6495_v15 = vld [vmem:[%s7969_s1 + $0x7e0] sm:$0xff]   ;;  %v6503_v19 = vld [vmem:[%s7969_s1 + $0x7d0] sm:$0xff]  }
 0x260   :  { %v6497_v16 = vld [vmem:[%s7969_s1 + $0x7a0] sm:$0xff]  }
 0x262   :  { %6023 = vmatpush3.bf16.msra.mxu0 %v6428_v23  ;;  %v6482_v23 = vld [vmem:[%s7969_s1 + $0x8b8] sm:$0xff]  }
 0x263   :  { %6024 = vmatprep.subr.bf16.mxu0 %v6429_v24  ;;  %v6483_v24 = vld [vmem:[%s7969_s1 + $0x7f8] sm:$0xff]  }
 0x264   :  { %6064 = vmatprep.subr.bf16.mxu1 %v6483_v24  ;;  %v6511_v24 = vld [vmem:[%s7969_s1 + $0x7c0] sm:$0xff]  }
 0x266   :  { %6025 = vmatpush3.bf16.msra.mxu0 %v6430_v25  ;;  %v6484_v25 = vld [vmem:[%s7969_s1 + $0x8f0] sm:$0xff]  }
 0x267   :  { %6026 = vmatprep.subr.bf16.mxu0 %v6431_v26  ;;  %v6486_v26 = vld [vmem:[%s7969_s1 + $0x8b0] sm:$0xff]  }
 0x26a   :  { %6027 = vmatpush3.bf16.msra.mxu0 %v6432_v28  ;;  %v6488_v28 = vld [vmem:[%s7969_s1 + $0x8e8] sm:$0xff]  }
 0x26b   :  { %6028 = vmatprep.subr.bf16.mxu0 %v6433_v29  ;;  %v6490_v29 = vld [vmem:[%s7969_s1 + $0x8a8] sm:$0xff]  }
 0x26e   :  { %6029 = vmatpush3.bf16.msra.mxu0 %v6434_v30  ;;  %v6492_v30 = vld [vmem:[%s7969_s1 + $0x8e0] sm:$0xff]  }
 0x26f   :  { %6030 = vmatprep.subr.bf16.mxu0 %v6435_v31  ;;  %v6494_v31 = vld [vmem:[%s7969_s1 + $0x8a0] sm:$0xff]  }
 0x272   :  { %6031 = vmatpush3.bf16.msra.mxu0 %v6436_v33  ;;  %v6496_v33 = vld [vmem:[%s7969_s1 + $0x8d8] sm:$0xff]  }
 0x273   :  { %6032 = vmatprep.subr.bf16.mxu0 %v6437_v36  ;;  %v6498_v36 = vld [vmem:[%s7969_s1 + $0x898] sm:$0xff]  }
 0x276   :  { %6033 = vmatpush3.bf16.msra.mxu0 %v6438_v37  ;;  %v6500_v37 = vld [vmem:[%s7969_s1 + $0x8d0] sm:$0xff]  }
 0x277   :  { %6034 = vmatprep.subr.bf16.mxu0 %v6439_v38  ;;  %v6502_v38 = vld [vmem:[%s7969_s1 + $0x890] sm:$0xff]  }
 0x27a   :  { %6035 = vmatpush3.bf16.msra.mxu0 %v6440_v39  ;;  %v6504_v39 = vld [vmem:[%s7969_s1 + $0x8c8] sm:$0xff]  }
 0x27b   :  { %6042 = vmatprep.subr.bf16.mxu0 %v6441_v47  ;;  %v3688_v47 = vpack.c.bf16 %v3684_v45, %v3684_v45  ;;  %v6527_v45 = vld [vmem:[%s7971_s3 + $0x1b4] ss:$8 sps:$4 sm:$0xff]  }
 0x27d   :  { %3124 = vmatmul.mubr.bf16.vlgmr.msra.gmra.mxu0 %v2960_v40  ;;  %v6506_v40 = vld [vmem:[%s7969_s1 + $0x888] sm:$0xff]  }
 0x27e   :  { %6043 = vmatpush3.bf16.msra.mxu0 %v6442_v49  ;;  %3530 = vmatprep.mubr.bf16.mxu0 %v3368_v21  ;;  %v2253_v49 = vrot.slane %v5132_v48, %v7398_v34  ;;  %v6507_v21 = vld [vmem:[%s7969_s1 + $0x7c8] sm:$0xff]  }
 0x27f   :  { %6044 = vmatprep.subr.bf16.mxu0 %v6446_v53  ;;  %v6530_v48 = vld [vmem:[%s7971_s3 + $0x1a4] ss:$8 sps:$4 sm:$0xff]  }
 0x282   :  { %6045 = vmatpush3.bf16.msra.mxu0 %v6447_v55 }
 0x283   :  { %6046 = vmatprep.subr.bf16.mxu0 %v6451_v58 }
 0x286   :  { %6047 = vmatpush3.bf16.msra.mxu0 %v6452_v61 }
 0x287   :  { %6048 = vmatprep.subr.bf16.mxu0 %v6456_v22 }
 0x28a   :  { %6049 = vmatpush3.bf16.msra.mxu0 %v6457_v27 }
 0x28b   :  { %6050 = vmatprep.subr.bf16.mxu0 %v6461_v1 }
 0x28e   :  { %6051 = vmatpush3.bf16.msra.mxu0 %v6462_v3 }
 0x28f   :  { %6052 = vmatprep.subr.bf16.mxu0 %v6466_v4  ;;  %v5351_v4 = vld [vmem:[%s7972_s2 + $0x2] ss:$0 sm:$0xff] }
 0x292   :  { %6053 = vmatpush3.bf16.msra.mxu0 %v6467_v6  ;;  %v3316_v6 = vcombine.high %v5387_v2, %v5387_v2 }
 0x293   :  { %6054 = vmatprep.subr.bf16.mxu0 %v6471_v8 }
 0x296   :  { %6055 = vmatpush3.bf16.msra.mxu0 %v6472_v10 }
 0x297   :  { %6056 = vmatprep.subr.bf16.mxu0 %v6476_v12  ;;  %v6489_v12 = vld [vmem:[%s7969_s1 + $0x7b0] sm:$0xff]  }
 0x29a   :  { %6057 = vmatpush3.bf16.msra.mxu0 %v6477_v14  ;;  %v6493_v14 = vld [vmem:[%s7969_s1 + $0x7a8] sm:$0xff]  }
 0x29b   :  { %6086 = vmatprep.subr.bf16.mxu0 %v6481_v18  ;;  %v6501_v18 = vld [vmem:[%s7969_s1 + $0x798] sm:$0xff]  }
 0x29d   :  { %3531 = vmatmul.mubr.bf16.vlgmr.msra.gmra.mxu0 %v3367_v20  ;;  %v6505_v20 = vld [vmem:[%s7969_s1 + $0x790] sm:$0xff]  }
 0x29e   :  { %6087 = vmatpush3.bf16.msra.mxu0 %v6482_v23  ;;  %3850 = vmatprep.mubr.bf16.mxu0 %v3688_v47  ;;  %v6509_v23 = vld [vmem:[%s7969_s1 + $0x788] sm:$0xff]  }
 0x29f   :  { %6088 = vmatprep.subr.bf16.mxu0 %v6484_v25  ;;  %v6512_v25 = vld [vmem:[%s7969_s1 + $0x780] sm:$0xff]  }
 0x2a2   :  { %6089 = vmatpush3.bf16.msra.mxu0 %v6486_v26  ;;  %v3319_v26 = vpack.c.bf16 %v5387_v2, %v5387_v2  ;;  %v6548_v2 = vld [vmem:[%s7969_s1 + $0x9a0] sm:$0xff]  }
 0x2a3   :  { %6090 = vmatprep.subr.bf16.mxu0 %v6488_v28 }
 0x2a6   :  { %6091 = vmatpush3.bf16.msra.mxu0 %v6490_v29 }
 0x2a7   :  { %6092 = vmatprep.subr.bf16.mxu0 %v6492_v30 }
 0x2aa   :  { %6093 = vmatpush3.bf16.msra.mxu0 %v6494_v31 }
 0x2ab   :  { %6094 = vmatprep.subr.bf16.mxu0 %v6496_v33 }
 0x2ae   :  { %6095 = vmatpush3.bf16.msra.mxu0 %v6498_v36  ;;  %v6513_v36 = vld [vmem:[%s7971_s3 + $0x1f0] ss:$8 sps:$4 sm:$0xff]  }
 0x2af   :  { %6096 = vmatprep.subr.bf16.mxu0 %v6500_v37  ;;  %v6515_v37 = vld [vmem:[%s7971_s3 + $0x1f4] ss:$8 sps:$4 sm:$0xff]  }
 0x2b2   :  { %6097 = vmatpush3.bf16.msra.mxu0 %v6502_v38  ;;  %v6518_v38 = vld [vmem:[%s7971_s3 + $0x1e4] ss:$8 sps:$4 sm:$0xff]  }
 0x2b3   :  { %6098 = vmatprep.subr.bf16.mxu0 %v6504_v39  ;;  %v6516_v39 = vld [vmem:[%s7971_s3 + $0x1e0] ss:$8 sps:$4 sm:$0xff]  }
 0x2b6   :  { %6099 = vmatpush3.bf16.msra.mxu0 %v6506_v40  ;;  %v6521_v40 = vld [vmem:[%s7971_s3 + $0x1d4] ss:$8 sps:$4 sm:$0xff]  }
 0x2b7   :  { %6100 = vmatprep.subr.bf16.mxu0 %v6508_v41  ;;  %v6519_v41 = vld [vmem:[%s7971_s3 + $0x1d0] ss:$8 sps:$4 sm:$0xff]  }
 0x2ba   :  { %6101 = vmatpush3.bf16.msra.mxu0 %v6510_v44  ;;  %v6522_v44 = vld [vmem:[%s7971_s3 + $0x1c0] ss:$8 sps:$4 sm:$0xff]  }
 0x2bd   :  { %3851 = vmatmul.mubr.bf16.vlgmr.msra.gmra.mxu0 %v3687_v46  ;;  %v6525_v46 = vld [vmem:[%s7971_s3 + $0x1b0] ss:$8 sps:$4 sm:$0xff]  }
 0x2fd   :  { %v2374_v52 = vpop.f32.mrf.mxu0 }
 0x2fe   :  { %v2375_v54 = vadd.f32 %v2374_v52, %v2253_v49 }
 0x2ff   :  { %v2376_v53 = vpop.f32.mrf.mxu0 }
 0x300   :  { %v2377_v55 = vadd.f32 %v2376_v53, %v2257_v51  ;;  %v6528_v51 = vld [vmem:[%s7971_s3 + $0x1a0] ss:$8 sps:$4 sm:$0xff]  }
 0x301   :  { %v2378_v57 = vpop.f32.mrf.mxu0 }
 0x302   :  { %v2383_v58 = vcombine.low %v2375_v54, %v2377_v55  ;;  %v6533_v54 = vld [vmem:[%s7971_s3 + $0x194] ss:$8 sps:$4 sm:$0xff]   ;;  %v6531_v57 = vld [vmem:[%s7971_s3 + $0x190] ss:$8 sps:$4 sm:$0xff]  }
 0x303   :  { %v2379_v59 = vpop.f32.mrf.mxu0 }
 0x304   :  { %5708 = vst.sshfl [vmem:[%s7974_s5 + $0x4] sm:$0x33 pattern:$0x76325410] %v2383_v58  ;;  %v6534_v58 = vld [vmem:[%s7969_s1 + $0x9f8] sm:$0xff]  }
 0x305   :  { %v6535_v59 = vld [vmem:[%s7969_s1 + $0x9b8] sm:$0xff]   ;;  %6108 = vmatprep.subr.bf16.mxu0 %v6534_v58 }
 0x306   :  { %6109 = vmatpush3.bf16.msra.mxu0 %v6535_v59  ;;  %v6569_v58 = vld [vmem:[%s7971_s3 + $0x270] ss:$8 sps:$4 sm:$0xff]   ;;  %v6571_v59 = vld [vmem:[%s7971_s3 + $0x274] ss:$8 sps:$4 sm:$0xff]  }
 0x31d   :  { %v5992_v60 = vpop.f32.mrf.mxu0 }
 0x31f   :  { %v5993_v61 = vpop.f32.mrf.mxu0 }
 0x320   :  { %v5994_v62 = vadd.f32 %v5993_v61, %v5992_v60  ;;  %v6538_v60 = vld [vmem:[%s7971_s3 + $0x184] ss:$8 sps:$4 sm:$0xff]   ;;  %v6536_v61 = vld [vmem:[%s7971_s3 + $0x180] ss:$8 sps:$4 sm:$0xff]  }
 0x321   :  { %v5995_v22 = vpop.f32.mrf.mxu0 }
 0x322   :  { %v2757_v63 = vadd.f32 %v5994_v62, %v7515_v43  ;;  %v6485_v43 = vld [vmem:[%s7969_s1 + $0x7b8] sm:$0xff]   ;;  %v6539_v62 = vld [vmem:[%s7969_s1 + $0x9f0] sm:$0xff]  }
 0x323   :  { %v5996_v27 = vpop.f32.mrf.mxu0  ;;  %v6540_v22 = vld [vmem:[%s7969_s1 + $0x9b0] sm:$0xff]   ;;  %6110 = vmatprep.subr.bf16.mxu0 %v6539_v62 }
 0x324   :  { %v2946_v0 = vadd.f32 %v7523_v50, %v2757_v63  ;;  %v3320_v50 = vpack.c.bf16 %v3316_v6, %v3316_v6  ;;  %v6541_v63 = vld [vmem:[%s7969_s1 + $0x978] sm:$0xff]   ;;  %6111 = vmatpush3.bf16.msra.mxu0 %v6540_v22  ;;  %v6543_v27 = vld [vmem:[%s7969_s1 + $0x9e8] sm:$0xff]  }
 0x325   :  { %6112 = vmatprep.subr.bf16.mxu0 %v6543_v27  ;;  %v6559_v6 = vld [vmem:[%s7969_s1 + $0x9c8] sm:$0xff]   ;;  %v6577_v62 = vld [vmem:[%s7971_s3 + $0x254] ss:$8 sps:$4 sm:$0xff]   ;;  %v6575_v22 = vld [vmem:[%s7971_s3 + $0x250] ss:$8 sps:$4 sm:$0xff]  }
 0x326   :  { %v6578_v27 = vld [vmem:[%s7971_s3 + $0x240] ss:$8 sps:$4 sm:$0xff]  }
 0x33d   :  { %v6036_v1 = vpop.f32.mrf.mxu0 }
 0x33f   :  { %v6037_v3 = vpop.f32.mrf.mxu0 }
 0x340   :  { %v6038_v56 = vadd.f32 %v6037_v3, %v6036_v1  ;;  %v6547_v1 = vld [vmem:[%s7969_s1 + $0x9e0] sm:$0xff]   ;;  %v6551_v3 = vld [vmem:[%s7969_s1 + $0x9d8] sm:$0xff]  }
 0x341   :  { %v6039_v5 = vpop.f32.mrf.mxu0 }
 0x342   :  { %v3131_v7 = vadd.f32 %v6038_v56, %v2946_v0  ;;  %v6544_v0 = vld [vmem:[%s7969_s1 + $0x9a8] sm:$0xff]   ;;  %v6552_v56 = vld [vmem:[%s7969_s1 + $0x998] sm:$0xff]   ;;  %v6556_v5 = vld [vmem:[%s7969_s1 + $0x990] sm:$0xff]  }
 0x343   :  { %v6040_v8 = vpop.f32.mrf.mxu0  ;;  %6113 = vmatpush3.bf16.msra.mxu0 %v6544_v0  ;;  %v6583_v0 = vld [vmem:[%s7971_s3 + $0x234] ss:$8 sps:$4 sm:$0xff]  }
 0x344   :  { %v3140_v9 = vadd.f32 %v5351_v4, %v3131_v7  ;;  %6114 = vmatprep.subr.bf16.mxu0 %v6547_v1  ;;  %v6555_v4 = vld [vmem:[%s7969_s1 + $0x9d0] sm:$0xff]   ;;  %v6560_v7 = vld [vmem:[%s7969_s1 + $0x988] sm:$0xff]   ;;  %v6563_v8 = vld [vmem:[%s7969_s1 + $0x9c0] sm:$0xff]  }
 0x345   :  { %v6581_v1 = vld [vmem:[%s7971_s3 + $0x230] ss:$8 sps:$4 sm:$0xff]  }
 0x346   :  { %v3141_v10 = vpack.c.bf16 %v3140_v9, %v3140_v9  ;;  %v5607_v9 = vld.sshfl [vmem:[%s7970_s0 + $0x4c] sm:$0x33 pattern:$0x76325410] }
 0x347   :  { %6115 = vmatpush3.bf16.msra.mxu0 %v6548_v2  ;;  %v6586_v2 = vld [vmem:[%s7971_s3 + $0x224] ss:$8 sps:$4 sm:$0xff]  }
 0x348   :  { %3285 = vmatmul.mubr.bf16.vlgmr.msra.gmra.mxu1 %v3141_v10  ;;  %6116 = vmatprep.subr.bf16.mxu0 %v6551_v3  ;;  %v4094_v10 = vpack.c.bf16 %v5607_v9, %v5607_v9 }
 0x349   :  { %6065 = vmatpush3.bf16.msra.mxu1 %v6485_v43  ;;  %3666 = vmatprep.mubr.bf16.mxu1 %v3320_v50  ;;  %v6564_v43 = vld [vmem:[%s7969_s1 + $0x980] sm:$0xff]   ;;  %v4091_v50 = vcombine.high %v5607_v9, %v5607_v9  ;;  %v6587_v9 = vld [vmem:[%s7971_s3 + $0x210] ss:$8 sps:$4 sm:$0xff]  }
 0x34a   :  { %6066 = vmatprep.subr.bf16.mxu1 %v6487_v11 }
 0x34b   :  { %6117 = vmatpush3.bf16.msra.mxu0 %v6552_v56  ;;  %v4095_v11 = vpack.c.bf16 %v4091_v50, %v4091_v50  ;;  %v6584_v56 = vld [vmem:[%s7971_s3 + $0x220] ss:$8 sps:$4 sm:$0xff]  }
 0x34c   :  { %6118 = vmatprep.subr.bf16.mxu0 %v6555_v4  ;;  %v6590_v50 = vld [vmem:[%s7971_s3 + $0x200] ss:$8 sps:$4 sm:$0xff]  }
 0x34d   :  { %6067 = vmatpush3.bf16.msra.mxu1 %v6489_v12  ;;  %4257 = vmatprep.mubr.bf16.mxu0 %v4095_v11  ;;  %v5368_v12 = vld [vmem:[%s7973_s4 + $0x4] sm:$0x3] }
 0x34e   :  { %6068 = vmatprep.subr.bf16.mxu1 %v6491_v13  ;;  %v3165_v13 = vrot.slane %v5368_v12, %v7398_v34 }
 0x34f   :  { %6119 = vmatpush3.bf16.msra.mxu0 %v6556_v5 }
 0x350   :  { %6120 = vmatprep.subr.bf16.mxu0 %v6559_v6 }
 0x351   :  { %6069 = vmatpush3.bf16.msra.mxu1 %v6493_v14  ;;  %v3169_v14 = vrot.slane %v5368_v12, %v7400_v35 }
 0x352   :  { %6070 = vmatprep.subr.bf16.mxu1 %v6495_v15 }
 0x353   :  { %6121 = vmatpush3.bf16.msra.mxu0 %v6560_v7 }
 0x354   :  { %6122 = vmatprep.subr.bf16.mxu0 %v6563_v8  ;;  %v6589_v8 = vld [vmem:[%s7971_s3 + $0x214] ss:$8 sps:$4 sm:$0xff]  }
 0x355   :  { %6071 = vmatpush3.bf16.msra.mxu1 %v6497_v16 }
 0x356   :  { %6072 = vmatprep.subr.bf16.mxu1 %v6499_v17 }
 0x357   :  { %6123 = vmatpush3.bf16.msra.mxu0 %v6564_v43  ;;  %v6592_v43 = vld [vmem:[%s7971_s3 + $0x204] ss:$8 sps:$4 sm:$0xff]  }
 0x358   :  { %4521 = vmatprep.subr.bf16.mxu0 %v6571_v59 }
 0x359   :  { %6073 = vmatpush3.bf16.msra.mxu1 %v6501_v18 }
 0x35a   :  { %6074 = vmatprep.subr.bf16.mxu1 %v6503_v19  ;;  %4258 = vmatmul.mubr.bf16.vlgmr.msra.gmra.mxu0 %v4094_v10  ;;  %v5554_v10 = vld [vmem:[%s7973_s4 + $0x6] sm:$0x3] }
 0x35b   :  { %4553 = vmatprep.mubr.bf16.mxu0 %v6593_v32  ;;  %4522 = vmatpush1.bf16.msra.mxu0 %v6569_v58  ;;  %v3892_v11 = vrot.slane %v5554_v10, %v7398_v34  ;;  %v3896_v12 = vrot.slane %v5554_v10, %v7400_v35 }
 0x35d   :  { %6075 = vmatpush3.bf16.msra.mxu1 %v6505_v20  ;;  %v6058_v28 = vpop.f32.mrf.mxu0 }
 0x35e   :  { %6076 = vmatprep.subr.bf16.mxu1 %v6507_v21 }
 0x35f   :  { %v6059_v29 = vpop.f32.mrf.mxu0 }
 0x360   :  { %v7734_v30 = vadd.f32 %v6059_v29, %v6058_v28  ;;  %v5537_v29 = vld [vmem:[%s7972_s2 + $0x3] ss:$0 sm:$0xff] }
 0x361   :  { %6077 = vmatpush3.bf16.msra.mxu1 %v6509_v23  ;;  %v6061_v31 = vpop.f32.mrf.mxu0 }
 0x362   :  { %6078 = vmatprep.subr.bf16.mxu1 %v6511_v24 }
 0x363   :  { %v6062_v33 = vpop.f32.mrf.mxu0 }
 0x365   :  { %6079 = vmatpush3.bf16.msra.mxu1 %v6512_v25  ;;  %v5573_v25 = vld.sshfl [vmem:[%s7970_s0 + $0x48] sm:$0x33 pattern:$0x76325410] }
 0x366   :  { %3979 = vmatprep.subr.bf16.mxu1 %v6515_v37  ;;  %v4043_v33 = vcombine.high %v5573_v25, %v5573_v25 }
 0x368   :  { %3667 = vmatmul.mubr.bf16.vlgmr.msra.gmra.mxu1 %v3319_v26 }
 0x369   :  { %4011 = vmatprep.mubr.bf16.mxu1 %v6593_v32  ;;  %3980 = vmatpush1.bf16.msra.mxu1 %v6513_v36 }
 0x36a   :  { %3981 = vmatprep.subr.bf16.mxu1 %v6518_v38  ;;  %v6542_v38 = vld [vmem:[%s7969_s1 + $0x938] sm:$0xff]  }
 0x36d   :  { %3982 = vmatpush1.bf16.msra.mxu1 %v6516_v39  ;;  %v4047_v39 = vpack.c.bf16 %v4043_v33, %v4043_v33 }
 0x36e   :  { %3983 = vmatprep.subr.bf16.mxu1 %v6521_v40 }
 0x371   :  { %3984 = vmatpush1.bf16.msra.mxu1 %v6519_v41  ;;  %v6545_v41 = vld [vmem:[%s7969_s1 + $0x970] sm:$0xff]  }
 0x372   :  { %3985 = vmatprep.subr.bf16.mxu1 %v6524_v42  ;;  %v6549_v42 = vld [vmem:[%s7969_s1 + $0x968] sm:$0xff]  }
 0x375   :  { %3986 = vmatpush1.bf16.msra.mxu1 %v6522_v44  ;;  %v6550_v44 = vld [vmem:[%s7969_s1 + $0x928] sm:$0xff]  }
 0x376   :  { %3987 = vmatprep.subr.bf16.mxu1 %v6527_v45  ;;  %v6553_v45 = vld [vmem:[%s7969_s1 + $0x960] sm:$0xff]  }
 0x379   :  { %3988 = vmatpush1.bf16.msra.mxu1 %v6525_v46  ;;  %v6554_v46 = vld [vmem:[%s7969_s1 + $0x920] sm:$0xff]  }
 0x37a   :  { %3989 = vmatprep.subr.bf16.mxu1 %v6530_v48  ;;  %v6558_v48 = vld [vmem:[%s7969_s1 + $0x918] sm:$0xff]  }
 0x37d   :  { %v6102_v47 = vpop.f32.mrf.mxu0  ;;  %3990 = vmatpush1.bf16.msra.mxu1 %v6528_v51  ;;  %v6562_v51 = vld [vmem:[%s7969_s1 + $0x910] sm:$0xff]  }
 0x37e   :  { %3991 = vmatprep.subr.bf16.mxu1 %v6533_v54  ;;  %v6567_v54 = vld [vmem:[%s7969_s1 + $0x940] sm:$0xff]  }
 0x37f   :  { %v6103_v49 = vpop.f32.mrf.mxu0 }
 0x380   :  { %v7772_v52 = vadd.f32 %v6103_v49, %v6102_v47  ;;  %v6557_v47 = vld [vmem:[%s7969_s1 + $0x958] sm:$0xff]   ;;  %v6561_v49 = vld [vmem:[%s7969_s1 + $0x950] sm:$0xff]  }
 0x381   :  { %v6105_v53 = vpop.f32.mrf.mxu0  ;;  %3992 = vmatpush1.bf16.msra.mxu1 %v6531_v57  ;;  %v4046_v57 = vpack.c.bf16 %v5573_v25, %v5573_v25 }
 0x382   :  { %3993 = vmatprep.subr.bf16.mxu1 %v6538_v60  ;;  %v6566_v53 = vld [vmem:[%s7969_s1 + $0x908] sm:$0xff]  }
 0x383   :  { %v6106_v55 = vpop.f32.mrf.mxu0  ;;  %v6574_v60 = vld [vmem:[%s7971_s3 + $0x264] ss:$8 sps:$4 sm:$0xff]  }
 0x384   :  { %v6568_v55 = vld [vmem:[%s7969_s1 + $0x900] sm:$0xff]   ;;  %4523 = vmatprep.subr.bf16.mxu0 %v6574_v60 }
 0x385   :  { %3994 = vmatpush1.bf16.msra.mxu1 %v6536_v61  ;;  %v6572_v61 = vld [vmem:[%s7971_s3 + $0x260] ss:$8 sps:$4 sm:$0xff]  }
 0x386   :  { %6130 = vmatprep.subr.bf16.mxu1 %v6541_v63  ;;  %4524 = vmatpush1.bf16.msra.mxu0 %v6572_v61  ;;  %v6580_v63 = vld [vmem:[%s7971_s3 + $0x244] ss:$8 sps:$4 sm:$0xff]  }
 0x387   :  { %4525 = vmatprep.subr.bf16.mxu0 %v6577_v62 }
 0x38a   :  { %4526 = vmatpush1.bf16.msra.mxu0 %v6575_v22 }
 0x38b   :  { %4527 = vmatprep.subr.bf16.mxu0 %v6580_v63 }
 0x38e   :  { %4528 = vmatpush1.bf16.msra.mxu0 %v6578_v27 }
 0x38f   :  { %4529 = vmatprep.subr.bf16.mxu0 %v6583_v0 }
 0x392   :  { %4530 = vmatpush1.bf16.msra.mxu0 %v6581_v1 }
 0x393   :  { %4531 = vmatprep.subr.bf16.mxu0 %v6586_v2 }
 0x396   :  { %4532 = vmatpush1.bf16.msra.mxu0 %v6584_v56 }
 0x397   :  { %4533 = vmatprep.subr.bf16.mxu0 %v6589_v8 }
 0x39a   :  { %4534 = vmatpush1.bf16.msra.mxu0 %v6587_v9 }
 0x39b   :  { %4535 = vmatprep.subr.bf16.mxu0 %v6592_v43 }
 0x39e   :  { %4536 = vmatpush1.bf16.msra.mxu0 %v6590_v50 }
 0x408   :  { %v3286_v15 = vpop.f32.mrf.mxu1 }
 0x409   :  { %v3287_v17 = vadd.f32 %v3286_v15, %v3165_v13 }
 0x40a   :  { %v3288_v16 = vpop.f32.mrf.mxu1 }
 0x40b   :  { %v3289_v18 = vadd.f32 %v3288_v16, %v3169_v14 }
 0x40c   :  { %v3290_v19 = vpop.f32.mrf.mxu1 }
 0x40d   :  { %v3295_v20 = vcombine.low %v3287_v17, %v3289_v18 }
 0x40e   :  { %v3291_v21 = vpop.f32.mrf.mxu1 }
 0x40f   :  { %5709 = vst.sshfl [vmem:[%s7974_s5 + $0x8] sm:$0x33 pattern:$0x76325410] %v3295_v20 }
 0x41a   :  { %v6124_v3 = vpop.f32.mrf.mxu0 }
 0x41c   :  { %v6125_v4 = vpop.f32.mrf.mxu0 }
 0x41d   :  { %v6126_v5 = vadd.f32 %v6125_v4, %v6124_v3 }
 0x41e   :  { %v6127_v6 = vpop.f32.mrf.mxu0 }
 0x420   :  { %v6128_v7 = vpop.f32.mrf.mxu0 }
 0x428   :  { %v6080_v32 = vpop.f32.mrf.mxu1 }
 0x42a   :  { %v6081_v23 = vpop.f32.mrf.mxu1 }
 0x42b   :  { %v6082_v24 = vadd.f32 %v6081_v23, %v6080_v32  ;;  %v5673_v23 = vld [vmem:[%s7972_s2 + $0x4] ss:$0 sm:$0xff] }
 0x42c   :  { %v6083_v26 = vpop.f32.mrf.mxu1 }
 0x42d   :  { %v3669_v28 = vadd.f32 %v6082_v24, %v7734_v30  ;;  %v6546_v30 = vld [vmem:[%s7969_s1 + $0x930] sm:$0xff]  }
 0x42e   :  { %v6084_v31 = vpop.f32.mrf.mxu1 }
 0x42f   :  { %v3858_v36 = vadd.f32 %v7772_v52, %v3669_v28  ;;  %v6565_v52 = vld [vmem:[%s7969_s1 + $0x948] sm:$0xff]  }
 0x430   :  { %v5690_v31 = vld [vmem:[%s7973_s4 + $0x8] sm:$0x3] }
 0x431   :  { %v3867_v37 = vadd.f32 %v5537_v29, %v3858_v36  ;;  %v4434_v33 = vrot.slane %v5690_v31, %v7398_v34  ;;  %v4438_v36 = vrot.slane %v5690_v31, %v7400_v35 }
 0x433   :  { %v3868_v40 = vpack.c.bf16 %v3867_v37, %v3867_v37 }
 0x435   :  { %4012 = vmatmul.mubr.bf16.vlgmr.msra.gmra.mxu1 %v3868_v40 }
 0x436   :  { %6131 = vmatpush3.bf16.msra.mxu1 %v6542_v38  ;;  %4393 = vmatprep.mubr.bf16.mxu1 %v4047_v39 }
 0x437   :  { %6132 = vmatprep.subr.bf16.mxu1 %v6545_v41 }
 0x43a   :  { %6133 = vmatpush3.bf16.msra.mxu1 %v6546_v30 }
 0x43b   :  { %6134 = vmatprep.subr.bf16.mxu1 %v6549_v42 }
 0x43e   :  { %6135 = vmatpush3.bf16.msra.mxu1 %v6550_v44 }
 0x43f   :  { %6136 = vmatprep.subr.bf16.mxu1 %v6553_v45 }
 0x442   :  { %6137 = vmatpush3.bf16.msra.mxu1 %v6554_v46 }
 0x443   :  { %6138 = vmatprep.subr.bf16.mxu1 %v6557_v47 }
 0x446   :  { %6139 = vmatpush3.bf16.msra.mxu1 %v6558_v48 }
 0x447   :  { %6140 = vmatprep.subr.bf16.mxu1 %v6561_v49 }
 0x44a   :  { %6141 = vmatpush3.bf16.msra.mxu1 %v6562_v51 }
 0x44b   :  { %6142 = vmatprep.subr.bf16.mxu1 %v6565_v52 }
 0x44e   :  { %6143 = vmatpush3.bf16.msra.mxu1 %v6566_v53 }
 0x44f   :  { %6144 = vmatprep.subr.bf16.mxu1 %v6567_v54 }
 0x452   :  { %6145 = vmatpush3.bf16.msra.mxu1 %v6568_v55 }
 0x455   :  { %4394 = vmatmul.mubr.bf16.vlgmr.msra.gmra.mxu1 %v4046_v57 }
 0x4f5   :  { %v4013_v13 = vpop.f32.mrf.mxu1 }
 0x4f6   :  { %v4014_v15 = vadd.f32 %v4013_v13, %v3892_v11 }
 0x4f7   :  { %v4015_v14 = vpop.f32.mrf.mxu1 }
 0x4f8   :  { %v4016_v16 = vadd.f32 %v4015_v14, %v3896_v12 }
 0x4f9   :  { %v4017_v17 = vpop.f32.mrf.mxu1 }
 0x4fa   :  { %v4022_v18 = vcombine.low %v4014_v15, %v4016_v16 }
 0x4fb   :  { %v4018_v19 = vpop.f32.mrf.mxu1 }
 0x4fc   :  { %5710 = vst.sshfl [vmem:[%s7974_s5 + $0xc] sm:$0x33 pattern:$0x76325410] %v4022_v18 }
 0x515   :  { %v6146_v20 = vpop.f32.mrf.mxu1 }
 0x517   :  { %v6147_v21 = vpop.f32.mrf.mxu1 }
 0x518   :  { %v6148_v32 = vadd.f32 %v6147_v21, %v6146_v20 }
 0x519   :  { %v6149_v24 = vpop.f32.mrf.mxu1 }
 0x51a   :  { %v4396_v25 = vadd.f32 %v6148_v32, %v6126_v5 }
 0x51b   :  { %v6150_v26 = vpop.f32.mrf.mxu1 }
 0x51c   :  { %v4409_v28 = vadd.f32 %v5673_v23, %v4396_v25 }
 0x51e   :  { %v4410_v29 = vpack.c.bf16 %v4409_v28, %v4409_v28 }
 0x520   :  { %4554 = vmatmul.mubr.bf16.vlgmr.msra.gmra.mxu0 %v4410_v29 }
 0x5e0   :  { %v4555_v37 = vpop.f32.mrf.mxu0 }
 0x5e1   :  { %v4556_v39 = vadd.f32 %v4555_v37, %v4434_v33 }
 0x5e2   :  { %v4557_v38 = vpop.f32.mrf.mxu0 }
 0x5e3   :  { %v4558_v40 = vadd.f32 %v4557_v38, %v4438_v36 }
 0x5e4   :  { %v4559_v41 = vpop.f32.mrf.mxu0 }
 0x5e5   :  { %v4564_v30 = vcombine.low %v4556_v39, %v4558_v40 }
 0x5e6   :  { %v4560_v42 = vpop.f32.mrf.mxu0 }
 0x5e7   :  { %5711 = vst.sshfl [vmem:[%s7974_s5 + $0x10] sm:$0x33 pattern:$0x76325410] %v4564_v30 }

// kernel: pyramid_v2_forward.4
= control target key start
LH: loop header
LB: loop body
LE: loop exit
PB: predicated region body
PF: predicated region fallthrough
CT: control target
= control target key end

     0   :  { %10 = vsyncpa [#allocation3], 0  ;;  %s11394_s0 = inlined_call_operand.vmem [shape: f32[21,2,2048], index: 0, kind: input, shape index: {}]   ;;  %s11395_s1 = inlined_call_operand.hbm [shape: bf16[21,2048,256], index: 1, kind: input, shape index: {}]   ;;  %s11396_s2 = inlined_call_operand.vmem [shape: f32[21,1,256], index: 2, kind: input, shape index: {}]   ;;  %s11397_s3 = inlined_call_operand.vmem [shape: bf16[21,256,256], index: 3, kind: input, shape index: {}]   ;;  %s11398_s4 = inlined_call_operand.vmem [shape: f32[21,1,256], index: 4, kind: input, shape index: {}]   ;;  %s11399_s5 = inlined_call_operand.vmem [shape: f32[21,2,256], index: 5, kind: output, shape index: {}]  }
   0x1   :  { %12 = vsyncpa [#allocation3 + $0x1], 0  ;;  %s10111_s18 = smov 0   ;;  %s10113_s19 = smov 0  }
   0x2   :  { %s10115_s20 = smov 0   ;;  %s10117_s21 = smov 0  }
   0x3 LB: > { %s10130_s22 = sadd.s32 4294967295, %s10075_s21   ;;  %s10133_s23 = sadd.s32 1, %s10075_s21   ;;  %s10075_s21 = sphi %s10117_s21, %s11408_s21   ;;  %s10071_s20 = sphi %s10115_s20, %s11407_s20   ;;  %s10067_s19 = sphi %s10113_s19, %s11406_s19   ;;  %s10063_s18 = sphi %s10111_s18, %s11405_s18  }
   0x4   : > { %s48_s24 = ssub.s32 %s10075_s21, %s10133_s23  ;;  %s51_s25 = sadd.s32 1, %s10071_s20 }
   0x5   : > { %p49_p0 = scmp.eq.s32.totalorder %s48_s24, 0  ;;  %p58_p1 = scmp.ne.s32.totalorder %s10071_s20, %s10067_s19 }
   0x6   : > { %p59_p2 = scmp.eq.s32.totalorder %s10075_s21, 0  ;;  %p64_p3 = scmp.ne.s32.totalorder %s10067_s19, %s10063_s18 }
   0x7   : > { %s10143_s26 = scalar_select %p49_p0, %s10071_s20, %s51_s25  }
   0x8   : > { %p60_p4 = por %p59_p2, %p58_p1  ;;  %p65_p5 = scmp.eq.s32.totalorder %s10130_s22, 0 }
   0x9   : > { %p8671_p6 = scmp.lt.s32.totalorder %s10075_s21, 7  ;;  %s198_s28 = sand.u32 1, %s10071_s20  }
   0xa   : > { %p10147_p7 = por %p65_p5, %p64_p3  ;;  %s8663_s29 = smul.u32 6144, %s198_s28 }
   0xb   : > { %s8662_s30 = smul.u32 98304, %s10075_s21  ;;  %p10153_p8 = pnand %p8671_p6, %p60_p4 }
   0xc   : > { %s11401_s27 = scalar_select %p10147_p7, 1, 0 }
   0xd   : > { %s10160_s9 = scalar_lea.hbm %s11395_s1, %s8662_s30  ;;  %s202_s10 = scalar_lea.vmem [#allocation2], %s8663_s29 }
   0xe   : > { %s210_s11 = sshll.u32 %s202_s10, 4  ;;  %s10165_s12 = scalar_lea.sflag [#allocation3], %s198_s28  ;;  %s10162_s11 = int_to_ptr.vmem [resolvable:$true] %s210_s11 }
   0xf   : > { %s10013_s13 = scalar_lea.hbm %s10160_s9, 98304  ;;  %p10015_p11 = pneg %p10153_p8 }
  0x10   : > { %p10014_p10 = scmp.ne.s32.totalorder %s10160_s9, %s10013_s13  ;;  %s10018_s16 = scalar_lea.hbm %s11395_s1, 688128 }
  0x11   : > { %p10019_p0 = scmp.lt.s32.totalorder %s10160_s9, %s11395_s1  ;;  %p10020_p1 = scmp.lt.s32.totalorder %s10018_s16, %s10013_s13 }
  0x12   : > { %p10016_p12 = pnand %p10015_p11, %p10014_p10 }
  0x13   : > { %p10021_p2 = por %p10020_p1, %p10019_p0 }
  0x14   : > { %p10017_p13 = pneg %p10016_p12 }
  0x16   : > { %p10022_p3 = pnand %p10021_p2, %p10017_p13 }
  0x18   : > { %10025 = shalt.err (!%p10022_p3)
}
  0x19   : > { %s10026_s24 = scalar_lea.vmem %s10162_s11, 98304  ;;  %s10077_s25 = smov [#allocation2]  }
  0x1a   : > { %p10027_p4 = scmp.ne.s32.totalorder %s10162_s11, %s10026_s24  ;;  %s10031_s28 = sshll.u32 %s10077_s25, 4  ;;  %s10032_s28 = int_to_ptr.vmem [resolvable:$false] %s10031_s28 }
  0x1b   : > { %s10033_s29 = scalar_lea.vmem %s10032_s28, 196608  ;;  %p10034_p10 = scmp.lt.s32.totalorder %s10162_s11, %s10032_s28 }
  0x1c   : > { %p10029_p5 = pnand %p10027_p4, %p10015_p11  ;;  %p10035_p12 = scmp.lt.s32.totalorder %s10033_s29, %s10026_s24 }
  0x1e   : > { %p10030_p6 = pneg %p10029_p5  ;;  %p10036_p9 = por %p10035_p12, %p10034_p10 }
  0x20   : > { %p10037_p7 = pnand %p10036_p9, %p10030_p6 }
  0x22   : > { %10040 = shalt.err (!%p10037_p7)
}
  0x23   : > { %s10078_s30 = smov 128   ;;  %s10079_s7 = smov 8  }
  0x24   : > { %8670 = dma.hbm_to_vmem [thread:$0]  (!%p10153_p8), %s10160_s9, 98304, %s10162_s11, %s10165_s12, %s10078_s30, %s10078_s30, %s10079_s7  }
  0x25   : > { %p228_p11 = scmp.lt.s32.totalorder %s10075_s21, 8  ;;  %p11403_p13 = scmp.ge.s32.totalorder %s10075_s21, 1 }
  0x27   : > { %p229_p0 = pnand %p11403_p13, %p228_p11 }
  0x28   : > { %s234_s8 = sand.u32 (!%p229_p0), 1, %s10067_s19   ;;  %p11404_p7 = scmp.ne.s32.totalorder (!%p229_p0), %s11401_s27, 0 }
  0x29   : > { %232 = sbr.rel (%p229_p0) target bundleno = 1627 (0x65b), region = 40  ;;  %s235_s13 = scalar_lea.sflag (!%p229_p0), [#allocation3], %s234_s8 }
  0x2a   : > { %s8664_s10 = smul.u32 (!%p229_p0), 6144, %s234_s8 }
  0x2c   : > { %s10190_s14 = scalar_lea.vmem (!%p229_p0), [#allocation2], %s8664_s10 }
  0x2e   : > { %10058 = dma.done.wait (%p11404_p7), %s235_s13, 98304  }
  0x2f   : > { %10060 = vsyncadd (%p11404_p7), %s235_s13, 4294868992  ;;  %v8707_v0 = vld [vmem:[%s10190_s14 + $0x74] ss:$8 sps:$4 sm:$0xff]   ;;  %v8711_v2 = vld [vmem:[%s10190_s14 + $0x70] ss:$8 sps:$4 sm:$0xff]   ;;  %s278_s21 = smul.u32 3, %s10130_s22  ;;  %v313_v38 = vlaneseq }
  0x30   : > { %v8709_v1 = vld [vmem:[%s10190_s14 + $0x174] ss:$8 sps:$4 sm:$0xff]   ;;  %1959 = vmatprep.subr.bf16.mxu0 %v8707_v0  ;;  %v8712_v3 = vld [vmem:[%s10190_s14 + $0x170] ss:$8 sps:$4 sm:$0xff]   ;;  %v8713_v4 = vld [vmem:[%s10190_s14 + $0x64] ss:$8 sps:$4 sm:$0xff]  }
  0x31   : > { %2000 = vmatprep.subr.bf16.mxu1 %v8709_v1  ;;  %1960 = vmatpush1.bf16.msra.mxu0 %v8711_v2  ;;  %v8715_v5 = vld [vmem:[%s10190_s14 + $0x164] ss:$8 sps:$4 sm:$0xff]   ;;  %v8717_v6 = vld [vmem:[%s10190_s14 + $0x60] ss:$8 sps:$4 sm:$0xff]   ;;  %v8719_v8 = vld [vmem:[%s10190_s14 + $0x54] ss:$8 sps:$4 sm:$0xff]  }
  0x32   : > { %2001 = vmatpush1.bf16.msra.mxu1 %v8712_v3  ;;  %1961 = vmatprep.subr.bf16.mxu0 %v8713_v4  ;;  %v8718_v7 = vld [vmem:[%s10190_s14 + $0x160] ss:$8 sps:$4 sm:$0xff]   ;;  %v8721_v9 = vld [vmem:[%s10190_s14 + $0x154] ss:$8 sps:$4 sm:$0xff]   ;;  %v8723_v10 = vld [vmem:[%s10190_s14 + $0x50] ss:$8 sps:$4 sm:$0xff]  }
  0x33   : > { %2002 = vmatprep.subr.bf16.mxu1 %v8715_v5  ;;  %v8724_v11 = vld [vmem:[%s10190_s14 + $0x150] ss:$8 sps:$4 sm:$0xff]   ;;  %v8725_v12 = vld [vmem:[%s10190_s14 + $0x44] ss:$8 sps:$4 sm:$0xff]   ;;  %v8729_v14 = vld [vmem:[%s10190_s14 + $0x40] ss:$8 sps:$4 sm:$0xff]  }
  0x34   : > { %v8727_v13 = vld [vmem:[%s10190_s14 + $0x144] ss:$8 sps:$4 sm:$0xff]   ;;  %v8730_v15 = vld [vmem:[%s10190_s14 + $0x140] ss:$8 sps:$4 sm:$0xff]   ;;  %v8731_v16 = vld [vmem:[%s10190_s14 + $0x34] ss:$8 sps:$4 sm:$0xff]  }
  0x35   : > { %1962 = vmatpush1.bf16.msra.mxu0 %v8717_v6  ;;  %v8733_v17 = vld [vmem:[%s10190_s14 + $0x134] ss:$8 sps:$4 sm:$0xff]   ;;  %v8735_v18 = vld [vmem:[%s10190_s14 + $0x30] ss:$8 sps:$4 sm:$0xff]   ;;  %v8737_v20 = vld [vmem:[%s10190_s14 + $0x24] ss:$8 sps:$4 sm:$0xff]  }
  0x36   : > { %2003 = vmatpush1.bf16.msra.mxu1 %v8718_v7  ;;  %1963 = vmatprep.subr.bf16.mxu0 %v8719_v8  ;;  %v8736_v19 = vld [vmem:[%s10190_s14 + $0x130] ss:$8 sps:$4 sm:$0xff]   ;;  %v8739_v21 = vld [vmem:[%s10190_s14 + $0x124] ss:$8 sps:$4 sm:$0xff]   ;;  %v8741_v22 = vld [vmem:[%s10190_s14 + $0x20] ss:$8 sps:$4 sm:$0xff]  }
  0x37   : > { %2004 = vmatprep.subr.bf16.mxu1 %v8721_v9  ;;  %v8742_v23 = vld [vmem:[%s10190_s14 + $0x120] ss:$8 sps:$4 sm:$0xff]   ;;  %v8743_v24 = vld [vmem:[%s10190_s14 + $0x14] ss:$8 sps:$4 sm:$0xff]   ;;  %v8747_v26 = vld [vmem:[%s10190_s14 + $0x10] ss:$8 sps:$4 sm:$0xff]  }
  0x38   : > { %v8745_v25 = vld [vmem:[%s10190_s14 + $0x114] ss:$8 sps:$4 sm:$0xff]   ;;  %v8748_v27 = vld [vmem:[%s10190_s14 + $0x110] ss:$8 sps:$4 sm:$0xff]   ;;  %v8749_v28 = vld [vmem:[%s10190_s14 + $0x4] ss:$8 sps:$4 sm:$0xff]  }
  0x39   : > { %1964 = vmatpush1.bf16.msra.mxu0 %v8723_v10  ;;  %v8751_v29 = vld [vmem:[%s10190_s14 + $0x104] ss:$8 sps:$4 sm:$0xff]   ;;  %v8753_v30 = vld [vmem:[%s10190_s14] ss:$8 sps:$4 sm:$0xff]   ;;  %v8755_v32 = vld [vmem:[%s10190_s14 + $0xf4] ss:$8 sps:$4 sm:$0xff]  }
  0x3a   : > { %2005 = vmatpush1.bf16.msra.mxu1 %v8724_v11  ;;  %1965 = vmatprep.subr.bf16.mxu0 %v8725_v12  ;;  %v8754_v31 = vld [vmem:[%s10190_s14 + $0x100] ss:$8 sps:$4 sm:$0xff]   ;;  %p279_p8 = scmp.lt.s32.totalorder %s278_s21, 20  ;;  %v8757_v33 = vld [vmem:[%s10190_s14 + $0x1f4] ss:$8 sps:$4 sm:$0xff]   ;;  %v10238_v43 = vshrl.u32 %v313_v38, 7 }
  0x3b   : > { %2006 = vmatprep.subr.bf16.mxu1 %v8727_v13  ;;  %v8759_v34 = vld [vmem:[%s10190_s14 + $0xf0] ss:$8 sps:$4 sm:$0xff]   ;;  %v10080_v36 = vmov 1983009808   ;;  %v8761_v39 = vld [vmem:[%s10190_s14 + $0xe4] ss:$8 sps:$4 sm:$0xff]  }
  0x3c   : > { %v8760_v35 = vld [vmem:[%s10190_s14 + $0x1f0] ss:$8 sps:$4 sm:$0xff]   ;;  %v311_v37 = vunpack.c.l.s4 %v10080_v36  ;;  %s11410_s21 = smov (!%p279_p8, %s278_s21), 20  ;;  %v8763_v40 = vld [vmem:[%s10190_s14 + $0x1e4] ss:$8 sps:$4 sm:$0xff]   ;;  %s7193_s18 = smul.u32 6, %s10130_s22 }
  0x3d   : > { %1966 = vmatpush1.bf16.msra.mxu0 %v8729_v14  ;;  %v8765_v41 = vld [vmem:[%s10190_s14 + $0xe0] ss:$8 sps:$4 sm:$0xff]   ;;  %v8767_v45 = vld [vmem:[%s10190_s14 + $0xd4] ss:$8 sps:$4 sm:$0xff]   ;;  %s8657_s27 = sshll.u32 %s11410_s21, 5  ;;  %s8658_s12 = sshll.u32 %s11410_s21, 8 }
  0x3e   : > { %2007 = vmatpush1.bf16.msra.mxu1 %v8730_v15  ;;  %1967 = vmatprep.subr.bf16.mxu0 %v8731_v16  ;;  %v312_v42 = vunpack.c.0.s8 %v311_v37  ;;  %v8766_v44 = vld [vmem:[%s10190_s14 + $0x1e0] ss:$8 sps:$4 sm:$0xff]   ;;  %v8769_v46 = vld [vmem:[%s10190_s14 + $0x1d4] ss:$8 sps:$4 sm:$0xff]   ;;  %v8771_v47 = vld [vmem:[%s10190_s14 + $0xd0] ss:$8 sps:$4 sm:$0xff]   ;;  %s10249_s11 = scalar_lea.vmem %s11394_s0, %s8657_s27  ;;  %s10417_s17 = scalar_lea.vmem %s11397_s3, %s8658_s12 }
  0x3f   : > { %2008 = vmatprep.subr.bf16.mxu1 %v8733_v17  ;;  %v8772_v48 = vld [vmem:[%s10190_s14 + $0x1d0] ss:$8 sps:$4 sm:$0xff]   ;;  %v8773_v50 = vld [vmem:[%s10190_s14 + $0xc4] ss:$8 sps:$4 sm:$0xff]   ;;  %v8777_v53 = vld [vmem:[%s10190_s14 + $0xc0] ss:$8 sps:$4 sm:$0xff]   ;;  %s10520_s28 = scalar_lea.vmem %s11396_s2, %s7193_s18  ;;  %s10877_s7 = scalar_lea.vmem %s11398_s4, %s7193_s18 }
  0x40   : > { %v10252_v49 = vsub.s32 %v312_v42, %v10238_v43  ;;  %v8775_v51 = vld [vmem:[%s10190_s14 + $0x1c4] ss:$8 sps:$4 sm:$0xff]   ;;  %v8778_v56 = vld [vmem:[%s10190_s14 + $0x1c0] ss:$8 sps:$4 sm:$0xff]   ;;  %v8779_v57 = vld [vmem:[%s10190_s14 + $0xb4] ss:$8 sps:$4 sm:$0xff]  }
  0x41   : > { %1968 = vmatpush1.bf16.msra.mxu0 %v8735_v18  ;;  %v301_v52 = vld [vmem:[%s10249_s11] sm:$0xff]  ;;  %v8781_v58 = vld [vmem:[%s10190_s14 + $0x1b4] ss:$8 sps:$4 sm:$0xff]   ;;  %v8783_v61 = vld [vmem:[%s10190_s14 + $0xb0] ss:$8 sps:$4 sm:$0xff]   ;;  %s8659_s22 = sshll.u32 %s11410_s21, 2 }
  0x42   : > { %2009 = vmatpush1.bf16.msra.mxu1 %v8736_v19  ;;  %1969 = vmatprep.subr.bf16.mxu0 %v8737_v20  ;;  %v316_v54 = vrot.slane %v301_v52, %v10252_v49  ;;  %v309_v55 = vcombine.high %v301_v52, %v301_v52  ;;  %v8784_v0 = vld [vmem:[%s10190_s14 + $0x1b0] ss:$8 sps:$4 sm:$0xff]   ;;  %v8785_v1 = vld [vmem:[%s10190_s14 + $0xa4] ss:$8 sps:$4 sm:$0xff]   ;;  %v8789_v4 = vld [vmem:[%s10190_s14 + $0xa0] ss:$8 sps:$4 sm:$0xff]   ;;  %s10897_s13 = scalar_lea.vmem %s11399_s5, %s8659_s22 }
  0x43   : > { %2010 = vmatprep.subr.bf16.mxu1 %v8739_v21  ;;  %v8787_v2 = vld [vmem:[%s10190_s14 + $0x1a4] ss:$8 sps:$4 sm:$0xff]   ;;  %v8790_v5 = vld [vmem:[%s10190_s14 + $0x1a0] ss:$8 sps:$4 sm:$0xff]   ;;  %v8791_v6 = vld [vmem:[%s10190_s14 + $0x94] ss:$8 sps:$4 sm:$0xff]  }
  0x44   : > { %v324_v59 = vcombine.high %v316_v54, %v316_v54  ;;  %v323_v60 = vrot.slane %v309_v55, %v10252_v49  ;;  %v8793_v7 = vld [vmem:[%s10190_s14 + $0x194] ss:$8 sps:$4 sm:$0xff]   ;;  %v8795_v8 = vld [vmem:[%s10190_s14 + $0x90] ss:$8 sps:$4 sm:$0xff]   ;;  %v8797_v10 = vld [vmem:[%s10190_s14 + $0x84] ss:$8 sps:$4 sm:$0xff]   ;;  %v393_v16 = vpack.c.bf16 %v316_v54, %v316_v54 }
  0x45   : > { %1970 = vmatpush1.bf16.msra.mxu0 %v8741_v22  ;;  %v8796_v9 = vld [vmem:[%s10190_s14 + $0x190] ss:$8 sps:$4 sm:$0xff]   ;;  %v8799_v11 = vld [vmem:[%s10190_s14 + $0x184] ss:$8 sps:$4 sm:$0xff]   ;;  %v8801_v12 = vld [vmem:[%s10190_s14 + $0x80] ss:$8 sps:$4 sm:$0xff]  }
  0x46   : > { %2011 = vmatpush1.bf16.msra.mxu1 %v8742_v23  ;;  %1971 = vmatprep.subr.bf16.mxu0 %v8743_v24  ;;  %v394_v62 = vpack.c.bf16 %v324_v59, %v324_v59  ;;  %v325_v63 = vcombine.high %v323_v60, %v323_v60  ;;  %v8802_v13 = vld [vmem:[%s10190_s14 + $0x180] ss:$8 sps:$4 sm:$0xff]   ;;  %v8806_v14 = vld [vmem:[%s10190_s14 + $0x274] ss:$8 sps:$4 sm:$0xff]   ;;  %v395_v17 = vpack.c.bf16 %v323_v60, %v323_v60  ;;  %v8804_v18 = vld [vmem:[%s10190_s14 + $0x270] ss:$8 sps:$4 sm:$0xff]  }
  0x47   : > { %2012 = vmatprep.subr.bf16.mxu1 %v8745_v25  ;;  %v8809_v15 = vld [vmem:[%s10190_s14 + $0x374] ss:$8 sps:$4 sm:$0xff]   ;;  %v8807_v19 = vld [vmem:[%s10190_s14 + $0x370] ss:$8 sps:$4 sm:$0xff]   ;;  %v8812_v20 = vld [vmem:[%s10190_s14 + $0x264] ss:$8 sps:$4 sm:$0xff]  }
  0x48   : > { %v396_v3 = vpack.c.bf16 %v325_v63, %v325_v63  ;;  %1991 = vmatprep.mubr.bf16.mxu0 %v394_v62  ;;  %v8815_v21 = vld [vmem:[%s10190_s14 + $0x364] ss:$8 sps:$4 sm:$0xff]   ;;  %v8810_v22 = vld [vmem:[%s10190_s14 + $0x260] ss:$8 sps:$4 sm:$0xff]   ;;  %v8818_v24 = vld [vmem:[%s10190_s14 + $0x254] ss:$8 sps:$4 sm:$0xff]  }
  0x49   : > { %1972 = vmatpush1.bf16.msra.mxu0 %v8747_v26  ;;  %v8813_v23 = vld [vmem:[%s10190_s14 + $0x360] ss:$8 sps:$4 sm:$0xff]   ;;  %v8821_v25 = vld [vmem:[%s10190_s14 + $0x354] ss:$8 sps:$4 sm:$0xff]   ;;  %v8816_v26 = vld [vmem:[%s10190_s14 + $0x250] ss:$8 sps:$4 sm:$0xff]  }
  0x4a   : > { %2013 = vmatpush1.bf16.msra.mxu1 %v8748_v27  ;;  %1973 = vmatprep.subr.bf16.mxu0 %v8749_v28  ;;  %v8819_v27 = vld [vmem:[%s10190_s14 + $0x350] ss:$8 sps:$4 sm:$0xff]   ;;  %v8824_v28 = vld [vmem:[%s10190_s14 + $0x244] ss:$8 sps:$4 sm:$0xff]   ;;  %v8834_v38 = vld [vmem:[%s10190_s14 + $0x220] ss:$8 sps:$4 sm:$0xff]  }
  0x4b   : > { %2014 = vmatprep.subr.bf16.mxu1 %v8751_v29  ;;  %2032 = vmatprep.mubr.bf16.mxu1 %v396_v3  ;;  %v8827_v29 = vld [vmem:[%s10190_s14 + $0x344] ss:$8 sps:$4 sm:$0xff]   ;;  %v8846_v55 = vld [vmem:[%s10190_s14 + $0x200] ss:$8 sps:$4 sm:$0xff]   ;;  %v8857_v59 = vld [vmem:[%s10190_s14 + $0x3f4] ss:$8 sps:$4 sm:$0xff]  }
  0x4c   : > { %v8836_v36 = vld [vmem:[%s10190_s14 + $0x224] ss:$8 sps:$4 sm:$0xff]   ;;  %v8852_v60 = vld [vmem:[%s10190_s14 + $0x2f0] ss:$8 sps:$4 sm:$0xff]   ;;  %v8869_v3 = vld [vmem:[%s10190_s14 + $0x3d4] ss:$8 sps:$4 sm:$0xff]  }
  0x4d   : > { %1974 = vmatpush1.bf16.msra.mxu0 %v8753_v30  ;;  %v8822_v30 = vld [vmem:[%s10190_s14 + $0x240] ss:$8 sps:$4 sm:$0xff]   ;;  %v8839_v37 = vld [vmem:[%s10190_s14 + $0x324] ss:$8 sps:$4 sm:$0xff]  }
  0x4e   : > { %2015 = vmatpush1.bf16.msra.mxu1 %v8754_v31  ;;  %1975 = vmatprep.subr.bf16.mxu0 %v8755_v32  ;;  %v8825_v31 = vld [vmem:[%s10190_s14 + $0x340] ss:$8 sps:$4 sm:$0xff]   ;;  %v8830_v32 = vld [vmem:[%s10190_s14 + $0x234] ss:$8 sps:$4 sm:$0xff]   ;;  %v8851_v52 = vld [vmem:[%s10190_s14 + $0x304] ss:$8 sps:$4 sm:$0xff]  }
  0x4f   : > { %2016 = vmatprep.subr.bf16.mxu1 %v8757_v33  ;;  %v8833_v33 = vld [vmem:[%s10190_s14 + $0x334] ss:$8 sps:$4 sm:$0xff]   ;;  %v302_v42 = vld [vmem:[%s10249_s11 + $0x8] sm:$0xff] }
  0x50   : > { %v8860_v62 = vld [vmem:[%s10190_s14 + $0x2e4] ss:$8 sps:$4 sm:$0xff]  }
  0x51   : > { %1976 = vmatpush2.bf16.msra.mxu0 %v8759_v34  ;;  %v8828_v34 = vld [vmem:[%s10190_s14 + $0x230] ss:$8 sps:$4 sm:$0xff]   ;;  %v8863_v63 = vld [vmem:[%s10190_s14 + $0x3e4] ss:$8 sps:$4 sm:$0xff]  }
  0x52   : > { %2017 = vmatpush2.bf16.msra.mxu1 %v8760_v35  ;;  %1977 = vmatprep.subr.bf16.mxu0 %v8761_v39  ;;  %v8831_v35 = vld [vmem:[%s10190_s14 + $0x330] ss:$8 sps:$4 sm:$0xff]   ;;  %v8837_v39 = vld [vmem:[%s10190_s14 + $0x320] ss:$8 sps:$4 sm:$0xff]  }
  0x53   : > { %2018 = vmatprep.subr.bf16.mxu1 %v8763_v40  ;;  %v8842_v40 = vld [vmem:[%s10190_s14 + $0x214] ss:$8 sps:$4 sm:$0xff]  }
  0x55   : > { %1978 = vmatpush2.bf16.msra.mxu0 %v8765_v41  ;;  %v8845_v41 = vld [vmem:[%s10190_s14 + $0x314] ss:$8 sps:$4 sm:$0xff]  }
  0x56   : > { %2019 = vmatpush2.bf16.msra.mxu1 %v8766_v44  ;;  %1979 = vmatprep.subr.bf16.mxu0 %v8767_v45  ;;  %v10305_v44 = vrot.slane %v302_v42, %v10252_v49  ;;  %v326_v45 = vcombine.high %v302_v42, %v302_v42  ;;  %v8918_v42 = vld [vmem:[%s10190_s14 + $0x554] ss:$8 sps:$4 sm:$0xff]  }
  0x57   : > { %2020 = vmatprep.subr.bf16.mxu1 %v8769_v46  ;;  %v8840_v46 = vld [vmem:[%s10190_s14 + $0x210] ss:$8 sps:$4 sm:$0xff]  }
  0x59   : > { %1980 = vmatpush2.bf16.msra.mxu0 %v8771_v47  ;;  %v8843_v47 = vld [vmem:[%s10190_s14 + $0x310] ss:$8 sps:$4 sm:$0xff]  }
  0x5a   : > { %2021 = vmatpush2.bf16.msra.mxu1 %v8772_v48  ;;  %1981 = vmatprep.subr.bf16.mxu0 %v8773_v50  ;;  %v341_v48 = vcombine.high %v10305_v44, %v10305_v44  ;;  %v10312_v50 = vrot.slane %v326_v45, %v10252_v49 }
  0x5b   : > { %2022 = vmatprep.subr.bf16.mxu1 %v8775_v51  ;;  %v8848_v51 = vld [vmem:[%s10190_s14 + $0x204] ss:$8 sps:$4 sm:$0xff]  }
  0x5c   : > { %v342_v54 = vcombine.high %v10312_v50, %v10312_v50 }
  0x5d   : > { %1982 = vmatpush2.bf16.msra.mxu0 %v8777_v53  ;;  %v398_v53 = vpack.c.bf16 %v341_v48, %v341_v48  ;;  %v8916_v48 = vld [vmem:[%s10190_s14 + $0x550] ss:$8 sps:$4 sm:$0xff]  }
  0x5e   : > { %2023 = vmatpush2.bf16.msra.mxu1 %v8778_v56  ;;  %1983 = vmatprep.subr.bf16.mxu0 %v8779_v57  ;;  %v8849_v56 = vld [vmem:[%s10190_s14 + $0x300] ss:$8 sps:$4 sm:$0xff]   ;;  %v400_v57 = vpack.c.bf16 %v342_v54, %v342_v54  ;;  %v8927_v54 = vld [vmem:[%s10190_s14 + $0x434] ss:$8 sps:$4 sm:$0xff]  }
  0x5f   : > { %2024 = vmatprep.subr.bf16.mxu1 %v8781_v58  ;;  %v8854_v58 = vld [vmem:[%s10190_s14 + $0x2f4] ss:$8 sps:$4 sm:$0xff]  }
  0x61   : > { %1984 = vmatpush2.bf16.msra.mxu0 %v8783_v61  ;;  %v8855_v61 = vld [vmem:[%s10190_s14 + $0x3f0] ss:$8 sps:$4 sm:$0xff]  }
  0x62   : > { %2025 = vmatpush2.bf16.msra.mxu1 %v8784_v0  ;;  %1985 = vmatprep.subr.bf16.mxu0 %v8785_v1  ;;  %v8858_v0 = vld [vmem:[%s10190_s14 + $0x2e0] ss:$8 sps:$4 sm:$0xff]  }
  0x63   : > { %2026 = vmatprep.subr.bf16.mxu1 %v8787_v2  ;;  %v8861_v1 = vld [vmem:[%s10190_s14 + $0x3e0] ss:$8 sps:$4 sm:$0xff]   ;;  %v8866_v2 = vld [vmem:[%s10190_s14 + $0x2d4] ss:$8 sps:$4 sm:$0xff]  }
  0x65   : > { %1986 = vmatpush2.bf16.msra.mxu0 %v8789_v4  ;;  %v8864_v4 = vld [vmem:[%s10190_s14 + $0x2d0] ss:$8 sps:$4 sm:$0xff]  }
  0x66   : > { %2027 = vmatpush2.bf16.msra.mxu1 %v8790_v5  ;;  %1987 = vmatprep.subr.bf16.mxu0 %v8791_v6  ;;  %v8867_v5 = vld [vmem:[%s10190_s14 + $0x3d0] ss:$8 sps:$4 sm:$0xff]   ;;  %v8872_v6 = vld [vmem:[%s10190_s14 + $0x2c4] ss:$8 sps:$4 sm:$0xff]  }
  0x67   : > { %2028 = vmatprep.subr.bf16.mxu1 %v8793_v7  ;;  %v8875_v7 = vld [vmem:[%s10190_s14 + $0x3c4] ss:$8 sps:$4 sm:$0xff]  }
  0x69   : > { %1988 = vmatpush2.bf16.msra.mxu0 %v8795_v8  ;;  %v8870_v8 = vld [vmem:[%s10190_s14 + $0x2c0] ss:$8 sps:$4 sm:$0xff]  }
  0x6a   : > { %2029 = vmatpush2.bf16.msra.mxu1 %v8796_v9  ;;  %1989 = vmatprep.subr.bf16.mxu0 %v8797_v10  ;;  %v8873_v9 = vld [vmem:[%s10190_s14 + $0x3c0] ss:$8 sps:$4 sm:$0xff]   ;;  %v8878_v10 = vld [vmem:[%s10190_s14 + $0x2b4] ss:$8 sps:$4 sm:$0xff]  }
  0x6b   : > { %2030 = vmatprep.subr.bf16.mxu1 %v8799_v11  ;;  %v8881_v11 = vld [vmem:[%s10190_s14 + $0x3b4] ss:$8 sps:$4 sm:$0xff]  }
  0x6d   : > { %1990 = vmatpush2.bf16.msra.mxu0 %v8801_v12  ;;  %v8876_v12 = vld [vmem:[%s10190_s14 + $0x2b0] ss:$8 sps:$4 sm:$0xff]  }
  0x6e   : > { %2031 = vmatpush2.bf16.msra.mxu1 %v8802_v13  ;;  %2041 = vmatprep.subr.bf16.mxu0 %v8806_v14  ;;  %v8879_v13 = vld [vmem:[%s10190_s14 + $0x3b0] ss:$8 sps:$4 sm:$0xff]   ;;  %v8884_v14 = vld [vmem:[%s10190_s14 + $0x2a4] ss:$8 sps:$4 sm:$0xff]  }
  0x6f   : > { %2082 = vmatprep.subr.bf16.mxu1 %v8809_v15  ;;  %v8887_v15 = vld [vmem:[%s10190_s14 + $0x3a4] ss:$8 sps:$4 sm:$0xff]  }
  0x70   : > { %1992 = vmatmul.mubr.bf16.vlgmr.msra.gmra.mxu0 %v393_v16  ;;  %v8882_v16 = vld [vmem:[%s10190_s14 + $0x2a0] ss:$8 sps:$4 sm:$0xff]  }
  0x71   : > { %2033 = vmatmul.mubr.bf16.vlgmr.msra.gmra.mxu1 %v395_v17  ;;  %2042 = vmatpush1.bf16.msra.mxu0 %v8804_v18  ;;  %v8885_v17 = vld [vmem:[%s10190_s14 + $0x3a0] ss:$8 sps:$4 sm:$0xff]   ;;  %v8890_v18 = vld [vmem:[%s10190_s14 + $0x294] ss:$8 sps:$4 sm:$0xff]  }
  0x72   : > { %2083 = vmatpush1.bf16.msra.mxu1 %v8807_v19  ;;  %2043 = vmatprep.subr.bf16.mxu0 %v8812_v20  ;;  %v8893_v19 = vld [vmem:[%s10190_s14 + $0x394] ss:$8 sps:$4 sm:$0xff]   ;;  %v8888_v20 = vld [vmem:[%s10190_s14 + $0x290] ss:$8 sps:$4 sm:$0xff]  }
  0x73   : > { %2084 = vmatprep.subr.bf16.mxu1 %v8815_v21  ;;  %2073 = vmatprep.mubr.bf16.mxu0 %v398_v53  ;;  %v8891_v21 = vld [vmem:[%s10190_s14 + $0x390] ss:$8 sps:$4 sm:$0xff]   ;;  %v8922_v53 = vld [vmem:[%s10190_s14 + $0x540] ss:$8 sps:$4 sm:$0xff]  }
  0x74   : > { %2114 = vmatprep.mubr.bf16.mxu1 %v400_v57  ;;  %v8928_v57 = vld [vmem:[%s10190_s14 + $0x530] ss:$8 sps:$4 sm:$0xff]  }
  0x75   : > { %2044 = vmatpush1.bf16.msra.mxu0 %v8810_v22  ;;  %v8896_v22 = vld [vmem:[%s10190_s14 + $0x284] ss:$8 sps:$4 sm:$0xff]  }
  0x76   : > { %2085 = vmatpush1.bf16.msra.mxu1 %v8813_v23  ;;  %2045 = vmatprep.subr.bf16.mxu0 %v8818_v24  ;;  %v8899_v23 = vld [vmem:[%s10190_s14 + $0x384] ss:$8 sps:$4 sm:$0xff]   ;;  %v8894_v24 = vld [vmem:[%s10190_s14 + $0x280] ss:$8 sps:$4 sm:$0xff]  }
  0x77   : > { %2086 = vmatprep.subr.bf16.mxu1 %v8821_v25  ;;  %v8897_v25 = vld [vmem:[%s10190_s14 + $0x380] ss:$8 sps:$4 sm:$0xff]  }
  0x79   : > { %2046 = vmatpush1.bf16.msra.mxu0 %v8816_v26  ;;  %v8903_v26 = vld [vmem:[%s10190_s14 + $0x474] ss:$8 sps:$4 sm:$0xff]  }
  0x7a   : > { %2087 = vmatpush1.bf16.msra.mxu1 %v8819_v27  ;;  %2047 = vmatprep.subr.bf16.mxu0 %v8824_v28  ;;  %v8906_v27 = vld [vmem:[%s10190_s14 + $0x574] ss:$8 sps:$4 sm:$0xff]   ;;  %v397_v28 = vpack.c.bf16 %v10305_v44, %v10305_v44 }
  0x7b   : > { %2088 = vmatprep.subr.bf16.mxu1 %v8827_v29  ;;  %v399_v29 = vpack.c.bf16 %v10312_v50, %v10312_v50  ;;  %v8921_v50 = vld [vmem:[%s10190_s14 + $0x444] ss:$8 sps:$4 sm:$0xff]  }
  0x7d   : > { %2048 = vmatpush1.bf16.msra.mxu0 %v8822_v30  ;;  %v8901_v30 = vld [vmem:[%s10190_s14 + $0x470] ss:$8 sps:$4 sm:$0xff]  }
  0x7e   : > { %2089 = vmatpush1.bf16.msra.mxu1 %v8825_v31  ;;  %2049 = vmatprep.subr.bf16.mxu0 %v8830_v32  ;;  %v8904_v31 = vld [vmem:[%s10190_s14 + $0x570] ss:$8 sps:$4 sm:$0xff]   ;;  %v8909_v32 = vld [vmem:[%s10190_s14 + $0x464] ss:$8 sps:$4 sm:$0xff]  }
  0x7f   : > { %2090 = vmatprep.subr.bf16.mxu1 %v8833_v33  ;;  %v303_v33 = vld [vmem:[%s10249_s11 + $0x10] sm:$0xff] }
  0x81   : > { %2050 = vmatpush1.bf16.msra.mxu0 %v8828_v34  ;;  %v8912_v34 = vld [vmem:[%s10190_s14 + $0x564] ss:$8 sps:$4 sm:$0xff]  }
  0x82   : > { %2091 = vmatpush1.bf16.msra.mxu1 %v8831_v35  ;;  %2051 = vmatprep.subr.bf16.mxu0 %v8836_v36  ;;  %v10364_v35 = vrot.slane %v303_v33, %v10252_v49  ;;  %v343_v36 = vcombine.high %v303_v33, %v303_v33  ;;  %v8985_v33 = vld [vmem:[%s10190_s14 + $0x490] ss:$8 sps:$4 sm:$0xff]  }
  0x83   : > { %2092 = vmatprep.subr.bf16.mxu1 %v8839_v37  ;;  %v8907_v37 = vld [vmem:[%s10190_s14 + $0x460] ss:$8 sps:$4 sm:$0xff]  }
  0x85   : > { %2052 = vmatpush1.bf16.msra.mxu0 %v8834_v38  ;;  %v358_v38 = vcombine.high %v10364_v35, %v10364_v35 }
  0x86   : > { %2093 = vmatpush1.bf16.msra.mxu1 %v8837_v39  ;;  %2053 = vmatprep.subr.bf16.mxu0 %v8842_v40  ;;  %v10370_v39 = vrot.slane %v343_v36, %v10252_v49  ;;  %v8910_v40 = vld [vmem:[%s10190_s14 + $0x560] ss:$8 sps:$4 sm:$0xff]  }
  0x87   : > { %2094 = vmatprep.subr.bf16.mxu1 %v8845_v41  ;;  %v8915_v41 = vld [vmem:[%s10190_s14 + $0x454] ss:$8 sps:$4 sm:$0xff]   ;;  %v402_v44 = vpack.c.bf16 %v358_v38, %v358_v38  ;;  %v8996_v38 = vld [vmem:[%s10190_s14 + $0x584] ss:$8 sps:$4 sm:$0xff]  }
  0x88   : > { %v359_v45 = vcombine.high %v10370_v39, %v10370_v39 }
  0x89   : > { %2054 = vmatpush1.bf16.msra.mxu0 %v8840_v46  ;;  %v8913_v46 = vld [vmem:[%s10190_s14 + $0x450] ss:$8 sps:$4 sm:$0xff]  }
  0x8a   : > { %2095 = vmatpush1.bf16.msra.mxu1 %v8843_v47  ;;  %2055 = vmatprep.subr.bf16.mxu0 %v8848_v51  ;;  %v404_v47 = vpack.c.bf16 %v359_v45, %v359_v45  ;;  %v8924_v51 = vld [vmem:[%s10190_s14 + $0x544] ss:$8 sps:$4 sm:$0xff]   ;;  %v9000_v45 = vld [vmem:[%s10190_s14 + $0x674] ss:$8 sps:$4 sm:$0xff]  }
  0x8b   : > { %2096 = vmatprep.subr.bf16.mxu1 %v8851_v52  ;;  %v8919_v52 = vld [vmem:[%s10190_s14 + $0x440] ss:$8 sps:$4 sm:$0xff]  }
  0x8d   : > { %2056 = vmatpush1.bf16.msra.mxu0 %v8846_v55  ;;  %v8930_v55 = vld [vmem:[%s10190_s14 + $0x534] ss:$8 sps:$4 sm:$0xff]  }
  0x8e   : > { %2097 = vmatpush1.bf16.msra.mxu1 %v8849_v56  ;;  %2057 = vmatprep.subr.bf16.mxu0 %v8854_v58  ;;  %v8925_v56 = vld [vmem:[%s10190_s14 + $0x430] ss:$8 sps:$4 sm:$0xff]   ;;  %v8933_v58 = vld [vmem:[%s10190_s14 + $0x424] ss:$8 sps:$4 sm:$0xff]  }
  0x8f   : > { %2098 = vmatprep.subr.bf16.mxu1 %v8857_v59  ;;  %v8936_v59 = vld [vmem:[%s10190_s14 + $0x524] ss:$8 sps:$4 sm:$0xff]  }
  0x91   : > { %2058 = vmatpush2.bf16.msra.mxu0 %v8852_v60  ;;  %v8931_v60 = vld [vmem:[%s10190_s14 + $0x420] ss:$8 sps:$4 sm:$0xff]  }
  0x92   : > { %2099 = vmatpush2.bf16.msra.mxu1 %v8855_v61  ;;  %2059 = vmatprep.subr.bf16.mxu0 %v8860_v62  ;;  %v8934_v61 = vld [vmem:[%s10190_s14 + $0x520] ss:$8 sps:$4 sm:$0xff]   ;;  %v8939_v62 = vld [vmem:[%s10190_s14 + $0x414] ss:$8 sps:$4 sm:$0xff]  }
  0x93   : > { %2100 = vmatprep.subr.bf16.mxu1 %v8863_v63  ;;  %v8942_v63 = vld [vmem:[%s10190_s14 + $0x514] ss:$8 sps:$4 sm:$0xff]  }
  0x95   : > { %2060 = vmatpush2.bf16.msra.mxu0 %v8858_v0  ;;  %v8937_v0 = vld [vmem:[%s10190_s14 + $0x410] ss:$8 sps:$4 sm:$0xff]  }
  0x96   : > { %2101 = vmatpush2.bf16.msra.mxu1 %v8861_v1  ;;  %2061 = vmatprep.subr.bf16.mxu0 %v8866_v2  ;;  %v8940_v1 = vld [vmem:[%s10190_s14 + $0x510] ss:$8 sps:$4 sm:$0xff]   ;;  %v8945_v2 = vld [vmem:[%s10190_s14 + $0x404] ss:$8 sps:$4 sm:$0xff]  }
  0x97   : > { %2102 = vmatprep.subr.bf16.mxu1 %v8869_v3  ;;  %v8948_v3 = vld [vmem:[%s10190_s14 + $0x504] ss:$8 sps:$4 sm:$0xff]  }
  0x99   : > { %2062 = vmatpush2.bf16.msra.mxu0 %v8864_v4  ;;  %v8943_v4 = vld [vmem:[%s10190_s14 + $0x400] ss:$8 sps:$4 sm:$0xff]  }
  0x9a   : > { %2103 = vmatpush2.bf16.msra.mxu1 %v8867_v5  ;;  %2063 = vmatprep.subr.bf16.mxu0 %v8872_v6  ;;  %v8946_v5 = vld [vmem:[%s10190_s14 + $0x500] ss:$8 sps:$4 sm:$0xff]   ;;  %v8951_v6 = vld [vmem:[%s10190_s14 + $0x4f4] ss:$8 sps:$4 sm:$0xff]  }
  0x9b   : > { %2104 = vmatprep.subr.bf16.mxu1 %v8875_v7  ;;  %v8954_v7 = vld [vmem:[%s10190_s14 + $0x5f4] ss:$8 sps:$4 sm:$0xff]  }
  0x9d   : > { %2064 = vmatpush2.bf16.msra.mxu0 %v8870_v8  ;;  %v8949_v8 = vld [vmem:[%s10190_s14 + $0x4f0] ss:$8 sps:$4 sm:$0xff]  }
  0x9e   : > { %2105 = vmatpush2.bf16.msra.mxu1 %v8873_v9  ;;  %2065 = vmatprep.subr.bf16.mxu0 %v8878_v10  ;;  %v8952_v9 = vld [vmem:[%s10190_s14 + $0x5f0] ss:$8 sps:$4 sm:$0xff]   ;;  %v8957_v10 = vld [vmem:[%s10190_s14 + $0x4e4] ss:$8 sps:$4 sm:$0xff]  }
  0x9f   : > { %2106 = vmatprep.subr.bf16.mxu1 %v8881_v11  ;;  %v8960_v11 = vld [vmem:[%s10190_s14 + $0x5e4] ss:$8 sps:$4 sm:$0xff]  }
  0xa1   : > { %2066 = vmatpush2.bf16.msra.mxu0 %v8876_v12  ;;  %v8955_v12 = vld [vmem:[%s10190_s14 + $0x4e0] ss:$8 sps:$4 sm:$0xff]  }
  0xa2   : > { %2107 = vmatpush2.bf16.msra.mxu1 %v8879_v13  ;;  %2067 = vmatprep.subr.bf16.mxu0 %v8884_v14  ;;  %v8958_v13 = vld [vmem:[%s10190_s14 + $0x5e0] ss:$8 sps:$4 sm:$0xff]   ;;  %v8963_v14 = vld [vmem:[%s10190_s14 + $0x4d4] ss:$8 sps:$4 sm:$0xff]  }
  0xa3   : > { %2108 = vmatprep.subr.bf16.mxu1 %v8887_v15  ;;  %v8966_v15 = vld [vmem:[%s10190_s14 + $0x5d4] ss:$8 sps:$4 sm:$0xff]  }
  0xa5   : > { %2068 = vmatpush2.bf16.msra.mxu0 %v8882_v16  ;;  %v8961_v16 = vld [vmem:[%s10190_s14 + $0x4d0] ss:$8 sps:$4 sm:$0xff]  }
  0xa6   : > { %2109 = vmatpush2.bf16.msra.mxu1 %v8885_v17  ;;  %2069 = vmatprep.subr.bf16.mxu0 %v8890_v18  ;;  %v8964_v17 = vld [vmem:[%s10190_s14 + $0x5d0] ss:$8 sps:$4 sm:$0xff]   ;;  %v8969_v18 = vld [vmem:[%s10190_s14 + $0x4c4] ss:$8 sps:$4 sm:$0xff]  }
  0xa7   : > { %2110 = vmatprep.subr.bf16.mxu1 %v8893_v19  ;;  %v8972_v19 = vld [vmem:[%s10190_s14 + $0x5c4] ss:$8 sps:$4 sm:$0xff]  }
  0xa9   : > { %2070 = vmatpush2.bf16.msra.mxu0 %v8888_v20  ;;  %v8967_v20 = vld [vmem:[%s10190_s14 + $0x4c0] ss:$8 sps:$4 sm:$0xff]  }
  0xaa   : > { %2111 = vmatpush2.bf16.msra.mxu1 %v8891_v21  ;;  %2071 = vmatprep.subr.bf16.mxu0 %v8896_v22  ;;  %v8970_v21 = vld [vmem:[%s10190_s14 + $0x5c0] ss:$8 sps:$4 sm:$0xff]   ;;  %v8975_v22 = vld [vmem:[%s10190_s14 + $0x4b4] ss:$8 sps:$4 sm:$0xff]  }
  0xab   : > { %2112 = vmatprep.subr.bf16.mxu1 %v8899_v23  ;;  %v8978_v23 = vld [vmem:[%s10190_s14 + $0x5b4] ss:$8 sps:$4 sm:$0xff]  }
  0xad   : > { %2072 = vmatpush2.bf16.msra.mxu0 %v8894_v24  ;;  %v8973_v24 = vld [vmem:[%s10190_s14 + $0x4b0] ss:$8 sps:$4 sm:$0xff]  }
  0xae   : > { %2113 = vmatpush2.bf16.msra.mxu1 %v8897_v25  ;;  %2123 = vmatprep.subr.bf16.mxu0 %v8903_v26  ;;  %v8976_v25 = vld [vmem:[%s10190_s14 + $0x5b0] ss:$8 sps:$4 sm:$0xff]   ;;  %v8981_v26 = vld [vmem:[%s10190_s14 + $0x4a4] ss:$8 sps:$4 sm:$0xff]  }
  0xaf   : > { %2164 = vmatprep.subr.bf16.mxu1 %v8906_v27  ;;  %v8984_v27 = vld [vmem:[%s10190_s14 + $0x5a4] ss:$8 sps:$4 sm:$0xff]  }
  0xb0   : > { %2074 = vmatmul.mubr.bf16.vlgmr.msra.gmra.mxu0 %v397_v28  ;;  %v304_v28 = vld [vmem:[%s10249_s11 + $0x18] sm:$0xff] }
  0xb1   : > { %2115 = vmatmul.mubr.bf16.vlgmr.msra.gmra.mxu1 %v399_v29  ;;  %2124 = vmatpush1.bf16.msra.mxu0 %v8901_v30  ;;  %v8979_v29 = vld [vmem:[%s10190_s14 + $0x4a0] ss:$8 sps:$4 sm:$0xff]   ;;  %v360_v36 = vcombine.high %v304_v28, %v304_v28 }
  0xb2   : > { %2165 = vmatpush1.bf16.msra.mxu1 %v8904_v31  ;;  %2125 = vmatprep.subr.bf16.mxu0 %v8909_v32  ;;  %v8982_v30 = vld [vmem:[%s10190_s14 + $0x5a0] ss:$8 sps:$4 sm:$0xff]   ;;  %v8987_v31 = vld [vmem:[%s10190_s14 + $0x494] ss:$8 sps:$4 sm:$0xff]  }
  0xb3   : > { %2166 = vmatprep.subr.bf16.mxu1 %v8912_v34  ;;  %2155 = vmatprep.mubr.bf16.mxu0 %v402_v44  ;;  %v8990_v32 = vld [vmem:[%s10190_s14 + $0x594] ss:$8 sps:$4 sm:$0xff]   ;;  %v8988_v34 = vld [vmem:[%s10190_s14 + $0x590] ss:$8 sps:$4 sm:$0xff]   ;;  %v10442_v44 = vrot.slane %v360_v36, %v10252_v49 }
  0xb4   : > { %2196 = vmatprep.mubr.bf16.mxu1 %v404_v47  ;;  %v8998_v47 = vld [vmem:[%s10190_s14 + $0x670] ss:$8 sps:$4 sm:$0xff]   ;;  %v9075_v36 = vld [vmem:[%s10190_s14 + $0x7b4] ss:$8 sps:$4 sm:$0xff]  }
  0xb5   : > { %2126 = vmatpush1.bf16.msra.mxu0 %v8907_v37  ;;  %v8993_v37 = vld [vmem:[%s10190_s14 + $0x484] ss:$8 sps:$4 sm:$0xff]  }
  0xb6   : > { %2167 = vmatpush1.bf16.msra.mxu1 %v8910_v40  ;;  %2127 = vmatprep.subr.bf16.mxu0 %v8915_v41  ;;  %v8991_v40 = vld [vmem:[%s10190_s14 + $0x480] ss:$8 sps:$4 sm:$0xff]  }
  0xb7   : > { %2168 = vmatprep.subr.bf16.mxu1 %v8918_v42  ;;  %v8994_v41 = vld [vmem:[%s10190_s14 + $0x580] ss:$8 sps:$4 sm:$0xff]   ;;  %v10439_v42 = vrot.slane %v304_v28, %v10252_v49  ;;  %v9058_v28 = vld [vmem:[%s10190_s14 + $0x6d0] ss:$8 sps:$4 sm:$0xff]  }
  0xb9   : > { %2128 = vmatpush1.bf16.msra.mxu0 %v8913_v46  ;;  %v9003_v46 = vld [vmem:[%s10190_s14 + $0x774] ss:$8 sps:$4 sm:$0xff]  }
  0xba   : > { %2169 = vmatpush1.bf16.msra.mxu1 %v8916_v48  ;;  %2129 = vmatprep.subr.bf16.mxu0 %v8921_v50  ;;  %v9001_v48 = vld [vmem:[%s10190_s14 + $0x770] ss:$8 sps:$4 sm:$0xff]   ;;  %v375_v50 = vcombine.high %v10439_v42, %v10439_v42 }
  0xbb   : > { %2170 = vmatprep.subr.bf16.mxu1 %v8924_v51  ;;  %v376_v51 = vcombine.high %v10442_v44, %v10442_v44 }
  0xbd   : > { %2130 = vmatpush1.bf16.msra.mxu0 %v8919_v52  ;;  %v401_v52 = vpack.c.bf16 %v10364_v35, %v10364_v35  ;;  %v9012_v35 = vld [vmem:[%s10190_s14 + $0x654] ss:$8 sps:$4 sm:$0xff]  }
  0xbe   : > { %2171 = vmatpush1.bf16.msra.mxu1 %v8922_v53  ;;  %2131 = vmatprep.subr.bf16.mxu0 %v8927_v54  ;;  %v403_v53 = vpack.c.bf16 %v10370_v39, %v10370_v39  ;;  %v9006_v54 = vld [vmem:[%s10190_s14 + $0x664] ss:$8 sps:$4 sm:$0xff]   ;;  %v9010_v39 = vld [vmem:[%s10190_s14 + $0x650] ss:$8 sps:$4 sm:$0xff]  }
  0xbf   : > { %2172 = vmatprep.subr.bf16.mxu1 %v8930_v55  ;;  %v9009_v55 = vld [vmem:[%s10190_s14 + $0x764] ss:$8 sps:$4 sm:$0xff]  }
  0xc1   : > { %2132 = vmatpush1.bf16.msra.mxu0 %v8925_v56  ;;  %v9004_v56 = vld [vmem:[%s10190_s14 + $0x660] ss:$8 sps:$4 sm:$0xff]  }
  0xc2   : > { %2173 = vmatpush1.bf16.msra.mxu1 %v8928_v57  ;;  %2133 = vmatprep.subr.bf16.mxu0 %v8933_v58  ;;  %v9007_v57 = vld [vmem:[%s10190_s14 + $0x760] ss:$8 sps:$4 sm:$0xff]   ;;  %v406_v58 = vpack.c.bf16 %v375_v50, %v375_v50  ;;  %v9082_v50 = vld [vmem:[%s10190_s14 + $0x690] ss:$8 sps:$4 sm:$0xff]  }
  0xc3   : > { %2174 = vmatprep.subr.bf16.mxu1 %v8936_v59  ;;  %v408_v59 = vpack.c.bf16 %v376_v51, %v376_v51  ;;  %v9085_v51 = vld [vmem:[%s10190_s14 + $0x790] ss:$8 sps:$4 sm:$0xff]  }
  0xc5   : > { %2134 = vmatpush1.bf16.msra.mxu0 %v8931_v60  ;;  %v9015_v60 = vld [vmem:[%s10190_s14 + $0x754] ss:$8 sps:$4 sm:$0xff]  }
  0xc6   : > { %2175 = vmatpush1.bf16.msra.mxu1 %v8934_v61  ;;  %2135 = vmatprep.subr.bf16.mxu0 %v8939_v62  ;;  %v9013_v61 = vld [vmem:[%s10190_s14 + $0x750] ss:$8 sps:$4 sm:$0xff]   ;;  %v9018_v62 = vld [vmem:[%s10190_s14 + $0x644] ss:$8 sps:$4 sm:$0xff]  }
  0xc7   : > { %2176 = vmatprep.subr.bf16.mxu1 %v8942_v63  ;;  %v9021_v63 = vld [vmem:[%s10190_s14 + $0x744] ss:$8 sps:$4 sm:$0xff]  }
  0xc9   : > { %2136 = vmatpush1.bf16.msra.mxu0 %v8937_v0  ;;  %v9016_v0 = vld [vmem:[%s10190_s14 + $0x640] ss:$8 sps:$4 sm:$0xff]  }
  0xca   : > { %2177 = vmatpush1.bf16.msra.mxu1 %v8940_v1  ;;  %2137 = vmatprep.subr.bf16.mxu0 %v8945_v2  ;;  %v9019_v1 = vld [vmem:[%s10190_s14 + $0x740] ss:$8 sps:$4 sm:$0xff]   ;;  %v9024_v2 = vld [vmem:[%s10190_s14 + $0x634] ss:$8 sps:$4 sm:$0xff]  }
  0xcb   : > { %2178 = vmatprep.subr.bf16.mxu1 %v8948_v3  ;;  %v9027_v3 = vld [vmem:[%s10190_s14 + $0x734] ss:$8 sps:$4 sm:$0xff]  }
  0xcd   : > { %2138 = vmatpush1.bf16.msra.mxu0 %v8943_v4  ;;  %v9022_v4 = vld [vmem:[%s10190_s14 + $0x630] ss:$8 sps:$4 sm:$0xff]  }
  0xce   : > { %2179 = vmatpush1.bf16.msra.mxu1 %v8946_v5  ;;  %2139 = vmatprep.subr.bf16.mxu0 %v8951_v6  ;;  %v9025_v5 = vld [vmem:[%s10190_s14 + $0x730] ss:$8 sps:$4 sm:$0xff]   ;;  %v9030_v6 = vld [vmem:[%s10190_s14 + $0x624] ss:$8 sps:$4 sm:$0xff]  }
  0xcf   : > { %2180 = vmatprep.subr.bf16.mxu1 %v8954_v7  ;;  %v9033_v7 = vld [vmem:[%s10190_s14 + $0x724] ss:$8 sps:$4 sm:$0xff]  }
  0xd1   : > { %2140 = vmatpush2.bf16.msra.mxu0 %v8949_v8  ;;  %v9028_v8 = vld [vmem:[%s10190_s14 + $0x620] ss:$8 sps:$4 sm:$0xff]  }
  0xd2   : > { %2181 = vmatpush2.bf16.msra.mxu1 %v8952_v9  ;;  %2141 = vmatprep.subr.bf16.mxu0 %v8957_v10  ;;  %v9031_v9 = vld [vmem:[%s10190_s14 + $0x720] ss:$8 sps:$4 sm:$0xff]   ;;  %v9036_v10 = vld [vmem:[%s10190_s14 + $0x614] ss:$8 sps:$4 sm:$0xff]  }
  0xd3   : > { %2182 = vmatprep.subr.bf16.mxu1 %v8960_v11  ;;  %v9039_v11 = vld [vmem:[%s10190_s14 + $0x714] ss:$8 sps:$4 sm:$0xff]  }
  0xd5   : > { %2142 = vmatpush2.bf16.msra.mxu0 %v8955_v12  ;;  %v9034_v12 = vld [vmem:[%s10190_s14 + $0x610] ss:$8 sps:$4 sm:$0xff]  }
  0xd6   : > { %2183 = vmatpush2.bf16.msra.mxu1 %v8958_v13  ;;  %2143 = vmatprep.subr.bf16.mxu0 %v8963_v14  ;;  %v9037_v13 = vld [vmem:[%s10190_s14 + $0x710] ss:$8 sps:$4 sm:$0xff]   ;;  %v9042_v14 = vld [vmem:[%s10190_s14 + $0x604] ss:$8 sps:$4 sm:$0xff]  }
  0xd7   : > { %2184 = vmatprep.subr.bf16.mxu1 %v8966_v15  ;;  %v9045_v15 = vld [vmem:[%s10190_s14 + $0x704] ss:$8 sps:$4 sm:$0xff]  }
  0xd9   : > { %2144 = vmatpush2.bf16.msra.mxu0 %v8961_v16  ;;  %v9040_v16 = vld [vmem:[%s10190_s14 + $0x600] ss:$8 sps:$4 sm:$0xff]  }
  0xda   : > { %2185 = vmatpush2.bf16.msra.mxu1 %v8964_v17  ;;  %2145 = vmatprep.subr.bf16.mxu0 %v8969_v18  ;;  %v9043_v17 = vld [vmem:[%s10190_s14 + $0x700] ss:$8 sps:$4 sm:$0xff]   ;;  %v9048_v18 = vld [vmem:[%s10190_s14 + $0x6f4] ss:$8 sps:$4 sm:$0xff]  }
  0xdb   : > { %2186 = vmatprep.subr.bf16.mxu1 %v8972_v19  ;;  %v9051_v19 = vld [vmem:[%s10190_s14 + $0x7f4] ss:$8 sps:$4 sm:$0xff]  }
  0xdd   : > { %2146 = vmatpush2.bf16.msra.mxu0 %v8967_v20  ;;  %v9046_v20 = vld [vmem:[%s10190_s14 + $0x6f0] ss:$8 sps:$4 sm:$0xff]  }
  0xde   : > { %2187 = vmatpush2.bf16.msra.mxu1 %v8970_v21  ;;  %2147 = vmatprep.subr.bf16.mxu0 %v8975_v22  ;;  %v9049_v21 = vld [vmem:[%s10190_s14 + $0x7f0] ss:$8 sps:$4 sm:$0xff]   ;;  %v9054_v22 = vld [vmem:[%s10190_s14 + $0x6e4] ss:$8 sps:$4 sm:$0xff]  }
  0xdf   : > { %2188 = vmatprep.subr.bf16.mxu1 %v8978_v23  ;;  %v9057_v23 = vld [vmem:[%s10190_s14 + $0x7e4] ss:$8 sps:$4 sm:$0xff]  }
  0xe1   : > { %2148 = vmatpush2.bf16.msra.mxu0 %v8973_v24  ;;  %v9052_v24 = vld [vmem:[%s10190_s14 + $0x6e0] ss:$8 sps:$4 sm:$0xff]  }
  0xe2   : > { %2189 = vmatpush2.bf16.msra.mxu1 %v8976_v25  ;;  %2149 = vmatprep.subr.bf16.mxu0 %v8981_v26  ;;  %v9055_v25 = vld [vmem:[%s10190_s14 + $0x7e0] ss:$8 sps:$4 sm:$0xff]   ;;  %v9060_v26 = vld [vmem:[%s10190_s14 + $0x6d4] ss:$8 sps:$4 sm:$0xff]  }
  0xe3   : > { %2190 = vmatprep.subr.bf16.mxu1 %v8984_v27  ;;  %v9063_v27 = vld [vmem:[%s10190_s14 + $0x7d4] ss:$8 sps:$4 sm:$0xff]  }
  0xe5   : > { %2150 = vmatpush2.bf16.msra.mxu0 %v8979_v29  ;;  %v9061_v29 = vld [vmem:[%s10190_s14 + $0x7d0] ss:$8 sps:$4 sm:$0xff]  }
  0xe6   : > { %2191 = vmatpush2.bf16.msra.mxu1 %v8982_v30  ;;  %2151 = vmatprep.subr.bf16.mxu0 %v8987_v31  ;;  %v9066_v30 = vld [vmem:[%s10190_s14 + $0x6c4] ss:$8 sps:$4 sm:$0xff]  }
  0xe7   : > { %2192 = vmatprep.subr.bf16.mxu1 %v8990_v32  ;;  %v9069_v31 = vld [vmem:[%s10190_s14 + $0x7c4] ss:$8 sps:$4 sm:$0xff]   ;;  %v9064_v32 = vld [vmem:[%s10190_s14 + $0x6c0] ss:$8 sps:$4 sm:$0xff]  }
  0xe9   : > { %2152 = vmatpush2.bf16.msra.mxu0 %v8985_v33  ;;  %v9067_v33 = vld [vmem:[%s10190_s14 + $0x7c0] ss:$8 sps:$4 sm:$0xff]  }
  0xea   : > { %2193 = vmatpush2.bf16.msra.mxu1 %v8988_v34  ;;  %2153 = vmatprep.subr.bf16.mxu0 %v8993_v37  ;;  %v9072_v34 = vld [vmem:[%s10190_s14 + $0x6b4] ss:$8 sps:$4 sm:$0xff]   ;;  %v9070_v37 = vld [vmem:[%s10190_s14 + $0x6b0] ss:$8 sps:$4 sm:$0xff]  }
  0xeb   : > { %2194 = vmatprep.subr.bf16.mxu1 %v8996_v38  ;;  %v9073_v38 = vld [vmem:[%s10190_s14 + $0x7b0] ss:$8 sps:$4 sm:$0xff]  }
  0xed   : > { %2154 = vmatpush2.bf16.msra.mxu0 %v8991_v40  ;;  %v9078_v40 = vld [vmem:[%s10190_s14 + $0x6a4] ss:$8 sps:$4 sm:$0xff]  }
  0xee   : > { %2195 = vmatpush2.bf16.msra.mxu1 %v8994_v41  ;;  %2205 = vmatprep.subr.bf16.mxu0 %v9000_v45  ;;  %v9081_v41 = vld [vmem:[%s10190_s14 + $0x7a4] ss:$8 sps:$4 sm:$0xff]   ;;  %v9076_v45 = vld [vmem:[%s10190_s14 + $0x6a0] ss:$8 sps:$4 sm:$0xff]  }
  0xef   : > { %2246 = vmatprep.subr.bf16.mxu1 %v9003_v46  ;;  %v9079_v46 = vld [vmem:[%s10190_s14 + $0x7a0] ss:$8 sps:$4 sm:$0xff]  }
  0xf0   : > { %2156 = vmatmul.mubr.bf16.vlgmr.msra.gmra.mxu0 %v401_v52  ;;  %v9090_v52 = vld [vmem:[%s10190_s14 + $0x684] ss:$8 sps:$4 sm:$0xff]  }
  0xf1   : > { %2197 = vmatmul.mubr.bf16.vlgmr.msra.gmra.mxu1 %v403_v53  ;;  %2206 = vmatpush1.bf16.msra.mxu0 %v8998_v47  ;;  %v9084_v47 = vld [vmem:[%s10190_s14 + $0x694] ss:$8 sps:$4 sm:$0xff]   ;;  %v9093_v53 = vld [vmem:[%s10190_s14 + $0x784] ss:$8 sps:$4 sm:$0xff]  }
  0xf2   : > { %2247 = vmatpush1.bf16.msra.mxu1 %v9001_v48  ;;  %2207 = vmatprep.subr.bf16.mxu0 %v9006_v54  ;;  %v9087_v48 = vld [vmem:[%s10190_s14 + $0x794] ss:$8 sps:$4 sm:$0xff]   ;;  %v9088_v54 = vld [vmem:[%s10190_s14 + $0x680] ss:$8 sps:$4 sm:$0xff]  }
  0xf3   : > { %2248 = vmatprep.subr.bf16.mxu1 %v9009_v55  ;;  %2237 = vmatprep.mubr.bf16.mxu0 %v406_v58  ;;  %v9091_v55 = vld [vmem:[%s10190_s14 + $0x780] ss:$8 sps:$4 sm:$0xff]   ;;  %v10529_v58 = vsub.s32 1, %v10238_v43 }
  0xf4   : > { %2278 = vmatprep.mubr.bf16.mxu1 %v408_v59  ;;  %v405_v59 = vpack.c.bf16 %v10439_v42, %v10439_v42 }
  0xf5   : > { %2208 = vmatpush1.bf16.msra.mxu0 %v9004_v56  ;;  %v667_v56 = vld [vmem:[%s10520_s28] sm:$0x3] }
  0xf6   : > { %2249 = vmatpush1.bf16.msra.mxu1 %v9007_v57  ;;  %2209 = vmatprep.subr.bf16.mxu0 %v9012_v35  ;;  %v10526_v57 = vsub.s32 0, %v10238_v43  ;;  %v407_v35 = vpack.c.bf16 %v10442_v44, %v10442_v44 }
  0xf7   : > { %2250 = vmatprep.subr.bf16.mxu1 %v9015_v60 }
  0xf8   : > { %v672_v60 = vrot.slane %v667_v56, %v10526_v57 }
  0xf9   : > { %2210 = vmatpush1.bf16.msra.mxu0 %v9010_v39  ;;  %v676_v39 = vrot.slane %v667_v56, %v10529_v58  ;;  %v9163_v56 = vld [vmem:[%s10417_s17 + $0xc4] ss:$8 sps:$4 sm:$0xff]  }
  0xfa   : > { %2251 = vmatpush1.bf16.msra.mxu1 %v9013_v61  ;;  %2211 = vmatprep.subr.bf16.mxu0 %v9018_v62 }
  0xfb   : > { %2252 = vmatprep.subr.bf16.mxu1 %v9021_v63 }
  0xfd   : > { %2212 = vmatpush1.bf16.msra.mxu0 %v9016_v0 }
  0xfe   : > { %2253 = vmatpush1.bf16.msra.mxu1 %v9019_v1  ;;  %2213 = vmatprep.subr.bf16.mxu0 %v9024_v2 }
  0xff   : > { %2254 = vmatprep.subr.bf16.mxu1 %v9027_v3 }
 0x101   : > { %2214 = vmatpush1.bf16.msra.mxu0 %v9022_v4 }
 0x102   : > { %2255 = vmatpush1.bf16.msra.mxu1 %v9025_v5  ;;  %2215 = vmatprep.subr.bf16.mxu0 %v9030_v6  ;;  %v9095_v6 = vld [vmem:[%s10417_s17 + $0x70] ss:$8 sps:$4 sm:$0xff]  }
 0x103   : > { %2256 = vmatprep.subr.bf16.mxu1 %v9033_v7  ;;  %v9097_v7 = vld [vmem:[%s10417_s17 + $0x74] ss:$8 sps:$4 sm:$0xff]  }
 0x105   : > { %2216 = vmatpush1.bf16.msra.mxu0 %v9028_v8  ;;  %v9098_v8 = vld [vmem:[%s10190_s14 + $0x870] ss:$8 sps:$4 sm:$0xff]  }
 0x106   : > { %2257 = vmatpush1.bf16.msra.mxu1 %v9031_v9  ;;  %2217 = vmatprep.subr.bf16.mxu0 %v9036_v10  ;;  %v9100_v9 = vld [vmem:[%s10190_s14 + $0x874] ss:$8 sps:$4 sm:$0xff]   ;;  %v9103_v10 = vld [vmem:[%s10417_s17 + $0x64] ss:$8 sps:$4 sm:$0xff]  }
 0x107   : > { %2258 = vmatprep.subr.bf16.mxu1 %v9039_v11  ;;  %v9106_v11 = vld [vmem:[%s10190_s14 + $0x864] ss:$8 sps:$4 sm:$0xff]  }
 0x109   : > { %2218 = vmatpush1.bf16.msra.mxu0 %v9034_v12  ;;  %v9101_v12 = vld [vmem:[%s10417_s17 + $0x60] ss:$8 sps:$4 sm:$0xff]  }
 0x10a   : > { %2259 = vmatpush1.bf16.msra.mxu1 %v9037_v13  ;;  %2219 = vmatprep.subr.bf16.mxu0 %v9042_v14  ;;  %v9104_v13 = vld [vmem:[%s10190_s14 + $0x860] ss:$8 sps:$4 sm:$0xff]   ;;  %v9109_v14 = vld [vmem:[%s10417_s17 + $0x54] ss:$8 sps:$4 sm:$0xff]  }
 0x10b   : > { %2260 = vmatprep.subr.bf16.mxu1 %v9045_v15  ;;  %v9112_v15 = vld [vmem:[%s10190_s14 + $0x854] ss:$8 sps:$4 sm:$0xff]  }
 0x10d   : > { %2220 = vmatpush1.bf16.msra.mxu0 %v9040_v16  ;;  %v9107_v16 = vld [vmem:[%s10417_s17 + $0x50] ss:$8 sps:$4 sm:$0xff]  }
 0x10e   : > { %2261 = vmatpush1.bf16.msra.mxu1 %v9043_v17  ;;  %2221 = vmatprep.subr.bf16.mxu0 %v9048_v18  ;;  %v9110_v17 = vld [vmem:[%s10190_s14 + $0x850] ss:$8 sps:$4 sm:$0xff]   ;;  %v9115_v18 = vld [vmem:[%s10417_s17 + $0x44] ss:$8 sps:$4 sm:$0xff]  }
 0x10f   : > { %2262 = vmatprep.subr.bf16.mxu1 %v9051_v19  ;;  %v9118_v19 = vld [vmem:[%s10190_s14 + $0x844] ss:$8 sps:$4 sm:$0xff]  }
 0x111   : > { %2222 = vmatpush2.bf16.msra.mxu0 %v9046_v20  ;;  %v9113_v20 = vld [vmem:[%s10417_s17 + $0x40] ss:$8 sps:$4 sm:$0xff]  }
 0x112   : > { %2263 = vmatpush2.bf16.msra.mxu1 %v9049_v21  ;;  %2223 = vmatprep.subr.bf16.mxu0 %v9054_v22  ;;  %v9116_v21 = vld [vmem:[%s10190_s14 + $0x840] ss:$8 sps:$4 sm:$0xff]   ;;  %v9121_v22 = vld [vmem:[%s10417_s17 + $0x34] ss:$8 sps:$4 sm:$0xff]  }
 0x113   : > { %2264 = vmatprep.subr.bf16.mxu1 %v9057_v23  ;;  %v9124_v23 = vld [vmem:[%s10190_s14 + $0x834] ss:$8 sps:$4 sm:$0xff]  }
 0x115   : > { %2224 = vmatpush2.bf16.msra.mxu0 %v9052_v24  ;;  %v9119_v24 = vld [vmem:[%s10417_s17 + $0x30] ss:$8 sps:$4 sm:$0xff]  }
 0x116   : > { %2265 = vmatpush2.bf16.msra.mxu1 %v9055_v25  ;;  %2225 = vmatprep.subr.bf16.mxu0 %v9060_v26  ;;  %v9122_v25 = vld [vmem:[%s10190_s14 + $0x830] ss:$8 sps:$4 sm:$0xff]   ;;  %v9127_v26 = vld [vmem:[%s10417_s17 + $0x24] ss:$8 sps:$4 sm:$0xff]  }
 0x117   : > { %2266 = vmatprep.subr.bf16.mxu1 %v9063_v27  ;;  %v9125_v27 = vld [vmem:[%s10417_s17 + $0x20] ss:$8 sps:$4 sm:$0xff]  }
 0x119   : > { %2226 = vmatpush2.bf16.msra.mxu0 %v9058_v28  ;;  %v9130_v28 = vld [vmem:[%s10190_s14 + $0x824] ss:$8 sps:$4 sm:$0xff]  }
 0x11a   : > { %2267 = vmatpush2.bf16.msra.mxu1 %v9061_v29  ;;  %2227 = vmatprep.subr.bf16.mxu0 %v9066_v30  ;;  %v9128_v29 = vld [vmem:[%s10190_s14 + $0x820] ss:$8 sps:$4 sm:$0xff]   ;;  %v9133_v30 = vld [vmem:[%s10417_s17 + $0x14] ss:$8 sps:$4 sm:$0xff]  }
 0x11b   : > { %2268 = vmatprep.subr.bf16.mxu1 %v9069_v31  ;;  %v9136_v31 = vld [vmem:[%s10190_s14 + $0x814] ss:$8 sps:$4 sm:$0xff]  }
 0x11d   : > { %2228 = vmatpush2.bf16.msra.mxu0 %v9064_v32  ;;  %v9131_v32 = vld [vmem:[%s10417_s17 + $0x10] ss:$8 sps:$4 sm:$0xff]  }
 0x11e   : > { %2269 = vmatpush2.bf16.msra.mxu1 %v9067_v33  ;;  %2229 = vmatprep.subr.bf16.mxu0 %v9072_v34  ;;  %v9134_v33 = vld [vmem:[%s10190_s14 + $0x810] ss:$8 sps:$4 sm:$0xff]   ;;  %v9139_v34 = vld [vmem:[%s10417_s17 + $0x4] ss:$8 sps:$4 sm:$0xff]  }
 0x11f   : > { %2270 = vmatprep.subr.bf16.mxu1 %v9075_v36  ;;  %v9142_v36 = vld [vmem:[%s10190_s14 + $0x804] ss:$8 sps:$4 sm:$0xff]  }
 0x121   : > { %2230 = vmatpush2.bf16.msra.mxu0 %v9070_v37  ;;  %v9137_v37 = vld [vmem:[%s10417_s17] ss:$8 sps:$4 sm:$0xff]  }
 0x122   : > { %2271 = vmatpush2.bf16.msra.mxu1 %v9073_v38  ;;  %2231 = vmatprep.subr.bf16.mxu0 %v9078_v40  ;;  %v9140_v38 = vld [vmem:[%s10190_s14 + $0x800] ss:$8 sps:$4 sm:$0xff]   ;;  %v9145_v40 = vld [vmem:[%s10417_s17 + $0xf4] ss:$8 sps:$4 sm:$0xff]  }
 0x123   : > { %2272 = vmatprep.subr.bf16.mxu1 %v9081_v41  ;;  %v9148_v41 = vld [vmem:[%s10190_s14 + $0x8f4] ss:$8 sps:$4 sm:$0xff]  }
 0x125   : > { %2232 = vmatpush2.bf16.msra.mxu0 %v9076_v45  ;;  %v9143_v45 = vld [vmem:[%s10417_s17 + $0xf0] ss:$8 sps:$4 sm:$0xff]  }
 0x126   : > { %2273 = vmatpush2.bf16.msra.mxu1 %v9079_v46  ;;  %2233 = vmatprep.subr.bf16.mxu0 %v9084_v47  ;;  %v9146_v46 = vld [vmem:[%s10190_s14 + $0x8f0] ss:$8 sps:$4 sm:$0xff]   ;;  %v9151_v47 = vld [vmem:[%s10417_s17 + $0xe4] ss:$8 sps:$4 sm:$0xff]  }
 0x127   : > { %2274 = vmatprep.subr.bf16.mxu1 %v9087_v48  ;;  %v9154_v48 = vld [vmem:[%s10190_s14 + $0x8e4] ss:$8 sps:$4 sm:$0xff]  }
 0x129   : > { %2234 = vmatpush2.bf16.msra.mxu0 %v9082_v50  ;;  %v9149_v50 = vld [vmem:[%s10417_s17 + $0xe0] ss:$8 sps:$4 sm:$0xff]  }
 0x12a   : > { %2275 = vmatpush2.bf16.msra.mxu1 %v9085_v51  ;;  %2235 = vmatprep.subr.bf16.mxu0 %v9090_v52  ;;  %v9152_v51 = vld [vmem:[%s10190_s14 + $0x8e0] ss:$8 sps:$4 sm:$0xff]   ;;  %v9157_v52 = vld [vmem:[%s10417_s17 + $0xd4] ss:$8 sps:$4 sm:$0xff]  }
 0x12b   : > { %2276 = vmatprep.subr.bf16.mxu1 %v9093_v53  ;;  %v9160_v53 = vld [vmem:[%s10190_s14 + $0x8d4] ss:$8 sps:$4 sm:$0xff]  }
 0x12d   : > { %2236 = vmatpush2.bf16.msra.mxu0 %v9088_v54  ;;  %v9155_v54 = vld [vmem:[%s10417_s17 + $0xd0] ss:$8 sps:$4 sm:$0xff]  }
 0x12e   : > { %2277 = vmatpush2.bf16.msra.mxu1 %v9091_v55  ;;  %2500 = vmatprep.subr.bf16.mxu0 %v9097_v7  ;;  %v9158_v55 = vld [vmem:[%s10190_s14 + $0x8d0] ss:$8 sps:$4 sm:$0xff]  }
 0x12f   : > { %4214 = vmatprep.subr.bf16.mxu1 %v9100_v9 }
 0x130   : > { %v1993_v61 = vpop.f32.mrf.mxu0  ;;  %2238 = vmatmul.mubr.bf16.vlgmr.msra.gmra.mxu0 %v405_v59  ;;  %v9166_v59 = vld [vmem:[%s10190_s14 + $0x8c4] ss:$8 sps:$4 sm:$0xff]  }
 0x131   : > { %v2034_v62 = vpop.f32.mrf.mxu1  ;;  %2279 = vmatmul.mubr.bf16.vlgmr.msra.gmra.mxu1 %v407_v35  ;;  %v1994_v43 = vadd.f32 %v1993_v61, %v672_v60  ;;  %2501 = vmatpush1.bf16.msra.mxu0 %v9095_v6  ;;  %v9161_v35 = vld [vmem:[%s10417_s17 + $0xc0] ss:$8 sps:$4 sm:$0xff]   ;;  %v9172_v61 = vld [vmem:[%s10190_s14 + $0x8b4] ss:$8 sps:$4 sm:$0xff]  }
 0x132   : > { %v1995_v42 = vpop.f32.mrf.mxu0  ;;  %4215 = vmatpush1.bf16.msra.mxu1 %v9098_v8  ;;  %2502 = vmatprep.subr.bf16.mxu0 %v9103_v10  ;;  %v9164_v60 = vld [vmem:[%s10190_s14 + $0x8c0] ss:$8 sps:$4 sm:$0xff]   ;;  %v9181_v8 = vld [vmem:[%s10417_s17 + $0x94] ss:$8 sps:$4 sm:$0xff]  }
 0x133   : > { %v2036_v63 = vpop.f32.mrf.mxu1  ;;  %v10537_v44 = vadd.f32 %v2034_v62, %v1994_v43  ;;  %v1996_v0 = vadd.f32 %v1995_v42, %v676_v39  ;;  %4216 = vmatprep.subr.bf16.mxu1 %v9106_v11  ;;  %v9169_v39 = vld [vmem:[%s10417_s17 + $0xb4] ss:$8 sps:$4 sm:$0xff]   ;;  %v9167_v62 = vld [vmem:[%s10417_s17 + $0xb0] ss:$8 sps:$4 sm:$0xff]   ;;  %v9175_v42 = vld [vmem:[%s10417_s17 + $0xa4] ss:$8 sps:$4 sm:$0xff]  }
 0x134   : > { %v1997_v1 = vpop.f32.mrf.mxu0  ;;  %v9170_v43 = vld [vmem:[%s10190_s14 + $0x8b0] ss:$8 sps:$4 sm:$0xff]  }
 0x135   : > { %v2038_v2 = vpop.f32.mrf.mxu1  ;;  %v10539_v3 = vadd.f32 %v2036_v63, %v1996_v0  ;;  %2503 = vmatpush1.bf16.msra.mxu0 %v9101_v12  ;;  %v9173_v63 = vld [vmem:[%s10417_s17 + $0xa0] ss:$8 sps:$4 sm:$0xff]   ;;  %v9179_v11 = vld [vmem:[%s10417_s17 + $0x90] ss:$8 sps:$4 sm:$0xff]  }
 0x136   : > { %v1998_v4 = vpop.f32.mrf.mxu0  ;;  %4217 = vmatpush1.bf16.msra.mxu1 %v9104_v13  ;;  %2504 = vmatprep.subr.bf16.mxu0 %v9109_v14  ;;  %v9178_v2 = vld [vmem:[%s10190_s14 + $0x8a4] ss:$8 sps:$4 sm:$0xff]   ;;  %v9184_v13 = vld [vmem:[%s10190_s14 + $0x894] ss:$8 sps:$4 sm:$0xff]  }
 0x137   : > { %v2039_v5 = vpop.f32.mrf.mxu1  ;;  %4218 = vmatprep.subr.bf16.mxu1 %v9112_v15  ;;  %v9182_v15 = vld [vmem:[%s10190_s14 + $0x890] ss:$8 sps:$4 sm:$0xff]  }
 0x138   : > { %v9176_v5 = vld [vmem:[%s10190_s14 + $0x8a0] ss:$8 sps:$4 sm:$0xff]  }
 0x139   : > { %2505 = vmatpush1.bf16.msra.mxu0 %v9107_v16 }
 0x13a   : > { %4219 = vmatpush1.bf16.msra.mxu1 %v9110_v17  ;;  %2506 = vmatprep.subr.bf16.mxu0 %v9115_v18  ;;  %v9187_v18 = vld [vmem:[%s10417_s17 + $0x84] ss:$8 sps:$4 sm:$0xff]  }
 0x13b   : > { %4220 = vmatprep.subr.bf16.mxu1 %v9118_v19  ;;  %v9188_v19 = vld [vmem:[%s10190_s14 + $0x880] ss:$8 sps:$4 sm:$0xff]  }
 0x13d   : > { %2507 = vmatpush1.bf16.msra.mxu0 %v9113_v20  ;;  %v9190_v20 = vld [vmem:[%s10190_s14 + $0x884] ss:$8 sps:$4 sm:$0xff]  }
 0x13e   : > { %4221 = vmatpush1.bf16.msra.mxu1 %v9116_v21  ;;  %2508 = vmatprep.subr.bf16.mxu0 %v9121_v22  ;;  %v10612_v21 = vld [vmem:[%s10249_s11 + $0x20] sm:$0xff] }
 0x13f   : > { %4222 = vmatprep.subr.bf16.mxu1 %v9124_v23  ;;  %v2570_v22 = vrot.slane %v10612_v21, %v10252_v49  ;;  %v9193_v23 = vld [vmem:[%s10190_s14 + $0x974] ss:$8 sps:$4 sm:$0xff]  }
 0x141   : > { %2509 = vmatpush1.bf16.msra.mxu0 %v9119_v24  ;;  %v2578_v24 = vcombine.high %v2570_v22, %v2570_v22 }
 0x142   : > { %4223 = vmatpush1.bf16.msra.mxu1 %v9122_v25  ;;  %2510 = vmatprep.subr.bf16.mxu0 %v9127_v26  ;;  %v9196_v26 = vld [vmem:[%s10190_s14 + $0xa74] ss:$8 sps:$4 sm:$0xff]  }
 0x143   : > { %4224 = vmatprep.subr.bf16.mxu1 %v9130_v28  ;;  %v2648_v25 = vpack.c.bf16 %v2578_v24, %v2578_v24  ;;  %v2647_v28 = vpack.c.bf16 %v2570_v22, %v2570_v22  ;;  %v9309_v22 = vld [vmem:[%s10190_s14 + $0xc40] ss:$8 sps:$4 sm:$0xff]   ;;  %v9315_v24 = vld [vmem:[%s10190_s14 + $0xc30] ss:$8 sps:$4 sm:$0xff]  }
 0x145   : > { %2511 = vmatpush1.bf16.msra.mxu0 %v9125_v27  ;;  %v9194_v27 = vld [vmem:[%s10190_s14 + $0xa70] ss:$8 sps:$4 sm:$0xff]   ;;  %4246 = vmatprep.mubr.bf16.mxu1 %v2648_v25  ;;  %v9323_v25 = vld [vmem:[%s10190_s14 + $0xc24] ss:$8 sps:$4 sm:$0xff]  }
 0x146   : > { %4225 = vmatpush1.bf16.msra.mxu1 %v9128_v29  ;;  %2512 = vmatprep.subr.bf16.mxu0 %v9133_v30  ;;  %v9202_v29 = vld [vmem:[%s10190_s14 + $0xa64] ss:$8 sps:$4 sm:$0xff]   ;;  %v9200_v30 = vld [vmem:[%s10190_s14 + $0xa60] ss:$8 sps:$4 sm:$0xff]  }
 0x147   : > { %4226 = vmatprep.subr.bf16.mxu1 %v9136_v31  ;;  %v9208_v31 = vld [vmem:[%s10190_s14 + $0xa54] ss:$8 sps:$4 sm:$0xff]  }
 0x149   : > { %2513 = vmatpush1.bf16.msra.mxu0 %v9131_v32  ;;  %v9206_v32 = vld [vmem:[%s10190_s14 + $0xa50] ss:$8 sps:$4 sm:$0xff]  }
 0x14a   : > { %4227 = vmatpush1.bf16.msra.mxu1 %v9134_v33  ;;  %2514 = vmatprep.subr.bf16.mxu0 %v9139_v34  ;;  %v9214_v33 = vld [vmem:[%s10190_s14 + $0xa44] ss:$8 sps:$4 sm:$0xff]   ;;  %v9212_v34 = vld [vmem:[%s10190_s14 + $0xa40] ss:$8 sps:$4 sm:$0xff]  }
 0x14b   : > { %4228 = vmatprep.subr.bf16.mxu1 %v9142_v36  ;;  %v9220_v36 = vld [vmem:[%s10190_s14 + $0xa34] ss:$8 sps:$4 sm:$0xff]  }
 0x14d   : > { %2515 = vmatpush1.bf16.msra.mxu0 %v9137_v37  ;;  %v9218_v37 = vld [vmem:[%s10190_s14 + $0xa30] ss:$8 sps:$4 sm:$0xff]  }
 0x14e   : > { %4229 = vmatpush1.bf16.msra.mxu1 %v9140_v38  ;;  %2516 = vmatprep.subr.bf16.mxu0 %v9145_v40  ;;  %v9226_v38 = vld [vmem:[%s10190_s14 + $0xa24] ss:$8 sps:$4 sm:$0xff]   ;;  %v9224_v40 = vld [vmem:[%s10190_s14 + $0xa20] ss:$8 sps:$4 sm:$0xff]  }
 0x14f   : > { %4230 = vmatprep.subr.bf16.mxu1 %v9148_v41  ;;  %v9232_v41 = vld [vmem:[%s10190_s14 + $0xa14] ss:$8 sps:$4 sm:$0xff]  }
 0x151   : > { %2517 = vmatpush2.bf16.msra.mxu0 %v9143_v45  ;;  %v9230_v45 = vld [vmem:[%s10190_s14 + $0xa10] ss:$8 sps:$4 sm:$0xff]  }
 0x152   : > { %4231 = vmatpush2.bf16.msra.mxu1 %v9146_v46  ;;  %2518 = vmatprep.subr.bf16.mxu0 %v9151_v47  ;;  %v9238_v46 = vld [vmem:[%s10190_s14 + $0xa04] ss:$8 sps:$4 sm:$0xff]   ;;  %v9236_v47 = vld [vmem:[%s10190_s14 + $0xa00] ss:$8 sps:$4 sm:$0xff]  }
 0x153   : > { %4232 = vmatprep.subr.bf16.mxu1 %v9154_v48  ;;  %v9244_v48 = vld [vmem:[%s10190_s14 + $0xaf4] ss:$8 sps:$4 sm:$0xff]  }
 0x155   : > { %2519 = vmatpush2.bf16.msra.mxu0 %v9149_v50  ;;  %v9242_v50 = vld [vmem:[%s10190_s14 + $0xaf0] ss:$8 sps:$4 sm:$0xff]  }
 0x156   : > { %4233 = vmatpush2.bf16.msra.mxu1 %v9152_v51  ;;  %2520 = vmatprep.subr.bf16.mxu0 %v9157_v52  ;;  %v9250_v51 = vld [vmem:[%s10190_s14 + $0xae4] ss:$8 sps:$4 sm:$0xff]   ;;  %v9248_v52 = vld [vmem:[%s10190_s14 + $0xae0] ss:$8 sps:$4 sm:$0xff]  }
 0x157   : > { %4234 = vmatprep.subr.bf16.mxu1 %v9160_v53  ;;  %v9256_v53 = vld [vmem:[%s10190_s14 + $0xad4] ss:$8 sps:$4 sm:$0xff]  }
 0x159   : > { %2521 = vmatpush2.bf16.msra.mxu0 %v9155_v54  ;;  %v9254_v54 = vld [vmem:[%s10190_s14 + $0xad0] ss:$8 sps:$4 sm:$0xff]  }
 0x15a   : > { %4235 = vmatpush2.bf16.msra.mxu1 %v9158_v55  ;;  %2522 = vmatprep.subr.bf16.mxu0 %v9163_v56  ;;  %v9262_v55 = vld [vmem:[%s10190_s14 + $0xac4] ss:$8 sps:$4 sm:$0xff]   ;;  %v9260_v56 = vld [vmem:[%s10190_s14 + $0xac0] ss:$8 sps:$4 sm:$0xff]  }
 0x15b   : > { %4236 = vmatprep.subr.bf16.mxu1 %v9166_v59  ;;  %v9268_v59 = vld [vmem:[%s10190_s14 + $0xab4] ss:$8 sps:$4 sm:$0xff]  }
 0x15d   : > { %2523 = vmatpush2.bf16.msra.mxu0 %v9161_v35  ;;  %v9266_v35 = vld [vmem:[%s10190_s14 + $0xab0] ss:$8 sps:$4 sm:$0xff]  }
 0x15e   : > { %4237 = vmatpush2.bf16.msra.mxu1 %v9164_v60  ;;  %2524 = vmatprep.subr.bf16.mxu0 %v9169_v39 }
 0x15f   : > { %4238 = vmatprep.subr.bf16.mxu1 %v9172_v61 }
 0x161   : > { %2525 = vmatpush2.bf16.msra.mxu0 %v9167_v62  ;;  %v9274_v62 = vld [vmem:[%s10190_s14 + $0xaa4] ss:$8 sps:$4 sm:$0xff]  }
 0x162   : > { %4239 = vmatpush2.bf16.msra.mxu1 %v9170_v43  ;;  %2526 = vmatprep.subr.bf16.mxu0 %v9175_v42 }
 0x163   : > { %4240 = vmatprep.subr.bf16.mxu1 %v9178_v2 }
 0x165   : > { %2527 = vmatpush2.bf16.msra.mxu0 %v9173_v63  ;;  %v9272_v63 = vld [vmem:[%s10190_s14 + $0xaa0] ss:$8 sps:$4 sm:$0xff]  }
 0x166   : > { %4241 = vmatpush2.bf16.msra.mxu1 %v9176_v5  ;;  %2528 = vmatprep.subr.bf16.mxu0 %v9181_v8  ;;  %v10655_v8 = vld [vmem:[%s10249_s11 + $0x28] sm:$0xff] }
 0x167   : > { %4242 = vmatprep.subr.bf16.mxu1 %v9184_v13 }
 0x169   : > { %2529 = vmatpush2.bf16.msra.mxu0 %v9179_v11  ;;  %v9284_v11 = vld [vmem:[%s10190_s14 + $0xa80] ss:$8 sps:$4 sm:$0xff]  }
 0x16a   : > { %4243 = vmatpush2.bf16.msra.mxu1 %v9182_v15  ;;  %2530 = vmatprep.subr.bf16.mxu0 %v9187_v18  ;;  %v9293_v15 = vld [vmem:[%s10190_s14 + $0xc74] ss:$8 sps:$4 sm:$0xff]   ;;  %v9297_v18 = vld [vmem:[%s10190_s14 + $0xc60] ss:$8 sps:$4 sm:$0xff]  }
 0x16b   : > { %4244 = vmatprep.subr.bf16.mxu1 %v9190_v20  ;;  %v9311_v20 = vld [vmem:[%s10190_s14 + $0xc44] ss:$8 sps:$4 sm:$0xff]  }
 0x16e   : > { %4245 = vmatpush2.bf16.msra.mxu1 %v9188_v19  ;;  %v9303_v19 = vld [vmem:[%s10190_s14 + $0xc50] ss:$8 sps:$4 sm:$0xff]  }
 0x16f   : > { %4296 = vmatprep.subr.bf16.mxu1 %v9196_v26  ;;  %v9321_v26 = vld [vmem:[%s10190_s14 + $0xc20] ss:$8 sps:$4 sm:$0xff]  }
 0x170   : > { %v2075_v0 = vpop.f32.mrf.mxu0 }
 0x171   : > { %v2116_v1 = vpop.f32.mrf.mxu1  ;;  %v2076_v4 = vadd.f32 %v2075_v0, %v10537_v44  ;;  %4247 = vmatmul.mubr.bf16.vlgmr.msra.gmra.mxu1 %v2647_v28  ;;  %v9327_v28 = vld [vmem:[%s10190_s14 + $0xc10] ss:$8 sps:$4 sm:$0xff]  }
 0x172   : > { %v2077_v6 = vpop.f32.mrf.mxu0  ;;  %4297 = vmatpush1.bf16.msra.mxu1 %v9194_v27  ;;  %v9329_v27 = vld [vmem:[%s10190_s14 + $0xc14] ss:$8 sps:$4 sm:$0xff]  }
 0x173   : > { %v2118_v7 = vpop.f32.mrf.mxu1  ;;  %v10599_v9 = vadd.f32 %v2116_v1, %v2076_v4  ;;  %v2078_v10 = vadd.f32 %v2077_v6, %v10539_v3  ;;  %v9185_v3 = vld [vmem:[%s10417_s17 + $0x80] ss:$8 sps:$4 sm:$0xff]   ;;  %4298 = vmatprep.subr.bf16.mxu1 %v9202_v29  ;;  %v9280_v4 = vld [vmem:[%s10190_s14 + $0xa94] ss:$8 sps:$4 sm:$0xff]   ;;  %v9335_v29 = vld [vmem:[%s10190_s14 + $0xc04] ss:$8 sps:$4 sm:$0xff]  }
 0x174   : > { %v2079_v12 = vpop.f32.mrf.mxu0  ;;  %2531 = vmatpush2.bf16.msra.mxu0 %v9185_v3  ;;  %v9305_v3 = vld [vmem:[%s10190_s14 + $0xc54] ss:$8 sps:$4 sm:$0xff]  }
 0x175   : > { %v2120_v44 = vpop.f32.mrf.mxu1  ;;  %v10604_v14 = vadd.f32 %v2118_v7, %v2078_v10  ;;  %4255 = vmatprep.subr.bf16.mxu0 %v9193_v23  ;;  %v9278_v7 = vld [vmem:[%s10190_s14 + $0xa90] ss:$8 sps:$4 sm:$0xff]   ;;  %v9286_v10 = vld [vmem:[%s10190_s14 + $0xa84] ss:$8 sps:$4 sm:$0xff]   ;;  %v9317_v23 = vld [vmem:[%s10190_s14 + $0xc34] ss:$8 sps:$4 sm:$0xff]  }
 0x176   : > { %v2080_v16 = vpop.f32.mrf.mxu0  ;;  %4299 = vmatpush1.bf16.msra.mxu1 %v9200_v30  ;;  %v9333_v30 = vld [vmem:[%s10190_s14 + $0xc00] ss:$8 sps:$4 sm:$0xff]  }
 0x177   : > { %v2121_v17 = vpop.f32.mrf.mxu1  ;;  %4300 = vmatprep.subr.bf16.mxu1 %v9208_v31  ;;  %v9291_v16 = vld [vmem:[%s10190_s14 + $0xc70] ss:$8 sps:$4 sm:$0xff]   ;;  %v9341_v31 = vld [vmem:[%s10190_s14 + $0xcf4] ss:$8 sps:$4 sm:$0xff]  }
 0x178   : > { %v9299_v17 = vld [vmem:[%s10190_s14 + $0xc64] ss:$8 sps:$4 sm:$0xff]  }
 0x17a   : > { %4301 = vmatpush1.bf16.msra.mxu1 %v9206_v32  ;;  %v9339_v32 = vld [vmem:[%s10190_s14 + $0xcf0] ss:$8 sps:$4 sm:$0xff]  }
 0x17b   : > { %4302 = vmatprep.subr.bf16.mxu1 %v9214_v33  ;;  %v9347_v33 = vld [vmem:[%s10190_s14 + $0xce4] ss:$8 sps:$4 sm:$0xff]  }
 0x17e   : > { %4303 = vmatpush1.bf16.msra.mxu1 %v9212_v34  ;;  %v9345_v34 = vld [vmem:[%s10190_s14 + $0xce0] ss:$8 sps:$4 sm:$0xff]  }
 0x17f   : > { %4304 = vmatprep.subr.bf16.mxu1 %v9220_v36  ;;  %v9353_v36 = vld [vmem:[%s10190_s14 + $0xcd4] ss:$8 sps:$4 sm:$0xff]  }
 0x182   : > { %4305 = vmatpush1.bf16.msra.mxu1 %v9218_v37  ;;  %v9351_v37 = vld [vmem:[%s10190_s14 + $0xcd0] ss:$8 sps:$4 sm:$0xff]  }
 0x183   : > { %4306 = vmatprep.subr.bf16.mxu1 %v9226_v38  ;;  %v9359_v38 = vld [vmem:[%s10190_s14 + $0xcc4] ss:$8 sps:$4 sm:$0xff]  }
 0x186   : > { %4307 = vmatpush1.bf16.msra.mxu1 %v9224_v40  ;;  %v9357_v40 = vld [vmem:[%s10190_s14 + $0xcc0] ss:$8 sps:$4 sm:$0xff]  }
 0x187   : > { %4308 = vmatprep.subr.bf16.mxu1 %v9232_v41 }
 0x18a   : > { %4309 = vmatpush1.bf16.msra.mxu1 %v9230_v45  ;;  %v9365_v45 = vld [vmem:[%s10190_s14 + $0xcb4] ss:$8 sps:$4 sm:$0xff]  }
 0x18b   : > { %4310 = vmatprep.subr.bf16.mxu1 %v9238_v46  ;;  %v2563_v46 = vcombine.high %v10612_v21, %v10612_v21 }
 0x18e   : > { %4311 = vmatpush1.bf16.msra.mxu1 %v9236_v47  ;;  %v9363_v47 = vld [vmem:[%s10190_s14 + $0xcb0] ss:$8 sps:$4 sm:$0xff]  }
 0x18f   : > { %4312 = vmatprep.subr.bf16.mxu1 %v9244_v48 }
 0x192   : > { %4313 = vmatpush2.bf16.msra.mxu1 %v9242_v50 }
 0x193   : > { %4314 = vmatprep.subr.bf16.mxu1 %v9250_v51 }
 0x196   : > { %4315 = vmatpush2.bf16.msra.mxu1 %v9248_v52 }
 0x197   : > { %4316 = vmatprep.subr.bf16.mxu1 %v9256_v53  ;;  %v9371_v53 = vld [vmem:[%s10190_s14 + $0xca4] ss:$8 sps:$4 sm:$0xff]  }
 0x19a   : > { %4317 = vmatpush2.bf16.msra.mxu1 %v9254_v54 }
 0x19b   : > { %4318 = vmatprep.subr.bf16.mxu1 %v9262_v55 }
 0x19e   : > { %4319 = vmatpush2.bf16.msra.mxu1 %v9260_v56  ;;  %v9369_v56 = vld [vmem:[%s10190_s14 + $0xca0] ss:$8 sps:$4 sm:$0xff]  }
 0x19f   : > { %4320 = vmatprep.subr.bf16.mxu1 %v9268_v59 }
 0x1a2   : > { %4321 = vmatpush2.bf16.msra.mxu1 %v9266_v35 }
 0x1a3   : > { %4322 = vmatprep.subr.bf16.mxu1 %v9274_v62  ;;  %v9377_v62 = vld [vmem:[%s10190_s14 + $0xc94] ss:$8 sps:$4 sm:$0xff]  }
 0x1a6   : > { %4323 = vmatpush2.bf16.msra.mxu1 %v9272_v63 }
 0x1a7   : > { %4324 = vmatprep.subr.bf16.mxu1 %v9280_v4 }
 0x1aa   : > { %4325 = vmatpush2.bf16.msra.mxu1 %v9278_v7  ;;  %v9383_v7 = vld [vmem:[%s10190_s14 + $0xc84] ss:$8 sps:$4 sm:$0xff]  }
 0x1ab   : > { %4326 = vmatprep.subr.bf16.mxu1 %v9286_v10  ;;  %v9191_v10 = vld [vmem:[%s10190_s14 + $0x970] ss:$8 sps:$4 sm:$0xff]  }
 0x1ae   : > { %4327 = vmatpush2.bf16.msra.mxu1 %v9284_v11 }
 0x1af   : > { %4378 = vmatprep.subr.bf16.mxu1 %v9293_v15  ;;  %v9199_v15 = vld [vmem:[%s10190_s14 + $0x964] ss:$8 sps:$4 sm:$0xff]  }
 0x1b0   : > { %v2157_v60 = vpop.f32.mrf.mxu0 }
 0x1b1   : > { %v2198_v39 = vpop.f32.mrf.mxu1  ;;  %v2158_v61 = vadd.f32 %v2157_v60, %v10599_v9  ;;  %v2587_v9 = vrot.slane %v10655_v8, %v10252_v49 }
 0x1b2   : > { %v10645_v43 = vpop.f32.mrf.mxu0 }
 0x1b3   : > { %v10647_v42 = vpop.f32.mrf.mxu1  ;;  %v10650_v0 = vadd.f32 %v2198_v39, %v2158_v61  ;;  %v2595_v12 = vcombine.high %v2587_v9, %v2587_v9  ;;  %v2651_v13 = vpack.c.bf16 %v2587_v9, %v2587_v9  ;;  %v2160_v41 = vadd.f32 %v10645_v43, %v10604_v14 }
 0x1b4   : > { %v2161_v1 = vpop.f32.mrf.mxu0  ;;  %v10695_v14 = vrot.slane %v2563_v46, %v10252_v49  ;;  %v9235_v46 = vld [vmem:[%s10190_s14 + $0x904] ss:$8 sps:$4 sm:$0xff]  }
 0x1b5   : > { %v2202_v2 = vpop.f32.mrf.mxu1  ;;  %v2652_v44 = vpack.c.bf16 %v2595_v12, %v2595_v12  ;;  %v2201_v51 = vadd.f32 %v10647_v42, %v2160_v41  ;;  %v9381_v12 = vld [vmem:[%s10190_s14 + $0xc80] ss:$8 sps:$4 sm:$0xff]   ;;  %v9227_v41 = vld [vmem:[%s10190_s14 + $0x910] ss:$8 sps:$4 sm:$0xff]  }
 0x1b6   : > { %v2162_v5 = vpop.f32.mrf.mxu0  ;;  %v2579_v63 = vcombine.high %v10695_v14, %v10695_v14  ;;  %v10703_v2 = vld [vmem:[%s10249_s11 + $0x30] sm:$0xff] }
 0x1b7   : > { %v2203_v6 = vpop.f32.mrf.mxu1  ;;  %4328 = vmatprep.mubr.bf16.mxu1 %v2652_v44  ;;  %v2604_v5 = vrot.slane %v10703_v2, %v10252_v49 }
 0x1b8   : > { %4329 = vmatmul.mubr.bf16.vlgmr.msra.gmra.mxu1 %v2651_v13  ;;  %v2650_v11 = vpack.c.bf16 %v2579_v63, %v2579_v63  ;;  %v9448_v63 = vld [vmem:[%s10190_s14 + $0xed0] ss:$8 sps:$4 sm:$0xff]  }
 0x1b9   : > { %4379 = vmatpush1.bf16.msra.mxu1 %v9291_v16  ;;  %v2612_v44 = vcombine.high %v2604_v5, %v2604_v5 }
 0x1ba   : > { %4380 = vmatprep.subr.bf16.mxu1 %v9299_v17  ;;  %v2655_v17 = vpack.c.bf16 %v2604_v5, %v2604_v5  ;;  %v9454_v5 = vld [vmem:[%s10190_s14 + $0xec0] ss:$8 sps:$4 sm:$0xff]  }
 0x1bb   : > { %v2656_v16 = vpack.c.bf16 %v2612_v44, %v2612_v44  ;;  %v9468_v44 = vld [vmem:[%s10190_s14 + $0xea4] ss:$8 sps:$4 sm:$0xff]  }
 0x1bd   : > { %4381 = vmatpush1.bf16.msra.mxu1 %v9297_v18  ;;  %v9390_v18 = vld [vmem:[%s10190_s14 + $0xe74] ss:$8 sps:$4 sm:$0xff]   ;;  %4410 = vmatprep.mubr.bf16.mxu1 %v2656_v16  ;;  %v9466_v16 = vld [vmem:[%s10190_s14 + $0xea0] ss:$8 sps:$4 sm:$0xff]  }
 0x1be   : > { %4382 = vmatprep.subr.bf16.mxu1 %v9305_v3  ;;  %v9197_v3 = vld [vmem:[%s10190_s14 + $0x960] ss:$8 sps:$4 sm:$0xff]  }
 0x1c1   : > { %4383 = vmatpush1.bf16.msra.mxu1 %v9303_v19  ;;  %v9388_v19 = vld [vmem:[%s10190_s14 + $0xe70] ss:$8 sps:$4 sm:$0xff]  }
 0x1c2   : > { %4384 = vmatprep.subr.bf16.mxu1 %v9311_v20  ;;  %v9205_v20 = vld [vmem:[%s10190_s14 + $0x954] ss:$8 sps:$4 sm:$0xff]  }
 0x1c5   : > { %4385 = vmatpush1.bf16.msra.mxu1 %v9309_v22  ;;  %v9396_v22 = vld [vmem:[%s10190_s14 + $0xe64] ss:$8 sps:$4 sm:$0xff]  }
 0x1c6   : > { %4386 = vmatprep.subr.bf16.mxu1 %v9317_v23  ;;  %v9203_v23 = vld [vmem:[%s10190_s14 + $0x950] ss:$8 sps:$4 sm:$0xff]  }
 0x1c9   : > { %4387 = vmatpush1.bf16.msra.mxu1 %v9315_v24  ;;  %v9394_v24 = vld [vmem:[%s10190_s14 + $0xe60] ss:$8 sps:$4 sm:$0xff]  }
 0x1ca   : > { %4388 = vmatprep.subr.bf16.mxu1 %v9323_v25  ;;  %v9211_v25 = vld [vmem:[%s10190_s14 + $0x944] ss:$8 sps:$4 sm:$0xff]  }
 0x1cd   : > { %4389 = vmatpush1.bf16.msra.mxu1 %v9321_v26  ;;  %v9402_v26 = vld [vmem:[%s10190_s14 + $0xe54] ss:$8 sps:$4 sm:$0xff]  }
 0x1ce   : > { %4390 = vmatprep.subr.bf16.mxu1 %v9329_v27  ;;  %v9209_v27 = vld [vmem:[%s10190_s14 + $0x940] ss:$8 sps:$4 sm:$0xff]  }
 0x1d1   : > { %4391 = vmatpush1.bf16.msra.mxu1 %v9327_v28  ;;  %v9400_v28 = vld [vmem:[%s10190_s14 + $0xe50] ss:$8 sps:$4 sm:$0xff]  }
 0x1d2   : > { %4392 = vmatprep.subr.bf16.mxu1 %v9335_v29  ;;  %v9217_v29 = vld [vmem:[%s10190_s14 + $0x934] ss:$8 sps:$4 sm:$0xff]  }
 0x1d5   : > { %4393 = vmatpush1.bf16.msra.mxu1 %v9333_v30  ;;  %v9408_v30 = vld [vmem:[%s10190_s14 + $0xe44] ss:$8 sps:$4 sm:$0xff]  }
 0x1d6   : > { %4394 = vmatprep.subr.bf16.mxu1 %v9341_v31  ;;  %v9215_v31 = vld [vmem:[%s10190_s14 + $0x930] ss:$8 sps:$4 sm:$0xff]  }
 0x1d9   : > { %4395 = vmatpush2.bf16.msra.mxu1 %v9339_v32  ;;  %v9406_v32 = vld [vmem:[%s10190_s14 + $0xe40] ss:$8 sps:$4 sm:$0xff]  }
 0x1da   : > { %4396 = vmatprep.subr.bf16.mxu1 %v9347_v33  ;;  %v9223_v33 = vld [vmem:[%s10190_s14 + $0x924] ss:$8 sps:$4 sm:$0xff]  }
 0x1dd   : > { %4397 = vmatpush2.bf16.msra.mxu1 %v9345_v34  ;;  %v9414_v34 = vld [vmem:[%s10190_s14 + $0xe34] ss:$8 sps:$4 sm:$0xff]  }
 0x1de   : > { %4398 = vmatprep.subr.bf16.mxu1 %v9353_v36  ;;  %v9221_v36 = vld [vmem:[%s10190_s14 + $0x920] ss:$8 sps:$4 sm:$0xff]  }
 0x1e1   : > { %4399 = vmatpush2.bf16.msra.mxu1 %v9351_v37  ;;  %v9412_v37 = vld [vmem:[%s10190_s14 + $0xe30] ss:$8 sps:$4 sm:$0xff]  }
 0x1e2   : > { %4400 = vmatprep.subr.bf16.mxu1 %v9359_v38  ;;  %v9229_v38 = vld [vmem:[%s10190_s14 + $0x914] ss:$8 sps:$4 sm:$0xff]  }
 0x1e5   : > { %4401 = vmatpush2.bf16.msra.mxu1 %v9357_v40  ;;  %v9420_v40 = vld [vmem:[%s10190_s14 + $0xe24] ss:$8 sps:$4 sm:$0xff]  }
 0x1e6   : > { %4402 = vmatprep.subr.bf16.mxu1 %v9365_v45  ;;  %v9418_v45 = vld [vmem:[%s10190_s14 + $0xe20] ss:$8 sps:$4 sm:$0xff]  }
 0x1e9   : > { %4403 = vmatpush2.bf16.msra.mxu1 %v9363_v47  ;;  %v9426_v47 = vld [vmem:[%s10190_s14 + $0xe14] ss:$8 sps:$4 sm:$0xff]  }
 0x1ea   : > { %4404 = vmatprep.subr.bf16.mxu1 %v9371_v53  ;;  %v9239_v53 = vld [vmem:[%s10190_s14 + $0x9f0] ss:$8 sps:$4 sm:$0xff]  }
 0x1ed   : > { %4405 = vmatpush2.bf16.msra.mxu1 %v9369_v56  ;;  %v9438_v56 = vld [vmem:[%s10190_s14 + $0xef4] ss:$8 sps:$4 sm:$0xff]  }
 0x1ee   : > { %4406 = vmatprep.subr.bf16.mxu1 %v9377_v62  ;;  %v9259_v62 = vld [vmem:[%s10190_s14 + $0x9c4] ss:$8 sps:$4 sm:$0xff]  }
 0x1f0   : > { %v2239_v48 = vpop.f32.mrf.mxu0 }
 0x1f1   : > { %v2280_v50 = vpop.f32.mrf.mxu1  ;;  %v2240_v52 = vadd.f32 %v2239_v48, %v10650_v0  ;;  %v9375_v0 = vld [vmem:[%s10190_s14 + $0xc90] ss:$8 sps:$4 sm:$0xff]   ;;  %v9233_v48 = vld [vmem:[%s10190_s14 + $0x900] ss:$8 sps:$4 sm:$0xff]  }
 0x1f2   : > { %v2241_v54 = vpop.f32.mrf.mxu0  ;;  %4407 = vmatpush2.bf16.msra.mxu1 %v9375_v0  ;;  %v9265_v0 = vld [vmem:[%s10190_s14 + $0x9b4] ss:$8 sps:$4 sm:$0xff]  }
 0x1f3   : > { %v2282_v55 = vpop.f32.mrf.mxu1  ;;  %v2281_v59 = vadd.f32 %v2280_v50, %v2240_v52  ;;  %v2242_v21 = vadd.f32 %v2241_v54, %v2201_v51  ;;  %4408 = vmatprep.subr.bf16.mxu1 %v9383_v7  ;;  %v9424_v50 = vld [vmem:[%s10190_s14 + $0xe10] ss:$8 sps:$4 sm:$0xff]   ;;  %v9241_v51 = vld [vmem:[%s10190_s14 + $0x9f4] ss:$8 sps:$4 sm:$0xff]   ;;  %v9432_v52 = vld [vmem:[%s10190_s14 + $0xe04] ss:$8 sps:$4 sm:$0xff]  }
 0x1f4   : > { %v2243_v35 = vpop.f32.mrf.mxu0  ;;  %v9430_v54 = vld [vmem:[%s10190_s14 + $0xe00] ss:$8 sps:$4 sm:$0xff]   ;;  %v9462_v7 = vld [vmem:[%s10190_s14 + $0xeb4] ss:$8 sps:$4 sm:$0xff]  }
 0x1f5   : > { %v2284_v60 = vpop.f32.mrf.mxu1  ;;  %vm2287_vm0 = vcmp.gt.f32.partialorder %v2281_v59, 0.0  ;;  %v2289_v39 = vmul.f32 0.1, %v2281_v59  ;;  %v2283_v61 = vadd.f32 %v2282_v55, %v2242_v21  ;;  %v9247_v55 = vld [vmem:[%s10190_s14 + $0x9e4] ss:$8 sps:$4 sm:$0xff]  }
 0x1f6   : > { %v2244_v43 = vpop.f32.mrf.mxu0  ;;  %4409 = vmatpush2.bf16.msra.mxu1 %v9381_v12  ;;  %v9436_v21 = vld [vmem:[%s10190_s14 + $0xef0] ss:$8 sps:$4 sm:$0xff]   ;;  %v9253_v35 = vld [vmem:[%s10190_s14 + $0x9d4] ss:$8 sps:$4 sm:$0xff]   ;;  %v9444_v60 = vld [vmem:[%s10190_s14 + $0xee4] ss:$8 sps:$4 sm:$0xff]  }
 0x1f7   : > { %v2285_v42 = vpop.f32.mrf.mxu1  ;;  %vm2288_vm1 = vcmp.gt.f32.partialorder %v2283_v61, 0.0  ;;  %v2290_v1 = vmul.f32 0.1, %v2283_v61  ;;  %v2291_v4 = vsel %vm2287_vm0, %v2281_v59, %v2289_v39  ;;  %4460 = vmatprep.subr.bf16.mxu1 %v9390_v18  ;;  %v9245_v59 = vld [vmem:[%s10190_s14 + $0x9e0] ss:$8 sps:$4 sm:$0xff]  }
 0x1f8   : > { %v2293_v13 = vpack.c.bf16 %v2291_v4, %v2291_v4  ;;  %v9251_v39 = vld [vmem:[%s10190_s14 + $0x9d0] ss:$8 sps:$4 sm:$0xff]   ;;  %v9450_v43 = vld [vmem:[%s10190_s14 + $0xed4] ss:$8 sps:$4 sm:$0xff]   ;;  %v9257_v42 = vld [vmem:[%s10190_s14 + $0x9c0] ss:$8 sps:$4 sm:$0xff]  }
 0x1f9   : > { %v2292_v6 = vsel %vm2288_vm1, %v2283_v61, %v2290_v1  ;;  %4411 = vmatmul.mubr.bf16.vlgmr.msra.gmra.mxu1 %v2655_v17  ;;  %v9442_v61 = vld [vmem:[%s10190_s14 + $0xee0] ss:$8 sps:$4 sm:$0xff]   ;;  %v9456_v1 = vld [vmem:[%s10190_s14 + $0xec4] ss:$8 sps:$4 sm:$0xff]   ;;  %v9263_v4 = vld [vmem:[%s10190_s14 + $0x9b0] ss:$8 sps:$4 sm:$0xff]  }
 0x1fa   : > { %v2294_v9 = vpack.c.bf16 %v2292_v6, %v2292_v6  ;;  %4461 = vmatpush1.bf16.msra.mxu1 %v9388_v19  ;;  %v9271_v6 = vld [vmem:[%s10190_s14 + $0x9a4] ss:$8 sps:$4 sm:$0xff]   ;;  %v9277_v12 = vld [vmem:[%s10190_s14 + $0x994] ss:$8 sps:$4 sm:$0xff]   ;;  %v9281_v18 = vld [vmem:[%s10190_s14 + $0x980] ss:$8 sps:$4 sm:$0xff]  }
 0x1fb   : > { %4462 = vmatprep.subr.bf16.mxu1 %v9396_v22  ;;  %v9283_v17 = vld [vmem:[%s10190_s14 + $0x984] ss:$8 sps:$4 sm:$0xff]   ;;  %v9472_v19 = vld [vmem:[%s10190_s14 + $0xe90] ss:$8 sps:$4 sm:$0xff]  }
 0x1fc   : > { %2532 = vmatprep.mubr.bf16.mxu0 %v2294_v9  ;;  %v9269_v9 = vld [vmem:[%s10190_s14 + $0x9a0] ss:$8 sps:$4 sm:$0xff]   ;;  %v10779_v22 = vld [vmem:[%s10249_s11 + $0x38] sm:$0xff] }
 0x1fd   : > { %2533 = vmatmul.mubr.bf16.vlgmr.msra.gmra.mxu0 %v2293_v13  ;;  %v9275_v13 = vld [vmem:[%s10190_s14 + $0x990] ss:$8 sps:$4 sm:$0xff]  }
 0x1fe   : > { %4256 = vmatpush1.bf16.msra.mxu0 %v9191_v10  ;;  %4287 = vmatprep.mubr.bf16.mxu0 %v2650_v11  ;;  %v2580_v10 = vcombine.high %v10655_v8, %v10655_v8  ;;  %v9460_v11 = vld [vmem:[%s10190_s14 + $0xeb0] ss:$8 sps:$4 sm:$0xff]   ;;  %v9474_v8 = vld [vmem:[%s10190_s14 + $0xe94] ss:$8 sps:$4 sm:$0xff]  }
 0x1ff   : > { %4257 = vmatprep.subr.bf16.mxu0 %v9199_v15  ;;  %4463 = vmatpush1.bf16.msra.mxu1 %v9394_v24  ;;  %v2649_v24 = vpack.c.bf16 %v10695_v14, %v10695_v14 }
 0x200   : > { %4464 = vmatprep.subr.bf16.mxu1 %v9402_v26  ;;  %v10768_v15 = vrot.slane %v2580_v10, %v10252_v49  ;;  %v9288_v26 = vld [vmem:[%s10190_s14 + $0xb70] ss:$8 sps:$4 sm:$0xff]  }
 0x201   : > { %v9385_v10 = vld [vmem:[%s10190_s14 + $0xd70] ss:$8 sps:$4 sm:$0xff]  }
 0x202   : > { %4258 = vmatpush1.bf16.msra.mxu0 %v9197_v3  ;;  %v2596_v3 = vcombine.high %v10768_v15, %v10768_v15 }
 0x203   : > { %4259 = vmatprep.subr.bf16.mxu0 %v9205_v20  ;;  %4465 = vmatpush1.bf16.msra.mxu1 %v9400_v28  ;;  %v9290_v20 = vld [vmem:[%s10190_s14 + $0xb74] ss:$8 sps:$4 sm:$0xff]   ;;  %v9478_v28 = vld [vmem:[%s10190_s14 + $0xe80] ss:$8 sps:$4 sm:$0xff]  }
 0x204   : > { %4466 = vmatprep.subr.bf16.mxu1 %v9408_v30  ;;  %v9296_v30 = vld [vmem:[%s10190_s14 + $0xb64] ss:$8 sps:$4 sm:$0xff]  }
 0x206   : > { %4260 = vmatpush1.bf16.msra.mxu0 %v9203_v23  ;;  %v2621_v23 = vrot.slane %v10779_v22, %v10252_v49 }
 0x207   : > { %4261 = vmatprep.subr.bf16.mxu0 %v9211_v25  ;;  %4467 = vmatpush1.bf16.msra.mxu1 %v9406_v32  ;;  %v9480_v25 = vld [vmem:[%s10190_s14 + $0xe84] ss:$8 sps:$4 sm:$0xff]   ;;  %v9294_v32 = vld [vmem:[%s10190_s14 + $0xb60] ss:$8 sps:$4 sm:$0xff]  }
 0x208   : > { %4468 = vmatprep.subr.bf16.mxu1 %v9414_v34  ;;  %v2659_v14 = vpack.c.bf16 %v2621_v23, %v2621_v23  ;;  %v9300_v34 = vld [vmem:[%s10190_s14 + $0xb50] ss:$8 sps:$4 sm:$0xff]  }
 0x20a   : > { %4262 = vmatpush1.bf16.msra.mxu0 %v9209_v27  ;;  %v2654_v27 = vpack.c.bf16 %v2596_v3, %v2596_v3 }
 0x20b   : > { %4263 = vmatprep.subr.bf16.mxu0 %v9217_v29  ;;  %4469 = vmatpush1.bf16.msra.mxu1 %v9412_v37  ;;  %v2629_v29 = vcombine.high %v2621_v23, %v2621_v23  ;;  %v9306_v37 = vld [vmem:[%s10190_s14 + $0xb40] ss:$8 sps:$4 sm:$0xff]   ;;  %v9411_v23 = vld [vmem:[%s10190_s14 + $0xd34] ss:$8 sps:$4 sm:$0xff]  }
 0x20c   : > { %4470 = vmatprep.subr.bf16.mxu1 %v9420_v40  ;;  %v9312_v40 = vld [vmem:[%s10190_s14 + $0xb30] ss:$8 sps:$4 sm:$0xff]  }
 0x20e   : > { %4264 = vmatpush1.bf16.msra.mxu0 %v9215_v31  ;;  %v2660_v31 = vpack.c.bf16 %v2629_v29, %v2629_v29  ;;  %v9429_v29 = vld [vmem:[%s10190_s14 + $0xd04] ss:$8 sps:$4 sm:$0xff]  }
 0x20f   : > { %4265 = vmatprep.subr.bf16.mxu0 %v9223_v33  ;;  %4471 = vmatpush1.bf16.msra.mxu1 %v9418_v45  ;;  %v9302_v33 = vld [vmem:[%s10190_s14 + $0xb54] ss:$8 sps:$4 sm:$0xff]   ;;  %v9318_v45 = vld [vmem:[%s10190_s14 + $0xb20] ss:$8 sps:$4 sm:$0xff]  }
 0x210   : > { %4472 = vmatprep.subr.bf16.mxu1 %v9426_v47  ;;  %4492 = vmatprep.mubr.bf16.mxu1 %v2660_v31  ;;  %v9324_v47 = vld [vmem:[%s10190_s14 + $0xb10] ss:$8 sps:$4 sm:$0xff]   ;;  %v9435_v31 = vld [vmem:[%s10190_s14 + $0xdf4] ss:$8 sps:$4 sm:$0xff]  }
 0x212   : > { %4266 = vmatpush1.bf16.msra.mxu0 %v9221_v36  ;;  %v9308_v36 = vld [vmem:[%s10190_s14 + $0xb44] ss:$8 sps:$4 sm:$0xff]  }
 0x213   : > { %4267 = vmatprep.subr.bf16.mxu0 %v9229_v38  ;;  %4473 = vmatpush1.bf16.msra.mxu1 %v9424_v50  ;;  %v9314_v38 = vld [vmem:[%s10190_s14 + $0xb34] ss:$8 sps:$4 sm:$0xff]   ;;  %v9330_v50 = vld [vmem:[%s10190_s14 + $0xb00] ss:$8 sps:$4 sm:$0xff]  }
 0x214   : > { %4474 = vmatprep.subr.bf16.mxu1 %v9432_v52  ;;  %v9336_v52 = vld [vmem:[%s10190_s14 + $0xbf0] ss:$8 sps:$4 sm:$0xff]  }
 0x216   : > { %4268 = vmatpush1.bf16.msra.mxu0 %v9227_v41  ;;  %v9320_v41 = vld [vmem:[%s10190_s14 + $0xb24] ss:$8 sps:$4 sm:$0xff]  }
 0x217   : > { %4269 = vmatprep.subr.bf16.mxu0 %v9235_v46  ;;  %4475 = vmatpush1.bf16.msra.mxu1 %v9430_v54  ;;  %v9326_v46 = vld [vmem:[%s10190_s14 + $0xb14] ss:$8 sps:$4 sm:$0xff]   ;;  %v9342_v54 = vld [vmem:[%s10190_s14 + $0xbe0] ss:$8 sps:$4 sm:$0xff]  }
 0x218   : > { %4476 = vmatprep.subr.bf16.mxu1 %v9438_v56  ;;  %v9348_v56 = vld [vmem:[%s10190_s14 + $0xbd0] ss:$8 sps:$4 sm:$0xff]  }
 0x21a   : > { %4270 = vmatpush1.bf16.msra.mxu0 %v9233_v48  ;;  %v9332_v48 = vld [vmem:[%s10190_s14 + $0xb04] ss:$8 sps:$4 sm:$0xff]  }
 0x21b   : > { %4271 = vmatprep.subr.bf16.mxu0 %v9241_v51  ;;  %4477 = vmatpush2.bf16.msra.mxu1 %v9436_v21  ;;  %v9338_v51 = vld [vmem:[%s10190_s14 + $0xbf4] ss:$8 sps:$4 sm:$0xff]   ;;  %v9354_v21 = vld [vmem:[%s10190_s14 + $0xbc0] ss:$8 sps:$4 sm:$0xff]  }
 0x21c   : > { %4478 = vmatprep.subr.bf16.mxu1 %v9444_v60  ;;  %v9360_v60 = vld [vmem:[%s10190_s14 + $0xbb0] ss:$8 sps:$4 sm:$0xff]  }
 0x21e   : > { %4272 = vmatpush2.bf16.msra.mxu0 %v9239_v53  ;;  %v9344_v53 = vld [vmem:[%s10190_s14 + $0xbe4] ss:$8 sps:$4 sm:$0xff]  }
 0x21f   : > { %4273 = vmatprep.subr.bf16.mxu0 %v9247_v55  ;;  %4479 = vmatpush2.bf16.msra.mxu1 %v9442_v61  ;;  %v9350_v55 = vld [vmem:[%s10190_s14 + $0xbd4] ss:$8 sps:$4 sm:$0xff]   ;;  %v9366_v61 = vld [vmem:[%s10190_s14 + $0xba0] ss:$8 sps:$4 sm:$0xff]  }
 0x220   : > { %4480 = vmatprep.subr.bf16.mxu1 %v9450_v43  ;;  %v9374_v43 = vld [vmem:[%s10190_s14 + $0xb94] ss:$8 sps:$4 sm:$0xff]  }
 0x222   : > { %4274 = vmatpush2.bf16.msra.mxu0 %v9245_v59  ;;  %v9356_v59 = vld [vmem:[%s10190_s14 + $0xbc4] ss:$8 sps:$4 sm:$0xff]  }
 0x223   : > { %4275 = vmatprep.subr.bf16.mxu0 %v9253_v35  ;;  %4481 = vmatpush2.bf16.msra.mxu1 %v9448_v63  ;;  %v9362_v35 = vld [vmem:[%s10190_s14 + $0xbb4] ss:$8 sps:$4 sm:$0xff]  }
 0x224   : > { %4482 = vmatprep.subr.bf16.mxu1 %v9456_v1 }
 0x226   : > { %4276 = vmatpush2.bf16.msra.mxu0 %v9251_v39  ;;  %v9368_v39 = vld [vmem:[%s10190_s14 + $0xba4] ss:$8 sps:$4 sm:$0xff]  }
 0x227   : > { %4277 = vmatprep.subr.bf16.mxu0 %v9259_v62  ;;  %4483 = vmatpush2.bf16.msra.mxu1 %v9454_v5  ;;  %v2597_v62 = vcombine.high %v10703_v2, %v10703_v2 }
 0x228   : > { %4484 = vmatprep.subr.bf16.mxu1 %v9462_v7 }
 0x229   : > { %v10819_v63 = vrot.slane %v2597_v62, %v10252_v49  ;;  %v9485_v62 = vld [vmem:[%s10190_s14 + $0xf60] ss:$8 sps:$4 sm:$0xff]  }
 0x22a   : > { %4278 = vmatpush2.bf16.msra.mxu0 %v9257_v42  ;;  %v9372_v42 = vld [vmem:[%s10190_s14 + $0xb90] ss:$8 sps:$4 sm:$0xff]  }
 0x22b   : > { %4279 = vmatprep.subr.bf16.mxu0 %v9265_v0  ;;  %4485 = vmatpush2.bf16.msra.mxu1 %v9460_v11  ;;  %v9380_v0 = vld [vmem:[%s10190_s14 + $0xb84] ss:$8 sps:$4 sm:$0xff]   ;;  %v2613_v5 = vcombine.high %v10819_v63, %v10819_v63 }
 0x22c   : > { %4486 = vmatprep.subr.bf16.mxu1 %v9468_v44  ;;  %v9393_v44 = vld [vmem:[%s10190_s14 + $0xd64] ss:$8 sps:$4 sm:$0xff]  }
 0x22d   : > { %v2658_v11 = vpack.c.bf16 %v2613_v5, %v2613_v5 }
 0x22e   : > { %4280 = vmatpush2.bf16.msra.mxu0 %v9263_v4  ;;  %v9378_v4 = vld [vmem:[%s10190_s14 + $0xb80] ss:$8 sps:$4 sm:$0xff]  }
 0x22f   : > { %4281 = vmatprep.subr.bf16.mxu0 %v9271_v6  ;;  %4487 = vmatpush2.bf16.msra.mxu1 %v9466_v16  ;;  %v9387_v6 = vld [vmem:[%s10190_s14 + $0xd74] ss:$8 sps:$4 sm:$0xff]  }
 0x230   : > { %4488 = vmatprep.subr.bf16.mxu1 %v9474_v8  ;;  %v9399_v16 = vld [vmem:[%s10190_s14 + $0xd54] ss:$8 sps:$4 sm:$0xff]  }
 0x231   : > { %v10822_v1 = vpop.f32.mrf.mxu1 }
 0x232   : > { %4282 = vmatpush2.bf16.msra.mxu0 %v9269_v9  ;;  %v2653_v9 = vpack.c.bf16 %v10768_v15, %v10768_v15  ;;  %v9397_v15 = vld [vmem:[%s10190_s14 + $0xd50] ss:$8 sps:$4 sm:$0xff]  }
 0x233   : > { %4283 = vmatprep.subr.bf16.mxu0 %v9277_v12  ;;  %4489 = vmatpush2.bf16.msra.mxu1 %v9472_v19  ;;  %v10827_v2 = vpop.f32.mrf.mxu1  ;;  %v9403_v19 = vld [vmem:[%s10190_s14 + $0xd40] ss:$8 sps:$4 sm:$0xff]  }
 0x234   : > { %4490 = vmatprep.subr.bf16.mxu1 %v9480_v25  ;;  %v9417_v25 = vld [vmem:[%s10190_s14 + $0xd24] ss:$8 sps:$4 sm:$0xff]  }
 0x235   : > { %v4252_v7 = vpop.f32.mrf.mxu1 }
 0x236   : > { %4284 = vmatpush2.bf16.msra.mxu0 %v9275_v13  ;;  %v9391_v13 = vld [vmem:[%s10190_s14 + $0xd60] ss:$8 sps:$4 sm:$0xff]   ;;  %v9488_v7 = vld [vmem:[%s10190_s14 + $0xf50] ss:$8 sps:$4 sm:$0xff]  }
 0x237   : > { %4285 = vmatprep.subr.bf16.mxu0 %v9283_v17  ;;  %4491 = vmatpush2.bf16.msra.mxu1 %v9478_v28  ;;  %v4253_v12 = vpop.f32.mrf.mxu1  ;;  %v9421_v28 = vld [vmem:[%s10190_s14 + $0xd10] ss:$8 sps:$4 sm:$0xff]  }
 0x23a   : > { %4286 = vmatpush2.bf16.msra.mxu0 %v9281_v18  ;;  %4493 = vmatmul.mubr.bf16.vlgmr.msra.gmra.mxu1 %v2659_v14  ;;  %v9405_v18 = vld [vmem:[%s10190_s14 + $0xd44] ss:$8 sps:$4 sm:$0xff]   ;;  %v9433_v14 = vld [vmem:[%s10190_s14 + $0xdf0] ss:$8 sps:$4 sm:$0xff]  }
 0x23b   : > { %4337 = vmatprep.subr.bf16.mxu0 %v9290_v20 }
 0x23d   : > { %4288 = vmatmul.mubr.bf16.vlgmr.msra.gmra.mxu0 %v2649_v24  ;;  %v9409_v24 = vld [vmem:[%s10190_s14 + $0xd30] ss:$8 sps:$4 sm:$0xff]  }
 0x23e   : > { %4338 = vmatpush1.bf16.msra.mxu0 %v9288_v26  ;;  %4369 = vmatprep.mubr.bf16.mxu0 %v2654_v27  ;;  %v9415_v26 = vld [vmem:[%s10190_s14 + $0xd20] ss:$8 sps:$4 sm:$0xff]   ;;  %v9423_v27 = vld [vmem:[%s10190_s14 + $0xd14] ss:$8 sps:$4 sm:$0xff]  }
 0x23f   : > { %4339 = vmatprep.subr.bf16.mxu0 %v9296_v30  ;;  %v9427_v30 = vld [vmem:[%s10190_s14 + $0xd00] ss:$8 sps:$4 sm:$0xff]  }
 0x242   : > { %4340 = vmatpush1.bf16.msra.mxu0 %v9294_v32  ;;  %v9441_v32 = vld [vmem:[%s10190_s14 + $0xde4] ss:$8 sps:$4 sm:$0xff]  }
 0x243   : > { %4341 = vmatprep.subr.bf16.mxu0 %v9302_v33  ;;  %v9439_v33 = vld [vmem:[%s10190_s14 + $0xde0] ss:$8 sps:$4 sm:$0xff]  }
 0x246   : > { %4342 = vmatpush1.bf16.msra.mxu0 %v9300_v34  ;;  %v9447_v34 = vld [vmem:[%s10190_s14 + $0xdd4] ss:$8 sps:$4 sm:$0xff]  }
 0x247   : > { %4343 = vmatprep.subr.bf16.mxu0 %v9308_v36  ;;  %v9445_v36 = vld [vmem:[%s10190_s14 + $0xdd0] ss:$8 sps:$4 sm:$0xff]  }
 0x24a   : > { %4344 = vmatpush1.bf16.msra.mxu0 %v9306_v37  ;;  %v9453_v37 = vld [vmem:[%s10190_s14 + $0xdc4] ss:$8 sps:$4 sm:$0xff]  }
 0x24b   : > { %4345 = vmatprep.subr.bf16.mxu0 %v9314_v38  ;;  %v9451_v38 = vld [vmem:[%s10190_s14 + $0xdc0] ss:$8 sps:$4 sm:$0xff]  }
 0x24e   : > { %4346 = vmatpush1.bf16.msra.mxu0 %v9312_v40  ;;  %v9459_v40 = vld [vmem:[%s10190_s14 + $0xdb4] ss:$8 sps:$4 sm:$0xff]  }
 0x24f   : > { %4347 = vmatprep.subr.bf16.mxu0 %v9320_v41  ;;  %v9457_v41 = vld [vmem:[%s10190_s14 + $0xdb0] ss:$8 sps:$4 sm:$0xff]  }
 0x252   : > { %4348 = vmatpush1.bf16.msra.mxu0 %v9318_v45  ;;  %v9465_v45 = vld [vmem:[%s10190_s14 + $0xda4] ss:$8 sps:$4 sm:$0xff]  }
 0x253   : > { %4349 = vmatprep.subr.bf16.mxu0 %v9326_v46  ;;  %v9463_v46 = vld [vmem:[%s10190_s14 + $0xda0] ss:$8 sps:$4 sm:$0xff]  }
 0x256   : > { %4350 = vmatpush1.bf16.msra.mxu0 %v9324_v47  ;;  %v2614_v47 = vcombine.high %v10779_v22, %v10779_v22 }
 0x257   : > { %4351 = vmatprep.subr.bf16.mxu0 %v9332_v48  ;;  %v9471_v48 = vld [vmem:[%s10190_s14 + $0xd94] ss:$8 sps:$4 sm:$0xff]  }
 0x25a   : > { %4352 = vmatpush1.bf16.msra.mxu0 %v9330_v50  ;;  %v9469_v50 = vld [vmem:[%s10190_s14 + $0xd90] ss:$8 sps:$4 sm:$0xff]  }
 0x25b   : > { %4353 = vmatprep.subr.bf16.mxu0 %v9338_v51  ;;  %v10868_v51 = vrot.slane %v2614_v47, %v10252_v49 }
 0x25d   : > { %v2630_v22 = vcombine.high %v10868_v51, %v10868_v51 }
 0x25e   : > { %4354 = vmatpush2.bf16.msra.mxu0 %v9336_v52  ;;  %v9477_v52 = vld [vmem:[%s10190_s14 + $0xd84] ss:$8 sps:$4 sm:$0xff]  }
 0x25f   : > { %4355 = vmatprep.subr.bf16.mxu0 %v9344_v53  ;;  %v9475_v53 = vld [vmem:[%s10190_s14 + $0xd80] ss:$8 sps:$4 sm:$0xff]  }
 0x262   : > { %4356 = vmatpush2.bf16.msra.mxu0 %v9342_v54  ;;  %v9484_v54 = vld [vmem:[%s10190_s14 + $0xf74] ss:$8 sps:$4 sm:$0xff]  }
 0x263   : > { %4357 = vmatprep.subr.bf16.mxu0 %v9350_v55  ;;  %v2657_v55 = vpack.c.bf16 %v10819_v63, %v10819_v63 }
 0x266   : > { %4358 = vmatpush2.bf16.msra.mxu0 %v9348_v56  ;;  %v2328_v56 = vld [vmem:[%s10877_s7] sm:$0x3] }
 0x267   : > { %4359 = vmatprep.subr.bf16.mxu0 %v9356_v59  ;;  %v9482_v59 = vld [vmem:[%s10190_s14 + $0xf70] ss:$8 sps:$4 sm:$0xff]  }
 0x26a   : > { %4360 = vmatpush2.bf16.msra.mxu0 %v9354_v21  ;;  %v2662_v21 = vpack.c.bf16 %v2630_v22, %v2630_v22 }
 0x26b   : > { %4361 = vmatprep.subr.bf16.mxu0 %v9362_v35  ;;  %v9487_v35 = vld [vmem:[%s10190_s14 + $0xf64] ss:$8 sps:$4 sm:$0xff]  }
 0x26e   : > { %4362 = vmatpush2.bf16.msra.mxu0 %v9360_v60  ;;  %v2333_v60 = vrot.slane %v2328_v56, %v10526_v57 }
 0x26f   : > { %4363 = vmatprep.subr.bf16.mxu0 %v9368_v39  ;;  %v2337_v39 = vrot.slane %v2328_v56, %v10529_v58 }
 0x272   : > { %4364 = vmatpush2.bf16.msra.mxu0 %v9366_v61 }
 0x273   : > { %4365 = vmatprep.subr.bf16.mxu0 %v9374_v43 }
 0x276   : > { %4366 = vmatpush2.bf16.msra.mxu0 %v9372_v42  ;;  %v9490_v42 = vld [vmem:[%s10190_s14 + $0xf54] ss:$8 sps:$4 sm:$0xff]  }
 0x277   : > { %4367 = vmatprep.subr.bf16.mxu0 %v9380_v0 }
 0x278   : > { %v10836_v17 = vpop.f32.mrf.mxu1 }
 0x27a   : > { %4368 = vmatpush2.bf16.msra.mxu0 %v9378_v4  ;;  %v10839_v8 = vpop.f32.mrf.mxu1 }
 0x27b   : > { %4419 = vmatprep.subr.bf16.mxu0 %v9387_v6 }
 0x27c   : > { %v4334_v3 = vpop.f32.mrf.mxu1 }
 0x27d   : > { %4370 = vmatmul.mubr.bf16.vlgmr.msra.gmra.mxu0 %v2653_v9  ;;  %v9497_v3 = vld [vmem:[%s10190_s14 + $0xf20] ss:$8 sps:$4 sm:$0xff]  }
 0x27e   : > { %4420 = vmatpush1.bf16.msra.mxu0 %v9385_v10  ;;  %4451 = vmatprep.mubr.bf16.mxu0 %v2658_v11  ;;  %v4335_v20 = vpop.f32.mrf.mxu1  ;;  %v9493_v11 = vld [vmem:[%s10190_s14 + $0xf44] ss:$8 sps:$4 sm:$0xff]  }
 0x27f   : > { %4421 = vmatprep.subr.bf16.mxu0 %v9393_v44  ;;  %v9491_v44 = vld [vmem:[%s10190_s14 + $0xf40] ss:$8 sps:$4 sm:$0xff]   ;;  %v9500_v20 = vld [vmem:[%s10190_s14 + $0xf10] ss:$8 sps:$4 sm:$0xff]  }
 0x282   : > { %4422 = vmatpush1.bf16.msra.mxu0 %v9391_v13 }
 0x283   : > { %4423 = vmatprep.subr.bf16.mxu0 %v9399_v16  ;;  %v9496_v16 = vld [vmem:[%s10190_s14 + $0xf34] ss:$8 sps:$4 sm:$0xff]  }
 0x286   : > { %4424 = vmatpush1.bf16.msra.mxu0 %v9397_v15  ;;  %v9494_v15 = vld [vmem:[%s10190_s14 + $0xf30] ss:$8 sps:$4 sm:$0xff]  }
 0x287   : > { %4425 = vmatprep.subr.bf16.mxu0 %v9405_v18  ;;  %v9499_v18 = vld [vmem:[%s10190_s14 + $0xf24] ss:$8 sps:$4 sm:$0xff]  }
 0x28a   : > { %4426 = vmatpush1.bf16.msra.mxu0 %v9403_v19  ;;  %v9502_v19 = vld [vmem:[%s10190_s14 + $0xf14] ss:$8 sps:$4 sm:$0xff]  }
 0x28b   : > { %4427 = vmatprep.subr.bf16.mxu0 %v9411_v23  ;;  %v9505_v23 = vld [vmem:[%s10190_s14 + $0xf04] ss:$8 sps:$4 sm:$0xff]  }
 0x28e   : > { %4428 = vmatpush1.bf16.msra.mxu0 %v9409_v24  ;;  %v9503_v24 = vld [vmem:[%s10190_s14 + $0xf00] ss:$8 sps:$4 sm:$0xff]  }
 0x28f   : > { %4429 = vmatprep.subr.bf16.mxu0 %v9417_v25  ;;  %v9508_v25 = vld [vmem:[%s10190_s14 + $0xff4] ss:$8 sps:$4 sm:$0xff]  }
 0x292   : > { %4430 = vmatpush1.bf16.msra.mxu0 %v9415_v26  ;;  %v9506_v26 = vld [vmem:[%s10190_s14 + $0xff0] ss:$8 sps:$4 sm:$0xff]  }
 0x293   : > { %4431 = vmatprep.subr.bf16.mxu0 %v9423_v27  ;;  %v9511_v27 = vld [vmem:[%s10190_s14 + $0xfe4] ss:$8 sps:$4 sm:$0xff]  }
 0x296   : > { %4432 = vmatpush1.bf16.msra.mxu0 %v9421_v28  ;;  %v9509_v28 = vld [vmem:[%s10190_s14 + $0xfe0] ss:$8 sps:$4 sm:$0xff]  }
 0x297   : > { %4433 = vmatprep.subr.bf16.mxu0 %v9429_v29  ;;  %v9514_v29 = vld [vmem:[%s10190_s14 + $0xfd4] ss:$8 sps:$4 sm:$0xff]  }
 0x29a   : > { %4434 = vmatpush1.bf16.msra.mxu0 %v9427_v30  ;;  %v9512_v30 = vld [vmem:[%s10190_s14 + $0xfd0] ss:$8 sps:$4 sm:$0xff]  }
 0x29b   : > { %4435 = vmatprep.subr.bf16.mxu0 %v9435_v31  ;;  %v9517_v31 = vld [vmem:[%s10190_s14 + $0xfc4] ss:$8 sps:$4 sm:$0xff]  }
 0x29e   : > { %4436 = vmatpush2.bf16.msra.mxu0 %v9433_v14  ;;  %v9515_v14 = vld [vmem:[%s10190_s14 + $0xfc0] ss:$8 sps:$4 sm:$0xff]  }
 0x29f   : > { %4437 = vmatprep.subr.bf16.mxu0 %v9441_v32  ;;  %v9520_v32 = vld [vmem:[%s10190_s14 + $0xfb4] ss:$8 sps:$4 sm:$0xff]  }
 0x2a2   : > { %4438 = vmatpush2.bf16.msra.mxu0 %v9439_v33  ;;  %v9518_v33 = vld [vmem:[%s10190_s14 + $0xfb0] ss:$8 sps:$4 sm:$0xff]  }
 0x2a3   : > { %4439 = vmatprep.subr.bf16.mxu0 %v9447_v34  ;;  %v9523_v34 = vld [vmem:[%s10190_s14 + $0xfa4] ss:$8 sps:$4 sm:$0xff]  }
 0x2a6   : > { %4440 = vmatpush2.bf16.msra.mxu0 %v9445_v36  ;;  %v9521_v36 = vld [vmem:[%s10190_s14 + $0xfa0] ss:$8 sps:$4 sm:$0xff]  }
 0x2a7   : > { %4441 = vmatprep.subr.bf16.mxu0 %v9453_v37  ;;  %v9526_v37 = vld [vmem:[%s10190_s14 + $0xf94] ss:$8 sps:$4 sm:$0xff]  }
 0x2aa   : > { %4442 = vmatpush2.bf16.msra.mxu0 %v9451_v38  ;;  %v9524_v38 = vld [vmem:[%s10190_s14 + $0xf90] ss:$8 sps:$4 sm:$0xff]  }
 0x2ab   : > { %4443 = vmatprep.subr.bf16.mxu0 %v9459_v40  ;;  %v7744_v40 = vld [vmem:[%s10520_s28 + $0x2] sm:$0x3] }
 0x2ac   : > { %v2931_v47 = vrot.slane %v7744_v40, %v10529_v58 }
 0x2ae   : > { %4444 = vmatpush2.bf16.msra.mxu0 %v9457_v41  ;;  %v9529_v41 = vld [vmem:[%s10190_s14 + $0xf84] ss:$8 sps:$4 sm:$0xff]  }
 0x2af   : > { %4445 = vmatprep.subr.bf16.mxu0 %v9465_v45  ;;  %v2927_v45 = vrot.slane %v7744_v40, %v10526_v57  ;;  %v9587_v40 = vld [vmem:[%s10190_s14 + $0x10e0] ss:$8 sps:$4 sm:$0xff]  }
 0x2b2   : > { %4446 = vmatpush2.bf16.msra.mxu0 %v9463_v46  ;;  %v9527_v46 = vld [vmem:[%s10190_s14 + $0xf80] ss:$8 sps:$4 sm:$0xff]  }
 0x2b3   : > { %4447 = vmatprep.subr.bf16.mxu0 %v9471_v48  ;;  %v2661_v48 = vpack.c.bf16 %v10868_v51, %v10868_v51 }
 0x2b6   : > { %4448 = vmatpush2.bf16.msra.mxu0 %v9469_v50  ;;  %v4249_v50 = vadd.f32 %v10822_v1, %v2927_v45  ;;  %v9595_v45 = vld [vmem:[%s10190_s14 + $0x10d4] ss:$8 sps:$4 sm:$0xff]  }
 0x2b7   : > { %4449 = vmatprep.subr.bf16.mxu0 %v9477_v52  ;;  %v4251_v52 = vadd.f32 %v10827_v2, %v2931_v47  ;;  %v9533_v2 = vld [vmem:[%s10190_s14 + $0x1070] ss:$8 sps:$4 sm:$0xff]  }
 0x2b8   : > { %v9593_v47 = vld [vmem:[%s10190_s14 + $0x10d0] ss:$8 sps:$4 sm:$0xff]  }
 0x2b9   : > { %v10892_v4 = vpop.f32.mrf.mxu1 }
 0x2ba   : > { %4450 = vmatpush2.bf16.msra.mxu0 %v9475_v53 }
 0x2bb   : > { %4501 = vmatprep.subr.bf16.mxu0 %v9484_v54  ;;  %v10900_v9 = vpop.f32.mrf.mxu1 }
 0x2bd   : > { %4452 = vmatmul.mubr.bf16.vlgmr.msra.gmra.mxu0 %v2657_v55  ;;  %v2534_v61 = vpop.f32.mrf.mxu0  ;;  %v4416_v12 = vpop.f32.mrf.mxu1 }
 0x2be   : > { %4502 = vmatpush1.bf16.msra.mxu0 %v9482_v59  ;;  %4533 = vmatprep.mubr.bf16.mxu0 %v2662_v21  ;;  %v2535_v63 = vadd.f32 %v2534_v61, %v2333_v60  ;;  %v9530_v21 = vld [vmem:[%s10417_s17 + $0x170] ss:$8 sps:$4 sm:$0xff]   ;;  %v9535_v60 = vld [vmem:[%s10190_s14 + $0x1074] ss:$8 sps:$4 sm:$0xff]   ;;  %v9548_v12 = vld [vmem:[%s10417_s17 + $0x140] ss:$8 sps:$4 sm:$0xff]  }
 0x2bf   : > { %v2536_v43 = vpop.f32.mrf.mxu0  ;;  %4503 = vmatprep.subr.bf16.mxu0 %v9487_v35  ;;  %v4417_v13 = vpop.f32.mrf.mxu1  ;;  %v9532_v35 = vld [vmem:[%s10417_s17 + $0x174] ss:$8 sps:$4 sm:$0xff]  }
 0x2c0   : > { %v2537_v0 = vadd.f32 %v2536_v43, %v2337_v39  ;;  %v9538_v39 = vld [vmem:[%s10417_s17 + $0x164] ss:$8 sps:$4 sm:$0xff]   ;;  %4756 = vmatprep.subr.bf16.mxu1 %v9532_v35  ;;  %v9536_v43 = vld [vmem:[%s10417_s17 + $0x160] ss:$8 sps:$4 sm:$0xff]   ;;  %v9556_v13 = vld [vmem:[%s10417_s17 + $0x134] ss:$8 sps:$4 sm:$0xff]  }
 0x2c1   : > { %v2538_v5 = vpop.f32.mrf.mxu0  ;;  %4757 = vmatpush1.bf16.msra.mxu1 %v9530_v21  ;;  %v9605_v21 = vld [vmem:[%s10190_s14 + $0x10b0] ss:$8 sps:$4 sm:$0xff]   ;;  %v9610_v35 = vld [vmem:[%s10417_s17 + $0x1a4] ss:$8 sps:$4 sm:$0xff]  }
 0x2c2   : > { %v2543_v6 = vcombine.low %v2535_v63, %v2537_v0  ;;  %4504 = vmatpush1.bf16.msra.mxu0 %v9485_v62  ;;  %v9541_v62 = vld [vmem:[%s10190_s14 + $0x1064] ss:$8 sps:$4 sm:$0xff]   ;;  %4758 = vmatprep.subr.bf16.mxu1 %v9538_v39  ;;  %v9539_v63 = vld [vmem:[%s10190_s14 + $0x1060] ss:$8 sps:$4 sm:$0xff]   ;;  %v9544_v0 = vld [vmem:[%s10417_s17 + $0x154] ss:$8 sps:$4 sm:$0xff]  }
 0x2c3   : > { %v2539_v10 = vpop.f32.mrf.mxu0  ;;  %4505 = vmatprep.subr.bf16.mxu0 %v9490_v42  ;;  %v9547_v5 = vld [vmem:[%s10190_s14 + $0x1054] ss:$8 sps:$4 sm:$0xff]  }
 0x2c4   : > { %7482 = vst.sshfl [vmem:[%s10897_s13] sm:$0x33 pattern:$0x76325410] %v2543_v6  ;;  %v9542_v6 = vld [vmem:[%s10417_s17 + $0x150] ss:$8 sps:$4 sm:$0xff]  }
 0x2c5   : > { %4759 = vmatpush1.bf16.msra.mxu1 %v9536_v43  ;;  %v9550_v10 = vld [vmem:[%s10417_s17 + $0x144] ss:$8 sps:$4 sm:$0xff]   ;;  %v9616_v43 = vld [vmem:[%s10417_s17 + $0x194] ss:$8 sps:$4 sm:$0xff]  }
 0x2c6   : > { %4506 = vmatpush1.bf16.msra.mxu0 %v9488_v7  ;;  %4760 = vmatprep.subr.bf16.mxu1 %v9544_v0  ;;  %v9545_v7 = vld [vmem:[%s10190_s14 + $0x1050] ss:$8 sps:$4 sm:$0xff]  }
 0x2c7   : > { %4507 = vmatprep.subr.bf16.mxu0 %v9493_v11  ;;  %v9553_v11 = vld [vmem:[%s10190_s14 + $0x1044] ss:$8 sps:$4 sm:$0xff]   ;;  %v9614_v0 = vld [vmem:[%s10417_s17 + $0x190] ss:$8 sps:$4 sm:$0xff]  }
 0x2c9   : > { %4761 = vmatpush1.bf16.msra.mxu1 %v9542_v6  ;;  %v9619_v6 = vld [vmem:[%s10190_s14 + $0x1094] ss:$8 sps:$4 sm:$0xff]  }
 0x2ca   : > { %4508 = vmatpush1.bf16.msra.mxu0 %v9491_v44  ;;  %4762 = vmatprep.subr.bf16.mxu1 %v9550_v10  ;;  %v9551_v44 = vld [vmem:[%s10190_s14 + $0x1040] ss:$8 sps:$4 sm:$0xff]   ;;  %v9622_v10 = vld [vmem:[%s10417_s17 + $0x184] ss:$8 sps:$4 sm:$0xff]  }
 0x2cb   : > { %4509 = vmatprep.subr.bf16.mxu0 %v9496_v16  ;;  %v9559_v16 = vld [vmem:[%s10190_s14 + $0x1034] ss:$8 sps:$4 sm:$0xff]  }
 0x2cd   : > { %4763 = vmatpush1.bf16.msra.mxu1 %v9548_v12  ;;  %v9625_v12 = vld [vmem:[%s10190_s14 + $0x1084] ss:$8 sps:$4 sm:$0xff]  }
 0x2ce   : > { %4510 = vmatpush1.bf16.msra.mxu0 %v9494_v15  ;;  %v9554_v15 = vld [vmem:[%s10417_s17 + $0x130] ss:$8 sps:$4 sm:$0xff]   ;;  %4764 = vmatprep.subr.bf16.mxu1 %v9556_v13 }
 0x2cf   : > { %4511 = vmatprep.subr.bf16.mxu0 %v9499_v18  ;;  %v9557_v18 = vld [vmem:[%s10190_s14 + $0x1030] ss:$8 sps:$4 sm:$0xff]  }
 0x2d1   : > { %4765 = vmatpush1.bf16.msra.mxu1 %v9554_v15 }
 0x2d2   : > { %4512 = vmatpush1.bf16.msra.mxu0 %v9497_v3  ;;  %v9562_v3 = vld [vmem:[%s10417_s17 + $0x124] ss:$8 sps:$4 sm:$0xff]  }
 0x2d3   : > { %4513 = vmatprep.subr.bf16.mxu0 %v9502_v19  ;;  %v9565_v19 = vld [vmem:[%s10190_s14 + $0x1024] ss:$8 sps:$4 sm:$0xff]   ;;  %4766 = vmatprep.subr.bf16.mxu1 %v9562_v3  ;;  %v9631_v3 = vld [vmem:[%s10190_s14 + $0x1274] ss:$8 sps:$4 sm:$0xff]  }
 0x2d6   : > { %4514 = vmatpush1.bf16.msra.mxu0 %v9500_v20  ;;  %v9560_v20 = vld [vmem:[%s10417_s17 + $0x120] ss:$8 sps:$4 sm:$0xff]  }
 0x2d7   : > { %4515 = vmatprep.subr.bf16.mxu0 %v9505_v23  ;;  %v9563_v23 = vld [vmem:[%s10190_s14 + $0x1020] ss:$8 sps:$4 sm:$0xff]   ;;  %4767 = vmatpush1.bf16.msra.mxu1 %v9560_v20 }
 0x2da   : > { %4516 = vmatpush1.bf16.msra.mxu0 %v9503_v24  ;;  %v9568_v24 = vld [vmem:[%s10417_s17 + $0x114] ss:$8 sps:$4 sm:$0xff]  }
 0x2db   : > { %4517 = vmatprep.subr.bf16.mxu0 %v9508_v25  ;;  %v9571_v25 = vld [vmem:[%s10190_s14 + $0x1014] ss:$8 sps:$4 sm:$0xff]   ;;  %4768 = vmatprep.subr.bf16.mxu1 %v9568_v24  ;;  %v9635_v24 = vld [vmem:[%s10190_s14 + $0x1260] ss:$8 sps:$4 sm:$0xff]  }
 0x2de   : > { %4518 = vmatpush2.bf16.msra.mxu0 %v9506_v26  ;;  %v9566_v26 = vld [vmem:[%s10417_s17 + $0x110] ss:$8 sps:$4 sm:$0xff]  }
 0x2df   : > { %4519 = vmatprep.subr.bf16.mxu0 %v9511_v27  ;;  %v9569_v27 = vld [vmem:[%s10190_s14 + $0x1010] ss:$8 sps:$4 sm:$0xff]   ;;  %4769 = vmatpush1.bf16.msra.mxu1 %v9566_v26 }
 0x2e0   : > { %v9641_v26 = vld [vmem:[%s10190_s14 + $0x1250] ss:$8 sps:$4 sm:$0xff]  }
 0x2e2   : > { %4520 = vmatpush2.bf16.msra.mxu0 %v9509_v28  ;;  %v9574_v28 = vld [vmem:[%s10417_s17 + $0x104] ss:$8 sps:$4 sm:$0xff]  }
 0x2e3   : > { %4521 = vmatprep.subr.bf16.mxu0 %v9514_v29  ;;  %v9577_v29 = vld [vmem:[%s10190_s14 + $0x1004] ss:$8 sps:$4 sm:$0xff]   ;;  %4770 = vmatprep.subr.bf16.mxu1 %v9574_v28  ;;  %v9647_v28 = vld [vmem:[%s10190_s14 + $0x1240] ss:$8 sps:$4 sm:$0xff]  }
 0x2e6   : > { %4522 = vmatpush2.bf16.msra.mxu0 %v9512_v30  ;;  %v9572_v30 = vld [vmem:[%s10417_s17 + $0x100] ss:$8 sps:$4 sm:$0xff]  }
 0x2e7   : > { %4523 = vmatprep.subr.bf16.mxu0 %v9517_v31  ;;  %v9575_v31 = vld [vmem:[%s10190_s14 + $0x1000] ss:$8 sps:$4 sm:$0xff]   ;;  %4771 = vmatpush1.bf16.msra.mxu1 %v9572_v30  ;;  %v9653_v30 = vld [vmem:[%s10190_s14 + $0x1230] ss:$8 sps:$4 sm:$0xff]  }
 0x2ea   : > { %4524 = vmatpush2.bf16.msra.mxu0 %v9515_v14  ;;  %v9580_v14 = vld [vmem:[%s10417_s17 + $0x1f4] ss:$8 sps:$4 sm:$0xff]  }
 0x2eb   : > { %4525 = vmatprep.subr.bf16.mxu0 %v9520_v32  ;;  %v9583_v32 = vld [vmem:[%s10190_s14 + $0x10f4] ss:$8 sps:$4 sm:$0xff]   ;;  %4772 = vmatprep.subr.bf16.mxu1 %v9580_v14  ;;  %v9659_v14 = vld [vmem:[%s10190_s14 + $0x1220] ss:$8 sps:$4 sm:$0xff]  }
 0x2ee   : > { %4526 = vmatpush2.bf16.msra.mxu0 %v9518_v33  ;;  %v9578_v33 = vld [vmem:[%s10417_s17 + $0x1f0] ss:$8 sps:$4 sm:$0xff]  }
 0x2ef   : > { %4527 = vmatprep.subr.bf16.mxu0 %v9523_v34  ;;  %v9581_v34 = vld [vmem:[%s10190_s14 + $0x10f0] ss:$8 sps:$4 sm:$0xff]   ;;  %4773 = vmatpush2.bf16.msra.mxu1 %v9578_v33 }
 0x2f0   : > { %v9665_v33 = vld [vmem:[%s10190_s14 + $0x1210] ss:$8 sps:$4 sm:$0xff]  }
 0x2f2   : > { %4528 = vmatpush2.bf16.msra.mxu0 %v9521_v36  ;;  %v9586_v36 = vld [vmem:[%s10417_s17 + $0x1e4] ss:$8 sps:$4 sm:$0xff]  }
 0x2f3   : > { %4529 = vmatprep.subr.bf16.mxu0 %v9526_v37  ;;  %v9589_v37 = vld [vmem:[%s10190_s14 + $0x10e4] ss:$8 sps:$4 sm:$0xff]   ;;  %4774 = vmatprep.subr.bf16.mxu1 %v9586_v36  ;;  %v9671_v36 = vld [vmem:[%s10190_s14 + $0x1200] ss:$8 sps:$4 sm:$0xff]  }
 0x2f6   : > { %4530 = vmatpush2.bf16.msra.mxu0 %v9524_v38  ;;  %v9584_v38 = vld [vmem:[%s10417_s17 + $0x1e0] ss:$8 sps:$4 sm:$0xff]  }
 0x2f7   : > { %4531 = vmatprep.subr.bf16.mxu0 %v9529_v41  ;;  %v9592_v41 = vld [vmem:[%s10417_s17 + $0x1d4] ss:$8 sps:$4 sm:$0xff]   ;;  %4775 = vmatpush2.bf16.msra.mxu1 %v9584_v38  ;;  %v9677_v38 = vld [vmem:[%s10190_s14 + $0x12f0] ss:$8 sps:$4 sm:$0xff]  }
 0x2f8   : > { %4776 = vmatprep.subr.bf16.mxu1 %v9592_v41  ;;  %v9683_v41 = vld [vmem:[%s10190_s14 + $0x12e0] ss:$8 sps:$4 sm:$0xff]  }
 0x2fa   : > { %4532 = vmatpush2.bf16.msra.mxu0 %v9527_v46  ;;  %v10940_v56 = vpop.f32.mrf.mxu1  ;;  %v9590_v46 = vld [vmem:[%s10417_s17 + $0x1d0] ss:$8 sps:$4 sm:$0xff]  }
 0x2fb   : > { %6471 = vmatprep.subr.bf16.mxu0 %v9535_v60  ;;  %4777 = vmatpush2.bf16.msra.mxu1 %v9590_v46  ;;  %v9613_v60 = vld [vmem:[%s10190_s14 + $0x10a4] ss:$8 sps:$4 sm:$0xff]   ;;  %v9689_v46 = vld [vmem:[%s10190_s14 + $0x12d0] ss:$8 sps:$4 sm:$0xff]  }
 0x2fc   : > { %v10942_v51 = vpop.f32.mrf.mxu1 }
 0x2fd   : > { %v4289_v53 = vpop.f32.mrf.mxu0  ;;  %4534 = vmatmul.mubr.bf16.vlgmr.msra.gmra.mxu0 %v2661_v48  ;;  %v9598_v48 = vld [vmem:[%s10417_s17 + $0x1c4] ss:$8 sps:$4 sm:$0xff]  }
 0x2fe   : > { %v10936_v22 = vadd.f32 %v4289_v53, %v4249_v50  ;;  %v4498_v61 = vpop.f32.mrf.mxu1  ;;  %6472 = vmatpush1.bf16.msra.mxu0 %v9533_v2  ;;  %v9601_v50 = vld [vmem:[%s10190_s14 + $0x10c4] ss:$8 sps:$4 sm:$0xff]   ;;  %4778 = vmatprep.subr.bf16.mxu1 %v9598_v48  ;;  %v9599_v53 = vld [vmem:[%s10190_s14 + $0x10c0] ss:$8 sps:$4 sm:$0xff]  }
 0x2ff   : > { %v4291_v54 = vpop.f32.mrf.mxu0  ;;  %6473 = vmatprep.subr.bf16.mxu0 %v9541_v62  ;;  %v9608_v2 = vld [vmem:[%s10417_s17 + $0x1a0] ss:$8 sps:$4 sm:$0xff]  }
 0x300   : > { %v10938_v55 = vadd.f32 %v4291_v54, %v4251_v52  ;;  %v4499_v42 = vpop.f32.mrf.mxu1  ;;  %v9596_v52 = vld [vmem:[%s10417_s17 + $0x1c0] ss:$8 sps:$4 sm:$0xff]   ;;  %v9604_v54 = vld [vmem:[%s10417_s17 + $0x1b4] ss:$8 sps:$4 sm:$0xff]   ;;  %v4331_v39 = vadd.f32 %v10836_v17, %v10936_v22  ;;  %v9617_v22 = vld [vmem:[%s10190_s14 + $0x1090] ss:$8 sps:$4 sm:$0xff]  }
 0x301   : > { %v4293_v59 = vpop.f32.mrf.mxu0  ;;  %4779 = vmatpush2.bf16.msra.mxu1 %v9596_v52  ;;  %v9611_v61 = vld [vmem:[%s10190_s14 + $0x10a0] ss:$8 sps:$4 sm:$0xff]   ;;  %v9701_v52 = vld [vmem:[%s10190_s14 + $0x12b0] ss:$8 sps:$4 sm:$0xff]  }
 0x302   : > { %6474 = vmatpush1.bf16.msra.mxu0 %v9539_v63  ;;  %v9607_v59 = vld [vmem:[%s10190_s14 + $0x10b4] ss:$8 sps:$4 sm:$0xff]   ;;  %4780 = vmatprep.subr.bf16.mxu1 %v9604_v54  ;;  %v4333_v42 = vadd.f32 %v10839_v8, %v10938_v55  ;;  %v9620_v8 = vld [vmem:[%s10417_s17 + $0x180] ss:$8 sps:$4 sm:$0xff]  }
 0x303   : > { %v4294_v1 = vpop.f32.mrf.mxu0  ;;  %6475 = vmatprep.subr.bf16.mxu0 %v9547_v5  ;;  %v9695_v48 = vld [vmem:[%s10190_s14 + $0x12c0] ss:$8 sps:$4 sm:$0xff]  }
 0x304   : > { %v9602_v1 = vld [vmem:[%s10417_s17 + $0x1b0] ss:$8 sps:$4 sm:$0xff]  }
 0x305   : > { %4781 = vmatpush2.bf16.msra.mxu1 %v9602_v1 }
 0x306   : > { %6476 = vmatpush1.bf16.msra.mxu0 %v9545_v7  ;;  %4782 = vmatprep.subr.bf16.mxu1 %v9610_v35 }
 0x307   : > { %6477 = vmatprep.subr.bf16.mxu0 %v9553_v11  ;;  %v9623_v11 = vld [vmem:[%s10190_s14 + $0x1080] ss:$8 sps:$4 sm:$0xff]  }
 0x309   : > { %4783 = vmatpush2.bf16.msra.mxu1 %v9608_v2  ;;  %v9713_v2 = vld [vmem:[%s10190_s14 + $0x1290] ss:$8 sps:$4 sm:$0xff]  }
 0x30a   : > { %6478 = vmatpush1.bf16.msra.mxu0 %v9551_v44  ;;  %4784 = vmatprep.subr.bf16.mxu1 %v9616_v43  ;;  %v11017_v44 = vld [vmem:[%s10249_s11 + $0x40] sm:$0xff] }
 0x30b   : > { %6479 = vmatprep.subr.bf16.mxu0 %v9559_v16  ;;  %v4827_v13 = vrot.slane %v11017_v44, %v10252_v49  ;;  %v9628_v16 = vld [vmem:[%s10190_s14 + $0x1174] ss:$8 sps:$4 sm:$0xff]   ;;  %v9719_v43 = vld [vmem:[%s10190_s14 + $0x1280] ss:$8 sps:$4 sm:$0xff]  }
 0x30d   : > { %4785 = vmatpush2.bf16.msra.mxu1 %v9614_v0  ;;  %v4835_v15 = vcombine.high %v4827_v13, %v4827_v13  ;;  %v4904_v20 = vpack.c.bf16 %v4827_v13, %v4827_v13  ;;  %v9752_v13 = vld [vmem:[%s10190_s14 + $0x1434] ss:$8 sps:$4 sm:$0xff]  }
 0x30e   : > { %6480 = vmatpush1.bf16.msra.mxu0 %v9557_v18  ;;  %4786 = vmatprep.subr.bf16.mxu1 %v9622_v10  ;;  %v9732_v10 = vld [vmem:[%s10190_s14 + $0x1460] ss:$8 sps:$4 sm:$0xff]  }
 0x30f   : > { %6481 = vmatprep.subr.bf16.mxu0 %v9565_v19  ;;  %v4905_v18 = vpack.c.bf16 %v4835_v15, %v4835_v15  ;;  %v9629_v19 = vld [vmem:[%s10190_s14 + $0x1270] ss:$8 sps:$4 sm:$0xff]   ;;  %v9758_v15 = vld [vmem:[%s10190_s14 + $0x1424] ss:$8 sps:$4 sm:$0xff]  }
 0x311   : > { %4787 = vmatpush2.bf16.msra.mxu1 %v9620_v8  ;;  %6503 = vmatprep.mubr.bf16.mxu0 %v4905_v18  ;;  %v9740_v8 = vld [vmem:[%s10190_s14 + $0x1454] ss:$8 sps:$4 sm:$0xff]   ;;  %v9756_v18 = vld [vmem:[%s10190_s14 + $0x1420] ss:$8 sps:$4 sm:$0xff]  }
 0x312   : > { %6482 = vmatpush1.bf16.msra.mxu0 %v9563_v23  ;;  %6512 = vmatprep.subr.bf16.mxu1 %v9628_v16  ;;  %v9637_v23 = vld [vmem:[%s10190_s14 + $0x1264] ss:$8 sps:$4 sm:$0xff]   ;;  %v9750_v16 = vld [vmem:[%s10190_s14 + $0x1430] ss:$8 sps:$4 sm:$0xff]  }
 0x313   : > { %6483 = vmatprep.subr.bf16.mxu0 %v9571_v25  ;;  %v9643_v25 = vld [vmem:[%s10190_s14 + $0x1254] ss:$8 sps:$4 sm:$0xff]  }
 0x316   : > { %6484 = vmatpush1.bf16.msra.mxu0 %v9569_v27  ;;  %v9649_v27 = vld [vmem:[%s10190_s14 + $0x1244] ss:$8 sps:$4 sm:$0xff]  }
 0x317   : > { %6485 = vmatprep.subr.bf16.mxu0 %v9577_v29  ;;  %v9655_v29 = vld [vmem:[%s10190_s14 + $0x1234] ss:$8 sps:$4 sm:$0xff]  }
 0x31a   : > { %6486 = vmatpush1.bf16.msra.mxu0 %v9575_v31  ;;  %v9661_v31 = vld [vmem:[%s10190_s14 + $0x1224] ss:$8 sps:$4 sm:$0xff]  }
 0x31b   : > { %6487 = vmatprep.subr.bf16.mxu0 %v9583_v32  ;;  %v9667_v32 = vld [vmem:[%s10190_s14 + $0x1214] ss:$8 sps:$4 sm:$0xff]  }
 0x31e   : > { %6488 = vmatpush2.bf16.msra.mxu0 %v9581_v34  ;;  %v9673_v34 = vld [vmem:[%s10190_s14 + $0x1204] ss:$8 sps:$4 sm:$0xff]  }
 0x31f   : > { %6489 = vmatprep.subr.bf16.mxu0 %v9589_v37  ;;  %v9679_v37 = vld [vmem:[%s10190_s14 + $0x12f4] ss:$8 sps:$4 sm:$0xff]  }
 0x322   : > { %6490 = vmatpush2.bf16.msra.mxu0 %v9587_v40  ;;  %v9685_v40 = vld [vmem:[%s10190_s14 + $0x12e4] ss:$8 sps:$4 sm:$0xff]  }
 0x323   : > { %6491 = vmatprep.subr.bf16.mxu0 %v9595_v45  ;;  %v9691_v45 = vld [vmem:[%s10190_s14 + $0x12d4] ss:$8 sps:$4 sm:$0xff]  }
 0x326   : > { %6492 = vmatpush2.bf16.msra.mxu0 %v9593_v47  ;;  %v9697_v47 = vld [vmem:[%s10190_s14 + $0x12c4] ss:$8 sps:$4 sm:$0xff]  }
 0x327   : > { %6493 = vmatprep.subr.bf16.mxu0 %v9601_v50  ;;  %v9703_v50 = vld [vmem:[%s10190_s14 + $0x12b4] ss:$8 sps:$4 sm:$0xff]  }
 0x32a   : > { %6494 = vmatpush2.bf16.msra.mxu0 %v9599_v53  ;;  %v9709_v53 = vld [vmem:[%s10190_s14 + $0x12a4] ss:$8 sps:$4 sm:$0xff]  }
 0x32b   : > { %6495 = vmatprep.subr.bf16.mxu0 %v9607_v59  ;;  %v9707_v59 = vld [vmem:[%s10190_s14 + $0x12a0] ss:$8 sps:$4 sm:$0xff]  }
 0x32e   : > { %6496 = vmatpush2.bf16.msra.mxu0 %v9605_v21  ;;  %v9715_v21 = vld [vmem:[%s10190_s14 + $0x1294] ss:$8 sps:$4 sm:$0xff]  }
 0x32f   : > { %6497 = vmatprep.subr.bf16.mxu0 %v9613_v60  ;;  %v11057_v60 = vld [vmem:[%s10249_s11 + $0x48] sm:$0xff] }
 0x332   : > { %6498 = vmatpush2.bf16.msra.mxu0 %v9611_v61  ;;  %v4844_v61 = vrot.slane %v11057_v60, %v10252_v49 }
 0x333   : > { %6499 = vmatprep.subr.bf16.mxu0 %v9619_v6  ;;  %v9728_v6 = vld [vmem:[%s10190_s14 + $0x1474] ss:$8 sps:$4 sm:$0xff]  }
 0x336   : > { %6500 = vmatpush2.bf16.msra.mxu0 %v9617_v22  ;;  %v9726_v22 = vld [vmem:[%s10190_s14 + $0x1470] ss:$8 sps:$4 sm:$0xff]  }
 0x337   : > { %6501 = vmatprep.subr.bf16.mxu0 %v9625_v12  ;;  %v9744_v12 = vld [vmem:[%s10190_s14 + $0x1440] ss:$8 sps:$4 sm:$0xff]  }
 0x33a   : > { %6502 = vmatpush2.bf16.msra.mxu0 %v9623_v11  ;;  %v9746_v11 = vld [vmem:[%s10190_s14 + $0x1444] ss:$8 sps:$4 sm:$0xff]  }
 0x33b   : > { %6553 = vmatprep.subr.bf16.mxu0 %v9631_v3  ;;  %v9764_v3 = vld [vmem:[%s10190_s14 + $0x1414] ss:$8 sps:$4 sm:$0xff]  }
 0x33d   : > { %v4371_v62 = vpop.f32.mrf.mxu0  ;;  %6504 = vmatmul.mubr.bf16.vlgmr.msra.gmra.mxu0 %v4904_v20  ;;  %v9770_v20 = vld [vmem:[%s10190_s14 + $0x1404] ss:$8 sps:$4 sm:$0xff]  }
 0x33e   : > { %v11005_v63 = vadd.f32 %v4371_v62, %v4331_v39  ;;  %6554 = vmatpush1.bf16.msra.mxu0 %v9629_v19  ;;  %v9721_v62 = vld [vmem:[%s10190_s14 + $0x1284] ss:$8 sps:$4 sm:$0xff]   ;;  %v9762_v19 = vld [vmem:[%s10190_s14 + $0x1410] ss:$8 sps:$4 sm:$0xff]  }
 0x33f   : > { %v4373_v5 = vpop.f32.mrf.mxu0  ;;  %6555 = vmatprep.subr.bf16.mxu0 %v9637_v23  ;;  %v9768_v23 = vld [vmem:[%s10190_s14 + $0x1400] ss:$8 sps:$4 sm:$0xff]  }
 0x340   : > { %v11009_v17 = vadd.f32 %v4373_v5, %v4333_v42  ;;  %v4852_v42 = vcombine.high %v4844_v61, %v4844_v61  ;;  %v4908_v5 = vpack.c.bf16 %v4844_v61, %v4844_v61 }
 0x341   : > { %v4375_v7 = vpop.f32.mrf.mxu0 }
 0x342   : > { %6556 = vmatpush1.bf16.msra.mxu0 %v9635_v24  ;;  %v4909_v0 = vpack.c.bf16 %v4852_v42, %v4852_v42  ;;  %v9734_v7 = vld [vmem:[%s10190_s14 + $0x1464] ss:$8 sps:$4 sm:$0xff]   ;;  %v9776_v24 = vld [vmem:[%s10190_s14 + $0x14f4] ss:$8 sps:$4 sm:$0xff]  }
 0x343   : > { %v4376_v55 = vpop.f32.mrf.mxu0  ;;  %6557 = vmatprep.subr.bf16.mxu0 %v9643_v25  ;;  %v9774_v25 = vld [vmem:[%s10190_s14 + $0x14f0] ss:$8 sps:$4 sm:$0xff]  }
 0x344   : > { %6585 = vmatprep.mubr.bf16.mxu0 %v4909_v0  ;;  %v9738_v55 = vld [vmem:[%s10190_s14 + $0x1450] ss:$8 sps:$4 sm:$0xff]   ;;  %v9634_v0 = vld [vmem:[%s10190_s14 + $0x1164] ss:$8 sps:$4 sm:$0xff]  }
 0x346   : > { %6558 = vmatpush1.bf16.msra.mxu0 %v9641_v26  ;;  %v9782_v26 = vld [vmem:[%s10190_s14 + $0x14e4] ss:$8 sps:$4 sm:$0xff]  }
 0x347   : > { %6559 = vmatprep.subr.bf16.mxu0 %v9649_v27  ;;  %v9780_v27 = vld [vmem:[%s10190_s14 + $0x14e0] ss:$8 sps:$4 sm:$0xff]  }
 0x34a   : > { %6560 = vmatpush1.bf16.msra.mxu0 %v9647_v28  ;;  %v9788_v28 = vld [vmem:[%s10190_s14 + $0x14d4] ss:$8 sps:$4 sm:$0xff]  }
 0x34b   : > { %6561 = vmatprep.subr.bf16.mxu0 %v9655_v29  ;;  %v9786_v29 = vld [vmem:[%s10190_s14 + $0x14d0] ss:$8 sps:$4 sm:$0xff]  }
 0x34e   : > { %6562 = vmatpush1.bf16.msra.mxu0 %v9653_v30  ;;  %v9794_v30 = vld [vmem:[%s10190_s14 + $0x14c4] ss:$8 sps:$4 sm:$0xff]  }
 0x34f   : > { %6563 = vmatprep.subr.bf16.mxu0 %v9661_v31  ;;  %v9792_v31 = vld [vmem:[%s10190_s14 + $0x14c0] ss:$8 sps:$4 sm:$0xff]  }
 0x352   : > { %6564 = vmatpush1.bf16.msra.mxu0 %v9659_v14  ;;  %v4413_v14 = vadd.f32 %v10892_v4, %v11005_v63  ;;  %v9806_v4 = vld [vmem:[%s10190_s14 + $0x14a4] ss:$8 sps:$4 sm:$0xff]  }
 0x353   : > { %6565 = vmatprep.subr.bf16.mxu0 %v9667_v32  ;;  %v4415_v32 = vadd.f32 %v10900_v9, %v11009_v17  ;;  %v9804_v17 = vld [vmem:[%s10190_s14 + $0x14a0] ss:$8 sps:$4 sm:$0xff]  }
 0x356   : > { %6566 = vmatpush1.bf16.msra.mxu0 %v9665_v33 }
 0x357   : > { %6567 = vmatprep.subr.bf16.mxu0 %v9673_v34  ;;  %v9800_v34 = vld [vmem:[%s10190_s14 + $0x14b4] ss:$8 sps:$4 sm:$0xff]  }
 0x35a   : > { %6568 = vmatpush1.bf16.msra.mxu0 %v9671_v36  ;;  %v4820_v36 = vcombine.high %v11017_v44, %v11017_v44 }
 0x35b   : > { %6569 = vmatprep.subr.bf16.mxu0 %v9679_v37  ;;  %v9798_v37 = vld [vmem:[%s10190_s14 + $0x14b0] ss:$8 sps:$4 sm:$0xff]  }
 0x35c   : > { %v11100_v9 = vrot.slane %v4820_v36, %v10252_v49  ;;  %v9676_v36 = vld [vmem:[%s10190_s14 + $0x11f4] ss:$8 sps:$4 sm:$0xff]  }
 0x35e   : > { %6570 = vmatpush2.bf16.msra.mxu0 %v9677_v38 }
 0x35f   : > { %6571 = vmatprep.subr.bf16.mxu0 %v9685_v40 }
 0x362   : > { %6572 = vmatpush2.bf16.msra.mxu0 %v9683_v41 }
 0x363   : > { %6573 = vmatprep.subr.bf16.mxu0 %v9691_v45 }
 0x366   : > { %6574 = vmatpush2.bf16.msra.mxu0 %v9689_v46 }
 0x367   : > { %6575 = vmatprep.subr.bf16.mxu0 %v9697_v47 }
 0x36a   : > { %6576 = vmatpush2.bf16.msra.mxu0 %v9695_v48 }
 0x36b   : > { %6577 = vmatprep.subr.bf16.mxu0 %v9703_v50  ;;  %v4836_v50 = vcombine.high %v11100_v9, %v11100_v9 }
 0x36d   : > { %v4907_v61 = vpack.c.bf16 %v4836_v50, %v4836_v50  ;;  %v9692_v50 = vld [vmem:[%s10190_s14 + $0x11c0] ss:$8 sps:$4 sm:$0xff]  }
 0x36e   : > { %6578 = vmatpush2.bf16.msra.mxu0 %v9701_v52  ;;  %v9810_v52 = vld [vmem:[%s10190_s14 + $0x1490] ss:$8 sps:$4 sm:$0xff]  }
 0x36f   : > { %6579 = vmatprep.subr.bf16.mxu0 %v9709_v53 }
 0x372   : > { %6580 = vmatpush2.bf16.msra.mxu0 %v9707_v59 }
 0x373   : > { %6581 = vmatprep.subr.bf16.mxu0 %v9715_v21 }
 0x376   : > { %6582 = vmatpush2.bf16.msra.mxu0 %v9713_v2 }
 0x377   : > { %6583 = vmatprep.subr.bf16.mxu0 %v9721_v62  ;;  %v9816_v62 = vld [vmem:[%s10190_s14 + $0x1480] ss:$8 sps:$4 sm:$0xff]  }
 0x37a   : > { %6584 = vmatpush2.bf16.msra.mxu0 %v9719_v43 }
 0x37b   : > { %6635 = vmatprep.subr.bf16.mxu0 %v9728_v6 }
 0x37d   : > { %v11049_v54 = vpop.f32.mrf.mxu0  ;;  %6586 = vmatmul.mubr.bf16.vlgmr.msra.gmra.mxu0 %v4908_v5 }
 0x37e   : > { %6636 = vmatpush1.bf16.msra.mxu0 %v9726_v22  ;;  %v4454_v33 = vadd.f32 %v11049_v54, %v4413_v14  ;;  %v9825_v22 = vld [vmem:[%s10190_s14 + $0x1674] ss:$8 sps:$4 sm:$0xff]   ;;  %v9670_v14 = vld [vmem:[%s10190_s14 + $0x1104] ss:$8 sps:$4 sm:$0xff]  }
 0x37f   : > { %v11052_v1 = vpop.f32.mrf.mxu0  ;;  %6637 = vmatprep.subr.bf16.mxu0 %v9734_v7  ;;  %v9632_v7 = vld [vmem:[%s10190_s14 + $0x1160] ss:$8 sps:$4 sm:$0xff]  }
 0x380   : > { %v4456_v38 = vadd.f32 %v11052_v1, %v4415_v32  ;;  %v4495_v40 = vadd.f32 %v10940_v56, %v4454_v33  ;;  %v9812_v56 = vld [vmem:[%s10190_s14 + $0x1494] ss:$8 sps:$4 sm:$0xff]   ;;  %v9668_v33 = vld [vmem:[%s10190_s14 + $0x1100] ss:$8 sps:$4 sm:$0xff]  }
 0x381   : > { %v4457_v35 = vpop.f32.mrf.mxu0  ;;  %v9861_v32 = vld [vmem:[%s10190_s14 + $0x1614] ss:$8 sps:$4 sm:$0xff]  }
 0x382   : > { %6638 = vmatpush1.bf16.msra.mxu0 %v9732_v10  ;;  %v4497_v41 = vadd.f32 %v10942_v51, %v4456_v38  ;;  %v11109_v51 = vld [vmem:[%s10249_s11 + $0x50] sm:$0xff]  ;;  %v9818_v35 = vld [vmem:[%s10190_s14 + $0x1484] ss:$8 sps:$4 sm:$0xff]  }
 0x383   : > { %v4458_v39 = vpop.f32.mrf.mxu0  ;;  %6639 = vmatprep.subr.bf16.mxu0 %v9740_v8  ;;  %v4861_v1 = vrot.slane %v11109_v51, %v10252_v49  ;;  %v9823_v10 = vld [vmem:[%s10190_s14 + $0x1670] ss:$8 sps:$4 sm:$0xff]   ;;  %v9640_v8 = vld [vmem:[%s10190_s14 + $0x1154] ss:$8 sps:$4 sm:$0xff]  }
 0x384   : > { %v9626_v39 = vld [vmem:[%s10190_s14 + $0x1170] ss:$8 sps:$4 sm:$0xff]  }
 0x385   : > { %v4869_v43 = vcombine.high %v4861_v1, %v4861_v1  ;;  %v4912_v6 = vpack.c.bf16 %v4861_v1, %v4861_v1  ;;  %v9674_v38 = vld [vmem:[%s10190_s14 + $0x11f0] ss:$8 sps:$4 sm:$0xff]   ;;  %v9889_v1 = vld [vmem:[%s10190_s14 + $0x16c0] ss:$8 sps:$4 sm:$0xff]  }
 0x386   : > { %6640 = vmatpush1.bf16.msra.mxu0 %v9738_v55  ;;  %v9831_v55 = vld [vmem:[%s10190_s14 + $0x1664] ss:$8 sps:$4 sm:$0xff]  }
 0x387   : > { %6641 = vmatprep.subr.bf16.mxu0 %v9746_v11  ;;  %v4913_v5 = vpack.c.bf16 %v4869_v43, %v4869_v43  ;;  %v9638_v11 = vld [vmem:[%s10190_s14 + $0x1150] ss:$8 sps:$4 sm:$0xff]   ;;  %v9903_v43 = vld [vmem:[%s10190_s14 + $0x16a4] ss:$8 sps:$4 sm:$0xff]  }
 0x389   : > { %6667 = vmatprep.mubr.bf16.mxu0 %v4913_v5  ;;  %v9901_v5 = vld [vmem:[%s10190_s14 + $0x16a0] ss:$8 sps:$4 sm:$0xff]  }
 0x38a   : > { %6642 = vmatpush1.bf16.msra.mxu0 %v9744_v12  ;;  %v9829_v12 = vld [vmem:[%s10190_s14 + $0x1660] ss:$8 sps:$4 sm:$0xff]  }
 0x38b   : > { %6643 = vmatprep.subr.bf16.mxu0 %v9752_v13  ;;  %v9646_v13 = vld [vmem:[%s10190_s14 + $0x1144] ss:$8 sps:$4 sm:$0xff]  }
 0x38e   : > { %6644 = vmatpush1.bf16.msra.mxu0 %v9750_v16  ;;  %v9837_v16 = vld [vmem:[%s10190_s14 + $0x1654] ss:$8 sps:$4 sm:$0xff]  }
 0x38f   : > { %6645 = vmatprep.subr.bf16.mxu0 %v9758_v15  ;;  %v9644_v15 = vld [vmem:[%s10190_s14 + $0x1140] ss:$8 sps:$4 sm:$0xff]  }
 0x392   : > { %6646 = vmatpush1.bf16.msra.mxu0 %v9756_v18  ;;  %v9835_v18 = vld [vmem:[%s10190_s14 + $0x1650] ss:$8 sps:$4 sm:$0xff]  }
 0x393   : > { %6647 = vmatprep.subr.bf16.mxu0 %v9764_v3  ;;  %v9652_v3 = vld [vmem:[%s10190_s14 + $0x1134] ss:$8 sps:$4 sm:$0xff]  }
 0x396   : > { %6648 = vmatpush1.bf16.msra.mxu0 %v9762_v19  ;;  %v9843_v19 = vld [vmem:[%s10190_s14 + $0x1644] ss:$8 sps:$4 sm:$0xff]  }
 0x397   : > { %6649 = vmatprep.subr.bf16.mxu0 %v9770_v20  ;;  %v9650_v20 = vld [vmem:[%s10190_s14 + $0x1130] ss:$8 sps:$4 sm:$0xff]  }
 0x39a   : > { %6650 = vmatpush1.bf16.msra.mxu0 %v9768_v23  ;;  %v9841_v23 = vld [vmem:[%s10190_s14 + $0x1640] ss:$8 sps:$4 sm:$0xff]  }
 0x39b   : > { %6651 = vmatprep.subr.bf16.mxu0 %v9776_v24  ;;  %v9658_v24 = vld [vmem:[%s10190_s14 + $0x1124] ss:$8 sps:$4 sm:$0xff]  }
 0x39e   : > { %6652 = vmatpush2.bf16.msra.mxu0 %v9774_v25  ;;  %v9849_v25 = vld [vmem:[%s10190_s14 + $0x1634] ss:$8 sps:$4 sm:$0xff]  }
 0x39f   : > { %6653 = vmatprep.subr.bf16.mxu0 %v9782_v26  ;;  %v9656_v26 = vld [vmem:[%s10190_s14 + $0x1120] ss:$8 sps:$4 sm:$0xff]  }
 0x3a2   : > { %6654 = vmatpush2.bf16.msra.mxu0 %v9780_v27  ;;  %v9847_v27 = vld [vmem:[%s10190_s14 + $0x1630] ss:$8 sps:$4 sm:$0xff]  }
 0x3a3   : > { %6655 = vmatprep.subr.bf16.mxu0 %v9788_v28  ;;  %v9664_v28 = vld [vmem:[%s10190_s14 + $0x1114] ss:$8 sps:$4 sm:$0xff]  }
 0x3a6   : > { %6656 = vmatpush2.bf16.msra.mxu0 %v9786_v29  ;;  %v9855_v29 = vld [vmem:[%s10190_s14 + $0x1624] ss:$8 sps:$4 sm:$0xff]  }
 0x3a7   : > { %6657 = vmatprep.subr.bf16.mxu0 %v9794_v30  ;;  %v9662_v30 = vld [vmem:[%s10190_s14 + $0x1110] ss:$8 sps:$4 sm:$0xff]  }
 0x3aa   : > { %6658 = vmatpush2.bf16.msra.mxu0 %v9792_v31  ;;  %v9853_v31 = vld [vmem:[%s10190_s14 + $0x1620] ss:$8 sps:$4 sm:$0xff]  }
 0x3ab   : > { %6659 = vmatprep.subr.bf16.mxu0 %v9800_v34  ;;  %v9859_v34 = vld [vmem:[%s10190_s14 + $0x1610] ss:$8 sps:$4 sm:$0xff]  }
 0x3ae   : > { %6660 = vmatpush2.bf16.msra.mxu0 %v9798_v37  ;;  %v9867_v37 = vld [vmem:[%s10190_s14 + $0x1604] ss:$8 sps:$4 sm:$0xff]  }
 0x3af   : > { %6661 = vmatprep.subr.bf16.mxu0 %v9806_v4  ;;  %v9682_v4 = vld [vmem:[%s10190_s14 + $0x11e4] ss:$8 sps:$4 sm:$0xff]  }
 0x3b2   : > { %6662 = vmatpush2.bf16.msra.mxu0 %v9804_v17  ;;  %v9680_v17 = vld [vmem:[%s10190_s14 + $0x11e0] ss:$8 sps:$4 sm:$0xff]  }
 0x3b3   : > { %6663 = vmatprep.subr.bf16.mxu0 %v9812_v56  ;;  %v9694_v56 = vld [vmem:[%s10190_s14 + $0x11c4] ss:$8 sps:$4 sm:$0xff]  }
 0x3b6   : > { %6664 = vmatpush2.bf16.msra.mxu0 %v9810_v52  ;;  %v9883_v52 = vld [vmem:[%s10190_s14 + $0x16d0] ss:$8 sps:$4 sm:$0xff]  }
 0x3b7   : > { %6665 = vmatprep.subr.bf16.mxu0 %v9818_v35  ;;  %v9897_v35 = vld [vmem:[%s10190_s14 + $0x16b4] ss:$8 sps:$4 sm:$0xff]  }
 0x3ba   : > { %6666 = vmatpush2.bf16.msra.mxu0 %v9816_v62  ;;  %v9712_v62 = vld [vmem:[%s10190_s14 + $0x1194] ss:$8 sps:$4 sm:$0xff]  }
 0x3bb   : > { %6717 = vmatprep.subr.bf16.mxu0 %v9825_v22  ;;  %v9716_v22 = vld [vmem:[%s10190_s14 + $0x1180] ss:$8 sps:$4 sm:$0xff]  }
 0x3bd   : > { %v4535_v63 = vpop.f32.mrf.mxu0  ;;  %6668 = vmatmul.mubr.bf16.vlgmr.msra.gmra.mxu0 %v4912_v6  ;;  %v9718_v6 = vld [vmem:[%s10190_s14 + $0x1184] ss:$8 sps:$4 sm:$0xff]  }
 0x3be   : > { %v4536_v45 = vadd.f32 %v4535_v63, %v4495_v40  ;;  %6718 = vmatpush1.bf16.msra.mxu0 %v9823_v10  ;;  %v9865_v40 = vld [vmem:[%s10190_s14 + $0x1600] ss:$8 sps:$4 sm:$0xff]   ;;  %v9873_v63 = vld [vmem:[%s10190_s14 + $0x16f4] ss:$8 sps:$4 sm:$0xff]   ;;  %v9907_v10 = vld [vmem:[%s10190_s14 + $0x1690] ss:$8 sps:$4 sm:$0xff]  }
 0x3bf   : > { %v4537_v44 = vpop.f32.mrf.mxu0  ;;  %6719 = vmatprep.subr.bf16.mxu0 %v9831_v55  ;;  %v11185_v55 = vld [vmem:[%s10249_s11 + $0x58] sm:$0xff] }
 0x3c0   : > { %vm4542_vm2 = vcmp.gt.f32.partialorder %v4536_v45, 0.0  ;;  %v4544_v46 = vmul.f32 0.1, %v4536_v45  ;;  %v4538_v47 = vadd.f32 %v4537_v44, %v4497_v41  ;;  %v9871_v41 = vld [vmem:[%s10190_s14 + $0x16f0] ss:$8 sps:$4 sm:$0xff]  }
 0x3c1   : > { %v4539_v48 = vpop.f32.mrf.mxu0  ;;  %v9879_v44 = vld [vmem:[%s10190_s14 + $0x16e4] ss:$8 sps:$4 sm:$0xff]  }
 0x3c2   : > { %vm4543_vm3 = vcmp.gt.f32.partialorder %v4538_v47, 0.0  ;;  %v4545_v53 = vmul.f32 0.1, %v4538_v47  ;;  %v4546_v54 = vsel %vm4542_vm2, %v4536_v45, %v4544_v46  ;;  %6720 = vmatpush1.bf16.msra.mxu0 %v9829_v12  ;;  %v9688_v45 = vld [vmem:[%s10190_s14 + $0x11d4] ss:$8 sps:$4 sm:$0xff]   ;;  %v4906_v12 = vpack.c.bf16 %v11100_v9, %v11100_v9 }
 0x3c3   : > { %v4540_v59 = vpop.f32.mrf.mxu0  ;;  %v4548_v42 = vpack.c.bf16 %v4546_v54, %v4546_v54  ;;  %6721 = vmatprep.subr.bf16.mxu0 %v9837_v16  ;;  %v9686_v46 = vld [vmem:[%s10190_s14 + $0x11d0] ss:$8 sps:$4 sm:$0xff]   ;;  %v9885_v48 = vld [vmem:[%s10190_s14 + $0x16d4] ss:$8 sps:$4 sm:$0xff]   ;;  %v9891_v54 = vld [vmem:[%s10190_s14 + $0x16c4] ss:$8 sps:$4 sm:$0xff]  }
 0x3c4   : > { %v4547_v21 = vsel %vm4543_vm3, %v4538_v47, %v4545_v53  ;;  %v9877_v47 = vld [vmem:[%s10190_s14 + $0x16e0] ss:$8 sps:$4 sm:$0xff]   ;;  %v9700_v53 = vld [vmem:[%s10190_s14 + $0x11b4] ss:$8 sps:$4 sm:$0xff]   ;;  %v9698_v59 = vld [vmem:[%s10190_s14 + $0x11b0] ss:$8 sps:$4 sm:$0xff]  }
 0x3c5   : > { %v4549_v2 = vpack.c.bf16 %v4547_v21, %v4547_v21  ;;  %v9706_v21 = vld [vmem:[%s10190_s14 + $0x11a4] ss:$8 sps:$4 sm:$0xff]   ;;  %v9723_v16 = vld [vmem:[%s10190_s14 + $0x1370] ss:$8 sps:$4 sm:$0xff]  }
 0x3c6   : > { %6722 = vmatpush1.bf16.msra.mxu0 %v9835_v18  ;;  %v9913_v18 = vld [vmem:[%s10190_s14 + $0x1680] ss:$8 sps:$4 sm:$0xff]  }
 0x3c7   : > { %4788 = vmatprep.mubr.bf16.mxu1 %v4549_v2  ;;  %6723 = vmatprep.subr.bf16.mxu0 %v9843_v19  ;;  %v9704_v2 = vld [vmem:[%s10190_s14 + $0x11a0] ss:$8 sps:$4 sm:$0xff]   ;;  %v9731_v19 = vld [vmem:[%s10190_s14 + $0x1364] ss:$8 sps:$4 sm:$0xff]  }
 0x3c8   : > { %4789 = vmatmul.mubr.bf16.vlgmr.msra.gmra.mxu1 %v4548_v42  ;;  %v9710_v42 = vld [vmem:[%s10190_s14 + $0x1190] ss:$8 sps:$4 sm:$0xff]  }
 0x3c9   : > { %6513 = vmatpush1.bf16.msra.mxu1 %v9626_v39  ;;  %6544 = vmatprep.mubr.bf16.mxu1 %v4907_v61  ;;  %v4837_v39 = vcombine.high %v11057_v60, %v11057_v60  ;;  %v9895_v61 = vld [vmem:[%s10190_s14 + $0x16b0] ss:$8 sps:$4 sm:$0xff]   ;;  %v9909_v60 = vld [vmem:[%s10190_s14 + $0x1694] ss:$8 sps:$4 sm:$0xff]  }
 0x3ca   : > { %6514 = vmatprep.subr.bf16.mxu1 %v9634_v0  ;;  %6724 = vmatpush1.bf16.msra.mxu0 %v9841_v23  ;;  %v9729_v23 = vld [vmem:[%s10190_s14 + $0x1360] ss:$8 sps:$4 sm:$0xff]  }
 0x3cb   : > { %6725 = vmatprep.subr.bf16.mxu0 %v9849_v25  ;;  %v11174_v0 = vrot.slane %v4837_v39, %v10252_v49  ;;  %v9735_v25 = vld [vmem:[%s10190_s14 + $0x1350] ss:$8 sps:$4 sm:$0xff]  }
 0x3cc   : > { %v9820_v39 = vld [vmem:[%s10190_s14 + $0x1570] ss:$8 sps:$4 sm:$0xff]  }
 0x3cd   : > { %6515 = vmatpush1.bf16.msra.mxu1 %v9632_v7  ;;  %v4853_v7 = vcombine.high %v11174_v0, %v11174_v0 }
 0x3ce   : > { %6516 = vmatprep.subr.bf16.mxu1 %v9640_v8  ;;  %6726 = vmatpush1.bf16.msra.mxu0 %v9847_v27  ;;  %v9725_v8 = vld [vmem:[%s10190_s14 + $0x1374] ss:$8 sps:$4 sm:$0xff]   ;;  %v9741_v27 = vld [vmem:[%s10190_s14 + $0x1340] ss:$8 sps:$4 sm:$0xff]  }
 0x3cf   : > { %6727 = vmatprep.subr.bf16.mxu0 %v9855_v29  ;;  %v9747_v29 = vld [vmem:[%s10190_s14 + $0x1330] ss:$8 sps:$4 sm:$0xff]  }
 0x3d1   : > { %6517 = vmatpush1.bf16.msra.mxu1 %v9638_v11  ;;  %v4878_v11 = vrot.slane %v11185_v55, %v10252_v49 }
 0x3d2   : > { %6518 = vmatprep.subr.bf16.mxu1 %v9646_v13  ;;  %6728 = vmatpush1.bf16.msra.mxu0 %v9853_v31  ;;  %v9915_v13 = vld [vmem:[%s10190_s14 + $0x1684] ss:$8 sps:$4 sm:$0xff]   ;;  %v9753_v31 = vld [vmem:[%s10190_s14 + $0x1320] ss:$8 sps:$4 sm:$0xff]  }
 0x3d3   : > { %6729 = vmatprep.subr.bf16.mxu0 %v9861_v32  ;;  %v4916_v9 = vpack.c.bf16 %v4878_v11, %v4878_v11  ;;  %v9759_v32 = vld [vmem:[%s10190_s14 + $0x1310] ss:$8 sps:$4 sm:$0xff]  }
 0x3d5   : > { %6519 = vmatpush1.bf16.msra.mxu1 %v9644_v15  ;;  %v4911_v15 = vpack.c.bf16 %v4853_v7, %v4853_v7 }
 0x3d6   : > { %6520 = vmatprep.subr.bf16.mxu1 %v9652_v3  ;;  %6730 = vmatpush1.bf16.msra.mxu0 %v9859_v34  ;;  %v4886_v3 = vcombine.high %v4878_v11, %v4878_v11  ;;  %v9765_v34 = vld [vmem:[%s10190_s14 + $0x1300] ss:$8 sps:$4 sm:$0xff]   ;;  %v9846_v11 = vld [vmem:[%s10190_s14 + $0x1534] ss:$8 sps:$4 sm:$0xff]  }
 0x3d7   : > { %6731 = vmatprep.subr.bf16.mxu0 %v9867_v37  ;;  %v9771_v37 = vld [vmem:[%s10190_s14 + $0x13f0] ss:$8 sps:$4 sm:$0xff]  }
 0x3d9   : > { %6521 = vmatpush1.bf16.msra.mxu1 %v9650_v20  ;;  %v4917_v20 = vpack.c.bf16 %v4886_v3, %v4886_v3  ;;  %v9864_v3 = vld [vmem:[%s10190_s14 + $0x1504] ss:$8 sps:$4 sm:$0xff]  }
 0x3da   : > { %6522 = vmatprep.subr.bf16.mxu1 %v9658_v24  ;;  %6732 = vmatpush1.bf16.msra.mxu0 %v9865_v40  ;;  %v9737_v24 = vld [vmem:[%s10190_s14 + $0x1354] ss:$8 sps:$4 sm:$0xff]   ;;  %v9777_v40 = vld [vmem:[%s10190_s14 + $0x13e0] ss:$8 sps:$4 sm:$0xff]  }
 0x3db   : > { %6733 = vmatprep.subr.bf16.mxu0 %v9873_v63  ;;  %6749 = vmatprep.mubr.bf16.mxu0 %v4917_v20  ;;  %v9783_v63 = vld [vmem:[%s10190_s14 + $0x13d0] ss:$8 sps:$4 sm:$0xff]   ;;  %v9870_v20 = vld [vmem:[%s10190_s14 + $0x15f4] ss:$8 sps:$4 sm:$0xff]  }
 0x3dd   : > { %6523 = vmatpush1.bf16.msra.mxu1 %v9656_v26  ;;  %v9743_v26 = vld [vmem:[%s10190_s14 + $0x1344] ss:$8 sps:$4 sm:$0xff]  }
 0x3de   : > { %6524 = vmatprep.subr.bf16.mxu1 %v9664_v28  ;;  %6734 = vmatpush2.bf16.msra.mxu0 %v9871_v41  ;;  %v9749_v28 = vld [vmem:[%s10190_s14 + $0x1334] ss:$8 sps:$4 sm:$0xff]   ;;  %v9789_v41 = vld [vmem:[%s10190_s14 + $0x13c0] ss:$8 sps:$4 sm:$0xff]  }
 0x3df   : > { %6735 = vmatprep.subr.bf16.mxu0 %v9879_v44  ;;  %v9795_v44 = vld [vmem:[%s10190_s14 + $0x13b0] ss:$8 sps:$4 sm:$0xff]  }
 0x3e1   : > { %6525 = vmatpush1.bf16.msra.mxu1 %v9662_v30  ;;  %v9755_v30 = vld [vmem:[%s10190_s14 + $0x1324] ss:$8 sps:$4 sm:$0xff]  }
 0x3e2   : > { %6526 = vmatprep.subr.bf16.mxu1 %v9670_v14  ;;  %6736 = vmatpush2.bf16.msra.mxu0 %v9877_v47  ;;  %v9761_v14 = vld [vmem:[%s10190_s14 + $0x1314] ss:$8 sps:$4 sm:$0xff]   ;;  %v9801_v47 = vld [vmem:[%s10190_s14 + $0x13a0] ss:$8 sps:$4 sm:$0xff]  }
 0x3e3   : > { %6737 = vmatprep.subr.bf16.mxu0 %v9885_v48  ;;  %v9809_v48 = vld [vmem:[%s10190_s14 + $0x1394] ss:$8 sps:$4 sm:$0xff]  }
 0x3e5   : > { %6527 = vmatpush1.bf16.msra.mxu1 %v9668_v33  ;;  %v9767_v33 = vld [vmem:[%s10190_s14 + $0x1304] ss:$8 sps:$4 sm:$0xff]  }
 0x3e6   : > { %6528 = vmatprep.subr.bf16.mxu1 %v9676_v36  ;;  %6738 = vmatpush2.bf16.msra.mxu0 %v9883_v52  ;;  %v9773_v36 = vld [vmem:[%s10190_s14 + $0x13f4] ss:$8 sps:$4 sm:$0xff]  }
 0x3e7   : > { %6739 = vmatprep.subr.bf16.mxu0 %v9891_v54 }
 0x3e9   : > { %6529 = vmatpush2.bf16.msra.mxu1 %v9674_v38  ;;  %v9779_v38 = vld [vmem:[%s10190_s14 + $0x13e4] ss:$8 sps:$4 sm:$0xff]  }
 0x3ea   : > { %6530 = vmatprep.subr.bf16.mxu1 %v9682_v4  ;;  %6740 = vmatpush2.bf16.msra.mxu0 %v9889_v1  ;;  %v9785_v4 = vld [vmem:[%s10190_s14 + $0x13d4] ss:$8 sps:$4 sm:$0xff]  }
 0x3eb   : > { %6741 = vmatprep.subr.bf16.mxu0 %v9897_v35 }
 0x3ed   : > { %6531 = vmatpush2.bf16.msra.mxu1 %v9680_v17  ;;  %v9791_v17 = vld [vmem:[%s10190_s14 + $0x13c4] ss:$8 sps:$4 sm:$0xff]  }
 0x3ee   : > { %6532 = vmatprep.subr.bf16.mxu1 %v9688_v45  ;;  %6742 = vmatpush2.bf16.msra.mxu0 %v9895_v61  ;;  %v9797_v45 = vld [vmem:[%s10190_s14 + $0x13b4] ss:$8 sps:$4 sm:$0xff]  }
 0x3ef   : > { %6743 = vmatprep.subr.bf16.mxu0 %v9903_v43  ;;  %v9828_v43 = vld [vmem:[%s10190_s14 + $0x1564] ss:$8 sps:$4 sm:$0xff]  }
 0x3f1   : > { %6533 = vmatpush2.bf16.msra.mxu1 %v9686_v46  ;;  %v9803_v46 = vld [vmem:[%s10190_s14 + $0x13a4] ss:$8 sps:$4 sm:$0xff]  }
 0x3f2   : > { %6534 = vmatprep.subr.bf16.mxu1 %v9694_v56  ;;  %6744 = vmatpush2.bf16.msra.mxu0 %v9901_v5  ;;  %v4854_v56 = vcombine.high %v11109_v51, %v11109_v51  ;;  %v9834_v5 = vld [vmem:[%s10190_s14 + $0x1554] ss:$8 sps:$4 sm:$0xff]  }
 0x3f3   : > { %6745 = vmatprep.subr.bf16.mxu0 %v9909_v60 }
 0x3f4   : > { %v11225_v52 = vrot.slane %v4854_v56, %v10252_v49 }
 0x3f5   : > { %6535 = vmatpush2.bf16.msra.mxu1 %v9692_v50  ;;  %v9807_v50 = vld [vmem:[%s10190_s14 + $0x1390] ss:$8 sps:$4 sm:$0xff]  }
 0x3f6   : > { %6536 = vmatprep.subr.bf16.mxu1 %v9700_v53  ;;  %6746 = vmatpush2.bf16.msra.mxu0 %v9907_v10  ;;  %v9815_v53 = vld [vmem:[%s10190_s14 + $0x1384] ss:$8 sps:$4 sm:$0xff]   ;;  %v4870_v1 = vcombine.high %v11225_v52, %v11225_v52  ;;  %v9838_v10 = vld [vmem:[%s10190_s14 + $0x1540] ss:$8 sps:$4 sm:$0xff]  }
 0x3f7   : > { %6747 = vmatprep.subr.bf16.mxu0 %v9915_v13  ;;  %v9852_v13 = vld [vmem:[%s10190_s14 + $0x1524] ss:$8 sps:$4 sm:$0xff]  }
 0x3f8   : > { %v4915_v61 = vpack.c.bf16 %v4870_v1, %v4870_v1 }
 0x3f9   : > { %6537 = vmatpush2.bf16.msra.mxu1 %v9698_v59  ;;  %v9813_v59 = vld [vmem:[%s10190_s14 + $0x1380] ss:$8 sps:$4 sm:$0xff]  }
 0x3fa   : > { %6538 = vmatprep.subr.bf16.mxu1 %v9706_v21  ;;  %6748 = vmatpush2.bf16.msra.mxu0 %v9913_v18  ;;  %v9822_v21 = vld [vmem:[%s10190_s14 + $0x1574] ss:$8 sps:$4 sm:$0xff]   ;;  %v9856_v18 = vld [vmem:[%s10190_s14 + $0x1510] ss:$8 sps:$4 sm:$0xff]  }
 0x3fd   : > { %6539 = vmatpush2.bf16.msra.mxu1 %v9704_v2  ;;  %6750 = vmatmul.mubr.bf16.vlgmr.msra.gmra.mxu0 %v4916_v9  ;;  %v11228_v54 = vpop.f32.mrf.mxu0  ;;  %v4910_v2 = vpack.c.bf16 %v11174_v0, %v11174_v0  ;;  %v9832_v0 = vld [vmem:[%s10190_s14 + $0x1550] ss:$8 sps:$4 sm:$0xff]  }
 0x3fe   : > { %6540 = vmatprep.subr.bf16.mxu1 %v9712_v62  ;;  %v9868_v9 = vld [vmem:[%s10190_s14 + $0x15f0] ss:$8 sps:$4 sm:$0xff]  }
 0x3ff   : > { %v11233_v51 = vpop.f32.mrf.mxu0 }
 0x401   : > { %6541 = vmatpush2.bf16.msra.mxu1 %v9710_v42  ;;  %v6509_v35 = vpop.f32.mrf.mxu0  ;;  %v9826_v42 = vld [vmem:[%s10190_s14 + $0x1560] ss:$8 sps:$4 sm:$0xff]  }
 0x402   : > { %6542 = vmatprep.subr.bf16.mxu1 %v9718_v6 }
 0x403   : > { %v6510_v62 = vpop.f32.mrf.mxu0 }
 0x404   : > { %v9926_v62 = vld [vmem:[%s10190_s14 + $0x1740] ss:$8 sps:$4 sm:$0xff]  }
 0x405   : > { %6543 = vmatpush2.bf16.msra.mxu1 %v9716_v22  ;;  %v9840_v22 = vld [vmem:[%s10190_s14 + $0x1544] ss:$8 sps:$4 sm:$0xff]  }
 0x406   : > { %6594 = vmatprep.subr.bf16.mxu1 %v9725_v8 }
 0x408   : > { %6545 = vmatmul.mubr.bf16.vlgmr.msra.gmra.mxu1 %v4906_v12  ;;  %v9844_v12 = vld [vmem:[%s10190_s14 + $0x1530] ss:$8 sps:$4 sm:$0xff]  }
 0x409   : > { %6595 = vmatpush1.bf16.msra.mxu1 %v9723_v16  ;;  %6626 = vmatprep.mubr.bf16.mxu1 %v4911_v15  ;;  %v9850_v16 = vld [vmem:[%s10190_s14 + $0x1520] ss:$8 sps:$4 sm:$0xff]   ;;  %v9858_v15 = vld [vmem:[%s10190_s14 + $0x1514] ss:$8 sps:$4 sm:$0xff]  }
 0x40a   : > { %6596 = vmatprep.subr.bf16.mxu1 %v9731_v19  ;;  %v9862_v19 = vld [vmem:[%s10190_s14 + $0x1500] ss:$8 sps:$4 sm:$0xff]  }
 0x40d   : > { %6597 = vmatpush1.bf16.msra.mxu1 %v9729_v23  ;;  %v9876_v23 = vld [vmem:[%s10190_s14 + $0x15e4] ss:$8 sps:$4 sm:$0xff]  }
 0x40e   : > { %6598 = vmatprep.subr.bf16.mxu1 %v9737_v24  ;;  %v9874_v24 = vld [vmem:[%s10190_s14 + $0x15e0] ss:$8 sps:$4 sm:$0xff]  }
 0x411   : > { %6599 = vmatpush1.bf16.msra.mxu1 %v9735_v25  ;;  %v9882_v25 = vld [vmem:[%s10190_s14 + $0x15d4] ss:$8 sps:$4 sm:$0xff]  }
 0x412   : > { %6600 = vmatprep.subr.bf16.mxu1 %v9743_v26  ;;  %v9880_v26 = vld [vmem:[%s10190_s14 + $0x15d0] ss:$8 sps:$4 sm:$0xff]  }
 0x415   : > { %6601 = vmatpush1.bf16.msra.mxu1 %v9741_v27  ;;  %v9888_v27 = vld [vmem:[%s10190_s14 + $0x15c4] ss:$8 sps:$4 sm:$0xff]  }
 0x416   : > { %6602 = vmatprep.subr.bf16.mxu1 %v9749_v28  ;;  %v9886_v28 = vld [vmem:[%s10190_s14 + $0x15c0] ss:$8 sps:$4 sm:$0xff]  }
 0x419   : > { %6603 = vmatpush1.bf16.msra.mxu1 %v9747_v29  ;;  %v9894_v29 = vld [vmem:[%s10190_s14 + $0x15b4] ss:$8 sps:$4 sm:$0xff]  }
 0x41a   : > { %6604 = vmatprep.subr.bf16.mxu1 %v9755_v30  ;;  %v9892_v30 = vld [vmem:[%s10190_s14 + $0x15b0] ss:$8 sps:$4 sm:$0xff]  }
 0x41d   : > { %6605 = vmatpush1.bf16.msra.mxu1 %v9753_v31  ;;  %v9900_v31 = vld [vmem:[%s10190_s14 + $0x15a4] ss:$8 sps:$4 sm:$0xff]  }
 0x41e   : > { %6606 = vmatprep.subr.bf16.mxu1 %v9761_v14  ;;  %v9898_v14 = vld [vmem:[%s10190_s14 + $0x15a0] ss:$8 sps:$4 sm:$0xff]  }
 0x421   : > { %6607 = vmatpush1.bf16.msra.mxu1 %v9759_v32  ;;  %v4871_v32 = vcombine.high %v11185_v55, %v11185_v55  ;;  %v4914_v55 = vpack.c.bf16 %v11225_v52, %v11225_v52 }
 0x422   : > { %6608 = vmatprep.subr.bf16.mxu1 %v9767_v33  ;;  %v9906_v33 = vld [vmem:[%s10190_s14 + $0x1594] ss:$8 sps:$4 sm:$0xff]  }
 0x425   : > { %6609 = vmatpush1.bf16.msra.mxu1 %v9765_v34  ;;  %v9904_v34 = vld [vmem:[%s10190_s14 + $0x1590] ss:$8 sps:$4 sm:$0xff]  }
 0x426   : > { %6610 = vmatprep.subr.bf16.mxu1 %v9773_v36  ;;  %v11274_v36 = vrot.slane %v4871_v32, %v10252_v49  ;;  %v9922_v49 = vld [vmem:[%s10190_s14 + $0x1764] ss:$8 sps:$4 sm:$0xff]  }
 0x428   : > { %v4918_v32 = vpack.c.bf16 %v11274_v36, %v11274_v36 }
 0x429   : > { %6611 = vmatpush2.bf16.msra.mxu1 %v9771_v37  ;;  %v9912_v37 = vld [vmem:[%s10190_s14 + $0x1584] ss:$8 sps:$4 sm:$0xff]  }
 0x42a   : > { %6612 = vmatprep.subr.bf16.mxu1 %v9779_v38  ;;  %v9910_v38 = vld [vmem:[%s10190_s14 + $0x1580] ss:$8 sps:$4 sm:$0xff]  }
 0x42d   : > { %6613 = vmatpush2.bf16.msra.mxu1 %v9777_v40  ;;  %v4887_v40 = vcombine.high %v11274_v36, %v11274_v36 }
 0x42e   : > { %6614 = vmatprep.subr.bf16.mxu1 %v9785_v4  ;;  %v9919_v4 = vld [vmem:[%s10190_s14 + $0x1774] ss:$8 sps:$4 sm:$0xff]  }
 0x431   : > { %6615 = vmatpush2.bf16.msra.mxu1 %v9783_v63  ;;  %v8034_v63 = vld [vmem:[%s10877_s7 + $0x2] sm:$0x3] }
 0x432   : > { %6616 = vmatprep.subr.bf16.mxu1 %v9791_v17  ;;  %v9917_v17 = vld [vmem:[%s10190_s14 + $0x1770] ss:$8 sps:$4 sm:$0xff]  }
 0x435   : > { %6617 = vmatpush2.bf16.msra.mxu1 %v9789_v41  ;;  %v4919_v41 = vpack.c.bf16 %v4887_v40, %v4887_v40 }
 0x436   : > { %6618 = vmatprep.subr.bf16.mxu1 %v9797_v45  ;;  %v4589_v45 = vrot.slane %v8034_v63, %v10526_v57 }
 0x439   : > { %6619 = vmatpush2.bf16.msra.mxu1 %v9795_v44  ;;  %v4593_v44 = vrot.slane %v8034_v63, %v10529_v58 }
 0x43a   : > { %6620 = vmatprep.subr.bf16.mxu1 %v9803_v46 }
 0x43d   : > { %6621 = vmatpush2.bf16.msra.mxu1 %v9801_v47  ;;  %v11242_v6 = vpop.f32.mrf.mxu0  ;;  %v9920_v47 = vld [vmem:[%s10190_s14 + $0x1760] ss:$8 sps:$4 sm:$0xff]  }
 0x43e   : > { %6622 = vmatprep.subr.bf16.mxu1 %v9809_v48  ;;  %v9925_v48 = vld [vmem:[%s10190_s14 + $0x1754] ss:$8 sps:$4 sm:$0xff]  }
 0x43f   : > { %v11245_v60 = vpop.f32.mrf.mxu0 }
 0x441   : > { %6623 = vmatpush2.bf16.msra.mxu1 %v9807_v50  ;;  %v6591_v7 = vpop.f32.mrf.mxu0 }
 0x442   : > { %6624 = vmatprep.subr.bf16.mxu1 %v9815_v53  ;;  %v9937_v7 = vld [vmem:[%s10190_s14 + $0x1714] ss:$8 sps:$4 sm:$0xff]  }
 0x443   : > { %v6592_v8 = vpop.f32.mrf.mxu0 }
 0x444   : > { %v9940_v8 = vld [vmem:[%s10190_s14 + $0x1704] ss:$8 sps:$4 sm:$0xff]  }
 0x445   : > { %6625 = vmatpush2.bf16.msra.mxu1 %v9813_v59 }
 0x446   : > { %6676 = vmatprep.subr.bf16.mxu1 %v9822_v21  ;;  %v9923_v21 = vld [vmem:[%s10190_s14 + $0x1750] ss:$8 sps:$4 sm:$0xff]  }
 0x448   : > { %6627 = vmatmul.mubr.bf16.vlgmr.msra.gmra.mxu1 %v4910_v2 }
 0x449   : > { %6677 = vmatpush1.bf16.msra.mxu1 %v9820_v39  ;;  %6708 = vmatprep.mubr.bf16.mxu1 %v4915_v61  ;;  %v9928_v39 = vld [vmem:[%s10190_s14 + $0x1744] ss:$8 sps:$4 sm:$0xff]  }
 0x44a   : > { %6678 = vmatprep.subr.bf16.mxu1 %v9828_v43 }
 0x44d   : > { %6679 = vmatpush1.bf16.msra.mxu1 %v9826_v42  ;;  %v9931_v42 = vld [vmem:[%s10190_s14 + $0x1734] ss:$8 sps:$4 sm:$0xff]  }
 0x44e   : > { %6680 = vmatprep.subr.bf16.mxu1 %v9834_v5  ;;  %v9929_v5 = vld [vmem:[%s10190_s14 + $0x1730] ss:$8 sps:$4 sm:$0xff]  }
 0x451   : > { %6681 = vmatpush1.bf16.msra.mxu1 %v9832_v0  ;;  %v9934_v0 = vld [vmem:[%s10190_s14 + $0x1724] ss:$8 sps:$4 sm:$0xff]  }
 0x452   : > { %6682 = vmatprep.subr.bf16.mxu1 %v9840_v22  ;;  %v9932_v22 = vld [vmem:[%s10190_s14 + $0x1720] ss:$8 sps:$4 sm:$0xff]  }
 0x455   : > { %6683 = vmatpush1.bf16.msra.mxu1 %v9838_v10  ;;  %v9935_v10 = vld [vmem:[%s10190_s14 + $0x1710] ss:$8 sps:$4 sm:$0xff]  }
 0x456   : > { %6684 = vmatprep.subr.bf16.mxu1 %v9846_v11  ;;  %v9938_v11 = vld [vmem:[%s10190_s14 + $0x1700] ss:$8 sps:$4 sm:$0xff]  }
 0x459   : > { %6685 = vmatpush1.bf16.msra.mxu1 %v9844_v12  ;;  %v9943_v12 = vld [vmem:[%s10190_s14 + $0x17f4] ss:$8 sps:$4 sm:$0xff]  }
 0x45a   : > { %6686 = vmatprep.subr.bf16.mxu1 %v9852_v13  ;;  %v9941_v13 = vld [vmem:[%s10190_s14 + $0x17f0] ss:$8 sps:$4 sm:$0xff]  }
 0x45d   : > { %6687 = vmatpush1.bf16.msra.mxu1 %v9850_v16  ;;  %v9946_v16 = vld [vmem:[%s10190_s14 + $0x17e4] ss:$8 sps:$4 sm:$0xff]  }
 0x45e   : > { %6688 = vmatprep.subr.bf16.mxu1 %v9858_v15  ;;  %v9944_v15 = vld [vmem:[%s10190_s14 + $0x17e0] ss:$8 sps:$4 sm:$0xff]  }
 0x461   : > { %6689 = vmatpush1.bf16.msra.mxu1 %v9856_v18  ;;  %v9949_v18 = vld [vmem:[%s10190_s14 + $0x17d4] ss:$8 sps:$4 sm:$0xff]  }
 0x462   : > { %6690 = vmatprep.subr.bf16.mxu1 %v9864_v3  ;;  %v9947_v3 = vld [vmem:[%s10190_s14 + $0x17d0] ss:$8 sps:$4 sm:$0xff]  }
 0x465   : > { %6691 = vmatpush1.bf16.msra.mxu1 %v9862_v19  ;;  %v9952_v19 = vld [vmem:[%s10190_s14 + $0x17c4] ss:$8 sps:$4 sm:$0xff]  }
 0x466   : > { %6692 = vmatprep.subr.bf16.mxu1 %v9870_v20  ;;  %v9950_v20 = vld [vmem:[%s10190_s14 + $0x17c0] ss:$8 sps:$4 sm:$0xff]  }
 0x469   : > { %6693 = vmatpush2.bf16.msra.mxu1 %v9868_v9  ;;  %v9955_v9 = vld [vmem:[%s10190_s14 + $0x17b4] ss:$8 sps:$4 sm:$0xff]  }
 0x46a   : > { %6694 = vmatprep.subr.bf16.mxu1 %v9876_v23  ;;  %v9953_v23 = vld [vmem:[%s10190_s14 + $0x17b0] ss:$8 sps:$4 sm:$0xff]  }
 0x46d   : > { %6695 = vmatpush2.bf16.msra.mxu1 %v9874_v24  ;;  %v9958_v24 = vld [vmem:[%s10190_s14 + $0x17a4] ss:$8 sps:$4 sm:$0xff]  }
 0x46e   : > { %6696 = vmatprep.subr.bf16.mxu1 %v9882_v25  ;;  %v9956_v25 = vld [vmem:[%s10190_s14 + $0x17a0] ss:$8 sps:$4 sm:$0xff]  }
 0x471   : > { %6697 = vmatpush2.bf16.msra.mxu1 %v9880_v26  ;;  %v9961_v26 = vld [vmem:[%s10190_s14 + $0x1794] ss:$8 sps:$4 sm:$0xff]  }
 0x472   : > { %6698 = vmatprep.subr.bf16.mxu1 %v9888_v27  ;;  %v9959_v27 = vld [vmem:[%s10190_s14 + $0x1790] ss:$8 sps:$4 sm:$0xff]  }
 0x475   : > { %6699 = vmatpush2.bf16.msra.mxu1 %v9886_v28  ;;  %v8329_v28 = vld [vmem:[%s10520_s28 + $0x4] sm:$0x3] }
 0x476   : > { %6700 = vmatprep.subr.bf16.mxu1 %v9894_v29  ;;  %v9964_v29 = vld [vmem:[%s10190_s14 + $0x1784] ss:$8 sps:$4 sm:$0xff]  }
 0x479   : > { %6701 = vmatpush2.bf16.msra.mxu1 %v9892_v30  ;;  %v5184_v30 = vrot.slane %v8329_v28, %v10526_v57 }
 0x47a   : > { %6702 = vmatprep.subr.bf16.mxu1 %v9900_v31  ;;  %v9962_v31 = vld [vmem:[%s10190_s14 + $0x1780] ss:$8 sps:$4 sm:$0xff]  }
 0x47d   : > { %6703 = vmatpush2.bf16.msra.mxu1 %v9898_v14  ;;  %v11290_v53 = vpop.f32.mrf.mxu0  ;;  %v5188_v14 = vrot.slane %v8329_v28, %v10529_v58 }
 0x47e   : > { %6704 = vmatprep.subr.bf16.mxu1 %v9906_v33  ;;  %v6506_v33 = vadd.f32 %v11228_v54, %v5184_v30 }
 0x47f   : > { %v11293_v35 = vpop.f32.mrf.mxu0 }
 0x481   : > { %6705 = vmatpush2.bf16.msra.mxu1 %v9904_v34  ;;  %v6673_v61 = vpop.f32.mrf.mxu0  ;;  %v6508_v34 = vadd.f32 %v11233_v51, %v5188_v14  ;;  %v9967_v51 = vld [vmem:[%s10417_s17 + $0x274] ss:$8 sps:$4 sm:$0xff]  }
 0x482   : > { %6706 = vmatprep.subr.bf16.mxu1 %v9912_v37  ;;  %7013 = vmatprep.subr.bf16.mxu0 %v9967_v51  ;;  %v9986_v61 = vld [vmem:[%s10417_s17 + $0x200] ss:$8 sps:$4 sm:$0xff]  }
 0x483   : > { %v6674_v43 = vpop.f32.mrf.mxu0 }
 0x484   : > { %v9989_v43 = vld [vmem:[%s10417_s17 + $0x2f0] ss:$8 sps:$4 sm:$0xff]  }
 0x485   : > { %6707 = vmatpush2.bf16.msra.mxu1 %v9910_v38 }
 0x486   : > { %6758 = vmatprep.subr.bf16.mxu1 %v9919_v4 }
 0x488   : > { %6709 = vmatmul.mubr.bf16.vlgmr.msra.gmra.mxu1 %v4914_v55  ;;  %v4790_v46 = vpop.f32.mrf.mxu1 }
 0x489   : > { %6759 = vmatpush1.bf16.msra.mxu1 %v9917_v17  ;;  %6790 = vmatprep.mubr.bf16.mxu1 %v4919_v41  ;;  %v4791_v50 = vadd.f32 %v4790_v46, %v4589_v45  ;;  %v9965_v17 = vld [vmem:[%s10417_s17 + $0x270] ss:$8 sps:$4 sm:$0xff]   ;;  %v9970_v41 = vld [vmem:[%s10417_s17 + $0x264] ss:$8 sps:$4 sm:$0xff]   ;;  %v9968_v45 = vld [vmem:[%s10417_s17 + $0x260] ss:$8 sps:$4 sm:$0xff]  }
 0x48a   : > { %v4792_v56 = vpop.f32.mrf.mxu1  ;;  %6760 = vmatprep.subr.bf16.mxu1 %v9922_v49  ;;  %7014 = vmatpush1.bf16.msra.mxu0 %v9965_v17  ;;  %v9973_v46 = vld [vmem:[%s10417_s17 + $0x254] ss:$8 sps:$4 sm:$0xff]  }
 0x48b   : > { %v4793_v52 = vadd.f32 %v4792_v56, %v4593_v44  ;;  %7015 = vmatprep.subr.bf16.mxu0 %v9970_v41  ;;  %v9976_v56 = vld [vmem:[%s10417_s17 + $0x244] ss:$8 sps:$4 sm:$0xff]  }
 0x48c   : > { %v4794_v59 = vpop.f32.mrf.mxu1 }
 0x48d   : > { %v4799_v1 = vcombine.low %v4791_v50, %v4793_v52  ;;  %6761 = vmatpush1.bf16.msra.mxu1 %v9920_v47  ;;  %v9971_v47 = vld [vmem:[%s10417_s17 + $0x250] ss:$8 sps:$4 sm:$0xff]   ;;  %v9979_v50 = vld [vmem:[%s10417_s17 + $0x234] ss:$8 sps:$4 sm:$0xff]   ;;  %v9982_v59 = vld [vmem:[%s10417_s17 + $0x224] ss:$8 sps:$4 sm:$0xff]  }
 0x48e   : > { %v4795_v2 = vpop.f32.mrf.mxu1  ;;  %6762 = vmatprep.subr.bf16.mxu1 %v9925_v48  ;;  %7016 = vmatpush1.bf16.msra.mxu0 %v9968_v45  ;;  %v9974_v48 = vld [vmem:[%s10417_s17 + $0x240] ss:$8 sps:$4 sm:$0xff]   ;;  %v9977_v52 = vld [vmem:[%s10417_s17 + $0x230] ss:$8 sps:$4 sm:$0xff]  }
 0x48f   : > { %8660 = vst.sshfl [vmem:[%s10897_s13 + $0x4] sm:$0x33 pattern:$0x76325410] %v4799_v1  ;;  %7017 = vmatprep.subr.bf16.mxu0 %v9973_v46  ;;  %v9980_v1 = vld [vmem:[%s10417_s17 + $0x220] ss:$8 sps:$4 sm:$0xff]  }
 0x490   : > { %v9983_v2 = vld [vmem:[%s10417_s17 + $0x210] ss:$8 sps:$4 sm:$0xff]  }
 0x491   : > { %6763 = vmatpush1.bf16.msra.mxu1 %v9923_v21  ;;  %v9985_v21 = vld [vmem:[%s10417_s17 + $0x214] ss:$8 sps:$4 sm:$0xff]  }
 0x492   : > { %6764 = vmatprep.subr.bf16.mxu1 %v9928_v39  ;;  %7018 = vmatpush1.bf16.msra.mxu0 %v9971_v47  ;;  %v9988_v39 = vld [vmem:[%s10417_s17 + $0x204] ss:$8 sps:$4 sm:$0xff]  }
 0x493   : > { %7019 = vmatprep.subr.bf16.mxu0 %v9976_v56 }
 0x495   : > { %6765 = vmatpush1.bf16.msra.mxu1 %v9926_v62  ;;  %v9991_v62 = vld [vmem:[%s10417_s17 + $0x2f4] ss:$8 sps:$4 sm:$0xff]  }
 0x496   : > { %6766 = vmatprep.subr.bf16.mxu1 %v9931_v42  ;;  %7020 = vmatpush1.bf16.msra.mxu0 %v9974_v48  ;;  %v9994_v42 = vld [vmem:[%s10417_s17 + $0x2e4] ss:$8 sps:$4 sm:$0xff]  }
 0x497   : > { %7021 = vmatprep.subr.bf16.mxu0 %v9979_v50 }
 0x499   : > { %6767 = vmatpush1.bf16.msra.mxu1 %v9929_v5  ;;  %v9992_v5 = vld [vmem:[%s10417_s17 + $0x2e0] ss:$8 sps:$4 sm:$0xff]  }
 0x49a   : > { %6768 = vmatprep.subr.bf16.mxu1 %v9934_v0  ;;  %7022 = vmatpush1.bf16.msra.mxu0 %v9977_v52  ;;  %v9997_v0 = vld [vmem:[%s10417_s17 + $0x2d4] ss:$8 sps:$4 sm:$0xff]  }
 0x49b   : > { %7023 = vmatprep.subr.bf16.mxu0 %v9982_v59 }
 0x49d   : > { %6769 = vmatpush1.bf16.msra.mxu1 %v9932_v22  ;;  %v9995_v22 = vld [vmem:[%s10417_s17 + $0x2d0] ss:$8 sps:$4 sm:$0xff]  }
 0x49e   : > { %6770 = vmatprep.subr.bf16.mxu1 %v9937_v7  ;;  %7024 = vmatpush1.bf16.msra.mxu0 %v9980_v1  ;;  %v10000_v7 = vld [vmem:[%s10417_s17 + $0x2c4] ss:$8 sps:$4 sm:$0xff]  }
 0x49f   : > { %7025 = vmatprep.subr.bf16.mxu0 %v9985_v21 }
 0x4a1   : > { %6771 = vmatpush1.bf16.msra.mxu1 %v9935_v10  ;;  %v9998_v10 = vld [vmem:[%s10417_s17 + $0x2c0] ss:$8 sps:$4 sm:$0xff]  }
 0x4a2   : > { %6772 = vmatprep.subr.bf16.mxu1 %v9940_v8  ;;  %7026 = vmatpush1.bf16.msra.mxu0 %v9983_v2  ;;  %v10003_v8 = vld [vmem:[%s10417_s17 + $0x2b4] ss:$8 sps:$4 sm:$0xff]  }
 0x4a3   : > { %7027 = vmatprep.subr.bf16.mxu0 %v9988_v39 }
 0x4a5   : > { %6773 = vmatpush1.bf16.msra.mxu1 %v9938_v11  ;;  %v10001_v11 = vld [vmem:[%s10417_s17 + $0x2b0] ss:$8 sps:$4 sm:$0xff]  }
 0x4a6   : > { %6774 = vmatprep.subr.bf16.mxu1 %v9943_v12  ;;  %7028 = vmatpush1.bf16.msra.mxu0 %v9986_v61  ;;  %v10006_v12 = vld [vmem:[%s10417_s17 + $0x2a4] ss:$8 sps:$4 sm:$0xff]  }
 0x4a7   : > { %7029 = vmatprep.subr.bf16.mxu0 %v9991_v62 }
 0x4a9   : > { %6775 = vmatpush2.bf16.msra.mxu1 %v9941_v13  ;;  %v10004_v13 = vld [vmem:[%s10417_s17 + $0x2a0] ss:$8 sps:$4 sm:$0xff]  }
 0x4aa   : > { %6776 = vmatprep.subr.bf16.mxu1 %v9946_v16  ;;  %7030 = vmatpush2.bf16.msra.mxu0 %v9989_v43 }
 0x4ab   : > { %7031 = vmatprep.subr.bf16.mxu0 %v9994_v42 }
 0x4ad   : > { %6777 = vmatpush2.bf16.msra.mxu1 %v9944_v15 }
 0x4ae   : > { %6778 = vmatprep.subr.bf16.mxu1 %v9949_v18  ;;  %7032 = vmatpush2.bf16.msra.mxu0 %v9992_v5 }
 0x4af   : > { %7033 = vmatprep.subr.bf16.mxu0 %v9997_v0 }
 0x4b1   : > { %6779 = vmatpush2.bf16.msra.mxu1 %v9947_v3 }
 0x4b2   : > { %6780 = vmatprep.subr.bf16.mxu1 %v9952_v19  ;;  %7034 = vmatpush2.bf16.msra.mxu0 %v9995_v22  ;;  %v10009_v19 = vld [vmem:[%s10417_s17 + $0x294] ss:$8 sps:$4 sm:$0xff]  }
 0x4b3   : > { %7035 = vmatprep.subr.bf16.mxu0 %v10000_v7 }
 0x4b5   : > { %6781 = vmatpush2.bf16.msra.mxu1 %v9950_v20 }
 0x4b6   : > { %6782 = vmatprep.subr.bf16.mxu1 %v9955_v9  ;;  %7036 = vmatpush2.bf16.msra.mxu0 %v9998_v10  ;;  %v10007_v9 = vld [vmem:[%s10417_s17 + $0x290] ss:$8 sps:$4 sm:$0xff]  }
 0x4b7   : > { %7037 = vmatprep.subr.bf16.mxu0 %v10003_v8 }
 0x4b9   : > { %6783 = vmatpush2.bf16.msra.mxu1 %v9953_v23 }
 0x4ba   : > { %6784 = vmatprep.subr.bf16.mxu1 %v9958_v24  ;;  %7038 = vmatpush2.bf16.msra.mxu0 %v10001_v11 }
 0x4bb   : > { %7039 = vmatprep.subr.bf16.mxu0 %v10006_v12 }
 0x4bd   : > { %6785 = vmatpush2.bf16.msra.mxu1 %v9956_v25  ;;  %v11333_v55 = vpop.f32.mrf.mxu0  ;;  %v10012_v25 = vld [vmem:[%s10417_s17 + $0x284] ss:$8 sps:$4 sm:$0xff]  }
 0x4be   : > { %6786 = vmatprep.subr.bf16.mxu1 %v9961_v26  ;;  %7040 = vmatpush2.bf16.msra.mxu0 %v10004_v13 }
 0x4bf   : > { %v11335_v36 = vpop.f32.mrf.mxu0  ;;  %7041 = vmatprep.subr.bf16.mxu0 %v10009_v19 }
 0x4c1   : > { %6787 = vmatpush2.bf16.msra.mxu1 %v9959_v27  ;;  %v6755_v49 = vpop.f32.mrf.mxu0  ;;  %v10010_v27 = vld [vmem:[%s10417_s17 + $0x280] ss:$8 sps:$4 sm:$0xff]  }
 0x4c2   : > { %6788 = vmatprep.subr.bf16.mxu1 %v9964_v29  ;;  %7042 = vmatpush2.bf16.msra.mxu0 %v10007_v9 }
 0x4c3   : > { %v6756_v44 = vpop.f32.mrf.mxu0  ;;  %7043 = vmatprep.subr.bf16.mxu0 %v10012_v25 }
 0x4c5   : > { %6789 = vmatpush2.bf16.msra.mxu1 %v9962_v31 }
 0x4c6   : > { %7044 = vmatpush2.bf16.msra.mxu0 %v10010_v27 }
 0x4c8   : > { %v6546_v37 = vpop.f32.mrf.mxu1  ;;  %6791 = vmatmul.mubr.bf16.vlgmr.msra.gmra.mxu1 %v4918_v32 }
 0x4c9   : > { %v11329_v38 = vadd.f32 %v6546_v37, %v6506_v33 }
 0x4ca   : > { %v6548_v40 = vpop.f32.mrf.mxu1 }
 0x4cb   : > { %v11331_v4 = vadd.f32 %v6548_v40, %v6508_v34  ;;  %v6588_v16 = vadd.f32 %v11242_v6, %v11329_v38 }
 0x4cc   : > { %v6550_v63 = vpop.f32.mrf.mxu1 }
 0x4cd   : > { %v6590_v18 = vadd.f32 %v11245_v60, %v11331_v4 }
 0x4ce   : > { %v6551_v54 = vpop.f32.mrf.mxu1 }
 0x508   : > { %v6628_v15 = vpop.f32.mrf.mxu1 }
 0x509   : > { %v6629_v3 = vadd.f32 %v6628_v15, %v6588_v16 }
 0x50a   : > { %v6630_v20 = vpop.f32.mrf.mxu1 }
 0x50b   : > { %v6631_v23 = vadd.f32 %v6630_v20, %v6590_v18  ;;  %v6670_v31 = vadd.f32 %v11290_v53, %v6629_v3 }
 0x50c   : > { %v6632_v24 = vpop.f32.mrf.mxu1 }
 0x50d   : > { %v6672_v60 = vadd.f32 %v11293_v35, %v6631_v23 }
 0x50e   : > { %v6633_v26 = vpop.f32.mrf.mxu1 }
 0x548   : > { %v6710_v28 = vpop.f32.mrf.mxu1 }
 0x549   : > { %v6711_v14 = vadd.f32 %v6710_v28, %v6670_v31 }
 0x54a   : > { %v6712_v29 = vpop.f32.mrf.mxu1 }
 0x54b   : > { %v6713_v32 = vadd.f32 %v6712_v29, %v6672_v60  ;;  %v6752_v33 = vadd.f32 %v11333_v55, %v6711_v14  ;;  %v8619_v55 = vld [vmem:[%s10877_s7 + $0x4] sm:$0x3] }
 0x54c   : > { %v6714_v6 = vpop.f32.mrf.mxu1  ;;  %v6850_v45 = vrot.slane %v8619_v55, %v10529_v58 }
 0x54d   : > { %v6754_v37 = vadd.f32 %v11335_v36, %v6713_v32  ;;  %v6846_v36 = vrot.slane %v8619_v55, %v10526_v57 }
 0x54e   : > { %v6715_v30 = vpop.f32.mrf.mxu1 }
 0x588   : > { %v6792_v34 = vpop.f32.mrf.mxu1 }
 0x589   : > { %v6793_v38 = vadd.f32 %v6792_v34, %v6752_v33 }
 0x58a   : > { %v6794_v40 = vpop.f32.mrf.mxu1 }
 0x58b   : > { %vm6799_vm4 = vcmp.gt.f32.partialorder %v6793_v38, 0.0  ;;  %v6801_v4 = vmul.f32 0.1, %v6793_v38  ;;  %v6795_v63 = vadd.f32 %v6794_v40, %v6754_v37 }
 0x58c   : > { %v6796_v54 = vpop.f32.mrf.mxu1 }
 0x58d   : > { %vm6800_vm5 = vcmp.gt.f32.partialorder %v6795_v63, 0.0  ;;  %v6802_v17 = vmul.f32 0.1, %v6795_v63  ;;  %v6803_v51 = vsel %vm6799_vm4, %v6793_v38, %v6801_v4 }
 0x58e   : > { %v6797_v53 = vpop.f32.mrf.mxu1  ;;  %v6805_v49 = vpack.c.bf16 %v6803_v51, %v6803_v51 }
 0x58f   : > { %v6804_v35 = vsel %vm6800_vm5, %v6795_v63, %v6802_v17 }
 0x590   : > { %v6806_v41 = vpack.c.bf16 %v6804_v35, %v6804_v35 }
 0x592   : > { %7045 = vmatprep.mubr.bf16.mxu0 %v6806_v41 }
 0x593   : > { %7046 = vmatmul.mubr.bf16.vlgmr.msra.gmra.mxu0 %v6805_v49 }
 0x653   : > { %v7047_v44 = vpop.f32.mrf.mxu0 }
 0x654   : > { %v7048_v47 = vadd.f32 %v7047_v44, %v6846_v36 }
 0x655   : > { %v7049_v46 = vpop.f32.mrf.mxu0 }
 0x656   : > { %v7050_v56 = vadd.f32 %v7049_v46, %v6850_v45 }
 0x657   : > { %v7051_v48 = vpop.f32.mrf.mxu0 }
 0x658   : > { %v7056_v50 = vcombine.low %v7048_v47, %v7050_v56 }
 0x659   : > { %v7052_v52 = vpop.f32.mrf.mxu0 }
 0x65a   : > { %8661 = vst.sshfl [vmem:[%s10897_s13 + $0x8] sm:$0x33 pattern:$0x76325410] %v7056_v50 }
 0x65b PF: > { %p15_p9 = scmp.ge.s32.totalorder %s10133_s23, 9   ;;  %s11405_s18 = smov %s10067_s19 }
 0x65c   : > { %s11406_s19 = smov %s10071_s20  ;;  %s11407_s20 = smov %s10143_s26 }
 0x65d   : > { %s11408_s21 = smov %s10133_s23  ;;  %17 = sbr.rel (!%p15_p9) target bundleno = 3 (0x3), region = 100 }
 0x662   :  { %7091 = vsyncpa [#allocation3], 1 }
 0x663   :  { %7093 = vsyncpa [#allocation3 + $0x1], 1 }

</bundles_post_ra>
